<compile_context>
chip_gen: v5e
topology: v5e:2x2
jax: 0.10.0
libtpu: 0.0.40
codegen_flags: <defaults>
</compile_context>

<pallas_src>
import functools
import math

import jax
import jax.numpy as jnp
from jax import lax
from jax.experimental import pallas as pl
from jax.experimental.pallas import tpu as pltpu


# ----------------------------------------------------------------------------- kernel
def transformer_block_kernel(x_ref, wconv_ref, bnscale_ref, bnbias_ref,
                             wlin_ref, blin_ref,
                             wqkv_ref, bqkv_ref, wo_ref, bo_ref, wffn_ref,
                             o_ref, *, channels, num_heads, num_layers,
                             use_conv, batch_tile, seq_len):
    # x_ref:       (Bt, Cin, S)  channel-major input tile (f32)
    # wconv_ref:   (Cin, C)      folded 1x1 conv weight, (in, out) layout (bf16)
    # bnscale_ref: (1, C)  f32   gamma / sqrt(var + eps)
    # bnbias_ref:  (1, C)  f32   beta - mean * scale
    # wlin_ref:    (C, C)  bf16  positional Linear (in, out); blin_ref (1, C) f32
    # wqkv_ref:    (L, C, 3C) bf16  Wq/Wk/Wv folded with MHA in_proj; bqkv_ref (L, 1, 3C) f32
    # wo_ref:      (L, C, C) bf16   MHA out_proj (in, out); bo_ref (L, 1, C) f32
    # wffn_ref:    (L, C, C) bf16   fc2 o fc1 folded (no bias)
    # o_ref:       (Bt, C, S) f32   channel-major output tile
    C = channels
    H = num_heads
    Dh = C // H
    S = seq_len
    Bt = batch_tile
    scale = 1.0 / math.sqrt(Dh)
    bf16 = jnp.bfloat16

    qk_dims = (((1,), (1,)), ((), ()))    # contract last dims: q @ k^T without explicit k.T
    conv_dims = (((0,), (0,)), ((), ()))  # contract the Cin axis of the (Cin, S) tile

    # ---- input relayout + 1x1 conv / BN / SiLU, fused per image --------------------
    hs = []
    for b in range(Bt):
        x_cs = x_ref[b]                                                 # (Cin, S) f32
        if use_conv:
            # conv in channel-major layout: result is already token-major (S, C).
            h = lax.dot_general(x_cs.astype(bf16), wconv_ref[...], conv_dims,
                                preferred_element_type=jnp.float32)     # (S, C) f32
            h = h * bnscale_ref[...] + bnbias_ref[...]                  # folded BN (f32)
            h = h * jax.nn.sigmoid(h)                                   # SiLU (f32, EUP)
        else:
            h = x_cs.T.astype(jnp.float32)                              # in-kernel XLU transpose
        hs.append(h)
    y = jnp.concatenate(hs, axis=0) if Bt > 1 else hs[0]                # (Bt*S, C) f32

    # ---- p + linear(p): one tall lane-dense matmul over all Bt*S tokens ------------
    y = y + (jnp.dot(y.astype(bf16), wlin_ref[...],
                     preferred_element_type=jnp.float32) + blin_ref[...])

    # ---- transformer layers (small static L -> unrolled, statically indexed weights)
    for l in range(num_layers):
        wqkv_l = wqkv_ref[l]          # (C, 3C) bf16
        bqkv_l = bqkv_ref[l]          # (1, 3C) f32
        wo_l = wo_ref[l]              # (C, C)  bf16
        bo_l = bo_ref[l]              # (1, C)  f32
        wffn_l = wffn_ref[l]          # (C, C)  bf16

        # Single fused (Bt*S, C) x (C, 3C) projection covers q, k and v (+ in_proj).
        qkv = (jnp.dot(y.astype(bf16), wqkv_l,
                       preferred_element_type=jnp.float32) + bqkv_l).astype(bf16)

        attn_rows = []
        for b in range(Bt):
            qkv_b = qkv[b * S:(b + 1) * S]                              # (S, 3C) bf16
            # Accumulate each head directly into the out-projection (no concat;
            # only one head's (S,S)/(S,Dh) intermediates alive at a time).
            acc = jnp.zeros((S, C), jnp.float32)
            for hh in range(H):
                q = qkv_b[:, hh * Dh:(hh + 1) * Dh]                     # (S, Dh) bf16
                k = qkv_b[:, C + hh * Dh:C + (hh + 1) * Dh]             # (S, Dh) bf16
                v = qkv_b[:, 2 * C + hh * Dh:2 * C + (hh + 1) * Dh]     # (S, Dh) bf16
                s = lax.dot_general(q, k, qk_dims,
                                    preferred_element_type=jnp.float32) * scale  # (S, S) f32
                s = s - jnp.max(s, axis=-1, keepdims=True)
                e = jnp.exp(s)
                p = e * pl.reciprocal(jnp.sum(e, axis=-1, keepdims=True), approx=True)
                hv = jnp.dot(p.astype(bf16), v,
                             preferred_element_type=jnp.float32)        # (S, Dh) f32
                acc = acc + jnp.dot(hv.astype(bf16),
                                    wo_l[hh * Dh:(hh + 1) * Dh, :],
                                    preferred_element_type=jnp.float32)  # (S, C) f32
            attn_rows.append(acc)
        attn = (jnp.concatenate(attn_rows, axis=0) if Bt > 1 else attn_rows[0]) + bo_l

        y = y + attn                                                    # residual 1 (f32)
        y = y + jnp.dot(y.astype(bf16), wffn_l,
                        preferred_element_type=jnp.float32)             # fc2(fc1(y)) + y

    # ---- emit channel-major (C, S): wrapper reshape back to NCHW is free -----------
    for b in range(Bt):
        o_ref[b] = y[b * S:(b + 1) * S].T.astype(o_ref.dtype)


# ----------------------------------------------------------------------------- host-side folding
def _fold_params(pt, cin, cout, eps):
    """Fold PyTorch-layout parameters into kernel (in, out)-layout arrays (weights -> bf16)."""
    C = cout
    f32, bf16 = jnp.float32, jnp.bfloat16
    use_conv = pt['conv_w'] is not None
    if use_conv:
        wc = pt['conv_w'].reshape(C, cin)                        # (C, Cin)
        inv = 1.0 / jnp.sqrt(pt['bn_var'] + eps)
        scale = pt['bn_gamma'] * inv
        bias = pt['bn_beta'] - pt['bn_mean'] * scale
        wconv_io = wc.T                                          # (Cin, C)
        bnscale = scale.reshape(1, C)
        bnbias = bias.reshape(1, C)
    else:
        wconv_io = jnp.zeros((cin, C), f32)                      # unused dummies
        bnscale = jnp.ones((1, C), f32)
        bnbias = jnp.zeros((1, C), f32)

    wlin_io = pt['lin_w'].T                                      # (C, C)
    blin = pt['lin_b'].reshape(1, C)

    wqkv, bqkv, wo, bo, wffn = [], [], [], [], []
    for lyr in pt['layers']:
        wiq, wik, wiv = jnp.split(lyr['in_proj_w'], 3, axis=0)   # each (C, C)
        biq, bik, biv = jnp.split(lyr['in_proj_b'], 3, axis=0)   # each (C,)
        # Fold Linear(no-bias) followed by in_proj: x @ Wq^T @ Wiq^T == x @ (Wq^T @ Wiq^T)
        wq_io = lyr['wq'].T @ wiq.T
        wk_io = lyr['wk'].T @ wik.T
        wv_io = lyr['wv'].T @ wiv.T
        wqkv.append(jnp.concatenate([wq_io, wk_io, wv_io], axis=1))       # (C, 3C)
        bqkv.append(jnp.concatenate([biq, bik, biv]).reshape(1, 3 * C))   # (1, 3C)
        wo.append(lyr['out_w'].T)                                         # (C, C)
        bo.append(lyr['out_b'].reshape(1, C))
        wffn.append(lyr['fc1'].T @ lyr['fc2'].T)                          # fold fc2(fc1(.))
    stack = lambda xs: jnp.stack(xs, axis=0)
    return (use_conv,
            wconv_io.astype(bf16), bnscale.astype(f32), bnbias.astype(f32),
            wlin_io.astype(bf16), blin.astype(f32),
            stack(wqkv).astype(bf16), stack(bqkv).astype(f32),
            stack(wo).astype(bf16), stack(bo).astype(f32),
            stack(wffn).astype(bf16))


def _vmem_budget(bt, s, cin, c, n_layers):
    """Explicit scoped-VMEM budget: weights (bf16, 1 buffer) + IO blocks (2 buffers) + temps."""
    bfb, f4 = 2, 4
    weights = (cin * c + c * c + n_layers * (3 * c * c + c * c + c * c)) * bfb
    biases = (4 * c + n_layers * 4 * c) * f4
    io = (bt * cin * s + bt * c * s) * f4 * 2
    temps = (bt * s * 3 * c + 2 * s * s + 6 * bt * s * c) * f4
    est = int(1.5 * (weights + biases + io + temps))
    return max(32 * 1024 * 1024, min(est, 64 * 1024 * 1024))


# ----------------------------------------------------------------------------- wrapper
def transformer_block_forward(x_nchw, pt, *, num_heads, eps=1e-5, batch_tile=1):
    """x_nchw: (N, Cin, W, H) float32 (PyTorch layout). Returns (N, C, W, H) float32."""
    N, Cin, W, H = x_nchw.shape
    C = pt['lin_w'].shape[0]
    L = len(pt['layers'])
    S = W * H
    assert N % batch_tile == 0
    assert C % num_heads == 0

    (use_conv, wconv, bnscale, bnbias, wlin, blin,
     wqkv, bqkv, wo, bo, wffn) = _fold_params(pt, Cin, C, eps)
    weights = (wconv, bnscale, bnbias, wlin, blin, wqkv, bqkv, wo, bo, wffn)

    # Channel-major (N, Cin, S) is a pure reshape of NCHW (no HBM transpose pass);
    # the token-major relayout happens inside the kernel.
    x_ncs = x_nchw.reshape(N, Cin, S)

    kernel = functools.partial(
        transformer_block_kernel,
        channels=C, num_heads=num_heads, num_layers=L,
        use_conv=use_conv, batch_tile=batch_tile, seq_len=S)

    def weight_spec(shape, single_buffer):
        # Constant block index across the grid -> weights DMA'd once, VMEM-resident.
        kwargs = {}
        if single_buffer and hasattr(pl, "Buffered"):
            kwargs["pipeline_mode"] = pl.Buffered(1)   # don't double-buffer constants
        return pl.BlockSpec(shape, lambda b, _n=len(shape): (0,) * _n, **kwargs)

    def build(single_buffer_weights):
        return pl.pallas_call(
            kernel,
            out_shape=jax.ShapeDtypeStruct((N, C, S), jnp.float32),
            grid_spec=pltpu.PrefetchScalarGridSpec(
                num_scalar_prefetch=0,
                grid=(N // batch_tile,),
                in_specs=[pl.BlockSpec((batch_tile, Cin, S), lambda b: (b, 0, 0))]
                         + [weight_spec(w.shape, single_buffer_weights) for w in weights],
                out_specs=pl.BlockSpec((batch_tile, C, S), lambda b: (b, 0, 0)),
            ),
            compiler_params=pltpu.CompilerParams(
                dimension_semantics=("parallel",),            # batch axis -> megacore on v7x
                vmem_limit_bytes=_vmem_budget(batch_tile, S, Cin, C, L)),
        )

    try:
        out = jax.block_until_ready(build(True)(x_ncs, *weights))
    except Exception:
        # TODO(synk): pl.Buffered(1) single-buffered resident weights are not accepted by
        # every jax/mosaic version; fall back to default (double-buffered) weight specs.
        out = jax.block_until_ready(build(False)(x_ncs, *weights))

    return out.reshape(N, C, W, H)


# ----------------------------------------------------------------------------- pure-JAX reference
def transformer_block_reference(x_nchw, pt, *, num_heads, eps=1e-5):
    """Pure-JAX reference replicating the PyTorch forward exactly (unfused, f32)."""
    x = x_nchw
    C = pt['lin_w'].shape[0]
    if pt['conv_w'] is not None:
        Cin = x.shape[1]
        wc = pt['conv_w'].reshape(C, Cin)
        h = jnp.einsum('nchw,kc->nkhw', x, wc)
        inv = 1.0 / jnp.sqrt(pt['bn_var'] + eps)
        h = (h - pt['bn_mean'][None, :, None, None]) * (pt['bn_gamma'] * inv)[None, :, None, None] \
            + pt['bn_beta'][None, :, None, None]
        h = h * jax.nn.sigmoid(h)
        x = h
    N, _, W, H = x.shape
    S = W * H
    Dh = C // num_heads

    p = x.reshape(N, C, S).transpose(2, 0, 1)                   # (S, N, C)
    y = p + (jnp.einsum('snc,dc->snd', p, pt['lin_w']) + pt['lin_b'])

    for lyr in pt['layers']:
        q0 = jnp.einsum('snc,dc->snd', y, lyr['wq'])
        k0 = jnp.einsum('snc,dc->snd', y, lyr['wk'])
        v0 = jnp.einsum('snc,dc->snd', y, lyr['wv'])
        wiq, wik, wiv = jnp.split(lyr['in_proj_w'], 3, axis=0)
        biq, bik, biv = jnp.split(lyr['in_proj_b'], 3, axis=0)
        q = jnp.einsum('snc,dc->snd', q0, wiq) + biq
        k = jnp.einsum('snc,dc->snd', k0, wik) + bik
        v = jnp.einsum('snc,dc->snd', v0, wiv) + biv
        q = q.reshape(S, N, num_heads, Dh) * (1.0 / math.sqrt(Dh))
        k = k.reshape(S, N, num_heads, Dh)
        v = v.reshape(S, N, num_heads, Dh)
        logits = jnp.einsum('snhd,tnhd->nhst', q, k)
        attn = jax.nn.softmax(logits, axis=-1)
        o = jnp.einsum('nhst,tnhd->snhd', attn, v).reshape(S, N, C)
        o = jnp.einsum('snc,dc->snd', o, lyr['out_w']) + lyr['out_b']
        y = o + y
        y = jnp.einsum('snc,dc->snd',
                       jnp.einsum('snc,dc->snd', y, lyr['fc1']), lyr['fc2']) + y
    return y.transpose(1, 2, 0).reshape(N, C, W, H)


# ----------------------------------------------------------------------------- test harness
if __name__ == "__main__":
    NUM_HEADS = 4

    def make_params(keys, cin, c, num_layers, with_conv):
        def nrm(shape, s=0.1):
            return s * jax.random.normal(next(keys), shape, jnp.float32)
        pt = {
            'conv_w': nrm((c, cin, 1, 1), 0.3) if with_conv else None,
            'bn_gamma': 1.0 + nrm((c,), 0.1),
            'bn_beta': nrm((c,), 0.1),
            'bn_mean': nrm((c,), 0.1),
            'bn_var': jnp.abs(jax.random.normal(next(keys), (c,), jnp.float32)) + 0.5,
            'lin_w': nrm((c, c), 0.1),
            'lin_b': nrm((c,), 0.05),
            'layers': [],
        }
        for _ in range(num_layers):
            pt['layers'].append({
                'wq': nrm((c, c), 0.1),
                'wk': nrm((c, c), 0.1),
                'wv': nrm((c, c), 0.1),
                'in_proj_w': nrm((3 * c, c), 0.1),
                'in_proj_b': nrm((3 * c,), 0.05),
                'out_w': nrm((c, c), 0.1),
                'out_b': nrm((c,), 0.05),
                'fc1': nrm((c, c), 0.1),
                'fc2': nrm((c, c), 0.1),
            })
        return pt

    def check(name, x, pt, batch_tile):
        out = transformer_block_forward(x, pt, num_heads=NUM_HEADS, batch_tile=batch_tile)
        out = jax.block_until_ready(out)
        ref = transformer_block_reference(x, pt, num_heads=NUM_HEADS)
        assert out.shape == ref.shape, f"{name}: shape {out.shape} vs {ref.shape}"
        max_err = float(jnp.max(jnp.abs(out - ref)))
        # bf16 matmul operands (f32 accumulation) -> slightly loosened tolerance.
        assert jnp.allclose(out, ref, atol=3e-2, rtol=3e-2), \
            f"{name}: mismatch vs reference, max abs err={max_err}"

    # Config A: Cin != C -> Conv+BN+SiLU path; exercised with 1 and 2 images per grid step.
    keys = iter(jax.random.split(jax.random.PRNGKey(0), 64))
    N, Cin, Wd, Hd, C, L = 2, 4, 8, 8, 32, 2            # spatial 8x8 -> S = 64 tokens
    x = jax.random.normal(next(keys), (N, Cin, Wd, Hd), jnp.float32)
    ptA = make_params(keys, Cin, C, L, with_conv=True)
    check("convA_bt1", x, ptA, batch_tile=1)
    check("convA_bt2", x, ptA, batch_tile=2)

    # Config B: Cin == C -> no conv (identity front end).
    keys = iter(jax.random.split(jax.random.PRNGKey(1), 64))
    Nb, Cb, Lb = 2, 32, 1
    xb = jax.random.normal(next(keys), (Nb, Cb, Wd, Hd), jnp.float32)
    ptB = make_params(keys, Cb, Cb, Lb, with_conv=False)
    check("noconvB_bt1", xb, ptB, batch_tile=1)

    print("KERNEL_OK")
</pallas_src>

<mosaic_0001>
module attributes {stable_mosaic.version = 11 : i64} {
  func.func @transformer_block_kernel(%arg0: i32, %arg1: memref<1x4x64xf32, #tpu.memory_space<vmem>>, %arg2: memref<4x32xbf16, #tpu.memory_space<vmem>>, %arg3: memref<1x32xf32, #tpu.memory_space<vmem>>, %arg4: memref<1x32xf32, #tpu.memory_space<vmem>>, %arg5: memref<32x32xbf16, #tpu.memory_space<vmem>>, %arg6: memref<1x32xf32, #tpu.memory_space<vmem>>, %arg7: memref<2x32x96xbf16, #tpu.memory_space<vmem>>, %arg8: memref<2x1x96xf32, #tpu.memory_space<vmem>>, %arg9: memref<2x32x32xbf16, #tpu.memory_space<vmem>>, %arg10: memref<2x1x32xf32, #tpu.memory_space<vmem>>, %arg11: memref<2x32x32xbf16, #tpu.memory_space<vmem>>, %arg12: memref<1x32x64xf32, #tpu.memory_space<vmem>>) attributes {dimension_semantics = [#tpu.dimension_semantics<parallel>], iteration_bounds = array<i64: 2>, scalar_prefetch = 0 : i64, scratch_operands = 0 : i64, tpu.core_type = #tpu.core_type<tc>, window_params = [{transform_indices = @transform_0, window_bounds = array<i64: 1, 4, 64>}, {pipeline_mode = #tpu.pipeline_mode<synchronous>, transform_indices = @transform_1, window_bounds = array<i64: 4, 32>}, {pipeline_mode = #tpu.pipeline_mode<synchronous>, transform_indices = @transform_2, window_bounds = array<i64: 1, 32>}, {pipeline_mode = #tpu.pipeline_mode<synchronous>, transform_indices = @transform_3, window_bounds = array<i64: 1, 32>}, {pipeline_mode = #tpu.pipeline_mode<synchronous>, transform_indices = @transform_4, window_bounds = array<i64: 32, 32>}, {pipeline_mode = #tpu.pipeline_mode<synchronous>, transform_indices = @transform_5, window_bounds = array<i64: 1, 32>}, {pipeline_mode = #tpu.pipeline_mode<synchronous>, transform_indices = @transform_6, window_bounds = array<i64: 2, 32, 96>}, {pipeline_mode = #tpu.pipeline_mode<synchronous>, transform_indices = @transform_7, window_bounds = array<i64: 2, 1, 96>}, {pipeline_mode = #tpu.pipeline_mode<synchronous>, transform_indices = @transform_8, window_bounds = array<i64: 2, 32, 32>}, {pipeline_mode = #tpu.pipeline_mode<synchronous>, transform_indices = @transform_9, window_bounds = array<i64: 2, 1, 32>}, {pipeline_mode = #tpu.pipeline_mode<synchronous>, transform_indices = @transform_10, window_bounds = array<i64: 2, 32, 32>}, {transform_indices = @transform_11, window_bounds = array<i64: 1, 32, 64>}]} {
    %c0 = arith.constant 0 : index
    %c0_0 = arith.constant 0 : index
    %c0_1 = arith.constant 0 : index
    %0 = vector.load %arg1[%c0, %c0_0, %c0_1] : memref<1x4x64xf32, #tpu.memory_space<vmem>>, vector<1x4x64xf32>
    %1 = vector.shape_cast %0 : vector<1x4x64xf32> to vector<4x64xf32>
    %2 = arith.truncf %1 : vector<4x64xf32> to vector<4x64xbf16>
    %c0_2 = arith.constant 0 : index
    %c0_3 = arith.constant 0 : index
    %3 = vector.load %arg2[%c0_2, %c0_3] : memref<4x32xbf16, #tpu.memory_space<vmem>>, vector<4x32xbf16>
    %cst = arith.constant dense<0.000000e+00> : vector<64x32xf32>
    %4 = tpu.matmul %2, %3, %cst {dimension_numbers = #tpu.dot_dimension_numbers<[0], [0], [1], [1], [0, 1, 1, 1], [], []>} : vector<4x64xbf16>, vector<4x32xbf16>, vector<64x32xf32> -> vector<64x32xf32>
    %c0_4 = arith.constant 0 : index
    %c0_5 = arith.constant 0 : index
    %5 = vector.load %arg3[%c0_4, %c0_5] : memref<1x32xf32, #tpu.memory_space<vmem>>, vector<1x32xf32>
    %6 = vector.broadcast %5 : vector<1x32xf32> to vector<64x32xf32>
    %7 = arith.mulf %4, %6 : vector<64x32xf32>
    %c0_6 = arith.constant 0 : index
    %c0_7 = arith.constant 0 : index
    %8 = vector.load %arg4[%c0_6, %c0_7] : memref<1x32xf32, #tpu.memory_space<vmem>>, vector<1x32xf32>
    %9 = vector.broadcast %8 : vector<1x32xf32> to vector<64x32xf32>
    %10 = arith.addf %7, %9 : vector<64x32xf32>
    %11 = arith.negf %10 : vector<64x32xf32>
    %12 = math.exp %11 : vector<64x32xf32>
    %cst_8 = arith.constant 1.000000e+00 : f32
    %13 = vector.broadcast %cst_8 : f32 to vector<64x32xf32>
    %14 = arith.addf %13, %12 : vector<64x32xf32>
    %15 = arith.divf %13, %14 : vector<64x32xf32>
    %16 = arith.mulf %10, %15 : vector<64x32xf32>
    %17 = arith.truncf %16 : vector<64x32xf32> to vector<64x32xbf16>
    %c0_9 = arith.constant 0 : index
    %c0_10 = arith.constant 0 : index
    %18 = vector.load %arg5[%c0_9, %c0_10] : memref<32x32xbf16, #tpu.memory_space<vmem>>, vector<32x32xbf16>
    %cst_11 = arith.constant dense<0.000000e+00> : vector<64x32xf32>
    %19 = tpu.matmul %17, %18, %cst_11 {dimension_numbers = #tpu.dot_dimension_numbers<[1], [0], [0], [1], [0, 0, 1, 1], [], []>} : vector<64x32xbf16>, vector<32x32xbf16>, vector<64x32xf32> -> vector<64x32xf32>
    %c0_12 = arith.constant 0 : index
    %c0_13 = arith.constant 0 : index
    %20 = vector.load %arg6[%c0_12, %c0_13] : memref<1x32xf32, #tpu.memory_space<vmem>>, vector<1x32xf32>
    %21 = vector.broadcast %20 : vector<1x32xf32> to vector<64x32xf32>
    %22 = arith.addf %19, %21 : vector<64x32xf32>
    %23 = arith.addf %16, %22 : vector<64x32xf32>
    %c0_14 = arith.constant 0 : index
    %c0_15 = arith.constant 0 : index
    %c0_16 = arith.constant 0 : index
    %24 = vector.load %arg7[%c0_14, %c0_15, %c0_16] : memref<2x32x96xbf16, #tpu.memory_space<vmem>>, vector<1x32x96xbf16>
    %25 = vector.shape_cast %24 : vector<1x32x96xbf16> to vector<32x96xbf16>
    %c0_17 = arith.constant 0 : index
    %c0_18 = arith.constant 0 : index
    %c0_19 = arith.constant 0 : index
    %26 = vector.load %arg8[%c0_17, %c0_18, %c0_19] : memref<2x1x96xf32, #tpu.memory_space<vmem>>, vector<1x1x96xf32>
    %27 = vector.shape_cast %26 : vector<1x1x96xf32> to vector<1x96xf32>
    %c0_20 = arith.constant 0 : index
    %c0_21 = arith.constant 0 : index
    %c0_22 = arith.constant 0 : index
    %28 = vector.load %arg9[%c0_20, %c0_21, %c0_22] : memref<2x32x32xbf16, #tpu.memory_space<vmem>>, vector<1x32x32xbf16>
    %29 = vector.shape_cast %28 : vector<1x32x32xbf16> to vector<32x32xbf16>
    %c0_23 = arith.constant 0 : index
    %c0_24 = arith.constant 0 : index
    %c0_25 = arith.constant 0 : index
    %30 = vector.load %arg10[%c0_23, %c0_24, %c0_25] : memref<2x1x32xf32, #tpu.memory_space<vmem>>, vector<1x1x32xf32>
    %31 = vector.shape_cast %30 : vector<1x1x32xf32> to vector<1x32xf32>
    %c0_26 = arith.constant 0 : index
    %c0_27 = arith.constant 0 : index
    %c0_28 = arith.constant 0 : index
    %32 = vector.load %arg11[%c0_26, %c0_27, %c0_28] : memref<2x32x32xbf16, #tpu.memory_space<vmem>>, vector<1x32x32xbf16>
    %33 = vector.shape_cast %32 : vector<1x32x32xbf16> to vector<32x32xbf16>
    %34 = arith.truncf %23 : vector<64x32xf32> to vector<64x32xbf16>
    %cst_29 = arith.constant dense<0.000000e+00> : vector<64x96xf32>
    %35 = tpu.matmul %34, %25, %cst_29 {dimension_numbers = #tpu.dot_dimension_numbers<[1], [0], [0], [1], [0, 0, 1, 1], [], []>} : vector<64x32xbf16>, vector<32x96xbf16>, vector<64x96xf32> -> vector<64x96xf32>
    %36 = vector.broadcast %27 : vector<1x96xf32> to vector<64x96xf32>
    %37 = arith.addf %35, %36 : vector<64x96xf32>
    %38 = arith.truncf %37 : vector<64x96xf32> to vector<64x96xbf16>
    %cst_30 = arith.constant 0.000000e+00 : f32
    %39 = vector.broadcast %cst_30 : f32 to vector<64x32xf32>
    %40 = vector.extract_strided_slice %38 {offsets = [0, 0], sizes = [64, 8], strides = [1, 1]} : vector<64x96xbf16> to vector<64x8xbf16>
    %41 = vector.extract_strided_slice %38 {offsets = [0, 32], sizes = [64, 8], strides = [1, 1]} : vector<64x96xbf16> to vector<64x8xbf16>
    %42 = vector.extract_strided_slice %38 {offsets = [0, 64], sizes = [64, 8], strides = [1, 1]} : vector<64x96xbf16> to vector<64x8xbf16>
    %cst_31 = arith.constant dense<0.000000e+00> : vector<64x64xf32>
    %43 = tpu.matmul %40, %41, %cst_31 {dimension_numbers = #tpu.dot_dimension_numbers<[1], [1], [0], [0], [0, 0, 1, 0], [], []>} : vector<64x8xbf16>, vector<64x8xbf16>, vector<64x64xf32> -> vector<64x64xf32>
    %cst_32 = arith.constant 0.353553385 : f32
    %44 = vector.broadcast %cst_32 : f32 to vector<64x64xf32>
    %45 = arith.mulf %43, %44 : vector<64x64xf32>
    %cst_33 = arith.constant dense<0xFF800000> : vector<64xf32>
    %46 = vector.multi_reduction <maximumf>, %45, %cst_33 [1] : vector<64x64xf32> to vector<64xf32>
    %47 = vector.shape_cast %46 : vector<64xf32> to vector<64x1xf32>
    %48 = vector.broadcast %47 : vector<64x1xf32> to vector<64x64xf32>
    %49 = arith.subf %45, %48 : vector<64x64xf32>
    %50 = math.exp %49 : vector<64x64xf32>
    %cst_34 = arith.constant dense<0.000000e+00> : vector<64xf32>
    %51 = vector.multi_reduction <add>, %50, %cst_34 [1] : vector<64x64xf32> to vector<64xf32>
    %52 = vector.shape_cast %51 : vector<64xf32> to vector<64x1xf32>
    %53 = tpu.reciprocal %52 {approx = true} : vector<64x1xf32> -> vector<64x1xf32>
    %54 = vector.broadcast %53 : vector<64x1xf32> to vector<64x64xf32>
    %55 = arith.mulf %50, %54 : vector<64x64xf32>
    %56 = arith.truncf %55 : vector<64x64xf32> to vector<64x64xbf16>
    %cst_35 = arith.constant dense<0.000000e+00> : vector<64x8xf32>
    %57 = tpu.matmul %56, %42, %cst_35 {dimension_numbers = #tpu.dot_dimension_numbers<[1], [0], [0], [1], [0, 0, 1, 1], [], []>} : vector<64x64xbf16>, vector<64x8xbf16>, vector<64x8xf32> -> vector<64x8xf32>
    %58 = arith.truncf %57 : vector<64x8xf32> to vector<64x8xbf16>
    %59 = vector.extract_strided_slice %29 {offsets = [0, 0], sizes = [8, 32], strides = [1, 1]} : vector<32x32xbf16> to vector<8x32xbf16>
    %cst_36 = arith.constant dense<0.000000e+00> : vector<64x32xf32>
    %60 = tpu.matmul %58, %59, %cst_36 {dimension_numbers = #tpu.dot_dimension_numbers<[1], [0], [0], [1], [0, 0, 1, 1], [], []>} : vector<64x8xbf16>, vector<8x32xbf16>, vector<64x32xf32> -> vector<64x32xf32>
    %61 = arith.addf %39, %60 : vector<64x32xf32>
    %62 = vector.extract_strided_slice %38 {offsets = [0, 8], sizes = [64, 8], strides = [1, 1]} : vector<64x96xbf16> to vector<64x8xbf16>
    %63 = vector.extract_strided_slice %38 {offsets = [0, 40], sizes = [64, 8], strides = [1, 1]} : vector<64x96xbf16> to vector<64x8xbf16>
    %64 = vector.extract_strided_slice %38 {offsets = [0, 72], sizes = [64, 8], strides = [1, 1]} : vector<64x96xbf16> to vector<64x8xbf16>
    %cst_37 = arith.constant dense<0.000000e+00> : vector<64x64xf32>
    %65 = tpu.matmul %62, %63, %cst_37 {dimension_numbers = #tpu.dot_dimension_numbers<[1], [1], [0], [0], [0, 0, 1, 0], [], []>} : vector<64x8xbf16>, vector<64x8xbf16>, vector<64x64xf32> -> vector<64x64xf32>
    %cst_38 = arith.constant 0.353553385 : f32
    %66 = vector.broadcast %cst_38 : f32 to vector<64x64xf32>
    %67 = arith.mulf %65, %66 : vector<64x64xf32>
    %cst_39 = arith.constant dense<0xFF800000> : vector<64xf32>
    %68 = vector.multi_reduction <maximumf>, %67, %cst_39 [1] : vector<64x64xf32> to vector<64xf32>
    %69 = vector.shape_cast %68 : vector<64xf32> to vector<64x1xf32>
    %70 = vector.broadcast %69 : vector<64x1xf32> to vector<64x64xf32>
    %71 = arith.subf %67, %70 : vector<64x64xf32>
    %72 = math.exp %71 : vector<64x64xf32>
    %cst_40 = arith.constant dense<0.000000e+00> : vector<64xf32>
    %73 = vector.multi_reduction <add>, %72, %cst_40 [1] : vector<64x64xf32> to vector<64xf32>
    %74 = vector.shape_cast %73 : vector<64xf32> to vector<64x1xf32>
    %75 = tpu.reciprocal %74 {approx = true} : vector<64x1xf32> -> vector<64x1xf32>
    %76 = vector.broadcast %75 : vector<64x1xf32> to vector<64x64xf32>
    %77 = arith.mulf %72, %76 : vector<64x64xf32>
    %78 = arith.truncf %77 : vector<64x64xf32> to vector<64x64xbf16>
    %cst_41 = arith.constant dense<0.000000e+00> : vector<64x8xf32>
    %79 = tpu.matmul %78, %64, %cst_41 {dimension_numbers = #tpu.dot_dimension_numbers<[1], [0], [0], [1], [0, 0, 1, 1], [], []>} : vector<64x64xbf16>, vector<64x8xbf16>, vector<64x8xf32> -> vector<64x8xf32>
    %80 = arith.truncf %79 : vector<64x8xf32> to vector<64x8xbf16>
    %81 = vector.extract_strided_slice %29 {offsets = [8, 0], sizes = [8, 32], strides = [1, 1]} : vector<32x32xbf16> to vector<8x32xbf16>
    %cst_42 = arith.constant dense<0.000000e+00> : vector<64x32xf32>
    %82 = tpu.matmul %80, %81, %cst_42 {dimension_numbers = #tpu.dot_dimension_numbers<[1], [0], [0], [1], [0, 0, 1, 1], [], []>} : vector<64x8xbf16>, vector<8x32xbf16>, vector<64x32xf32> -> vector<64x32xf32>
    %83 = arith.addf %61, %82 : vector<64x32xf32>
    %84 = vector.extract_strided_slice %38 {offsets = [0, 16], sizes = [64, 8], strides = [1, 1]} : vector<64x96xbf16> to vector<64x8xbf16>
    %85 = vector.extract_strided_slice %38 {offsets = [0, 48], sizes = [64, 8], strides = [1, 1]} : vector<64x96xbf16> to vector<64x8xbf16>
    %86 = vector.extract_strided_slice %38 {offsets = [0, 80], sizes = [64, 8], strides = [1, 1]} : vector<64x96xbf16> to vector<64x8xbf16>
    %cst_43 = arith.constant dense<0.000000e+00> : vector<64x64xf32>
    %87 = tpu.matmul %84, %85, %cst_43 {dimension_numbers = #tpu.dot_dimension_numbers<[1], [1], [0], [0], [0, 0, 1, 0], [], []>} : vector<64x8xbf16>, vector<64x8xbf16>, vector<64x64xf32> -> vector<64x64xf32>
    %cst_44 = arith.constant 0.353553385 : f32
    %88 = vector.broadcast %cst_44 : f32 to vector<64x64xf32>
    %89 = arith.mulf %87, %88 : vector<64x64xf32>
    %cst_45 = arith.constant dense<0xFF800000> : vector<64xf32>
    %90 = vector.multi_reduction <maximumf>, %89, %cst_45 [1] : vector<64x64xf32> to vector<64xf32>
    %91 = vector.shape_cast %90 : vector<64xf32> to vector<64x1xf32>
    %92 = vector.broadcast %91 : vector<64x1xf32> to vector<64x64xf32>
    %93 = arith.subf %89, %92 : vector<64x64xf32>
    %94 = math.exp %93 : vector<64x64xf32>
    %cst_46 = arith.constant dense<0.000000e+00> : vector<64xf32>
    %95 = vector.multi_reduction <add>, %94, %cst_46 [1] : vector<64x64xf32> to vector<64xf32>
    %96 = vector.shape_cast %95 : vector<64xf32> to vector<64x1xf32>
    %97 = tpu.reciprocal %96 {approx = true} : vector<64x1xf32> -> vector<64x1xf32>
    %98 = vector.broadcast %97 : vector<64x1xf32> to vector<64x64xf32>
    %99 = arith.mulf %94, %98 : vector<64x64xf32>
    %100 = arith.truncf %99 : vector<64x64xf32> to vector<64x64xbf16>
    %cst_47 = arith.constant dense<0.000000e+00> : vector<64x8xf32>
    %101 = tpu.matmul %100, %86, %cst_47 {dimension_numbers = #tpu.dot_dimension_numbers<[1], [0], [0], [1], [0, 0, 1, 1], [], []>} : vector<64x64xbf16>, vector<64x8xbf16>, vector<64x8xf32> -> vector<64x8xf32>
    %102 = arith.truncf %101 : vector<64x8xf32> to vector<64x8xbf16>
    %103 = vector.extract_strided_slice %29 {offsets = [16, 0], sizes = [8, 32], strides = [1, 1]} : vector<32x32xbf16> to vector<8x32xbf16>
    %cst_48 = arith.constant dense<0.000000e+00> : vector<64x32xf32>
    %104 = tpu.matmul %102, %103, %cst_48 {dimension_numbers = #tpu.dot_dimension_numbers<[1], [0], [0], [1], [0, 0, 1, 1], [], []>} : vector<64x8xbf16>, vector<8x32xbf16>, vector<64x32xf32> -> vector<64x32xf32>
    %105 = arith.addf %83, %104 : vector<64x32xf32>
    %106 = vector.extract_strided_slice %38 {offsets = [0, 24], sizes = [64, 8], strides = [1, 1]} : vector<64x96xbf16> to vector<64x8xbf16>
    %107 = vector.extract_strided_slice %38 {offsets = [0, 56], sizes = [64, 8], strides = [1, 1]} : vector<64x96xbf16> to vector<64x8xbf16>
    %108 = vector.extract_strided_slice %38 {offsets = [0, 88], sizes = [64, 8], strides = [1, 1]} : vector<64x96xbf16> to vector<64x8xbf16>
    %cst_49 = arith.constant dense<0.000000e+00> : vector<64x64xf32>
    %109 = tpu.matmul %106, %107, %cst_49 {dimension_numbers = #tpu.dot_dimension_numbers<[1], [1], [0], [0], [0, 0, 1, 0], [], []>} : vector<64x8xbf16>, vector<64x8xbf16>, vector<64x64xf32> -> vector<64x64xf32>
    %cst_50 = arith.constant 0.353553385 : f32
    %110 = vector.broadcast %cst_50 : f32 to vector<64x64xf32>
    %111 = arith.mulf %109, %110 : vector<64x64xf32>
    %cst_51 = arith.constant dense<0xFF800000> : vector<64xf32>
    %112 = vector.multi_reduction <maximumf>, %111, %cst_51 [1] : vector<64x64xf32> to vector<64xf32>
    %113 = vector.shape_cast %112 : vector<64xf32> to vector<64x1xf32>
    %114 = vector.broadcast %113 : vector<64x1xf32> to vector<64x64xf32>
    %115 = arith.subf %111, %114 : vector<64x64xf32>
    %116 = math.exp %115 : vector<64x64xf32>
    %cst_52 = arith.constant dense<0.000000e+00> : vector<64xf32>
    %117 = vector.multi_reduction <add>, %116, %cst_52 [1] : vector<64x64xf32> to vector<64xf32>
    %118 = vector.shape_cast %117 : vector<64xf32> to vector<64x1xf32>
    %119 = tpu.reciprocal %118 {approx = true} : vector<64x1xf32> -> vector<64x1xf32>
    %120 = vector.broadcast %119 : vector<64x1xf32> to vector<64x64xf32>
    %121 = arith.mulf %116, %120 : vector<64x64xf32>
    %122 = arith.truncf %121 : vector<64x64xf32> to vector<64x64xbf16>
    %cst_53 = arith.constant dense<0.000000e+00> : vector<64x8xf32>
    %123 = tpu.matmul %122, %108, %cst_53 {dimension_numbers = #tpu.dot_dimension_numbers<[1], [0], [0], [1], [0, 0, 1, 1], [], []>} : vector<64x64xbf16>, vector<64x8xbf16>, vector<64x8xf32> -> vector<64x8xf32>
    %124 = arith.truncf %123 : vector<64x8xf32> to vector<64x8xbf16>
    %125 = vector.extract_strided_slice %29 {offsets = [24, 0], sizes = [8, 32], strides = [1, 1]} : vector<32x32xbf16> to vector<8x32xbf16>
    %cst_54 = arith.constant dense<0.000000e+00> : vector<64x32xf32>
    %126 = tpu.matmul %124, %125, %cst_54 {dimension_numbers = #tpu.dot_dimension_numbers<[1], [0], [0], [1], [0, 0, 1, 1], [], []>} : vector<64x8xbf16>, vector<8x32xbf16>, vector<64x32xf32> -> vector<64x32xf32>
    %127 = arith.addf %105, %126 : vector<64x32xf32>
    %128 = vector.broadcast %31 : vector<1x32xf32> to vector<64x32xf32>
    %129 = arith.addf %127, %128 : vector<64x32xf32>
    %130 = arith.addf %23, %129 : vector<64x32xf32>
    %131 = arith.truncf %130 : vector<64x32xf32> to vector<64x32xbf16>
    %cst_55 = arith.constant dense<0.000000e+00> : vector<64x32xf32>
    %132 = tpu.matmul %131, %33, %cst_55 {dimension_numbers = #tpu.dot_dimension_numbers<[1], [0], [0], [1], [0, 0, 1, 1], [], []>} : vector<64x32xbf16>, vector<32x32xbf16>, vector<64x32xf32> -> vector<64x32xf32>
    %133 = arith.addf %130, %132 : vector<64x32xf32>
    %c1 = arith.constant 1 : index
    %c0_56 = arith.constant 0 : index
    %c0_57 = arith.constant 0 : index
    %134 = vector.load %arg7[%c1, %c0_56, %c0_57] : memref<2x32x96xbf16, #tpu.memory_space<vmem>>, vector<1x32x96xbf16>
    %135 = vector.shape_cast %134 : vector<1x32x96xbf16> to vector<32x96xbf16>
    %c1_58 = arith.constant 1 : index
    %c0_59 = arith.constant 0 : index
    %c0_60 = arith.constant 0 : index
    %136 = vector.load %arg8[%c1_58, %c0_59, %c0_60] : memref<2x1x96xf32, #tpu.memory_space<vmem>>, vector<1x1x96xf32>
    %137 = vector.shape_cast %136 : vector<1x1x96xf32> to vector<1x96xf32>
    %c1_61 = arith.constant 1 : index
    %c0_62 = arith.constant 0 : index
    %c0_63 = arith.constant 0 : index
    %138 = vector.load %arg9[%c1_61, %c0_62, %c0_63] : memref<2x32x32xbf16, #tpu.memory_space<vmem>>, vector<1x32x32xbf16>
    %139 = vector.shape_cast %138 : vector<1x32x32xbf16> to vector<32x32xbf16>
    %c1_64 = arith.constant 1 : index
    %c0_65 = arith.constant 0 : index
    %c0_66 = arith.constant 0 : index
    %140 = vector.load %arg10[%c1_64, %c0_65, %c0_66] : memref<2x1x32xf32, #tpu.memory_space<vmem>>, vector<1x1x32xf32>
    %141 = vector.shape_cast %140 : vector<1x1x32xf32> to vector<1x32xf32>
    %c1_67 = arith.constant 1 : index
    %c0_68 = arith.constant 0 : index
    %c0_69 = arith.constant 0 : index
    %142 = vector.load %arg11[%c1_67, %c0_68, %c0_69] : memref<2x32x32xbf16, #tpu.memory_space<vmem>>, vector<1x32x32xbf16>
    %143 = vector.shape_cast %142 : vector<1x32x32xbf16> to vector<32x32xbf16>
    %144 = arith.truncf %133 : vector<64x32xf32> to vector<64x32xbf16>
    %cst_70 = arith.constant dense<0.000000e+00> : vector<64x96xf32>
    %145 = tpu.matmul %144, %135, %cst_70 {dimension_numbers = #tpu.dot_dimension_numbers<[1], [0], [0], [1], [0, 0, 1, 1], [], []>} : vector<64x32xbf16>, vector<32x96xbf16>, vector<64x96xf32> -> vector<64x96xf32>
    %146 = vector.broadcast %137 : vector<1x96xf32> to vector<64x96xf32>
    %147 = arith.addf %145, %146 : vector<64x96xf32>
    %148 = arith.truncf %147 : vector<64x96xf32> to vector<64x96xbf16>
    %cst_71 = arith.constant 0.000000e+00 : f32
    %149 = vector.broadcast %cst_71 : f32 to vector<64x32xf32>
    %150 = vector.extract_strided_slice %148 {offsets = [0, 0], sizes = [64, 8], strides = [1, 1]} : vector<64x96xbf16> to vector<64x8xbf16>
    %151 = vector.extract_strided_slice %148 {offsets = [0, 32], sizes = [64, 8], strides = [1, 1]} : vector<64x96xbf16> to vector<64x8xbf16>
    %152 = vector.extract_strided_slice %148 {offsets = [0, 64], sizes = [64, 8], strides = [1, 1]} : vector<64x96xbf16> to vector<64x8xbf16>
    %cst_72 = arith.constant dense<0.000000e+00> : vector<64x64xf32>
    %153 = tpu.matmul %150, %151, %cst_72 {dimension_numbers = #tpu.dot_dimension_numbers<[1], [1], [0], [0], [0, 0, 1, 0], [], []>} : vector<64x8xbf16>, vector<64x8xbf16>, vector<64x64xf32> -> vector<64x64xf32>
    %cst_73 = arith.constant 0.353553385 : f32
    %154 = vector.broadcast %cst_73 : f32 to vector<64x64xf32>
    %155 = arith.mulf %153, %154 : vector<64x64xf32>
    %cst_74 = arith.constant dense<0xFF800000> : vector<64xf32>
    %156 = vector.multi_reduction <maximumf>, %155, %cst_74 [1] : vector<64x64xf32> to vector<64xf32>
    %157 = vector.shape_cast %156 : vector<64xf32> to vector<64x1xf32>
    %158 = vector.broadcast %157 : vector<64x1xf32> to vector<64x64xf32>
    %159 = arith.subf %155, %158 : vector<64x64xf32>
    %160 = math.exp %159 : vector<64x64xf32>
    %cst_75 = arith.constant dense<0.000000e+00> : vector<64xf32>
    %161 = vector.multi_reduction <add>, %160, %cst_75 [1] : vector<64x64xf32> to vector<64xf32>
    %162 = vector.shape_cast %161 : vector<64xf32> to vector<64x1xf32>
    %163 = tpu.reciprocal %162 {approx = true} : vector<64x1xf32> -> vector<64x1xf32>
    %164 = vector.broadcast %163 : vector<64x1xf32> to vector<64x64xf32>
    %165 = arith.mulf %160, %164 : vector<64x64xf32>
    %166 = arith.truncf %165 : vector<64x64xf32> to vector<64x64xbf16>
    %cst_76 = arith.constant dense<0.000000e+00> : vector<64x8xf32>
    %167 = tpu.matmul %166, %152, %cst_76 {dimension_numbers = #tpu.dot_dimension_numbers<[1], [0], [0], [1], [0, 0, 1, 1], [], []>} : vector<64x64xbf16>, vector<64x8xbf16>, vector<64x8xf32> -> vector<64x8xf32>
    %168 = arith.truncf %167 : vector<64x8xf32> to vector<64x8xbf16>
    %169 = vector.extract_strided_slice %139 {offsets = [0, 0], sizes = [8, 32], strides = [1, 1]} : vector<32x32xbf16> to vector<8x32xbf16>
    %cst_77 = arith.constant dense<0.000000e+00> : vector<64x32xf32>
    %170 = tpu.matmul %168, %169, %cst_77 {dimension_numbers = #tpu.dot_dimension_numbers<[1], [0], [0], [1], [0, 0, 1, 1], [], []>} : vector<64x8xbf16>, vector<8x32xbf16>, vector<64x32xf32> -> vector<64x32xf32>
    %171 = arith.addf %149, %170 : vector<64x32xf32>
    %172 = vector.extract_strided_slice %148 {offsets = [0, 8], sizes = [64, 8], strides = [1, 1]} : vector<64x96xbf16> to vector<64x8xbf16>
    %173 = vector.extract_strided_slice %148 {offsets = [0, 40], sizes = [64, 8], strides = [1, 1]} : vector<64x96xbf16> to vector<64x8xbf16>
    %174 = vector.extract_strided_slice %148 {offsets = [0, 72], sizes = [64, 8], strides = [1, 1]} : vector<64x96xbf16> to vector<64x8xbf16>
    %cst_78 = arith.constant dense<0.000000e+00> : vector<64x64xf32>
    %175 = tpu.matmul %172, %173, %cst_78 {dimension_numbers = #tpu.dot_dimension_numbers<[1], [1], [0], [0], [0, 0, 1, 0], [], []>} : vector<64x8xbf16>, vector<64x8xbf16>, vector<64x64xf32> -> vector<64x64xf32>
    %cst_79 = arith.constant 0.353553385 : f32
    %176 = vector.broadcast %cst_79 : f32 to vector<64x64xf32>
    %177 = arith.mulf %175, %176 : vector<64x64xf32>
    %cst_80 = arith.constant dense<0xFF800000> : vector<64xf32>
    %178 = vector.multi_reduction <maximumf>, %177, %cst_80 [1] : vector<64x64xf32> to vector<64xf32>
    %179 = vector.shape_cast %178 : vector<64xf32> to vector<64x1xf32>
    %180 = vector.broadcast %179 : vector<64x1xf32> to vector<64x64xf32>
    %181 = arith.subf %177, %180 : vector<64x64xf32>
    %182 = math.exp %181 : vector<64x64xf32>
    %cst_81 = arith.constant dense<0.000000e+00> : vector<64xf32>
    %183 = vector.multi_reduction <add>, %182, %cst_81 [1] : vector<64x64xf32> to vector<64xf32>
    %184 = vector.shape_cast %183 : vector<64xf32> to vector<64x1xf32>
    %185 = tpu.reciprocal %184 {approx = true} : vector<64x1xf32> -> vector<64x1xf32>
    %186 = vector.broadcast %185 : vector<64x1xf32> to vector<64x64xf32>
    %187 = arith.mulf %182, %186 : vector<64x64xf32>
    %188 = arith.truncf %187 : vector<64x64xf32> to vector<64x64xbf16>
    %cst_82 = arith.constant dense<0.000000e+00> : vector<64x8xf32>
    %189 = tpu.matmul %188, %174, %cst_82 {dimension_numbers = #tpu.dot_dimension_numbers<[1], [0], [0], [1], [0, 0, 1, 1], [], []>} : vector<64x64xbf16>, vector<64x8xbf16>, vector<64x8xf32> -> vector<64x8xf32>
    %190 = arith.truncf %189 : vector<64x8xf32> to vector<64x8xbf16>
    %191 = vector.extract_strided_slice %139 {offsets = [8, 0], sizes = [8, 32], strides = [1, 1]} : vector<32x32xbf16> to vector<8x32xbf16>
    %cst_83 = arith.constant dense<0.000000e+00> : vector<64x32xf32>
    %192 = tpu.matmul %190, %191, %cst_83 {dimension_numbers = #tpu.dot_dimension_numbers<[1], [0], [0], [1], [0, 0, 1, 1], [], []>} : vector<64x8xbf16>, vector<8x32xbf16>, vector<64x32xf32> -> vector<64x32xf32>
    %193 = arith.addf %171, %192 : vector<64x32xf32>
    %194 = vector.extract_strided_slice %148 {offsets = [0, 16], sizes = [64, 8], strides = [1, 1]} : vector<64x96xbf16> to vector<64x8xbf16>
    %195 = vector.extract_strided_slice %148 {offsets = [0, 48], sizes = [64, 8], strides = [1, 1]} : vector<64x96xbf16> to vector<64x8xbf16>
    %196 = vector.extract_strided_slice %148 {offsets = [0, 80], sizes = [64, 8], strides = [1, 1]} : vector<64x96xbf16> to vector<64x8xbf16>
    %cst_84 = arith.constant dense<0.000000e+00> : vector<64x64xf32>
    %197 = tpu.matmul %194, %195, %cst_84 {dimension_numbers = #tpu.dot_dimension_numbers<[1], [1], [0], [0], [0, 0, 1, 0], [], []>} : vector<64x8xbf16>, vector<64x8xbf16>, vector<64x64xf32> -> vector<64x64xf32>
    %cst_85 = arith.constant 0.353553385 : f32
    %198 = vector.broadcast %cst_85 : f32 to vector<64x64xf32>
    %199 = arith.mulf %197, %198 : vector<64x64xf32>
    %cst_86 = arith.constant dense<0xFF800000> : vector<64xf32>
    %200 = vector.multi_reduction <maximumf>, %199, %cst_86 [1] : vector<64x64xf32> to vector<64xf32>
    %201 = vector.shape_cast %200 : vector<64xf32> to vector<64x1xf32>
    %202 = vector.broadcast %201 : vector<64x1xf32> to vector<64x64xf32>
    %203 = arith.subf %199, %202 : vector<64x64xf32>
    %204 = math.exp %203 : vector<64x64xf32>
    %cst_87 = arith.constant dense<0.000000e+00> : vector<64xf32>
    %205 = vector.multi_reduction <add>, %204, %cst_87 [1] : vector<64x64xf32> to vector<64xf32>
    %206 = vector.shape_cast %205 : vector<64xf32> to vector<64x1xf32>
    %207 = tpu.reciprocal %206 {approx = true} : vector<64x1xf32> -> vector<64x1xf32>
    %208 = vector.broadcast %207 : vector<64x1xf32> to vector<64x64xf32>
    %209 = arith.mulf %204, %208 : vector<64x64xf32>
    %210 = arith.truncf %209 : vector<64x64xf32> to vector<64x64xbf16>
    %cst_88 = arith.constant dense<0.000000e+00> : vector<64x8xf32>
    %211 = tpu.matmul %210, %196, %cst_88 {dimension_numbers = #tpu.dot_dimension_numbers<[1], [0], [0], [1], [0, 0, 1, 1], [], []>} : vector<64x64xbf16>, vector<64x8xbf16>, vector<64x8xf32> -> vector<64x8xf32>
    %212 = arith.truncf %211 : vector<64x8xf32> to vector<64x8xbf16>
    %213 = vector.extract_strided_slice %139 {offsets = [16, 0], sizes = [8, 32], strides = [1, 1]} : vector<32x32xbf16> to vector<8x32xbf16>
    %cst_89 = arith.constant dense<0.000000e+00> : vector<64x32xf32>
    %214 = tpu.matmul %212, %213, %cst_89 {dimension_numbers = #tpu.dot_dimension_numbers<[1], [0], [0], [1], [0, 0, 1, 1], [], []>} : vector<64x8xbf16>, vector<8x32xbf16>, vector<64x32xf32> -> vector<64x32xf32>
    %215 = arith.addf %193, %214 : vector<64x32xf32>
    %216 = vector.extract_strided_slice %148 {offsets = [0, 24], sizes = [64, 8], strides = [1, 1]} : vector<64x96xbf16> to vector<64x8xbf16>
    %217 = vector.extract_strided_slice %148 {offsets = [0, 56], sizes = [64, 8], strides = [1, 1]} : vector<64x96xbf16> to vector<64x8xbf16>
    %218 = vector.extract_strided_slice %148 {offsets = [0, 88], sizes = [64, 8], strides = [1, 1]} : vector<64x96xbf16> to vector<64x8xbf16>
    %cst_90 = arith.constant dense<0.000000e+00> : vector<64x64xf32>
    %219 = tpu.matmul %216, %217, %cst_90 {dimension_numbers = #tpu.dot_dimension_numbers<[1], [1], [0], [0], [0, 0, 1, 0], [], []>} : vector<64x8xbf16>, vector<64x8xbf16>, vector<64x64xf32> -> vector<64x64xf32>
    %cst_91 = arith.constant 0.353553385 : f32
    %220 = vector.broadcast %cst_91 : f32 to vector<64x64xf32>
    %221 = arith.mulf %219, %220 : vector<64x64xf32>
    %cst_92 = arith.constant dense<0xFF800000> : vector<64xf32>
    %222 = vector.multi_reduction <maximumf>, %221, %cst_92 [1] : vector<64x64xf32> to vector<64xf32>
    %223 = vector.shape_cast %222 : vector<64xf32> to vector<64x1xf32>
    %224 = vector.broadcast %223 : vector<64x1xf32> to vector<64x64xf32>
    %225 = arith.subf %221, %224 : vector<64x64xf32>
    %226 = math.exp %225 : vector<64x64xf32>
    %cst_93 = arith.constant dense<0.000000e+00> : vector<64xf32>
    %227 = vector.multi_reduction <add>, %226, %cst_93 [1] : vector<64x64xf32> to vector<64xf32>
    %228 = vector.shape_cast %227 : vector<64xf32> to vector<64x1xf32>
    %229 = tpu.reciprocal %228 {approx = true} : vector<64x1xf32> -> vector<64x1xf32>
    %230 = vector.broadcast %229 : vector<64x1xf32> to vector<64x64xf32>
    %231 = arith.mulf %226, %230 : vector<64x64xf32>
    %232 = arith.truncf %231 : vector<64x64xf32> to vector<64x64xbf16>
    %cst_94 = arith.constant dense<0.000000e+00> : vector<64x8xf32>
    %233 = tpu.matmul %232, %218, %cst_94 {dimension_numbers = #tpu.dot_dimension_numbers<[1], [0], [0], [1], [0, 0, 1, 1], [], []>} : vector<64x64xbf16>, vector<64x8xbf16>, vector<64x8xf32> -> vector<64x8xf32>
    %234 = arith.truncf %233 : vector<64x8xf32> to vector<64x8xbf16>
    %235 = vector.extract_strided_slice %139 {offsets = [24, 0], sizes = [8, 32], strides = [1, 1]} : vector<32x32xbf16> to vector<8x32xbf16>
    %cst_95 = arith.constant dense<0.000000e+00> : vector<64x32xf32>
    %236 = tpu.matmul %234, %235, %cst_95 {dimension_numbers = #tpu.dot_dimension_numbers<[1], [0], [0], [1], [0, 0, 1, 1], [], []>} : vector<64x8xbf16>, vector<8x32xbf16>, vector<64x32xf32> -> vector<64x32xf32>
    %237 = arith.addf %215, %236 : vector<64x32xf32>
    %238 = vector.broadcast %141 : vector<1x32xf32> to vector<64x32xf32>
    %239 = arith.addf %237, %238 : vector<64x32xf32>
    %240 = arith.addf %133, %239 : vector<64x32xf32>
    %241 = arith.truncf %240 : vector<64x32xf32> to vector<64x32xbf16>
    %cst_96 = arith.constant dense<0.000000e+00> : vector<64x32xf32>
    %242 = tpu.matmul %241, %143, %cst_96 {dimension_numbers = #tpu.dot_dimension_numbers<[1], [0], [0], [1], [0, 0, 1, 1], [], []>} : vector<64x32xbf16>, vector<32x32xbf16>, vector<64x32xf32> -> vector<64x32xf32>
    %243 = arith.addf %240, %242 : vector<64x32xf32>
    %244 = tpu.transpose %243, [1, 0] : vector<64x32xf32> -> vector<32x64xf32>
    %c0_97 = arith.constant 0 : index
    %c0_98 = arith.constant 0 : index
    %c0_99 = arith.constant 0 : index
    %245 = vector.load %arg12[%c0_97, %c0_98, %c0_99] : memref<1x32x64xf32, #tpu.memory_space<vmem>>, vector<1x32x64xf32>
    %246 = vector.shape_cast %245 : vector<1x32x64xf32> to vector<32x64xf32>
    %247 = vector.shape_cast %244 : vector<32x64xf32> to vector<1x32x64xf32>
    tpu.vector_store %arg12[%c0_97, %c0_98, %c0_99], %247 {strides = array<i32>} : memref<1x32x64xf32, #tpu.memory_space<vmem>>, vector<1x32x64xf32>,
    return
  }
  func.func @transform_0(%arg0: i32) -> (i32, i32, i32) {
    %c0_i32 = arith.constant 0 : i32
    %c0_i32_0 = arith.constant 0 : i32
    %c0_i32_1 = arith.constant 0 : i32
    return %arg0, %c0_i32, %c0_i32_0 : i32, i32, i32
  }
  func.func @transform_1(%arg0: i32) -> (i32, i32) {
    %c0_i32 = arith.constant 0 : i32
    %c0_i32_0 = arith.constant 0 : i32
    %c0_i32_1 = arith.constant 0 : i32
    return %c0_i32, %c0_i32_0 : i32, i32
  }
  func.func @transform_2(%arg0: i32) -> (i32, i32) {
    %c0_i32 = arith.constant 0 : i32
    %c0_i32_0 = arith.constant 0 : i32
    %c0_i32_1 = arith.constant 0 : i32
    return %c0_i32, %c0_i32_0 : i32, i32
  }
  func.func @transform_3(%arg0: i32) -> (i32, i32) {
    %c0_i32 = arith.constant 0 : i32
    %c0_i32_0 = arith.constant 0 : i32
    %c0_i32_1 = arith.constant 0 : i32
    return %c0_i32, %c0_i32_0 : i32, i32
  }
  func.func @transform_4(%arg0: i32) -> (i32, i32) {
    %c0_i32 = arith.constant 0 : i32
    %c0_i32_0 = arith.constant 0 : i32
    %c0_i32_1 = arith.constant 0 : i32
    return %c0_i32, %c0_i32_0 : i32, i32
  }
  func.func @transform_5(%arg0: i32) -> (i32, i32) {
    %c0_i32 = arith.constant 0 : i32
    %c0_i32_0 = arith.constant 0 : i32
    %c0_i32_1 = arith.constant 0 : i32
    return %c0_i32, %c0_i32_0 : i32, i32
  }
  func.func @transform_6(%arg0: i32) -> (i32, i32, i32) {
    %c0_i32 = arith.constant 0 : i32
    %c0_i32_0 = arith.constant 0 : i32
    %c0_i32_1 = arith.constant 0 : i32
    %c0_i32_2 = arith.constant 0 : i32
    return %c0_i32, %c0_i32_0, %c0_i32_1 : i32, i32, i32
  }
  func.func @transform_7(%arg0: i32) -> (i32, i32, i32) {
    %c0_i32 = arith.constant 0 : i32
    %c0_i32_0 = arith.constant 0 : i32
    %c0_i32_1 = arith.constant 0 : i32
    %c0_i32_2 = arith.constant 0 : i32
    return %c0_i32, %c0_i32_0, %c0_i32_1 : i32, i32, i32
  }
  func.func @transform_8(%arg0: i32) -> (i32, i32, i32) {
    %c0_i32 = arith.constant 0 : i32
    %c0_i32_0 = arith.constant 0 : i32
    %c0_i32_1 = arith.constant 0 : i32
    %c0_i32_2 = arith.constant 0 : i32
    return %c0_i32, %c0_i32_0, %c0_i32_1 : i32, i32, i32
  }
  func.func @transform_9(%arg0: i32) -> (i32, i32, i32) {
    %c0_i32 = arith.constant 0 : i32
    %c0_i32_0 = arith.constant 0 : i32
    %c0_i32_1 = arith.constant 0 : i32
    %c0_i32_2 = arith.constant 0 : i32
    return %c0_i32, %c0_i32_0, %c0_i32_1 : i32, i32, i32
  }
  func.func @transform_10(%arg0: i32) -> (i32, i32, i32) {
    %c0_i32 = arith.constant 0 : i32
    %c0_i32_0 = arith.constant 0 : i32
    %c0_i32_1 = arith.constant 0 : i32
    %c0_i32_2 = arith.constant 0 : i32
    return %c0_i32, %c0_i32_0, %c0_i32_1 : i32, i32, i32
  }
  func.func @transform_11(%arg0: i32) -> (i32, i32, i32) {
    %c0_i32 = arith.constant 0 : i32
    %c0_i32_0 = arith.constant 0 : i32
    %c0_i32_1 = arith.constant 0 : i32
    return %arg0, %c0_i32, %c0_i32_0 : i32, i32, i32
  }
}

module attributes {stable_mosaic.version = 11 : i64} {
  func.func @transformer_block_kernel(%arg0: i32, %arg1: memref<1x4x64xf32, #tpu.memory_space<vmem>>, %arg2: memref<4x32xbf16, #tpu.memory_space<vmem>>, %arg3: memref<1x32xf32, #tpu.memory_space<vmem>>, %arg4: memref<1x32xf32, #tpu.memory_space<vmem>>, %arg5: memref<32x32xbf16, #tpu.memory_space<vmem>>, %arg6: memref<1x32xf32, #tpu.memory_space<vmem>>, %arg7: memref<2x32x96xbf16, #tpu.memory_space<vmem>>, %arg8: memref<2x1x96xf32, #tpu.memory_space<vmem>>, %arg9: memref<2x32x32xbf16, #tpu.memory_space<vmem>>, %arg10: memref<2x1x32xf32, #tpu.memory_space<vmem>>, %arg11: memref<2x32x32xbf16, #tpu.memory_space<vmem>>, %arg12: memref<1x32x64xf32, #tpu.memory_space<vmem>>) attributes {dimension_semantics = [#tpu.dimension_semantics<parallel>], iteration_bounds = array<i64: 2>, scalar_prefetch = 0 : i64, scratch_operands = 0 : i64, tpu.core_type = #tpu.core_type<tc>, window_params = [{transform_indices = @transform_0, window_bounds = array<i64: 1, 4, 64>}, {pipeline_mode = #tpu.pipeline_mode<synchronous>, transform_indices = @transform_1, window_bounds = array<i64: 4, 32>}, {pipeline_mode = #tpu.pipeline_mode<synchronous>, transform_indices = @transform_2, window_bounds = array<i64: 1, 32>}, {pipeline_mode = #tpu.pipeline_mode<synchronous>, transform_indices = @transform_3, window_bounds = array<i64: 1, 32>}, {pipeline_mode = #tpu.pipeline_mode<synchronous>, transform_indices = @transform_4, window_bounds = array<i64: 32, 32>}, {pipeline_mode = #tpu.pipeline_mode<synchronous>, transform_indices = @transform_5, window_bounds = array<i64: 1, 32>}, {pipeline_mode = #tpu.pipeline_mode<synchronous>, transform_indices = @transform_6, window_bounds = array<i64: 2, 32, 96>}, {pipeline_mode = #tpu.pipeline_mode<synchronous>, transform_indices = @transform_7, window_bounds = array<i64: 2, 1, 96>}, {pipeline_mode = #tpu.pipeline_mode<synchronous>, transform_indices = @transform_8, window_bounds = array<i64: 2, 32, 32>}, {pipeline_mode = #tpu.pipeline_mode<synchronous>, transform_indices = @transform_9, window_bounds = array<i64: 2, 1, 32>}, {pipeline_mode = #tpu.pipeline_mode<synchronous>, transform_indices = @transform_10, window_bounds = array<i64: 2, 32, 32>}, {transform_indices = @transform_11, window_bounds = array<i64: 1, 32, 64>}]} {
    %c0 = arith.constant 0 : index
    %c0_0 = arith.constant 0 : index
    %c0_1 = arith.constant 0 : index
    %0 = vector.load %arg1[%c0, %c0_0, %c0_1] : memref<1x4x64xf32, #tpu.memory_space<vmem>>, vector<1x4x64xf32>
    %1 = vector.shape_cast %0 : vector<1x4x64xf32> to vector<4x64xf32>
    %2 = arith.truncf %1 : vector<4x64xf32> to vector<4x64xbf16>
    %c0_2 = arith.constant 0 : index
    %c0_3 = arith.constant 0 : index
    %3 = vector.load %arg2[%c0_2, %c0_3] : memref<4x32xbf16, #tpu.memory_space<vmem>>, vector<4x32xbf16>
    %cst = arith.constant dense<0.000000e+00> : vector<64x32xf32>
    %4 = tpu.matmul %2, %3, %cst {dimension_numbers = #tpu.dot_dimension_numbers<[0], [0], [1], [1], [0, 1, 1, 1], [], []>} : vector<4x64xbf16>, vector<4x32xbf16>, vector<64x32xf32> -> vector<64x32xf32>
    %c0_4 = arith.constant 0 : index
    %c0_5 = arith.constant 0 : index
    %5 = vector.load %arg3[%c0_4, %c0_5] : memref<1x32xf32, #tpu.memory_space<vmem>>, vector<1x32xf32>
    %6 = vector.broadcast %5 : vector<1x32xf32> to vector<64x32xf32>
    %7 = arith.mulf %4, %6 : vector<64x32xf32>
    %c0_6 = arith.constant 0 : index
    %c0_7 = arith.constant 0 : index
    %8 = vector.load %arg4[%c0_6, %c0_7] : memref<1x32xf32, #tpu.memory_space<vmem>>, vector<1x32xf32>
    %9 = vector.broadcast %8 : vector<1x32xf32> to vector<64x32xf32>
    %10 = arith.addf %7, %9 : vector<64x32xf32>
    %11 = arith.negf %10 : vector<64x32xf32>
    %12 = math.exp %11 : vector<64x32xf32>
    %cst_8 = arith.constant 1.000000e+00 : f32
    %13 = vector.broadcast %cst_8 : f32 to vector<64x32xf32>
    %14 = arith.addf %13, %12 : vector<64x32xf32>
    %15 = arith.divf %13, %14 : vector<64x32xf32>
    %16 = arith.mulf %10, %15 : vector<64x32xf32>
    %17 = arith.truncf %16 : vector<64x32xf32> to vector<64x32xbf16>
    %c0_9 = arith.constant 0 : index
    %c0_10 = arith.constant 0 : index
    %18 = vector.load %arg5[%c0_9, %c0_10] : memref<32x32xbf16, #tpu.memory_space<vmem>>, vector<32x32xbf16>
    %cst_11 = arith.constant dense<0.000000e+00> : vector<64x32xf32>
    %19 = tpu.matmul %17, %18, %cst_11 {dimension_numbers = #tpu.dot_dimension_numbers<[1], [0], [0], [1], [0, 0, 1, 1], [], []>} : vector<64x32xbf16>, vector<32x32xbf16>, vector<64x32xf32> -> vector<64x32xf32>
    %c0_12 = arith.constant 0 : index
    %c0_13 = arith.constant 0 : index
    %20 = vector.load %arg6[%c0_12, %c0_13] : memref<1x32xf32, #tpu.memory_space<vmem>>, vector<1x32xf32>
    %21 = vector.broadcast %20 : vector<1x32xf32> to vector<64x32xf32>
    %22 = arith.addf %19, %21 : vector<64x32xf32>
    %23 = arith.addf %16, %22 : vector<64x32xf32>
    %c0_14 = arith.constant 0 : index
    %c0_15 = arith.constant 0 : index
    %c0_16 = arith.constant 0 : index
    %24 = vector.load %arg7[%c0_14, %c0_15, %c0_16] : memref<2x32x96xbf16, #tpu.memory_space<vmem>>, vector<1x32x96xbf16>
    %25 = vector.shape_cast %24 : vector<1x32x96xbf16> to vector<32x96xbf16>
    %c0_17 = arith.constant 0 : index
    %c0_18 = arith.constant 0 : index
    %c0_19 = arith.constant 0 : index
    %26 = vector.load %arg8[%c0_17, %c0_18, %c0_19] : memref<2x1x96xf32, #tpu.memory_space<vmem>>, vector<1x1x96xf32>
    %27 = vector.shape_cast %26 : vector<1x1x96xf32> to vector<1x96xf32>
    %c0_20 = arith.constant 0 : index
    %c0_21 = arith.constant 0 : index
    %c0_22 = arith.constant 0 : index
    %28 = vector.load %arg9[%c0_20, %c0_21, %c0_22] : memref<2x32x32xbf16, #tpu.memory_space<vmem>>, vector<1x32x32xbf16>
    %29 = vector.shape_cast %28 : vector<1x32x32xbf16> to vector<32x32xbf16>
    %c0_23 = arith.constant 0 : index
    %c0_24 = arith.constant 0 : index
    %c0_25 = arith.constant 0 : index
    %30 = vector.load %arg10[%c0_23, %c0_24, %c0_25] : memref<2x1x32xf32, #tpu.memory_space<vmem>>, vector<1x1x32xf32>
    %31 = vector.shape_cast %30 : vector<1x1x32xf32> to vector<1x32xf32>
    %c0_26 = arith.constant 0 : index
    %c0_27 = arith.constant 0 : index
    %c0_28 = arith.constant 0 : index
    %32 = vector.load %arg11[%c0_26, %c0_27, %c0_28] : memref<2x32x32xbf16, #tpu.memory_space<vmem>>, vector<1x32x32xbf16>
    %33 = vector.shape_cast %32 : vector<1x32x32xbf16> to vector<32x32xbf16>
    %34 = arith.truncf %23 : vector<64x32xf32> to vector<64x32xbf16>
    %cst_29 = arith.constant dense<0.000000e+00> : vector<64x96xf32>
    %35 = tpu.matmul %34, %25, %cst_29 {dimension_numbers = #tpu.dot_dimension_numbers<[1], [0], [0], [1], [0, 0, 1, 1], [], []>} : vector<64x32xbf16>, vector<32x96xbf16>, vector<64x96xf32> -> vector<64x96xf32>
    %36 = vector.broadcast %27 : vector<1x96xf32> to vector<64x96xf32>
    %37 = arith.addf %35, %36 : vector<64x96xf32>
    %38 = arith.truncf %37 : vector<64x96xf32> to vector<64x96xbf16>
    %cst_30 = arith.constant 0.000000e+00 : f32
    %39 = vector.broadcast %cst_30 : f32 to vector<64x32xf32>
    %40 = vector.extract_strided_slice %38 {offsets = [0, 0], sizes = [64, 8], strides = [1, 1]} : vector<64x96xbf16> to vector<64x8xbf16>
    %41 = vector.extract_strided_slice %38 {offsets = [0, 32], sizes = [64, 8], strides = [1, 1]} : vector<64x96xbf16> to vector<64x8xbf16>
    %42 = vector.extract_strided_slice %38 {offsets = [0, 64], sizes = [64, 8], strides = [1, 1]} : vector<64x96xbf16> to vector<64x8xbf16>
    %cst_31 = arith.constant dense<0.000000e+00> : vector<64x64xf32>
    %43 = tpu.matmul %40, %41, %cst_31 {dimension_numbers = #tpu.dot_dimension_numbers<[1], [1], [0], [0], [0, 0, 1, 0], [], []>} : vector<64x8xbf16>, vector<64x8xbf16>, vector<64x64xf32> -> vector<64x64xf32>
    %cst_32 = arith.constant 0.353553385 : f32
    %44 = vector.broadcast %cst_32 : f32 to vector<64x64xf32>
    %45 = arith.mulf %43, %44 : vector<64x64xf32>
    %cst_33 = arith.constant dense<0xFF800000> : vector<64xf32>
    %46 = vector.multi_reduction <maximumf>, %45, %cst_33 [1] : vector<64x64xf32> to vector<64xf32>
    %47 = vector.shape_cast %46 : vector<64xf32> to vector<64x1xf32>
    %48 = vector.broadcast %47 : vector<64x1xf32> to vector<64x64xf32>
    %49 = arith.subf %45, %48 : vector<64x64xf32>
    %50 = math.exp %49 : vector<64x64xf32>
    %cst_34 = arith.constant dense<0.000000e+00> : vector<64xf32>
    %51 = vector.multi_reduction <add>, %50, %cst_34 [1] : vector<64x64xf32> to vector<64xf32>
    %52 = vector.shape_cast %51 : vector<64xf32> to vector<64x1xf32>
    %53 = tpu.reciprocal %52 {approx = true} : vector<64x1xf32> -> vector<64x1xf32>
    %54 = vector.broadcast %53 : vector<64x1xf32> to vector<64x64xf32>
    %55 = arith.mulf %50, %54 : vector<64x64xf32>
    %56 = arith.truncf %55 : vector<64x64xf32> to vector<64x64xbf16>
    %cst_35 = arith.constant dense<0.000000e+00> : vector<64x8xf32>
    %57 = tpu.matmul %56, %42, %cst_35 {dimension_numbers = #tpu.dot_dimension_numbers<[1], [0], [0], [1], [0, 0, 1, 1], [], []>} : vector<64x64xbf16>, vector<64x8xbf16>, vector<64x8xf32> -> vector<64x8xf32>
    %58 = arith.truncf %57 : vector<64x8xf32> to vector<64x8xbf16>
    %59 = vector.extract_strided_slice %29 {offsets = [0, 0], sizes = [8, 32], strides = [1, 1]} : vector<32x32xbf16> to vector<8x32xbf16>
    %cst_36 = arith.constant dense<0.000000e+00> : vector<64x32xf32>
    %60 = tpu.matmul %58, %59, %cst_36 {dimension_numbers = #tpu.dot_dimension_numbers<[1], [0], [0], [1], [0, 0, 1, 1], [], []>} : vector<64x8xbf16>, vector<8x32xbf16>, vector<64x32xf32> -> vector<64x32xf32>
    %61 = arith.addf %39, %60 : vector<64x32xf32>
    %62 = vector.extract_strided_slice %38 {offsets = [0, 8], sizes = [64, 8], strides = [1, 1]} : vector<64x96xbf16> to vector<64x8xbf16>
    %63 = vector.extract_strided_slice %38 {offsets = [0, 40], sizes = [64, 8], strides = [1, 1]} : vector<64x96xbf16> to vector<64x8xbf16>
    %64 = vector.extract_strided_slice %38 {offsets = [0, 72], sizes = [64, 8], strides = [1, 1]} : vector<64x96xbf16> to vector<64x8xbf16>
    %cst_37 = arith.constant dense<0.000000e+00> : vector<64x64xf32>
    %65 = tpu.matmul %62, %63, %cst_37 {dimension_numbers = #tpu.dot_dimension_numbers<[1], [1], [0], [0], [0, 0, 1, 0], [], []>} : vector<64x8xbf16>, vector<64x8xbf16>, vector<64x64xf32> -> vector<64x64xf32>
    %cst_38 = arith.constant 0.353553385 : f32
    %66 = vector.broadcast %cst_38 : f32 to vector<64x64xf32>
    %67 = arith.mulf %65, %66 : vector<64x64xf32>
    %cst_39 = arith.constant dense<0xFF800000> : vector<64xf32>
    %68 = vector.multi_reduction <maximumf>, %67, %cst_39 [1] : vector<64x64xf32> to vector<64xf32>
    %69 = vector.shape_cast %68 : vector<64xf32> to vector<64x1xf32>
    %70 = vector.broadcast %69 : vector<64x1xf32> to vector<64x64xf32>
    %71 = arith.subf %67, %70 : vector<64x64xf32>
    %72 = math.exp %71 : vector<64x64xf32>
    %cst_40 = arith.constant dense<0.000000e+00> : vector<64xf32>
    %73 = vector.multi_reduction <add>, %72, %cst_40 [1] : vector<64x64xf32> to vector<64xf32>
    %74 = vector.shape_cast %73 : vector<64xf32> to vector<64x1xf32>
    %75 = tpu.reciprocal %74 {approx = true} : vector<64x1xf32> -> vector<64x1xf32>
    %76 = vector.broadcast %75 : vector<64x1xf32> to vector<64x64xf32>
    %77 = arith.mulf %72, %76 : vector<64x64xf32>
    %78 = arith.truncf %77 : vector<64x64xf32> to vector<64x64xbf16>
    %cst_41 = arith.constant dense<0.000000e+00> : vector<64x8xf32>
    %79 = tpu.matmul %78, %64, %cst_41 {dimension_numbers = #tpu.dot_dimension_numbers<[1], [0], [0], [1], [0, 0, 1, 1], [], []>} : vector<64x64xbf16>, vector<64x8xbf16>, vector<64x8xf32> -> vector<64x8xf32>
    %80 = arith.truncf %79 : vector<64x8xf32> to vector<64x8xbf16>
    %81 = vector.extract_strided_slice %29 {offsets = [8, 0], sizes = [8, 32], strides = [1, 1]} : vector<32x32xbf16> to vector<8x32xbf16>
    %cst_42 = arith.constant dense<0.000000e+00> : vector<64x32xf32>
    %82 = tpu.matmul %80, %81, %cst_42 {dimension_numbers = #tpu.dot_dimension_numbers<[1], [0], [0], [1], [0, 0, 1, 1], [], []>} : vector<64x8xbf16>, vector<8x32xbf16>, vector<64x32xf32> -> vector<64x32xf32>
    %83 = arith.addf %61, %82 : vector<64x32xf32>
    %84 = vector.extract_strided_slice %38 {offsets = [0, 16], sizes = [64, 8], strides = [1, 1]} : vector<64x96xbf16> to vector<64x8xbf16>
    %85 = vector.extract_strided_slice %38 {offsets = [0, 48], sizes = [64, 8], strides = [1, 1]} : vector<64x96xbf16> to vector<64x8xbf16>
    %86 = vector.extract_strided_slice %38 {offsets = [0, 80], sizes = [64, 8], strides = [1, 1]} : vector<64x96xbf16> to vector<64x8xbf16>
    %cst_43 = arith.constant dense<0.000000e+00> : vector<64x64xf32>
    %87 = tpu.matmul %84, %85, %cst_43 {dimension_numbers = #tpu.dot_dimension_numbers<[1], [1], [0], [0], [0, 0, 1, 0], [], []>} : vector<64x8xbf16>, vector<64x8xbf16>, vector<64x64xf32> -> vector<64x64xf32>
    %cst_44 = arith.constant 0.353553385 : f32
    %88 = vector.broadcast %cst_44 : f32 to vector<64x64xf32>
    %89 = arith.mulf %87, %88 : vector<64x64xf32>
    %cst_45 = arith.constant dense<0xFF800000> : vector<64xf32>
    %90 = vector.multi_reduction <maximumf>, %89, %cst_45 [1] : vector<64x64xf32> to vector<64xf32>
    %91 = vector.shape_cast %90 : vector<64xf32> to vector<64x1xf32>
    %92 = vector.broadcast %91 : vector<64x1xf32> to vector<64x64xf32>
    %93 = arith.subf %89, %92 : vector<64x64xf32>
    %94 = math.exp %93 : vector<64x64xf32>
    %cst_46 = arith.constant dense<0.000000e+00> : vector<64xf32>
    %95 = vector.multi_reduction <add>, %94, %cst_46 [1] : vector<64x64xf32> to vector<64xf32>
    %96 = vector.shape_cast %95 : vector<64xf32> to vector<64x1xf32>
    %97 = tpu.reciprocal %96 {approx = true} : vector<64x1xf32> -> vector<64x1xf32>
    %98 = vector.broadcast %97 : vector<64x1xf32> to vector<64x64xf32>
    %99 = arith.mulf %94, %98 : vector<64x64xf32>
    %100 = arith.truncf %99 : vector<64x64xf32> to vector<64x64xbf16>
    %cst_47 = arith.constant dense<0.000000e+00> : vector<64x8xf32>
    %101 = tpu.matmul %100, %86, %cst_47 {dimension_numbers = #tpu.dot_dimension_numbers<[1], [0], [0], [1], [0, 0, 1, 1], [], []>} : vector<64x64xbf16>, vector<64x8xbf16>, vector<64x8xf32> -> vector<64x8xf32>
    %102 = arith.truncf %101 : vector<64x8xf32> to vector<64x8xbf16>
    %103 = vector.extract_strided_slice %29 {offsets = [16, 0], sizes = [8, 32], strides = [1, 1]} : vector<32x32xbf16> to vector<8x32xbf16>
    %cst_48 = arith.constant dense<0.000000e+00> : vector<64x32xf32>
    %104 = tpu.matmul %102, %103, %cst_48 {dimension_numbers = #tpu.dot_dimension_numbers<[1], [0], [0], [1], [0, 0, 1, 1], [], []>} : vector<64x8xbf16>, vector<8x32xbf16>, vector<64x32xf32> -> vector<64x32xf32>
    %105 = arith.addf %83, %104 : vector<64x32xf32>
    %106 = vector.extract_strided_slice %38 {offsets = [0, 24], sizes = [64, 8], strides = [1, 1]} : vector<64x96xbf16> to vector<64x8xbf16>
    %107 = vector.extract_strided_slice %38 {offsets = [0, 56], sizes = [64, 8], strides = [1, 1]} : vector<64x96xbf16> to vector<64x8xbf16>
    %108 = vector.extract_strided_slice %38 {offsets = [0, 88], sizes = [64, 8], strides = [1, 1]} : vector<64x96xbf16> to vector<64x8xbf16>
    %cst_49 = arith.constant dense<0.000000e+00> : vector<64x64xf32>
    %109 = tpu.matmul %106, %107, %cst_49 {dimension_numbers = #tpu.dot_dimension_numbers<[1], [1], [0], [0], [0, 0, 1, 0], [], []>} : vector<64x8xbf16>, vector<64x8xbf16>, vector<64x64xf32> -> vector<64x64xf32>
    %cst_50 = arith.constant 0.353553385 : f32
    %110 = vector.broadcast %cst_50 : f32 to vector<64x64xf32>
    %111 = arith.mulf %109, %110 : vector<64x64xf32>
    %cst_51 = arith.constant dense<0xFF800000> : vector<64xf32>
    %112 = vector.multi_reduction <maximumf>, %111, %cst_51 [1] : vector<64x64xf32> to vector<64xf32>
    %113 = vector.shape_cast %112 : vector<64xf32> to vector<64x1xf32>
    %114 = vector.broadcast %113 : vector<64x1xf32> to vector<64x64xf32>
    %115 = arith.subf %111, %114 : vector<64x64xf32>
    %116 = math.exp %115 : vector<64x64xf32>
    %cst_52 = arith.constant dense<0.000000e+00> : vector<64xf32>
    %117 = vector.multi_reduction <add>, %116, %cst_52 [1] : vector<64x64xf32> to vector<64xf32>
    %118 = vector.shape_cast %117 : vector<64xf32> to vector<64x1xf32>
    %119 = tpu.reciprocal %118 {approx = true} : vector<64x1xf32> -> vector<64x1xf32>
    %120 = vector.broadcast %119 : vector<64x1xf32> to vector<64x64xf32>
    %121 = arith.mulf %116, %120 : vector<64x64xf32>
    %122 = arith.truncf %121 : vector<64x64xf32> to vector<64x64xbf16>
    %cst_53 = arith.constant dense<0.000000e+00> : vector<64x8xf32>
    %123 = tpu.matmul %122, %108, %cst_53 {dimension_numbers = #tpu.dot_dimension_numbers<[1], [0], [0], [1], [0, 0, 1, 1], [], []>} : vector<64x64xbf16>, vector<64x8xbf16>, vector<64x8xf32> -> vector<64x8xf32>
    %124 = arith.truncf %123 : vector<64x8xf32> to vector<64x8xbf16>
    %125 = vector.extract_strided_slice %29 {offsets = [24, 0], sizes = [8, 32], strides = [1, 1]} : vector<32x32xbf16> to vector<8x32xbf16>
    %cst_54 = arith.constant dense<0.000000e+00> : vector<64x32xf32>
    %126 = tpu.matmul %124, %125, %cst_54 {dimension_numbers = #tpu.dot_dimension_numbers<[1], [0], [0], [1], [0, 0, 1, 1], [], []>} : vector<64x8xbf16>, vector<8x32xbf16>, vector<64x32xf32> -> vector<64x32xf32>
    %127 = arith.addf %105, %126 : vector<64x32xf32>
    %128 = vector.broadcast %31 : vector<1x32xf32> to vector<64x32xf32>
    %129 = arith.addf %127, %128 : vector<64x32xf32>
    %130 = arith.addf %23, %129 : vector<64x32xf32>
    %131 = arith.truncf %130 : vector<64x32xf32> to vector<64x32xbf16>
    %cst_55 = arith.constant dense<0.000000e+00> : vector<64x32xf32>
    %132 = tpu.matmul %131, %33, %cst_55 {dimension_numbers = #tpu.dot_dimension_numbers<[1], [0], [0], [1], [0, 0, 1, 1], [], []>} : vector<64x32xbf16>, vector<32x32xbf16>, vector<64x32xf32> -> vector<64x32xf32>
    %133 = arith.addf %130, %132 : vector<64x32xf32>
    %c1 = arith.constant 1 : index
    %c0_56 = arith.constant 0 : index
    %c0_57 = arith.constant 0 : index
    %134 = vector.load %arg7[%c1, %c0_56, %c0_57] : memref<2x32x96xbf16, #tpu.memory_space<vmem>>, vector<1x32x96xbf16>
    %135 = vector.shape_cast %134 : vector<1x32x96xbf16> to vector<32x96xbf16>
    %c1_58 = arith.constant 1 : index
    %c0_59 = arith.constant 0 : index
    %c0_60 = arith.constant 0 : index
    %136 = vector.load %arg8[%c1_58, %c0_59, %c0_60] : memref<2x1x96xf32, #tpu.memory_space<vmem>>, vector<1x1x96xf32>
    %137 = vector.shape_cast %136 : vector<1x1x96xf32> to vector<1x96xf32>
    %c1_61 = arith.constant 1 : index
    %c0_62 = arith.constant 0 : index
    %c0_63 = arith.constant 0 : index
    %138 = vector.load %arg9[%c1_61, %c0_62, %c0_63] : memref<2x32x32xbf16, #tpu.memory_space<vmem>>, vector<1x32x32xbf16>
    %139 = vector.shape_cast %138 : vector<1x32x32xbf16> to vector<32x32xbf16>
    %c1_64 = arith.constant 1 : index
    %c0_65 = arith.constant 0 : index
    %c0_66 = arith.constant 0 : index
    %140 = vector.load %arg10[%c1_64, %c0_65, %c0_66] : memref<2x1x32xf32, #tpu.memory_space<vmem>>, vector<1x1x32xf32>
    %141 = vector.shape_cast %140 : vector<1x1x32xf32> to vector<1x32xf32>
    %c1_67 = arith.constant 1 : index
    %c0_68 = arith.constant 0 : index
    %c0_69 = arith.constant 0 : index
    %142 = vector.load %arg11[%c1_67, %c0_68, %c0_69] : memref<2x32x32xbf16, #tpu.memory_space<vmem>>, vector<1x32x32xbf16>
    %143 = vector.shape_cast %142 : vector<1x32x32xbf16> to vector<32x32xbf16>
    %144 = arith.truncf %133 : vector<64x32xf32> to vector<64x32xbf16>
    %cst_70 = arith.constant dense<0.000000e+00> : vector<64x96xf32>
    %145 = tpu.matmul %144, %135, %cst_70 {dimension_numbers = #tpu.dot_dimension_numbers<[1], [0], [0], [1], [0, 0, 1, 1], [], []>} : vector<64x32xbf16>, vector<32x96xbf16>, vector<64x96xf32> -> vector<64x96xf32>
    %146 = vector.broadcast %137 : vector<1x96xf32> to vector<64x96xf32>
    %147 = arith.addf %145, %146 : vector<64x96xf32>
    %148 = arith.truncf %147 : vector<64x96xf32> to vector<64x96xbf16>
    %cst_71 = arith.constant 0.000000e+00 : f32
    %149 = vector.broadcast %cst_71 : f32 to vector<64x32xf32>
    %150 = vector.extract_strided_slice %148 {offsets = [0, 0], sizes = [64, 8], strides = [1, 1]} : vector<64x96xbf16> to vector<64x8xbf16>
    %151 = vector.extract_strided_slice %148 {offsets = [0, 32], sizes = [64, 8], strides = [1, 1]} : vector<64x96xbf16> to vector<64x8xbf16>
    %152 = vector.extract_strided_slice %148 {offsets = [0, 64], sizes = [64, 8], strides = [1, 1]} : vector<64x96xbf16> to vector<64x8xbf16>
    %cst_72 = arith.constant dense<0.000000e+00> : vector<64x64xf32>
    %153 = tpu.matmul %150, %151, %cst_72 {dimension_numbers = #tpu.dot_dimension_numbers<[1], [1], [0], [0], [0, 0, 1, 0], [], []>} : vector<64x8xbf16>, vector<64x8xbf16>, vector<64x64xf32> -> vector<64x64xf32>
    %cst_73 = arith.constant 0.353553385 : f32
    %154 = vector.broadcast %cst_73 : f32 to vector<64x64xf32>
    %155 = arith.mulf %153, %154 : vector<64x64xf32>
    %cst_74 = arith.constant dense<0xFF800000> : vector<64xf32>
    %156 = vector.multi_reduction <maximumf>, %155, %cst_74 [1] : vector<64x64xf32> to vector<64xf32>
    %157 = vector.shape_cast %156 : vector<64xf32> to vector<64x1xf32>
    %158 = vector.broadcast %157 : vector<64x1xf32> to vector<64x64xf32>
    %159 = arith.subf %155, %158 : vector<64x64xf32>
    %160 = math.exp %159 : vector<64x64xf32>
    %cst_75 = arith.constant dense<0.000000e+00> : vector<64xf32>
    %161 = vector.multi_reduction <add>, %160, %cst_75 [1] : vector<64x64xf32> to vector<64xf32>
    %162 = vector.shape_cast %161 : vector<64xf32> to vector<64x1xf32>
    %163 = tpu.reciprocal %162 {approx = true} : vector<64x1xf32> -> vector<64x1xf32>
    %164 = vector.broadcast %163 : vector<64x1xf32> to vector<64x64xf32>
    %165 = arith.mulf %160, %164 : vector<64x64xf32>
    %166 = arith.truncf %165 : vector<64x64xf32> to vector<64x64xbf16>
    %cst_76 = arith.constant dense<0.000000e+00> : vector<64x8xf32>
    %167 = tpu.matmul %166, %152, %cst_76 {dimension_numbers = #tpu.dot_dimension_numbers<[1], [0], [0], [1], [0, 0, 1, 1], [], []>} : vector<64x64xbf16>, vector<64x8xbf16>, vector<64x8xf32> -> vector<64x8xf32>
    %168 = arith.truncf %167 : vector<64x8xf32> to vector<64x8xbf16>
    %169 = vector.extract_strided_slice %139 {offsets = [0, 0], sizes = [8, 32], strides = [1, 1]} : vector<32x32xbf16> to vector<8x32xbf16>
    %cst_77 = arith.constant dense<0.000000e+00> : vector<64x32xf32>
    %170 = tpu.matmul %168, %169, %cst_77 {dimension_numbers = #tpu.dot_dimension_numbers<[1], [0], [0], [1], [0, 0, 1, 1], [], []>} : vector<64x8xbf16>, vector<8x32xbf16>, vector<64x32xf32> -> vector<64x32xf32>
    %171 = arith.addf %149, %170 : vector<64x32xf32>
    %172 = vector.extract_strided_slice %148 {offsets = [0, 8], sizes = [64, 8], strides = [1, 1]} : vector<64x96xbf16> to vector<64x8xbf16>
    %173 = vector.extract_strided_slice %148 {offsets = [0, 40], sizes = [64, 8], strides = [1, 1]} : vector<64x96xbf16> to vector<64x8xbf16>
    %174 = vector.extract_strided_slice %148 {offsets = [0, 72], sizes = [64, 8], strides = [1, 1]} : vector<64x96xbf16> to vector<64x8xbf16>
    %cst_78 = arith.constant dense<0.000000e+00> : vector<64x64xf32>
    %175 = tpu.matmul %172, %173, %cst_78 {dimension_numbers = #tpu.dot_dimension_numbers<[1], [1], [0], [0], [0, 0, 1, 0], [], []>} : vector<64x8xbf16>, vector<64x8xbf16>, vector<64x64xf32> -> vector<64x64xf32>
    %cst_79 = arith.constant 0.353553385 : f32
    %176 = vector.broadcast %cst_79 : f32 to vector<64x64xf32>
    %177 = arith.mulf %175, %176 : vector<64x64xf32>
    %cst_80 = arith.constant dense<0xFF800000> : vector<64xf32>
    %178 = vector.multi_reduction <maximumf>, %177, %cst_80 [1] : vector<64x64xf32> to vector<64xf32>
    %179 = vector.shape_cast %178 : vector<64xf32> to vector<64x1xf32>
    %180 = vector.broadcast %179 : vector<64x1xf32> to vector<64x64xf32>
    %181 = arith.subf %177, %180 : vector<64x64xf32>
    %182 = math.exp %181 : vector<64x64xf32>
    %cst_81 = arith.constant dense<0.000000e+00> : vector<64xf32>
    %183 = vector.multi_reduction <add>, %182, %cst_81 [1] : vector<64x64xf32> to vector<64xf32>
    %184 = vector.shape_cast %183 : vector<64xf32> to vector<64x1xf32>
    %185 = tpu.reciprocal %184 {approx = true} : vector<64x1xf32> -> vector<64x1xf32>
    %186 = vector.broadcast %185 : vector<64x1xf32> to vector<64x64xf32>
    %187 = arith.mulf %182, %186 : vector<64x64xf32>
    %188 = arith.truncf %187 : vector<64x64xf32> to vector<64x64xbf16>
    %cst_82 = arith.constant dense<0.000000e+00> : vector<64x8xf32>
    %189 = tpu.matmul %188, %174, %cst_82 {dimension_numbers = #tpu.dot_dimension_numbers<[1], [0], [0], [1], [0, 0, 1, 1], [], []>} : vector<64x64xbf16>, vector<64x8xbf16>, vector<64x8xf32> -> vector<64x8xf32>
    %190 = arith.truncf %189 : vector<64x8xf32> to vector<64x8xbf16>
    %191 = vector.extract_strided_slice %139 {offsets = [8, 0], sizes = [8, 32], strides = [1, 1]} : vector<32x32xbf16> to vector<8x32xbf16>
    %cst_83 = arith.constant dense<0.000000e+00> : vector<64x32xf32>
    %192 = tpu.matmul %190, %191, %cst_83 {dimension_numbers = #tpu.dot_dimension_numbers<[1], [0], [0], [1], [0, 0, 1, 1], [], []>} : vector<64x8xbf16>, vector<8x32xbf16>, vector<64x32xf32> -> vector<64x32xf32>
    %193 = arith.addf %171, %192 : vector<64x32xf32>
    %194 = vector.extract_strided_slice %148 {offsets = [0, 16], sizes = [64, 8], strides = [1, 1]} : vector<64x96xbf16> to vector<64x8xbf16>
    %195 = vector.extract_strided_slice %148 {offsets = [0, 48], sizes = [64, 8], strides = [1, 1]} : vector<64x96xbf16> to vector<64x8xbf16>
    %196 = vector.extract_strided_slice %148 {offsets = [0, 80], sizes = [64, 8], strides = [1, 1]} : vector<64x96xbf16> to vector<64x8xbf16>
    %cst_84 = arith.constant dense<0.000000e+00> : vector<64x64xf32>
    %197 = tpu.matmul %194, %195, %cst_84 {dimension_numbers = #tpu.dot_dimension_numbers<[1], [1], [0], [0], [0, 0, 1, 0], [], []>} : vector<64x8xbf16>, vector<64x8xbf16>, vector<64x64xf32> -> vector<64x64xf32>
    %cst_85 = arith.constant 0.353553385 : f32
    %198 = vector.broadcast %cst_85 : f32 to vector<64x64xf32>
    %199 = arith.mulf %197, %198 : vector<64x64xf32>
    %cst_86 = arith.constant dense<0xFF800000> : vector<64xf32>
    %200 = vector.multi_reduction <maximumf>, %199, %cst_86 [1] : vector<64x64xf32> to vector<64xf32>
    %201 = vector.shape_cast %200 : vector<64xf32> to vector<64x1xf32>
    %202 = vector.broadcast %201 : vector<64x1xf32> to vector<64x64xf32>
    %203 = arith.subf %199, %202 : vector<64x64xf32>
    %204 = math.exp %203 : vector<64x64xf32>
    %cst_87 = arith.constant dense<0.000000e+00> : vector<64xf32>
    %205 = vector.multi_reduction <add>, %204, %cst_87 [1] : vector<64x64xf32> to vector<64xf32>
    %206 = vector.shape_cast %205 : vector<64xf32> to vector<64x1xf32>
    %207 = tpu.reciprocal %206 {approx = true} : vector<64x1xf32> -> vector<64x1xf32>
    %208 = vector.broadcast %207 : vector<64x1xf32> to vector<64x64xf32>
    %209 = arith.mulf %204, %208 : vector<64x64xf32>
    %210 = arith.truncf %209 : vector<64x64xf32> to vector<64x64xbf16>
    %cst_88 = arith.constant dense<0.000000e+00> : vector<64x8xf32>
    %211 = tpu.matmul %210, %196, %cst_88 {dimension_numbers = #tpu.dot_dimension_numbers<[1], [0], [0], [1], [0, 0, 1, 1], [], []>} : vector<64x64xbf16>, vector<64x8xbf16>, vector<64x8xf32> -> vector<64x8xf32>
    %212 = arith.truncf %211 : vector<64x8xf32> to vector<64x8xbf16>
    %213 = vector.extract_strided_slice %139 {offsets = [16, 0], sizes = [8, 32], strides = [1, 1]} : vector<32x32xbf16> to vector<8x32xbf16>
    %cst_89 = arith.constant dense<0.000000e+00> : vector<64x32xf32>
    %214 = tpu.matmul %212, %213, %cst_89 {dimension_numbers = #tpu.dot_dimension_numbers<[1], [0], [0], [1], [0, 0, 1, 1], [], []>} : vector<64x8xbf16>, vector<8x32xbf16>, vector<64x32xf32> -> vector<64x32xf32>
    %215 = arith.addf %193, %214 : vector<64x32xf32>
    %216 = vector.extract_strided_slice %148 {offsets = [0, 24], sizes = [64, 8], strides = [1, 1]} : vector<64x96xbf16> to vector<64x8xbf16>
    %217 = vector.extract_strided_slice %148 {offsets = [0, 56], sizes = [64, 8], strides = [1, 1]} : vector<64x96xbf16> to vector<64x8xbf16>
    %218 = vector.extract_strided_slice %148 {offsets = [0, 88], sizes = [64, 8], strides = [1, 1]} : vector<64x96xbf16> to vector<64x8xbf16>
    %cst_90 = arith.constant dense<0.000000e+00> : vector<64x64xf32>
    %219 = tpu.matmul %216, %217, %cst_90 {dimension_numbers = #tpu.dot_dimension_numbers<[1], [1], [0], [0], [0, 0, 1, 0], [], []>} : vector<64x8xbf16>, vector<64x8xbf16>, vector<64x64xf32> -> vector<64x64xf32>
    %cst_91 = arith.constant 0.353553385 : f32
    %220 = vector.broadcast %cst_91 : f32 to vector<64x64xf32>
    %221 = arith.mulf %219, %220 : vector<64x64xf32>
    %cst_92 = arith.constant dense<0xFF800000> : vector<64xf32>
    %222 = vector.multi_reduction <maximumf>, %221, %cst_92 [1] : vector<64x64xf32> to vector<64xf32>
    %223 = vector.shape_cast %222 : vector<64xf32> to vector<64x1xf32>
    %224 = vector.broadcast %223 : vector<64x1xf32> to vector<64x64xf32>
    %225 = arith.subf %221, %224 : vector<64x64xf32>
    %226 = math.exp %225 : vector<64x64xf32>
    %cst_93 = arith.constant dense<0.000000e+00> : vector<64xf32>
    %227 = vector.multi_reduction <add>, %226, %cst_93 [1] : vector<64x64xf32> to vector<64xf32>
    %228 = vector.shape_cast %227 : vector<64xf32> to vector<64x1xf32>
    %229 = tpu.reciprocal %228 {approx = true} : vector<64x1xf32> -> vector<64x1xf32>
    %230 = vector.broadcast %229 : vector<64x1xf32> to vector<64x64xf32>
    %231 = arith.mulf %226, %230 : vector<64x64xf32>
    %232 = arith.truncf %231 : vector<64x64xf32> to vector<64x64xbf16>
    %cst_94 = arith.constant dense<0.000000e+00> : vector<64x8xf32>
    %233 = tpu.matmul %232, %218, %cst_94 {dimension_numbers = #tpu.dot_dimension_numbers<[1], [0], [0], [1], [0, 0, 1, 1], [], []>} : vector<64x64xbf16>, vector<64x8xbf16>, vector<64x8xf32> -> vector<64x8xf32>
    %234 = arith.truncf %233 : vector<64x8xf32> to vector<64x8xbf16>
    %235 = vector.extract_strided_slice %139 {offsets = [24, 0], sizes = [8, 32], strides = [1, 1]} : vector<32x32xbf16> to vector<8x32xbf16>
    %cst_95 = arith.constant dense<0.000000e+00> : vector<64x32xf32>
    %236 = tpu.matmul %234, %235, %cst_95 {dimension_numbers = #tpu.dot_dimension_numbers<[1], [0], [0], [1], [0, 0, 1, 1], [], []>} : vector<64x8xbf16>, vector<8x32xbf16>, vector<64x32xf32> -> vector<64x32xf32>
    %237 = arith.addf %215, %236 : vector<64x32xf32>
    %238 = vector.broadcast %141 : vector<1x32xf32> to vector<64x32xf32>
    %239 = arith.addf %237, %238 : vector<64x32xf32>
    %240 = arith.addf %133, %239 : vector<64x32xf32>
    %241 = arith.truncf %240 : vector<64x32xf32> to vector<64x32xbf16>
    %cst_96 = arith.constant dense<0.000000e+00> : vector<64x32xf32>
    %242 = tpu.matmul %241, %143, %cst_96 {dimension_numbers = #tpu.dot_dimension_numbers<[1], [0], [0], [1], [0, 0, 1, 1], [], []>} : vector<64x32xbf16>, vector<32x32xbf16>, vector<64x32xf32> -> vector<64x32xf32>
    %243 = arith.addf %240, %242 : vector<64x32xf32>
    %244 = tpu.transpose %243, [1, 0] : vector<64x32xf32> -> vector<32x64xf32>
    %c0_97 = arith.constant 0 : index
    %c0_98 = arith.constant 0 : index
    %c0_99 = arith.constant 0 : index
    %245 = vector.load %arg12[%c0_97, %c0_98, %c0_99] : memref<1x32x64xf32, #tpu.memory_space<vmem>>, vector<1x32x64xf32>
    %246 = vector.shape_cast %245 : vector<1x32x64xf32> to vector<32x64xf32>
    %247 = vector.shape_cast %244 : vector<32x64xf32> to vector<1x32x64xf32>
    tpu.vector_store %arg12[%c0_97, %c0_98, %c0_99], %247 {strides = array<i32>} : memref<1x32x64xf32, #tpu.memory_space<vmem>>, vector<1x32x64xf32>,
    return
  }
  func.func @transform_0(%arg0: i32) -> (i32, i32, i32) {
    %c0_i32 = arith.constant 0 : i32
    %c0_i32_0 = arith.constant 0 : i32
    %c0_i32_1 = arith.constant 0 : i32
    return %arg0, %c0_i32, %c0_i32_0 : i32, i32, i32
  }
  func.func @transform_1(%arg0: i32) -> (i32, i32) {
    %c0_i32 = arith.constant 0 : i32
    %c0_i32_0 = arith.constant 0 : i32
    %c0_i32_1 = arith.constant 0 : i32
    return %c0_i32, %c0_i32_0 : i32, i32
  }
  func.func @transform_2(%arg0: i32) -> (i32, i32) {
    %c0_i32 = arith.constant 0 : i32
    %c0_i32_0 = arith.constant 0 : i32
    %c0_i32_1 = arith.constant 0 : i32
    return %c0_i32, %c0_i32_0 : i32, i32
  }
  func.func @transform_3(%arg0: i32) -> (i32, i32) {
    %c0_i32 = arith.constant 0 : i32
    %c0_i32_0 = arith.constant 0 : i32
    %c0_i32_1 = arith.constant 0 : i32
    return %c0_i32, %c0_i32_0 : i32, i32
  }
  func.func @transform_4(%arg0: i32) -> (i32, i32) {
    %c0_i32 = arith.constant 0 : i32
    %c0_i32_0 = arith.constant 0 : i32
    %c0_i32_1 = arith.constant 0 : i32
    return %c0_i32, %c0_i32_0 : i32, i32
  }
  func.func @transform_5(%arg0: i32) -> (i32, i32) {
    %c0_i32 = arith.constant 0 : i32
    %c0_i32_0 = arith.constant 0 : i32
    %c0_i32_1 = arith.constant 0 : i32
    return %c0_i32, %c0_i32_0 : i32, i32
  }
  func.func @transform_6(%arg0: i32) -> (i32, i32, i32) {
    %c0_i32 = arith.constant 0 : i32
    %c0_i32_0 = arith.constant 0 : i32
    %c0_i32_1 = arith.constant 0 : i32
    %c0_i32_2 = arith.constant 0 : i32
    return %c0_i32, %c0_i32_0, %c0_i32_1 : i32, i32, i32
  }
  func.func @transform_7(%arg0: i32) -> (i32, i32, i32) {
    %c0_i32 = arith.constant 0 : i32
    %c0_i32_0 = arith.constant 0 : i32
    %c0_i32_1 = arith.constant 0 : i32
    %c0_i32_2 = arith.constant 0 : i32
    return %c0_i32, %c0_i32_0, %c0_i32_1 : i32, i32, i32
  }
  func.func @transform_8(%arg0: i32) -> (i32, i32, i32) {
    %c0_i32 = arith.constant 0 : i32
    %c0_i32_0 = arith.constant 0 : i32
    %c0_i32_1 = arith.constant 0 : i32
    %c0_i32_2 = arith.constant 0 : i32
    return %c0_i32, %c0_i32_0, %c0_i32_1 : i32, i32, i32
  }
  func.func @transform_9(%arg0: i32) -> (i32, i32, i32) {
    %c0_i32 = arith.constant 0 : i32
    %c0_i32_0 = arith.constant 0 : i32
    %c0_i32_1 = arith.constant 0 : i32
    %c0_i32_2 = arith.constant 0 : i32
    return %c0_i32, %c0_i32_0, %c0_i32_1 : i32, i32, i32
  }
  func.func @transform_10(%arg0: i32) -> (i32, i32, i32) {
    %c0_i32 = arith.constant 0 : i32
    %c0_i32_0 = arith.constant 0 : i32
    %c0_i32_1 = arith.constant 0 : i32
    %c0_i32_2 = arith.constant 0 : i32
    return %c0_i32, %c0_i32_0, %c0_i32_1 : i32, i32, i32
  }
  func.func @transform_11(%arg0: i32) -> (i32, i32, i32) {
    %c0_i32 = arith.constant 0 : i32
    %c0_i32_0 = arith.constant 0 : i32
    %c0_i32_1 = arith.constant 0 : i32
    return %arg0, %c0_i32, %c0_i32_0 : i32, i32, i32
  }
}

</mosaic_0001>

<bundles_post_ra>
// kernel: tpu_custom_call.1
= control target key start
LH: loop header
LB: loop body
LE: loop exit
PB: predicated region body
PF: predicated region fallthrough
CT: control target
= control target key end

     0   :  { %s6059_s0 = inlined_call_operand.hbm [shape: f32[2,4,64], index: 0, kind: input, shape index: {}]   ;;  %s6060_s1 = inlined_call_operand.hbm [shape: bf16[4,32], index: 1, kind: input, shape index: {}]   ;;  %s6061_s2 = inlined_call_operand.hbm [shape: f32[1,32], index: 2, kind: input, shape index: {}]   ;;  %s6062_s3 = inlined_call_operand.hbm [shape: f32[1,32], index: 3, kind: input, shape index: {}]   ;;  %s6063_s4 = inlined_call_operand.hbm [shape: bf16[32,32], index: 4, kind: input, shape index: {}]   ;;  %s6064_s5 = inlined_call_operand.hbm [shape: f32[1,32], index: 5, kind: input, shape index: {}]   ;;  %s6065_s6 = inlined_call_operand.hbm [shape: bf16[2,32,96], index: 6, kind: input, shape index: {}]   ;;  %s6066_s7 = inlined_call_operand.vmem [shape: f32[2,1,96], index: 7, kind: input, shape index: {}]   ;;  %s6067_s8 = inlined_call_operand.hbm [shape: bf16[2,32,32], index: 8, kind: input, shape index: {}]   ;;  %s6068_s9 = inlined_call_operand.vmem [shape: f32[2,1,32], index: 9, kind: input, shape index: {}]   ;;  %s6069_s10 = inlined_call_operand.hbm [shape: bf16[2,32,32], index: 10, kind: input, shape index: {}]   ;;  %s6070_s11 = inlined_call_operand.hbm [shape: f32[2,32,64], index: 11, kind: output, shape index: {}]  }
   0x1   :  { %6071 = sst [smem:[#allocation24_spill]] %s6060_s1 }
   0x2   :  { %6072 = sst [smem:[#allocation25_spill]] %s6061_s2 }
   0x3   :  { %6073 = sst [smem:[#allocation26_spill]] %s6062_s3 }
   0x4   :  { %6074 = sst [smem:[#allocation27_spill]] %s6063_s4 }
   0x5   :  { %6075 = sst [smem:[#allocation28_spill]] %s6064_s5 }
   0x6   :  { %6076 = sst [smem:[#allocation29_spill]] %s6065_s6 }
   0x7   :  { %16 = vsyncpa [#allocation3], 0 }
   0x8   :  { %18 = vsyncpa [#allocation3 + $0x1], 0 }
   0x9   :  { %19 = vsyncpa [#allocation6], 0 }
   0xa   :  { %20 = vsyncpa [#allocation9], 0 }
   0xb   :  { %21 = vsyncpa [#allocation12], 0 }
   0xc   :  { %22 = vsyncpa [#allocation15], 0 }
   0xd   :  { %23 = vsyncpa [#allocation4], 0 }
   0xe   :  { %25 = vsyncpa [#allocation4 + $0x1], 0  ;;  %s4698_s17 = smov 0   ;;  %s4700_s18 = smov 0  }
   0xf   :  { %s4702_s19 = smov 0   ;;  %s4704_s20 = smov 0  }
  0x10 LB: > { %s6077_s1 = sld [smem:[#allocation24_spill]]  ;;  %s4722_s24 = sadd.s32 4294967295, %s4613_s20   ;;  %s4613_s20 = sphi %s4704_s20, %s6094_s20   ;;  %s4609_s19 = sphi %s4702_s19, %s6093_s19   ;;  %s4605_s18 = sphi %s4700_s18, %s6092_s18   ;;  %s4601_s17 = sphi %s4698_s17, %s6091_s17  }
  0x11   : > { %p3610_p0 = scmp.ge.s32.totalorder %s4613_s20, 1  ;;  %p52_p1 = scmp.eq.s32.totalorder %s4722_s24, 0 }
  0x12   : > { %p298_p2 = scmp.lt.s32.totalorder %s4613_s20, 3  ;;  %s4615_s26 = smov [#allocation5]  }
  0x13   : > { %s312_s27 = sshll.u32 %s4615_s26, 4  ;;  %s6079_s3 = sld [smem:[#allocation26_spill]]  ;;  %s313_s27 = int_to_ptr.vmem [resolvable:$true] %s312_s27 }
  0x14   : > { %p4727_p3 = pnand %p3610_p0, %p298_p2  ;;  %s4616_s13 = smov [#allocation8]  }
  0x15   : > { %s336_s14 = sshll.u32 %s4616_s13, 4  ;;  %s6081_s5 = sld [smem:[#allocation28_spill]]  ;;  %s337_s14 = int_to_ptr.vmem [resolvable:$true] %s336_s14 }
  0x16   : > { %s310_s23 = sshll.u32 %s6077_s1, 4  ;;  %p3858_p5 = pneg %p4727_p3  ;;  %s311_s23 = int_to_ptr.hbm [resolvable:$true] %s310_s23 }
  0x17   : > { %s4617_s22 = smov [#allocation11]   ;;  %s388_s1 = sshll.u32 %s6067_s8, 4  ;;  %s389_s1 = int_to_ptr.hbm [resolvable:$true] %s388_s1 }
  0x18   : > { %p4739_p6 = pnand %p3858_p5, %p52_p1  ;;  %s362_s26 = sshll.u32 %s4617_s22, 4  ;;  %s363_s26 = int_to_ptr.vmem [resolvable:$true] %s362_s26 }
  0x19   : > { %s334_s30 = sshll.u32 %s6079_s3, 4  ;;  %s4618_s13 = smov [#allocation14]   ;;  %s335_s30 = int_to_ptr.hbm [resolvable:$true] %s334_s30 }
  0x1a   : > { %3861 = dma.hbm_to_vmem [thread:$0]  (!%p4739_p6), %s311_s23, 32, %s313_s27, [#allocation6]  }
  0x1b   : > { %s360_s21 = sshll.u32 %s6081_s5, 4  ;;  %s390_s15 = sshll.u32 %s4618_s13, 4  ;;  %s361_s21 = int_to_ptr.hbm [resolvable:$true] %s360_s21  ;;  %s391_s15 = int_to_ptr.vmem [resolvable:$true] %s390_s15 }
  0x1c   : > { %3867 = dma.hbm_to_vmem [thread:$0]  (!%p4739_p6), %s335_s30, 16, %s337_s14, [#allocation9]  }
  0x1d   : > { %3873 = dma.hbm_to_vmem [thread:$0]  (!%p4739_p6), %s361_s21, 16, %s363_s26, [#allocation12]  }
  0x1e   : > { %s6082_s2 = sld [smem:[#allocation25_spill]]  ;;  %s4619_s23 = smov 64  }
  0x1f   : > { %s4620_s27 = smov 4   ;;  %s6083_s4 = sld [smem:[#allocation27_spill]] }
  0x20   : > { %3879 = dma.hbm_to_vmem [thread:$0]  (!%p4739_p6), %s389_s1, 512, %s391_s15, [#allocation15], %s4619_s23, %s4619_s23, %s4620_s27  }
  0x21   : > { %s4621_s28 = smov [#allocation7]   ;;  %s4622_s3 = smov [#allocation10]  }
  0x22   : > { %s324_s21 = sshll.u32 %s4621_s28, 4  ;;  %s347_s26 = sshll.u32 %s4622_s3, 4  ;;  %s325_s21 = int_to_ptr.vmem [resolvable:$true] %s324_s21  ;;  %s348_s26 = int_to_ptr.vmem [resolvable:$true] %s347_s26 }
  0x23   : > { %s6084_s6 = sld [smem:[#allocation29_spill]]  ;;  %s4623_s30 = smov [#allocation13]  }
  0x24   : > { %s322_s5 = sshll.u32 %s6082_s2, 4  ;;  %s373_s14 = sshll.u32 %s4623_s30, 4  ;;  %s323_s5 = int_to_ptr.hbm [resolvable:$true] %s322_s5  ;;  %s374_s14 = int_to_ptr.vmem [resolvable:$true] %s373_s14 }
  0x25   : > { %s345_s22 = sshll.u32 %s6083_s4, 4  ;;  %s4624_s28 = smov [#allocation16]   ;;  %s346_s22 = int_to_ptr.hbm [resolvable:$true] %s345_s22 }
  0x26   : > { %3864 = dma.hbm_to_vmem [thread:$0]  (!%p4739_p6), %s323_s5, 16, %s325_s21, [#allocation6]  }
  0x27   : > { %3870 = dma.hbm_to_vmem [thread:$0]  (!%p4739_p6), %s346_s22, 256, %s348_s26, [#allocation9], %s4619_s23, %s4619_s23, %s4620_s27  }
  0x28   : > { %s405_s5 = sshll.u32 %s6069_s10, 4  ;;  %s407_s22 = sshll.u32 %s4624_s28, 4  ;;  %s406_s5 = int_to_ptr.hbm [resolvable:$true] %s405_s5  ;;  %s408_s22 = int_to_ptr.vmem [resolvable:$true] %s407_s22 }
  0x29   : > { %s371_s1 = sshll.u32 %s6084_s6, 4  ;;  %s3609_s21 = sadd.s32 4294967294, %s4613_s20   ;;  %s372_s1 = int_to_ptr.hbm [resolvable:$true] %s371_s1 }
  0x2a   : > { %3876 = dma.hbm_to_vmem [thread:$0]  (!%p4739_p6), %s372_s1, 512, %s374_s14, [#allocation12], %s4619_s23, %s4619_s23, %s4620_s27  }
  0x2b   : > { %3882 = dma.hbm_to_vmem [thread:$0]  (!%p4739_p6), %s406_s5, 512, %s408_s22, [#allocation15], %s4619_s23, %s4619_s23, %s4620_s27  }
  0x2c   : > { %s4779_s3 = sadd.s32 1, %s4613_s20   ;;  %s38_s29 = sadd.s32 1, %s4609_s19 }
  0x2d   : > { %s35_s26 = ssub.s32 %s4613_s20, %s4779_s3  ;;  %p45_p8 = scmp.ne.s32.totalorder %s4609_s19, %s4605_s18 }
  0x2e   : > { %p36_p7 = scmp.eq.s32.totalorder %s35_s26, 0  ;;  %p46_p9 = scmp.eq.s32.totalorder %s4613_s20, 0 }
  0x2f   : > { %p51_p10 = scmp.ne.s32.totalorder %s4605_s18, %s4601_s17  ;;  %p285_p13 = scmp.eq.s32.totalorder %s4722_s24, 1 }
  0x30   : > { %s4790_s13 = scalar_select %p36_p7, %s4609_s19, %s38_s29  }
  0x31   : > { %p4792_p11 = por %p46_p9, %p45_p8  ;;  %p4798_p12 = por %p52_p1, %p51_p10 }
  0x32   : > { %p291_p0 = scmp.eq.s32.totalorder %s3609_s21, 1  ;;  %p3899_p2 = scmp.lt.s32.totalorder %s4613_s20, 2 }
  0x33   : > { %s421_s23 = sand.u32 1, %s4609_s19   ;;  %p4805_p5 = por %p285_p13, %p45_p8 }
  0x34   : > { %p4809_p6 = por %p291_p0, %p51_p10  ;;  %s3620_s16 = sshll.u32 %s421_s23, 2 }
  0x35   : > { %s3621_s5 = sshll.u32 %s4613_s20, 2  ;;  %s425_s22 = scalar_lea.vmem [#allocation2], %s3620_s16 }
  0x36   : > { %s429_s28 = scalar_lea.hbm %s6059_s0, %s3621_s5  ;;  %s433_s26 = sshll.u32 %s425_s22, 4  ;;  %s434_s26 = int_to_ptr.vmem [resolvable:$true] %s433_s26 }
  0x37   : > { %s431_s29 = sshll.u32 %s429_s28, 4  ;;  %p4819_p7 = pnand %p3899_p2, %p4792_p11  ;;  %s432_s29 = int_to_ptr.hbm [resolvable:$true] %s431_s29 }
  0x38   : > { %s422_s2 = scalar_lea.sflag [#allocation3], %s421_s23  ;;  %s4501_s4 = sshra.s32 %s432_s29, 4  ;;  %s4502_s4 = int_to_ptr.hbm [resolvable:$true] %s4501_s4 }
  0x39   : > { %s4503_s6 = scalar_lea.hbm %s4502_s4, 4  ;;  %p4505_p9 = pneg %p4819_p7 }
  0x3a   : > { %p4504_p8 = scmp.ne.s32.totalorder %s4502_s4, %s4503_s6  ;;  %s4508_s30 = scalar_lea.hbm %s6059_s0, 8 }
  0x3b   : > { %p4509_p11 = scmp.lt.s32.totalorder %s4502_s4, %s6059_s0  ;;  %p4510_p0 = scmp.lt.s32.totalorder %s4508_s30, %s4503_s6 }
  0x3c   : > { %p4506_p10 = pnand %p4505_p9, %p4504_p8 }
  0x3d   : > { %p4511_p2 = por %p4510_p0, %p4509_p11 }
  0x3e   : > { %p4507_p13 = pneg %p4506_p10 }
  0x40   : > { %p4512_p4 = pnand %p4511_p2, %p4507_p13 }
  0x42   : > { %4515 = shalt.err (!%p4512_p4)
}
  0x43   : > { %3886 = dma.hbm_to_vmem [thread:$0]  (!%p4819_p7), %s432_s29, 64, %s434_s26, %s422_s2  }
  0x44   : > { %442 = sbr.rel (%p4727_p3) target bundleno = 4671 (0x123f), region = 64  ;;  %s4836_s23 = sand.u32 (!%p4727_p3), 1, %s4605_s18  }
  0x45   : > { %s3623_s28 = sshll.u32 (!%p4727_p3), %s4836_s23, 2  ;;  %s445_s22 = scalar_lea.sflag (!%p4727_p3), [#allocation3], %s4836_s23 }
  0x46   : > { %s448_s16 = scalar_lea.vmem (!%p4727_p3), [#allocation2], %s3623_s28 }
  0x49   : > { %4576 = dma.done.wait (%p4798_p12), %s445_s22, 64  }
  0x4a   : > { %4578 = vsyncadd (%p4798_p12), %s445_s22, 4294967232 }
  0x4b   : > { %4580 = dma.done.wait (%p52_p1), [#allocation6], 48  }
  0x4c   : > { %4582 = vsyncadd (%p52_p1), [#allocation6], 4294967248 }
  0x4d   : > { %4584 = dma.done.wait (%p52_p1), [#allocation9], 272  }
  0x4e   : > { %4586 = vsyncadd (%p52_p1), [#allocation9], 4294967024 }
  0x4f   : > { %4588 = dma.done.wait (%p52_p1), [#allocation12], 528  }
  0x50   : > { %4590 = vsyncadd (%p52_p1), [#allocation12], 4294966768 }
  0x51   : > { %4592 = dma.done.wait (%p52_p1), [#allocation15], 1024  }
  0x52   : > { %4594 = vsyncadd (%p52_p1), [#allocation15], 4294966272  ;;  %vm561_vm0 = vcmask 1041408   ;;  %v529_v0 = vld [vmem:[%s448_s16] sm:$0xf]  ;;  %vm548_vm1 = vcmask 31744  }
  0x53   : > { %v531_v1 = vld [vmem:[#allocation5] sm:$0x3]  ;;  %v530_v2 = vpack.c.bf16 %v529_v0, %v529_v0  ;;  %v4860_v8 = vld [vmem:[#allocation7] ss:$0 sm:$0xff]  ;;  %v4862_v9 = vld [vmem:[#allocation8] ss:$0 sm:$0xff] }
  0x54   : > { %v563_v3 = vsel %vm561_vm0, %v531_v1, 0  ;;  %v3809_v14 = vld [vmem:[#allocation10 + $0x8] sm:$0xff]  ;;  %v3808_v17 = vld [vmem:[#allocation10] sm:$0xff]  ;;  %vm802_vm10 = vcmask 261120   ;;  %s4625_s6 = smov 96   ;;  %s4626_s25 = smov 64  }
  0x55   : > { %572 = vmatpush.bf16.msra.mxu0 %v563_v3  ;;  %3819 = vmatpush.bf16.msra.mxu3 %v563_v3  ;;  %s4627_s12 = smov 88   ;;  %s4628_s26 = smov 120  }
  0x56   : > { %532 = vxpose.xlu0.c.b16.start.end [1/1] (short) (narrow) %v530_v2, 64  ;;  %821 = vmatpush.bf16.msra.mxu1 %v3809_v14  ;;  %s4629_s29 = smov 72   ;;  %s4630_s21 = smov 112  }
  0x57   : > { %3820 = vmatpush.bf16.msra.mxu2 %v3809_v14  ;;  %s4631_s5 = smov 80   ;;  %s4632_s30 = smov 104  }
  0x58   : > { %s4633_s14 = smov 56   ;;  %s4634_s1 = smov 40  }
  0x59   : > { %s4635_s28 = smov 48   ;;  %s4551_s4 = scalar_lea.hbm %s6070_s11, 64 }
  0x5a   : > { %822 = vmatpush.bf16.msra.mxu1 %v3808_v17 }
  0x5b   : > { %3821 = vmatpush.bf16.msra.mxu2 %v3808_v17 }
 0x102   : > { %v540_v4 = vpop.trf.xlu0 }
 0x103   : > { %3633 = vmatmul.msk.bf16.vlgmr.msra.gmra.mxu0 %vm548_vm1, %v540_v4 }
 0x112   : > { %v541_v5 = vpop.trf.xlu0 }
 0x113   : > { %3634 = vmatmul.msk.bf16.gmra.mxu0 %vm548_vm1, %v541_v5 }
 0x122   : > { %v542_v6 = vpop.trf.xlu0 }
 0x123   : > { %3635 = vmatmul.msk.bf16.vlgmr.msra.gmra.mxu3 %vm548_vm1, %v542_v6 }
 0x132   : > { %v543_v7 = vpop.trf.xlu0 }
 0x133   : > { %3636 = vmatmul.msk.bf16.gmra.mxu3 %vm548_vm1, %v543_v7 }
 0x180   : > { %v574_v10 = vpop.f32.mrf.mxu0 }
 0x181   : > { %v598_v11 = vmul.f32 %v4860_v8, %v574_v10 }
 0x183   : > { %v4866_v12 = vadd.f32 %v4862_v9, %v598_v11 }
 0x185   : > { %v3637_v13 = vmul.f32 -1.442695, %v4866_v12 }
 0x187   : > { %3973 = vpow2.f32 %v3637_v13 }
 0x188   : > { %v576_v15 = vpop.f32.mrf.mxu0 }
 0x189   : > { %v599_v16 = vmul.f32 %v4860_v8, %v576_v15 }
 0x18b   : > { %v611_v18 = vadd.f32 %v4862_v9, %v599_v16 }
 0x18d   : > { %v3974_v19 = vpop.eup %3973  ;;  %v3638_v20 = vmul.f32 -1.442695, %v611_v18 }
 0x18e   : > { %v642_v21 = vadd.f32 1.0, %v3974_v19 }
 0x18f   : > { %3975 = vpow2.f32 %v3638_v20 }
 0x190   : > { %3977 = vrcp.f32 %v642_v21  ;;  %v579_v22 = vpop.f32.mrf.mxu0  ;;  %vm655_vm2 = vweird.f32 %v642_v21  ;;  %v659_v38 = vand.u32 2147483647, %v642_v21  ;;  %v661_v39 = vand.u32 2147483648, %v642_v21 }
 0x191   : > { %v600_v23 = vmul.f32 %v4860_v8, %v579_v22 }
 0x192   : > { %vm660_vm5 = vcmp.eq.f32.partialorder %v659_v38, 8.507059e+37  ;;  %v662_v44 = vor.u32 1.1754944e-38, %v661_v39 }
 0x193   : > { %v4873_v24 = vadd.f32 %v4862_v9, %v600_v23 }
 0x195   : > { %v3976_v25 = vpop.eup %3975  ;;  %v3639_v26 = vmul.f32 -1.442695, %v4873_v24 }
 0x196   : > { %v3978_v27 = vpop.eup %3977  ;;  %v643_v28 = vadd.f32 1.0, %v3976_v25 }
 0x197   : > { %v651_v29 = vmul.f32 %v3978_v27, %v642_v21  ;;  %3979 = vpow2.f32 %v3639_v26  ;;  %vm656_vm3 = vweird.f32 %v3978_v27 }
 0x198   : > { %3981 = vrcp.f32 %v643_v28  ;;  %v581_v30 = vpop.f32.mrf.mxu0  ;;  %vm657_vm4 = vmor %vm655_vm2, %vm656_vm3  ;;  %v676_v45 = vand.u32 2147483648, %v643_v28  ;;  %v674_v48 = vand.u32 2147483647, %v643_v28  ;;  %vm670_vm7 = vweird.f32 %v643_v28 }
 0x199   : > { %v652_v31 = vsub.f32 1.0, %v651_v29  ;;  %v601_v32 = vmul.f32 %v4860_v8, %v581_v30 }
 0x19a   : > { %v677_v53 = vor.u32 1.1754944e-38, %v676_v45  ;;  %vm675_vm9 = vcmp.eq.f32.partialorder %v674_v48, 8.507059e+37 }
 0x19b   : > { %v653_v33 = vmul.f32 %v3978_v27, %v652_v31  ;;  %v4878_v34 = vadd.f32 %v4862_v9, %v601_v32 }
 0x19d   : > { %v3980_v35 = vpop.eup %3979  ;;  %v3640_v36 = vmul.f32 -1.442695, %v4878_v34  ;;  %v654_v41 = vadd.f32 %v3978_v27, %v653_v33 }
 0x19e   : > { %v3982_v37 = vpop.eup %3981  ;;  %v644_v40 = vadd.f32 1.0, %v3980_v35 }
 0x19f   : > { %v666_v42 = vmul.f32 %v3982_v37, %v643_v28  ;;  %3983 = vpow2.f32 %v3640_v36  ;;  %v658_v46 = vsel %vm657_vm4, %v3978_v27, %v654_v41  ;;  %vm671_vm6 = vweird.f32 %v3982_v37 }
 0x1a0   : > { %3985 = vrcp.f32 %v644_v40  ;;  %v663_v52 = vsel %vm660_vm5, %v662_v44, %v658_v46  ;;  %vm672_vm8 = vmor %vm670_vm7, %vm671_vm6  ;;  %vm685_vm11 = vweird.f32 %v644_v40  ;;  %v691_v10 = vand.u32 2147483648, %v644_v40 }
 0x1a1   : > { %v667_v43 = vsub.f32 1.0, %v666_v42  ;;  %v4883_v60 = vmul.f32 %v663_v52, %v4866_v12  ;;  %v689_v11 = vand.u32 2147483647, %v644_v40 }
 0x1a2   : > { %v692_v20 = vor.u32 1.1754944e-38, %v691_v10 }
 0x1a3   : > { %v668_v47 = vmul.f32 %v3982_v37, %v667_v43  ;;  %vm690_vm15 = vcmp.eq.f32.partialorder %v689_v11, 8.507059e+37 }
 0x1a5   : > { %v3984_v49 = vpop.eup %3983  ;;  %v669_v50 = vadd.f32 %v3982_v37, %v668_v47 }
 0x1a6   : > { %v3986_v51 = vpop.eup %3985  ;;  %v645_v54 = vadd.f32 1.0, %v3984_v49  ;;  %v584_v55 = vpop.f32.mrf.mxu3 }
 0x1a7   : > { %v673_v56 = vsel %vm672_vm8, %v3982_v37, %v669_v50  ;;  %v681_v57 = vmul.f32 %v3986_v51, %v644_v40  ;;  %v602_v58 = vmul.f32 %v4860_v8, %v584_v55  ;;  %vm686_vm12 = vweird.f32 %v3986_v51 }
 0x1a8   : > { %v678_v59 = vsel %vm675_vm9, %v677_v53, %v673_v56  ;;  %3987 = vrcp.f32 %v645_v54  ;;  %vm687_vm13 = vmor %vm685_vm11, %vm686_vm12  ;;  %v704_v14 = vand.u32 2147483647, %v645_v54  ;;  %v706_v15 = vand.u32 2147483648, %v645_v54 }
 0x1a9   : > { %v4885_v61 = vmul.f32 %v678_v59, %v611_v18  ;;  %v682_v62 = vsub.f32 1.0, %v681_v57  ;;  %v4888_v63 = vadd.f32 %v4862_v9, %v602_v58  ;;  %vm700_vm0 = vweird.f32 %v645_v54 }
 0x1aa   : > { %v707_v25 = vor.u32 1.1754944e-38, %v706_v15  ;;  %vm705_vm2 = vcmp.eq.f32.partialorder %v704_v14, 8.507059e+37 }
 0x1ab   : > { %v683_v0 = vmul.f32 %v3986_v51, %v682_v62  ;;  %v3641_v1 = vmul.f32 -1.442695, %v4888_v63  ;;  %v778_v2 = vpack.c.bf16 %v4885_v61, %v4883_v60 }
 0x1ad   : > { %3989 = vpow2.f32 %v3641_v1  ;;  %3653 = vmatmul.msk.bf16.vlgmr.msra.gmra.mxu1 %vm802_vm10, %v778_v2  ;;  %v684_v5 = vadd.f32 %v3986_v51, %v683_v0 }
 0x1ae   : > { %v3988_v3 = vpop.eup %3987  ;;  %v586_v4 = vpop.f32.mrf.mxu3 }
 0x1af   : > { %v696_v6 = vmul.f32 %v3988_v3, %v645_v54  ;;  %v603_v7 = vmul.f32 %v4860_v8, %v586_v4  ;;  %v688_v17 = vsel %vm687_vm13, %v3986_v51, %v684_v5  ;;  %vm701_vm14 = vweird.f32 %v3988_v3 }
 0x1b0   : > { %v693_v23 = vsel %vm690_vm15, %v692_v20, %v688_v17  ;;  %vm702_vm1 = vmor %vm700_vm0, %vm701_vm14 }
 0x1b1   : > { %v697_v12 = vsub.f32 1.0, %v696_v6  ;;  %v4896_v13 = vadd.f32 %v4862_v9, %v603_v7  ;;  %v4901_v30 = vmul.f32 %v693_v23, %v4873_v24 }
 0x1b3   : > { %v3990_v16 = vpop.eup %3989  ;;  %v698_v18 = vmul.f32 %v3988_v3, %v697_v12  ;;  %v3642_v19 = vmul.f32 -1.442695, %v4896_v13 }
 0x1b4   : > { %v646_v21 = vadd.f32 1.0, %v3990_v16 }
 0x1b5   : > { %v699_v22 = vadd.f32 %v3988_v3, %v698_v18  ;;  %3991 = vpow2.f32 %v3642_v19 }
 0x1b6   : > { %3993 = vrcp.f32 %v646_v21  ;;  %v589_v26 = vpop.f32.mrf.mxu3  ;;  %v721_v49 = vand.u32 2147483648, %v646_v21  ;;  %vm715_vm4 = vweird.f32 %v646_v21  ;;  %v719_v50 = vand.u32 2147483647, %v646_v21 }
 0x1b7   : > { %v703_v27 = vsel %vm702_vm1, %v3988_v3, %v699_v22  ;;  %v604_v28 = vmul.f32 %v4860_v8, %v589_v26 }
 0x1b8   : > { %v708_v29 = vsel %vm705_vm2, %v707_v25, %v703_v27  ;;  %v722_v54 = vor.u32 1.1754944e-38, %v721_v49  ;;  %vm720_vm7 = vcmp.eq.f32.partialorder %v719_v50, 8.507059e+37 }
 0x1b9   : > { %v4904_v31 = vmul.f32 %v708_v29, %v4878_v34  ;;  %v4907_v32 = vadd.f32 %v4862_v9, %v604_v28  ;;  %v3811_v29 = vld [vmem:[#allocation13 + $0x8] sm:$0xff] }
 0x1ba   : > { %903 = vmatpush.bf16.msrb.mxu2 %v3811_v29 }
 0x1bb   : > { %v3992_v33 = vpop.eup %3991  ;;  %v3643_v35 = vmul.f32 -1.442695, %v4907_v32  ;;  %v779_v36 = vpack.c.bf16 %v4904_v31, %v4901_v30 }
 0x1bc   : > { %v3994_v37 = vpop.eup %3993  ;;  %v647_v38 = vadd.f32 1.0, %v3992_v33  ;;  %v3810_v33 = vld [vmem:[#allocation13] sm:$0xff] }
 0x1bd   : > { %v711_v39 = vmul.f32 %v3994_v37, %v646_v21  ;;  %3995 = vpow2.f32 %v3643_v35  ;;  %3654 = vmatmul.msk.bf16.gmra.mxu1 %vm802_vm10, %v779_v36  ;;  %vm716_vm3 = vweird.f32 %v3994_v37  ;;  %v3968_v36 = vld [vmem:[#allocation11] ss:$0 sm:$0xff] }
 0x1be   : > { %3997 = vrcp.f32 %v647_v38  ;;  %v591_v24 = vpop.f32.mrf.mxu3  ;;  %vm717_vm5 = vmor %vm715_vm4, %vm716_vm3  ;;  %vm730_vm8 = vweird.f32 %v647_v38  ;;  %904 = vmatpush.bf16.msrb.mxu2 %v3810_v33  ;;  %vm962_vm4 = vcmask 64512  }
 0x1bf   : > { %v712_v40 = vsub.f32 1.0, %v711_v39  ;;  %v605_v34 = vmul.f32 %v4860_v8, %v591_v24  ;;  %v736_v8 = vand.u32 2147483648, %v647_v38 }
 0x1c1   : > { %v713_v41 = vmul.f32 %v3994_v37, %v712_v40  ;;  %v4915_v42 = vadd.f32 %v4862_v9, %v605_v34  ;;  %v734_v9 = vand.u32 2147483647, %v647_v38  ;;  %v737_v59 = vor.u32 1.1754944e-38, %v736_v8 }
 0x1c3   : > { %v3996_v43 = vpop.eup %3995  ;;  %v3644_v44 = vmul.f32 -1.442695, %v4915_v42  ;;  %v714_v47 = vadd.f32 %v3994_v37, %v713_v41  ;;  %vm735_vm11 = vcmp.eq.f32.partialorder %v734_v9, 8.507059e+37 }
 0x1c4   : > { %v3998_v45 = vpop.eup %3997  ;;  %v648_v46 = vadd.f32 1.0, %v3996_v43 }
 0x1c5   : > { %v726_v48 = vmul.f32 %v3998_v45, %v647_v38  ;;  %3999 = vpow2.f32 %v3644_v44  ;;  %v718_v52 = vsel %vm717_vm5, %v3994_v37, %v714_v47  ;;  %vm731_vm6 = vweird.f32 %v3998_v45 }
 0x1c6   : > { %4001 = vrcp.f32 %v648_v46  ;;  %v723_v58 = vsel %vm720_vm7, %v722_v54, %v718_v52  ;;  %vm732_vm9 = vmor %vm730_vm8, %vm731_vm6  ;;  %v751_v14 = vand.u32 2147483648, %v648_v46  ;;  %vm745_vm13 = vweird.f32 %v648_v46 }
 0x1c7   : > { %v727_v51 = vsub.f32 1.0, %v726_v48  ;;  %v774_v3 = vmul.f32 %v723_v58, %v4888_v63  ;;  %v749_v15 = vand.u32 2147483647, %v648_v46  ;;  %vm1024_vm5 = vcmask 523264  }
 0x1c8   : > { %vm1412_vm6 = vcmask 1043456  }
 0x1c9   : > { %v728_v53 = vmul.f32 %v3998_v45, %v727_v51  ;;  %vm750_vm0 = vcmp.eq.f32.partialorder %v749_v15, 8.507059e+37 }
 0x1cb   : > { %v4000_v55 = vpop.eup %3999  ;;  %v729_v56 = vadd.f32 %v3998_v45, %v728_v53 }
 0x1cc   : > { %v4002_v57 = vpop.eup %4001  ;;  %v649_v62 = vadd.f32 1.0, %v4000_v55 }
 0x1cd   : > { %v733_v0 = vsel %vm732_vm9, %v3998_v45, %v729_v56  ;;  %v741_v1 = vmul.f32 %v4002_v57, %v648_v46  ;;  %vm746_vm12 = vweird.f32 %v4002_v57  ;;  %v3969_v56 = vld [vmem:[%s6066_s7] ss:$0 sm:$0xff] }
 0x1ce   : > { %v738_v2 = vsel %vm735_vm11, %v737_v59, %v733_v0  ;;  %4003 = vrcp.f32 %v649_v62  ;;  %vm747_vm14 = vmor %vm745_vm13, %vm746_vm12  ;;  %v766_v17 = vand.u32 2147483648, %v649_v62  ;;  %v764_v63 = vand.u32 2147483647, %v649_v62 }
 0x1cf   : > { %v775_v4 = vmul.f32 %v738_v2, %v4896_v13  ;;  %v742_v5 = vsub.f32 1.0, %v741_v1  ;;  %v752_v13 = vor.u32 1.1754944e-38, %v751_v14  ;;  %vm760_vm1 = vweird.f32 %v649_v62 }
 0x1d0   : > { %v767_v22 = vor.u32 1.1754944e-38, %v766_v17  ;;  %vm765_vm3 = vcmp.eq.f32.partialorder %v764_v63, 8.507059e+37 }
 0x1d1   : > { %v743_v6 = vmul.f32 %v4002_v57, %v742_v5  ;;  %v780_v7 = vpack.c.bf16 %v775_v4, %v774_v3 }
 0x1d3   : > { %3655 = vmatmul.msk.bf16.vlgmr.msra.gmra.mxu2 %vm802_vm10, %v780_v7  ;;  %v744_v11 = vadd.f32 %v4002_v57, %v743_v6 }
 0x1d4   : > { %v4004_v10 = vpop.eup %4003 }
 0x1d5   : > { %v756_v12 = vmul.f32 %v4004_v10, %v649_v62  ;;  %v748_v18 = vsel %vm747_vm14, %v4002_v57, %v744_v11  ;;  %vm761_vm15 = vweird.f32 %v4004_v10 }
 0x1d6   : > { %v753_v21 = vsel %vm750_vm0, %v752_v13, %v748_v18  ;;  %vm762_vm2 = vmor %vm760_vm1, %vm761_vm15 }
 0x1d7   : > { %v757_v16 = vsub.f32 1.0, %v756_v12  ;;  %v776_v26 = vmul.f32 %v753_v21, %v4907_v32 }
 0x1d9   : > { %v758_v19 = vmul.f32 %v4004_v10, %v757_v16 }
 0x1db   : > { %v759_v20 = vadd.f32 %v4004_v10, %v758_v19 }
 0x1dd   : > { %v763_v23 = vsel %vm762_vm2, %v4004_v10, %v759_v20 }
 0x1de   : > { %v768_v25 = vsel %vm765_vm3, %v767_v22, %v763_v23 }
 0x1df   : > { %v777_v27 = vmul.f32 %v768_v25, %v4915_v42 }
 0x1e1   : > { %v781_v28 = vpack.c.bf16 %v777_v27, %v776_v26 }
 0x1e3   : > { %3656 = vmatmul.msk.bf16.gmra.mxu2 %vm802_vm10, %v781_v28 }
 0x22a   : > { %v824_v35 = vpop.f32.mrf.mxu1 }
 0x22b   : > { %v825_v37 = vadd.f32 %v3968_v36, %v824_v35 }
 0x22d   : > { %v4925_v24 = vadd.f32 %v825_v37, %v4883_v60 }
 0x232   : > { %v826_v38 = vpop.f32.mrf.mxu1 }
 0x233   : > { %v827_v39 = vadd.f32 %v3968_v36, %v826_v38 }
 0x235   : > { %v4928_v40 = vadd.f32 %v827_v39, %v4885_v61 }
 0x237   : > { %v866_v32 = vpack.c.bf16 %v4928_v40, %v4925_v24 }
 0x239   : > { %3665 = vmatmul.msk.bf16.vlgmr.msrb.gmra.mxu2 %vm802_vm10, %v866_v32 }
 0x23a   : > { %v829_v34 = vpop.f32.mrf.mxu1 }
 0x23b   : > { %v830_v41 = vadd.f32 %v3968_v36, %v829_v34 }
 0x23d   : > { %v4934_v44 = vadd.f32 %v830_v41, %v4901_v30 }
 0x242   : > { %v831_v42 = vpop.f32.mrf.mxu1 }
 0x243   : > { %v832_v43 = vadd.f32 %v3968_v36, %v831_v42 }
 0x245   : > { %v4937_v45 = vadd.f32 %v832_v43, %v4904_v31 }
 0x247   : > { %v867_v60 = vpack.c.bf16 %v4937_v45, %v4934_v44 }
 0x249   : > { %3666 = vmatmul.msk.bf16.gmra.mxu2 %vm802_vm10, %v867_v60 }
 0x256   : > { %v834_v61 = vpop.f32.mrf.mxu2 }
 0x257   : > { %v835_v46 = vadd.f32 %v3968_v36, %v834_v61 }
 0x259   : > { %v4942_v49 = vadd.f32 %v835_v46, %v774_v3 }
 0x25e   : > { %v836_v47 = vpop.f32.mrf.mxu2 }
 0x25f   : > { %v837_v48 = vadd.f32 %v3968_v36, %v836_v47 }
 0x261   : > { %v4944_v50 = vadd.f32 %v837_v48, %v775_v4 }
 0x263   : > { %v868_v30 = vpack.c.bf16 %v4944_v50, %v4942_v49 }
 0x265   : > { %3667 = vmatmul.msk.bf16.gmra.mxu2 %vm802_vm10, %v868_v30 }
 0x266   : > { %v839_v31 = vpop.f32.mrf.mxu2 }
 0x267   : > { %v840_v51 = vadd.f32 %v3968_v36, %v839_v31 }
 0x269   : > { %v4949_v53 = vadd.f32 %v840_v51, %v776_v26 }
 0x26e   : > { %v841_v8 = vpop.f32.mrf.mxu2 }
 0x26f   : > { %v842_v52 = vadd.f32 %v3968_v36, %v841_v8 }
 0x271   : > { %v4951_v9 = vadd.f32 %v842_v52, %v777_v27 }
 0x273   : > { %v869_v54 = vpack.c.bf16 %v4951_v9, %v4949_v53 }
 0x275   : > { %3668 = vmatmul.msk.bf16.gmra.mxu2 %vm802_vm10, %v869_v54 }
 0x2bc   : > { %v906_v55 = vpop.f32.mrf.mxu2 }
 0x2bd   : > { %v907_v57 = vadd.f32 %v3969_v56, %v906_v55 }
 0x2bf   : > { %v926_v59 = vpack.c.bf16 %v907_v57, %v907_v57 }
 0x2c1   : > { %v942_v1 = vunpack.c.l.b16 %v926_v59 }
 0x2c4   : > { %v908_v58 = vpop.f32.mrf.mxu2 }
 0x2c5   : > { %v909_v62 = vadd.f32 %v3969_v56, %v908_v58 }
 0x2c7   : > { %v927_v0 = vpack.c.bf16 %v909_v62, %v909_v62 }
 0x2c9   : > { %v943_v2 = vunpack.c.l.b16 %v927_v0 }
 0x2cb   : > { %v4959_v3 = vpack.c.b16 %v943_v2, %v942_v1 }
 0x2cc   : > { %v911_v4 = vpop.f32.mrf.mxu2 }
 0x2cd   : > { %954 = vrot.lane.b32.xlu2 %v4959_v3, %s4625_s6  ;;  %v912_v16 = vadd.f32 %v3969_v56, %v911_v4 }
 0x2cf   : > { %v928_v20 = vpack.c.bf16 %v912_v16, %v912_v16 }
 0x2d1   : > { %v944_v22 = vunpack.c.l.b16 %v928_v20 }
 0x2d4   : > { %v913_v5 = vpop.f32.mrf.mxu2 }
 0x2d5   : > { %v914_v14 = vadd.f32 %v3969_v56, %v913_v5 }
 0x2d7   : > { %v929_v19 = vpack.c.bf16 %v914_v14, %v914_v14 }
 0x2d9   : > { %v945_v21 = vunpack.c.l.b16 %v929_v19 }
 0x2db   : > { %v4967_v25 = vpack.c.b16 %v945_v21, %v944_v22 }
 0x2e8   : > { %v916_v6 = vpop.f32.mrf.mxu2 }
 0x2e9   : > { %v917_v7 = vadd.f32 %v3969_v56, %v916_v6 }
 0x2eb   : > { %v930_v11 = vpack.c.bf16 %v917_v7, %v917_v7 }
 0x2ed   : > { %v946_v17 = vunpack.c.l.b16 %v930_v11 }
 0x2f0   : > { %v918_v10 = vpop.f32.mrf.mxu2 }
 0x2f1   : > { %v919_v12 = vadd.f32 %v3969_v56, %v918_v10 }
 0x2f3   : > { %v931_v15 = vpack.c.bf16 %v919_v12, %v919_v12 }
 0x2f5   : > { %v947_v18 = vunpack.c.l.b16 %v931_v15 }
 0x2f7   : > { %v4963_v63 = vpack.c.b16 %v947_v18, %v946_v17 }
 0x2f8   : > { %v921_v13 = vpop.f32.mrf.mxu2 }
 0x2f9   : > { %958 = vrot.lane.b32.xlu1 %v4963_v63, %s4625_s6  ;;  %v922_v23 = vadd.f32 %v3969_v56, %v921_v13 }
 0x2fb   : > { %v932_v27 = vpack.c.bf16 %v922_v23, %v922_v23 }
 0x2fd   : > { %v948_v33 = vunpack.c.l.b16 %v932_v27 }
 0x300   : > { %v923_v26 = vpop.f32.mrf.mxu2 }
 0x301   : > { %v924_v28 = vadd.f32 %v3969_v56, %v923_v26  ;;  %956 = vrot.lane.b32.xlu1 %v4967_v25, %s4625_s6 }
 0x303   : > { %v933_v29 = vpack.c.bf16 %v924_v28, %v924_v28 }
 0x305   : > { %v949_v35 = vunpack.c.l.b16 %v933_v29 }
 0x307   : > { %v4971_v36 = vpack.c.b16 %v949_v35, %v948_v33 }
 0x309   : > { %1123 = vrot.lane.b32.xlu1 %v4971_v36, %s4626_s25  ;;  %960 = vrot.lane.b32.xlu0 %v4971_v36, %s4625_s6 }
 0x327   : > { %v955_v43 = vpop.permute.xlu2 %954 }
 0x328   : > { %v976_v60 = vsel %vm962_vm4, %v955_v43, 0 }
 0x36b   : > { %v959_v37 = vpop.permute.xlu1 %958 }
 0x36c   : > { %v982_v41 = vsel %vm962_vm4, %v959_v37, 0 }
 0x373   : > { %v957_v38 = vpop.permute.xlu1 %956 }
 0x374   : > { %v979_v42 = vsel %vm962_vm4, %v957_v38, 0 }
 0x37b   : > { %v1124_v39 = vpop.permute.xlu1 %1123  ;;  %v961_v32 = vpop.permute.xlu0 %960 }
 0x37c   : > { %1145 = vmatpush.bf16.msrb.mxu0 %v1124_v39  ;;  %v985_v34 = vsel %vm962_vm4, %v961_v32, 0 }
 0x37d   : > { %991 = vmatpush.bf16.xpose.msrb.mxu3 %v985_v34 }
 0x385   : > { %992 = vmatpush.bf16.xpose.msrb.mxu3 %v982_v41 }
 0x38d   : > { %993 = vmatpush.bf16.xpose.msrb.mxu3 %v979_v42 }
 0x395   : > { %994 = vmatpush.bf16.xpose.msrb.mxu3 %v976_v60 }
 0x39c   : > { %3669 = vmatmul.msk.bf16.vlgmr.msrb.gmra.mxu3 %vm962_vm4, %v4959_v3 }
 0x3ac   : > { %3670 = vmatmul.msk.bf16.gmra.mxu3 %vm962_vm4, %v4967_v25 }
 0x3bc   : > { %3671 = vmatmul.msk.bf16.gmra.mxu3 %vm962_vm4, %v4963_v63 }
 0x3cc   : > { %3672 = vmatmul.msk.bf16.gmra.mxu3 %vm962_vm4, %v4971_v36 }
 0x41f   : > { %v996_v61 = vpop.f32.mrf.mxu3 }
 0x420   : > { %v1016_v46 = vmul.f32 0.35355338, %v996_v61 }
 0x422   : > { %v1025_v47 = vsel %vm1024_vm5, %v1016_v46, -inf }
 0x423   : > { %1026 = vmax.xlane.f32.xlu2 %v1025_v47 }
 0x427   : > { %v998_v48 = vpop.f32.mrf.mxu3 }
 0x428   : > { %v1017_v30 = vmul.f32 0.35355338, %v998_v48 }
 0x42a   : > { %v1028_v31 = vsel %vm1024_vm5, %v1017_v30, -inf }
 0x42b   : > { %1029 = vmax.xlane.f32.xlu1 %v1028_v31 }
 0x42f   : > { %v1001_v51 = vpop.f32.mrf.mxu3 }
 0x430   : > { %v1018_v8 = vmul.f32 0.35355338, %v1001_v51 }
 0x432   : > { %v1031_v52 = vsel %vm1024_vm5, %v1018_v8, -inf }
 0x433   : > { %1032 = vmax.xlane.f32.xlu2 %v1031_v52 }
 0x437   : > { %v1003_v54 = vpop.f32.mrf.mxu3 }
 0x438   : > { %v4992_v55 = vmul.f32 0.35355338, %v1003_v54 }
 0x43a   : > { %v1034_v56 = vsel %vm1024_vm5, %v4992_v55, -inf }
 0x43b   : > { %1035 = vmax.xlane.f32.xlu2 %v1034_v56 }
 0x43f   : > { %v1006_v57 = vpop.f32.mrf.mxu3 }
 0x440   : > { %v1020_v58 = vmul.f32 0.35355338, %v1006_v57 }
 0x442   : > { %v1037_v59 = vsel %vm1024_vm5, %v1020_v58, -inf }
 0x443   : > { %1038 = vmax.xlane.f32.xlu1 %v1037_v59 }
 0x447   : > { %v1008_v62 = vpop.f32.mrf.mxu3 }
 0x448   : > { %v1021_v0 = vmul.f32 0.35355338, %v1008_v62 }
 0x44a   : > { %v1040_v1 = vsel %vm1024_vm5, %v1021_v0, -inf }
 0x44b   : > { %1041 = vmax.xlane.f32.xlu2 %v1040_v1 }
 0x44f   : > { %v1011_v2 = vpop.f32.mrf.mxu3 }
 0x450   : > { %v1022_v4 = vmul.f32 0.35355338, %v1011_v2 }
 0x452   : > { %v1043_v5 = vsel %vm1024_vm5, %v1022_v4, -inf }
 0x453   : > { %1044 = vmax.xlane.f32.xlu1 %v1043_v5 }
 0x457   : > { %v1013_v6 = vpop.f32.mrf.mxu3 }
 0x458   : > { %v1023_v7 = vmul.f32 0.35355338, %v1013_v6 }
 0x45a   : > { %v1046_v10 = vsel %vm1024_vm5, %v1023_v7, -inf }
 0x45b   : > { %1047 = vmax.xlane.f32.xlu2 %v1046_v10 }
 0x46c   : > { %1119 = vrot.lane.b32.xlu1 %v4967_v25, %s4626_s25 }
 0x474   : > { %1117 = vrot.lane.b32.xlu1 %v4959_v3, %s4626_s25 }
 0x496   : > { %v1027_v11 = vpop.xlane.xlu2 %1026 }
 0x497   : > { %v1049_v12 = vsub.f32 %v1016_v46, %v1027_v11 }
 0x499   : > { %v1057_v14 = vmul.f32 1.442695, %v1049_v12 }
 0x49b   : > { %4005 = vpow2.f32 %v1057_v14 }
 0x49e   : > { %v1030_v15 = vpop.xlane.xlu1 %1029 }
 0x49f   : > { %v1050_v16 = vsub.f32 %v1017_v30, %v1030_v15 }
 0x4a1   : > { %v5004_v17 = vpop.eup %4005  ;;  %v1059_v18 = vmul.f32 1.442695, %v1050_v16 }
 0x4a2   : > { %v1073_v19 = vsel %vm1024_vm5, %v5004_v17, 0.0 }
 0x4a3   : > { %4007 = vpow2.f32 %v1059_v18  ;;  %1074 = vadd.xlane.f32.xlu2 %v1073_v19 }
 0x4a6   : > { %v1033_v13 = vpop.xlane.xlu2 %1032 }
 0x4a7   : > { %v1051_v20 = vsub.f32 %v1018_v8, %v1033_v13 }
 0x4a9   : > { %v5008_v21 = vpop.eup %4007  ;;  %v1061_v22 = vmul.f32 1.442695, %v1051_v20 }
 0x4aa   : > { %v1076_v23 = vsel %vm1024_vm5, %v5008_v21, 0.0 }
 0x4ab   : > { %4009 = vpow2.f32 %v1061_v22  ;;  %1077 = vadd.xlane.f32.xlu2 %v1076_v23 }
 0x4ae   : > { %v1036_v35 = vpop.xlane.xlu2 %1035 }
 0x4af   : > { %v1052_v48 = vsub.f32 %v4992_v55, %v1036_v35 }
 0x4b1   : > { %v5012_v26 = vpop.eup %4009  ;;  %v1063_v31 = vmul.f32 1.442695, %v1052_v48 }
 0x4b2   : > { %v1079_v27 = vsel %vm1024_vm5, %v5012_v26, 0.0 }
 0x4b3   : > { %1080 = vadd.xlane.f32.xlu1 %v1079_v27 }
 0x4b6   : > { %v1039_v28 = vpop.xlane.xlu1 %1038 }
 0x4b7   : > { %v1053_v29 = vsub.f32 %v1020_v58, %v1039_v28 }
 0x4b9   : > { %v1065_v33 = vmul.f32 1.442695, %v1053_v29 }
 0x4bb   : > { %4011 = vpow2.f32 %v1065_v33 }
 0x4be   : > { %v1042_v39 = vpop.xlane.xlu2 %1041 }
 0x4bf   : > { %v1054_v51 = vsub.f32 %v1021_v0, %v1042_v39 }
 0x4c1   : > { %v5016_v37 = vpop.eup %4011  ;;  %v1067_v8 = vmul.f32 1.442695, %v1054_v51 }
 0x4c2   : > { %v1085_v38 = vsel %vm1024_vm5, %v5016_v37, 0.0 }
 0x4c3   : > { %1086 = vadd.xlane.f32.xlu1 %v1085_v38  ;;  %1121 = vrot.lane.b32.xlu2 %v4963_v63, %s4626_s25 }
 0x4c6   : > { %v1045_v32 = vpop.xlane.xlu1 %1044 }
 0x4c7   : > { %v1055_v34 = vsub.f32 %v1022_v4, %v1045_v32 }
 0x4c9   : > { %v1069_v41 = vmul.f32 1.442695, %v1055_v34 }
 0x4cb   : > { %4013 = vpow2.f32 %v1069_v41 }
 0x4ce   : > { %v1048_v42 = vpop.xlane.xlu2 %1047 }
 0x4cf   : > { %v1056_v43 = vsub.f32 %v1023_v7, %v1048_v42 }
 0x4d1   : > { %v5022_v60 = vpop.eup %4013  ;;  %v1071_v61 = vmul.f32 1.442695, %v1056_v43 }
 0x4d2   : > { %v1091_v46 = vsel %vm1024_vm5, %v5022_v60, 0.0 }
 0x4d3   : > { %4015 = vpow2.f32 %v1071_v61  ;;  %1092 = vadd.xlane.f32.xlu1 %v1091_v46 }
 0x4d4   : > { %4017 = vpow2.f32 %v1063_v31 }
 0x4d5   : > { %4019 = vpow2.f32 %v1067_v8 }
 0x4d9   : > { %v5026_v47 = vpop.eup %4015 }
 0x4da   : > { %v1094_v30 = vsel %vm1024_vm5, %v5026_v47, 0.0  ;;  %v5031_v52 = vpop.eup %4017 }
 0x4db   : > { %1095 = vadd.xlane.f32.xlu0 %v1094_v30  ;;  %v1082_v54 = vsel %vm1024_vm5, %v5031_v52, 0.0  ;;  %v5039_v55 = vpop.eup %4019 }
 0x4dc   : > { %v1088_v56 = vsel %vm1024_vm5, %v5039_v55, 0.0 }
 0x4de   : > { %v1120_v59 = vpop.permute.xlu1 %1119 }
 0x4e6   : > { %v1118_v4 = vpop.permute.xlu1 %1117 }
 0x4ec   : > { %1186 = vrot.lane.b32.xlu1 %v4963_v63, %s4627_s12  ;;  %1083 = vadd.xlane.f32.xlu2 %v1082_v54 }
 0x4ef   : > { %1178 = vrot.lane.b32.xlu0 %v4963_v63, %s4628_s26 }
 0x4f4   : > { %1182 = vrot.lane.b32.xlu1 %v4959_v3, %s4627_s12  ;;  %1089 = vadd.xlane.f32.xlu2 %v1088_v56 }
 0x4f7   : > { %1779 = vrot.lane.b32.xlu0 %v4963_v63, %s4629_s29 }
 0x4fc   : > { %1176 = vrot.lane.b32.xlu1 %v4967_v25, %s4628_s26 }
 0x4ff   : > { %1489 = vrot.lane.b32.xlu0 %v4959_v3, %s4630_s21 }
 0x504   : > { %1501 = vrot.lane.b32.xlu1 %v4963_v63, %s4631_s5 }
 0x507   : > { %1491 = vrot.lane.b32.xlu0 %v4967_v25, %s4630_s21 }
 0x50c   : > { %1180 = vrot.lane.b32.xlu1 %v4971_v36, %s4628_s26  ;;  %1188 = vrot.lane.b32.xlu2 %v4971_v36, %s4627_s12 }
 0x50f   : > { %1771 = vrot.lane.b32.xlu0 %v4963_v63, %s4632_s30 }
 0x514   : > { %1497 = vrot.lane.b32.xlu1 %v4959_v3, %s4631_s5  ;;  %1184 = vrot.lane.b32.xlu2 %v4967_v25, %s4627_s12 }
 0x516   : > { %v1075_v57 = vpop.xlane.xlu2 %1074 }
 0x51c   : > { %1775 = vrot.lane.b32.xlu1 %v4959_v3, %s4629_s29  ;;  %1174 = vrot.lane.b32.xlu2 %v4959_v3, %s4628_s26 }
 0x51e   : > { %v1078_v58 = vpop.xlane.xlu2 %1077 }
 0x51f   : > { %4021 = vrcp.f32 %v1078_v58 }
 0x520   : > { %4023 = vrcp.f32 %v1075_v57 }
 0x524   : > { %1769 = vrot.lane.b32.xlu1 %v4967_v25, %s4632_s30  ;;  %1503 = vrot.lane.b32.xlu2 %v4971_v36, %s4631_s5 }
 0x525   : > { %v4022_v0 = vpop.eup %4021 }
 0x526   : > { %v1122_v62 = vpop.permute.xlu2 %1121  ;;  %v4024_v1 = vpop.eup %4023  ;;  %v1106_v2 = vmul.f32 %v4022_v0, %v5008_v21  ;;  %v857_v21 = vld [vmem:[#allocation14] sm:$0xf] }
 0x527   : > { %1146 = vmatpush.bf16.msrb.mxu0 %v1122_v62  ;;  %v1105_v5 = vmul.f32 %v4024_v1, %v5004_v17  ;;  %v1081_v7 = vpop.xlane.xlu1 %1080  ;;  %v1458_v23 = vsel %vm1412_vm6, %v857_v21, 0 }
 0x528   : > { %4025 = vrcp.f32 %v1081_v7 }
 0x529   : > { %v1113_v6 = vpack.c.bf16 %v1106_v2, %v1105_v5 }
 0x52b   : > { %1147 = vmatpush.bf16.msrb.mxu0 %v1120_v59 }
 0x52c   : > { %1495 = vrot.lane.b32.xlu1 %v4971_v36, %s4630_s21  ;;  %1781 = vrot.lane.b32.xlu2 %v4971_v36, %s4629_s29 }
 0x52e   : > { %v4026_v14 = vpop.eup %4025 }
 0x52f   : > { %1148 = vmatpush.bf16.msrb.mxu0 %v1118_v4  ;;  %v1107_v17 = vmul.f32 %v4026_v14, %v5012_v26 }
 0x532   : > { %3673 = vmatmul.msk.bf16.vlgmr.msrb.gmra.mxu0 %vm1024_vm5, %v1113_v6 }
 0x533   : > { %1467 = vmatpush.bf16.msra.mxu0 %v1458_v23 }
 0x534   : > { %1499 = vrot.lane.b32.xlu2 %v4967_v25, %s4631_s5 }
 0x536   : > { %v1087_v10 = vpop.xlane.xlu1 %1086 }
 0x53c   : > { %1777 = vrot.lane.b32.xlu2 %v4967_v25, %s4629_s29 }
 0x544   : > { %1767 = vrot.lane.b32.xlu2 %v4959_v3, %s4632_s30 }
 0x546   : > { %v1093_v12 = vpop.xlane.xlu1 %1092 }
 0x54c   : > { %1493 = vrot.lane.b32.xlu2 %v4963_v63, %s4630_s21 }
 0x54e   : > { %v1096_v39 = vpop.xlane.xlu0 %1095 }
 0x554   : > { %1773 = vrot.lane.b32.xlu2 %v4971_v36, %s4632_s30 }
 0x55e   : > { %v1187_v19 = vpop.permute.xlu1 %1186 }
 0x55f   : > { %v1084_v11 = vpop.xlane.xlu2 %1083  ;;  %v1209_v38 = vsel %vm962_vm4, %v1187_v19, 0 }
 0x560   : > { %4027 = vrcp.f32 %v1084_v11 }
 0x566   : > { %v4028_v15 = vpop.eup %4027  ;;  %v1183_v28 = vpop.permute.xlu1 %1182 }
 0x567   : > { %v1090_v16 = vpop.xlane.xlu2 %1089  ;;  %v1108_v18 = vmul.f32 %v4028_v15, %v5031_v52  ;;  %v1203_v51 = vsel %vm962_vm4, %v1183_v28, 0  ;;  %v1179_v52 = vpop.permute.xlu0 %1178 }
 0x568   : > { %4029 = vrcp.f32 %v1090_v16 }
 0x569   : > { %v1114_v13 = vpack.c.bf16 %v1108_v18, %v1107_v17  ;;  %4031 = vrcp.f32 %v1087_v10 }
 0x56a   : > { %4033 = vrcp.f32 %v1096_v39 }
 0x56b   : > { %3674 = vmatmul.msk.bf16.gmra.mxu0 %vm1024_vm5, %v1114_v13  ;;  %4035 = vrcp.f32 %v1093_v12 }
 0x56e   : > { %v4030_v27 = vpop.eup %4029  ;;  %v1177_v34 = vpop.permute.xlu1 %1176 }
 0x56f   : > { %v1189_v20 = vpop.permute.xlu2 %1188  ;;  %v4032_v26 = vpop.eup %4031  ;;  %v1110_v29 = vmul.f32 %v4030_v27, %v5039_v55 }
 0x570   : > { %v1212_v22 = vsel %vm962_vm4, %v1189_v20, 0  ;;  %v1109_v35 = vmul.f32 %v4032_v26, %v5016_v37  ;;  %v4034_v43 = vpop.eup %4033 }
 0x571   : > { %1218 = vmatpush.bf16.xpose.msrb.mxu1 %v1212_v22  ;;  %v4036_v61 = vpop.eup %4035  ;;  %v1112_v46 = vmul.f32 %v4034_v43, %v5026_v47 }
 0x572   : > { %v1115_v32 = vpack.c.bf16 %v1110_v29, %v1109_v35  ;;  %v1111_v30 = vmul.f32 %v4036_v61, %v5022_v60  ;;  %v1780_v60 = vpop.permute.xlu0 %1779 }
 0x573   : > { %v1802_v58 = vsel %vm962_vm4, %v1780_v60, 0 }
 0x574   : > { %v1116_v8 = vpack.c.bf16 %v1112_v46, %v1111_v30 }
 0x576   : > { %v1502_v48 = vpop.permute.xlu1 %1501 }
 0x577   : > { %v1185_v33 = vpop.permute.xlu2 %1184  ;;  %v1524_v56 = vsel %vm962_vm4, %v1502_v48, 0 }
 0x578   : > { %v1206_v42 = vsel %vm962_vm4, %v1185_v33, 0 }
 0x579   : > { %1219 = vmatpush.bf16.xpose.msrb.mxu1 %v1209_v38 }
 0x57a   : > { %v1490_v11 = vpop.permute.xlu0 %1489 }
 0x57b   : > { %3675 = vmatmul.msk.bf16.gmra.mxu0 %vm1024_vm5, %v1115_v32 }
 0x57e   : > { %v1181_v47 = vpop.permute.xlu1 %1180 }
 0x57f   : > { %v1175_v41 = vpop.permute.xlu2 %1174 }
 0x581   : > { %1220 = vmatpush.bf16.xpose.msrb.mxu1 %v1206_v42 }
 0x582   : > { %v1492_v12 = vpop.permute.xlu0 %1491 }
 0x586   : > { %v1498_v62 = vpop.permute.xlu1 %1497 }
 0x587   : > { %v1504_v37 = vpop.permute.xlu2 %1503  ;;  %v1518_v2 = vsel %vm962_vm4, %v1498_v62, 0 }
 0x588   : > { %v1527_v31 = vsel %vm962_vm4, %v1504_v37, 0 }
 0x589   : > { %1221 = vmatpush.bf16.xpose.msrb.mxu1 %v1203_v51 }
 0x58b   : > { %3676 = vmatmul.msk.bf16.gmra.mxu0 %vm1024_vm5, %v1116_v8 }
 0x58e   : > { %v1776_v4 = vpop.permute.xlu1 %1775 }
 0x58f   : > { %v1782_v54 = vpop.permute.xlu2 %1781  ;;  %v1796_v5 = vsel %vm962_vm4, %v1776_v4, 0 }
 0x590   : > { %v1805_v55 = vsel %vm962_vm4, %v1782_v54, 0  ;;  %3677 = vmatmul.msk.bf16.vlgmr.msrb.gmra.mxu1 %vm962_vm4, %v1175_v41 }
 0x591   : > { %1533 = vmatpush.bf16.xpose.msra.mxu1 %v1527_v31  ;;  %1811 = vmatpush.bf16.xpose.msrb.mxu0 %v1805_v55  ;;  %v1772_v55 = vpop.permute.xlu0 %1771 }
 0x596   : > { %v1770_v19 = vpop.permute.xlu1 %1769 }
 0x597   : > { %v1500_v57 = vpop.permute.xlu2 %1499 }
 0x598   : > { %v1521_v59 = vsel %vm962_vm4, %v1500_v57, 0 }
 0x599   : > { %1534 = vmatpush.bf16.xpose.msra.mxu1 %v1524_v56  ;;  %1812 = vmatpush.bf16.xpose.msrb.mxu0 %v1802_v58 }
 0x59e   : > { %v1496_v20 = vpop.permute.xlu1 %1495 }
 0x59f   : > { %v1778_v0 = vpop.permute.xlu2 %1777 }
 0x5a0   : > { %3678 = vmatmul.msk.bf16.gmra.mxu1 %vm962_vm4, %v1177_v34  ;;  %v1799_v1 = vsel %vm962_vm4, %v1778_v0, 0 }
 0x5a1   : > { %1535 = vmatpush.bf16.xpose.msra.mxu1 %v1521_v59  ;;  %1813 = vmatpush.bf16.xpose.msrb.mxu0 %v1799_v1 }
 0x5a7   : > { %v1768_v14 = vpop.permute.xlu2 %1767 }
 0x5a9   : > { %1536 = vmatpush.bf16.xpose.msra.mxu1 %v1518_v2  ;;  %1814 = vmatpush.bf16.xpose.msrb.mxu0 %v1796_v5 }
 0x5af   : > { %v1150_v6 = vpop.f32.mrf.mxu0  ;;  %v1494_v16 = vpop.permute.xlu2 %1493 }
 0x5b0   : > { %3679 = vmatmul.msk.bf16.gmra.mxu1 %vm962_vm4, %v1179_v52 }
 0x5b7   : > { %v1152_v7 = vpop.f32.mrf.mxu0  ;;  %v1774_v58 = vpop.permute.xlu2 %1773 }
 0x5b8   : > { %v1170_v10 = vpack.c.bf16 %v1152_v7, %v1150_v6 }
 0x5ba   : > { %3689 = vmatmul.msk.bf16.vlgmr.msra.gmra.mxu0 %vm962_vm4, %v1170_v10 }
 0x5c0   : > { %3680 = vmatmul.msk.bf16.gmra.mxu1 %vm962_vm4, %v1181_v47 }
 0x5d0   : > { %3693 = vmatmul.msk.bf16.vlgmr.msra.gmra.mxu1 %vm962_vm4, %v1490_v11 }
 0x5e0   : > { %3694 = vmatmul.msk.bf16.gmra.mxu1 %vm962_vm4, %v1492_v12 }
 0x5e8   : > { %v1155_v15 = vpop.f32.mrf.mxu0 }
 0x5f0   : > { %v1157_v17 = vpop.f32.mrf.mxu0  ;;  %3695 = vmatmul.msk.bf16.gmra.mxu1 %vm962_vm4, %v1494_v16 }
 0x5f1   : > { %v1171_v18 = vpack.c.bf16 %v1157_v17, %v1155_v15 }
 0x5f3   : > { %3690 = vmatmul.msk.bf16.gmra.mxu0 %vm962_vm4, %v1171_v18 }
 0x5f8   : > { %v1160_v13 = vpop.f32.mrf.mxu0 }
 0x600   : > { %v1162_v21 = vpop.f32.mrf.mxu0  ;;  %3696 = vmatmul.msk.bf16.gmra.mxu1 %vm962_vm4, %v1496_v20 }
 0x601   : > { %v1172_v22 = vpack.c.bf16 %v1162_v21, %v1160_v13 }
 0x603   : > { %3691 = vmatmul.msk.bf16.gmra.mxu0 %vm962_vm4, %v1172_v22 }
 0x608   : > { %v1165_v23 = vpop.f32.mrf.mxu0 }
 0x60d   : > { %v1223_v27 = vpop.f32.mrf.mxu1 }
 0x60e   : > { %v1243_v28 = vmul.f32 0.35355338, %v1223_v27 }
 0x610   : > { %v1167_v26 = vpop.f32.mrf.mxu0  ;;  %v1251_v29 = vsel %vm1024_vm5, %v1243_v28, -inf }
 0x611   : > { %v1173_v33 = vpack.c.bf16 %v1167_v26, %v1165_v23  ;;  %1252 = vmax.xlane.f32.xlu0 %v1251_v29 }
 0x613   : > { %3692 = vmatmul.msk.bf16.gmra.mxu0 %vm962_vm4, %v1173_v33 }
 0x615   : > { %v1225_v35 = vpop.f32.mrf.mxu1 }
 0x616   : > { %v1244_v38 = vmul.f32 0.35355338, %v1225_v35 }
 0x618   : > { %v1254_v39 = vsel %vm1024_vm5, %v1244_v38, -inf }
 0x619   : > { %1255 = vmax.xlane.f32.xlu1 %v1254_v39 }
 0x61d   : > { %v1228_v32 = vpop.f32.mrf.mxu1 }
 0x61e   : > { %v5126_v34 = vmul.f32 0.35355338, %v1228_v32 }
 0x620   : > { %v1257_v41 = vsel %vm1024_vm5, %v5126_v34, -inf }
 0x621   : > { %1258 = vmax.xlane.f32.xlu2 %v1257_v41 }
 0x623   : > { %3705 = vmatmul.msk.bf16.vlgmr.msrb.gmra.mxu0 %vm962_vm4, %v1768_v14 }
 0x625   : > { %v1230_v42 = vpop.f32.mrf.mxu1 }
 0x626   : > { %v5131_v43 = vmul.f32 0.35355338, %v1230_v42 }
 0x628   : > { %v1260_v61 = vsel %vm1024_vm5, %v5131_v43, -inf }
 0x629   : > { %1261 = vmax.xlane.f32.xlu0 %v1260_v61 }
 0x62d   : > { %v1233_v46 = vpop.f32.mrf.mxu1 }
 0x62e   : > { %v5135_v48 = vmul.f32 0.35355338, %v1233_v46 }
 0x630   : > { %v1263_v37 = vsel %vm1024_vm5, %v5135_v48, -inf }
 0x631   : > { %1264 = vmax.xlane.f32.xlu1 %v1263_v37 }
 0x633   : > { %3706 = vmatmul.msk.bf16.gmra.mxu0 %vm962_vm4, %v1770_v19 }
 0x635   : > { %v1235_v30 = vpop.f32.mrf.mxu1 }
 0x636   : > { %v5140_v31 = vmul.f32 0.35355338, %v1235_v30 }
 0x637   : > { %v5174_v18 = vpop.f32.mrf.mxu0 }
 0x638   : > { %v1266_v51 = vsel %vm1024_vm5, %v5140_v31, -inf }
 0x639   : > { %1267 = vmax.xlane.f32.xlu2 %v1266_v51 }
 0x63d   : > { %v1238_v8 = vpop.f32.mrf.mxu1 }
 0x63e   : > { %v5144_v52 = vmul.f32 0.35355338, %v1238_v8 }
 0x640   : > { %v1269_v54 = vsel %vm1024_vm5, %v5144_v52, -inf }
 0x641   : > { %1270 = vmax.xlane.f32.xlu0 %v1269_v54 }
 0x643   : > { %3707 = vmatmul.msk.bf16.gmra.mxu0 %vm962_vm4, %v1772_v55 }
 0x645   : > { %v1240_v47 = vpop.f32.mrf.mxu1 }
 0x646   : > { %v5149_v56 = vmul.f32 0.35355338, %v1240_v47 }
 0x648   : > { %v1272_v60 = vsel %vm1024_vm5, %v5149_v56, -inf }
 0x649   : > { %1273 = vmax.xlane.f32.xlu1 %v1272_v60 }
 0x64d   : > { %v1538_v57 = vpop.f32.mrf.mxu1 }
 0x64e   : > { %v5213_v51 = vmul.f32 0.35355338, %v1538_v57 }
 0x650   : > { %v1566_v55 = vsel %vm1024_vm5, %v5213_v51, -inf }
 0x651   : > { %1349 = vrot.lane.b32.xlu2 %v4971_v36, %s4633_s14 }
 0x653   : > { %3708 = vmatmul.msk.bf16.gmra.mxu0 %vm962_vm4, %v1774_v58 }
 0x655   : > { %v1540_v59 = vpop.f32.mrf.mxu1 }
 0x656   : > { %v5162_v2 = vmul.f32 0.35355338, %v1540_v59 }
 0x658   : > { %v1569_v5 = vsel %vm1024_vm5, %v5162_v2, -inf }
 0x659   : > { %1343 = vrot.lane.b32.xlu2 %v4959_v3, %s4633_s14 }
 0x65d   : > { %v5158_v62 = vpop.f32.mrf.mxu1 }
 0x665   : > { %v1545_v0 = vpop.f32.mrf.mxu1 }
 0x666   : > { %v5166_v7 = vmul.f32 0.35355338, %v1545_v0 }
 0x668   : > { %v1575_v14 = vsel %vm1024_vm5, %v5166_v7, -inf }
 0x66d   : > { %v5160_v1 = vpop.f32.mrf.mxu1 }
 0x675   : > { %v1550_v4 = vpop.f32.mrf.mxu1 }
 0x676   : > { %v5172_v16 = vmul.f32 0.35355338, %v1550_v4 }
 0x678   : > { %v1581_v21 = vsel %vm1024_vm5, %v5172_v16, -inf }
 0x67d   : > { %v5168_v12 = vpop.f32.mrf.mxu1 }
 0x682   : > { %1570 = vmax.xlane.f32.xlu2 %v1569_v5 }
 0x684   : > { %v1253_v6 = vpop.xlane.xlu0 %1252 }
 0x685   : > { %v1275_v10 = vsub.f32 %v1243_v28, %v1253_v6  ;;  %v1555_v22 = vpop.f32.mrf.mxu1  ;;  %v5186_v28 = vpop.f32.mrf.mxu0  ;;  %v5229_v6 = vmul.f32 0.35355338, %v5158_v62 }
 0x686   : > { %v5182_v23 = vmul.f32 0.35355338, %v1555_v22 }
 0x687   : > { %v1283_v11 = vmul.f32 1.442695, %v1275_v10 }
 0x688   : > { %v1587_v29 = vsel %vm1024_vm5, %v5182_v23, -inf }
 0x689   : > { %4037 = vpow2.f32 %v1283_v11 }
 0x68a   : > { %1576 = vmax.xlane.f32.xlu2 %v1575_v14  ;;  %v1572_v14 = vsel %vm1024_vm5, %v5229_v6, -inf }
 0x68c   : > { %v1256_v15 = vpop.xlane.xlu1 %1255 }
 0x68d   : > { %v1276_v17 = vsub.f32 %v1244_v38, %v1256_v15  ;;  %v5192_v33 = vpop.f32.mrf.mxu0 }
 0x68f   : > { %v5176_v19 = vpop.eup %4037  ;;  %v1285_v13 = vmul.f32 1.442695, %v1276_v17 }
 0x690   : > { %v1299_v20 = vsel %vm1024_vm5, %v5176_v19, 0.0 }
 0x691   : > { %4039 = vpow2.f32 %v1285_v13  ;;  %1300 = vadd.xlane.f32.xlu0 %v1299_v20 }
 0x692   : > { %1582 = vmax.xlane.f32.xlu2 %v1581_v21 }
 0x694   : > { %v1259_v35 = vpop.xlane.xlu2 %1258 }
 0x695   : > { %v5196_v38 = vpop.f32.mrf.mxu0  ;;  %v1277_v8 = vsub.f32 %v5126_v34, %v1259_v35 }
 0x697   : > { %v5184_v27 = vpop.eup %4039  ;;  %v1287_v54 = vmul.f32 1.442695, %v1277_v8 }
 0x698   : > { %v1302_v26 = vsel %vm1024_vm5, %v5184_v27, 0.0 }
 0x699   : > { %1303 = vadd.xlane.f32.xlu1 %v1302_v26 }
 0x69a   : > { %1588 = vmax.xlane.f32.xlu2 %v1587_v29  ;;  %v5250_v29 = vmul.f32 0.35355338, %v5160_v1 }
 0x69c   : > { %v1262_v61 = vpop.xlane.xlu0 %1261 }
 0x69d   : > { %v5202_v32 = vpop.f32.mrf.mxu0  ;;  %v1278_v46 = vsub.f32 %v5131_v43, %v1262_v61 }
 0x69f   : > { %v1289_v30 = vmul.f32 1.442695, %v1278_v46 }
 0x6a1   : > { %4041 = vpow2.f32 %v1289_v30 }
 0x6a2   : > { %4043 = vpow2.f32 %v1287_v54  ;;  %v5262_v54 = vmul.f32 0.35355338, %v5168_v12 }
 0x6a4   : > { %v1265_v47 = vpop.xlane.xlu1 %1264 }
 0x6a5   : > { %1347 = vrot.lane.b32.xlu0 %v4963_v63, %s4633_s14  ;;  %v5206_v42 = vpop.f32.mrf.mxu0  ;;  %v1279_v58 = vsub.f32 %v5135_v48, %v1265_v47 }
 0x6a7   : > { %v5221_v43 = vpop.eup %4041  ;;  %v1291_v57 = vmul.f32 1.442695, %v1279_v58  ;;  %v1584_v58 = vsel %vm1024_vm5, %v5262_v54, -inf }
 0x6a8   : > { %v1308_v34 = vsel %vm1024_vm5, %v5221_v43, 0.0  ;;  %v5226_v4 = vpop.eup %4043 }
 0x6a9   : > { %4045 = vpow2.f32 %v1291_v57  ;;  %v1305_v48 = vsel %vm1024_vm5, %v5226_v4, 0.0 }
 0x6ac   : > { %v1268_v39 = vpop.xlane.xlu2 %1267 }
 0x6ad   : > { %v5211_v37 = vpop.f32.mrf.mxu0  ;;  %v1280_v59 = vsub.f32 %v5140_v31, %v1268_v39 }
 0x6af   : > { %v1293_v5 = vmul.f32 1.442695, %v1280_v59  ;;  %v5236_v15 = vpop.eup %4045 }
 0x6b1   : > { %4047 = vpow2.f32 %v1293_v5 }
 0x6b2   : > { %1345 = vrot.lane.b32.xlu1 %v4967_v25, %s4633_s14  ;;  %1942 = vrot.lane.b32.xlu2 %v4971_v36, %s4634_s1 }
 0x6b4   : > { %v1350_v41 = vpop.permute.xlu2 %1349  ;;  %v1271_v0 = vpop.xlane.xlu0 %1270 }
 0x6b5   : > { %1371 = vmatpush.bf16.msra.mxu2 %v1350_v41  ;;  %v5218_v60 = vpop.f32.mrf.mxu0  ;;  %v1281_v10 = vsub.f32 %v5144_v52, %v1271_v0  ;;  %v1311_v52 = vsel %vm1024_vm5, %v5236_v15, 0.0 }
 0x6b7   : > { %v1295_v31 = vmul.f32 1.442695, %v1281_v10  ;;  %v5238_v62 = vpop.eup %4047 }
 0x6b8   : > { %v1314_v21 = vsel %vm1024_vm5, %v5238_v62, 0.0 }
 0x6b9   : > { %4049 = vpow2.f32 %v1295_v31 }
 0x6ba   : > { %1658 = vrot.lane.b32.xlu2 %v4959_v3, %s4635_s28 }
 0x6bc   : > { %v1274_v17 = vpop.xlane.xlu1 %1273  ;;  %v1344_v39 = vpop.permute.xlu2 %1343 }
 0x6bd   : > { %v1816_v11 = vpop.f32.mrf.mxu0  ;;  %v1282_v13 = vsub.f32 %v5149_v56, %v1274_v17  ;;  %v1578_v56 = vsel %vm1024_vm5, %v5250_v29, -inf }
 0x6bf   : > { %v5247_v22 = vpop.eup %4049  ;;  %v1297_v26 = vmul.f32 1.442695, %v1282_v13 }
 0x6c0   : > { %v1317_v35 = vsel %vm1024_vm5, %v5247_v22, 0.0 }
 0x6c1   : > { %4051 = vpow2.f32 %v1297_v26 }
 0x6c2   : > { %1940 = vrot.lane.b32.xlu2 %v4963_v63, %s4634_s1 }
 0x6c5   : > { %v5243_v20 = vpop.f32.mrf.mxu0 }
 0x6c7   : > { %v5256_v61 = vpop.eup %4051 }
 0x6c8   : > { %v1320_v1 = vsel %vm1024_vm5, %v5256_v61, 0.0 }
 0x6cd   : > { %v1821_v41 = vpop.f32.mrf.mxu0 }
 0x6ce   : > { %v5280_v5 = vmul.f32 0.35355338, %v1821_v41 }
 0x6cf   : > { %1567 = vmax.xlane.f32.xlu0 %v1566_v55 }
 0x6d5   : > { %v1823_v55 = vpop.f32.mrf.mxu0 }
 0x6d7   : > { %1309 = vadd.xlane.f32.xlu0 %v1308_v34  ;;  %v5272_v34 = vmul.f32 0.35355338, %v1816_v11  ;;  %v1850_v11 = vsel %vm1024_vm5, %v5280_v5, -inf }
 0x6d9   : > { %v1844_v0 = vsel %vm1024_vm5, %v5272_v34, -inf }
 0x6dc   : > { %1306 = vadd.xlane.f32.xlu1 %v1305_v48 }
 0x6dd   : > { %v1826_v57 = vpop.f32.mrf.mxu0 }
 0x6df   : > { %1573 = vmax.xlane.f32.xlu0 %v1572_v14 }
 0x6e4   : > { %1312 = vadd.xlane.f32.xlu1 %v1311_v52 }
 0x6e5   : > { %v1828_v48 = vpop.f32.mrf.mxu0 }
 0x6e7   : > { %1315 = vadd.xlane.f32.xlu0 %v1314_v21 }
 0x6ec   : > { %1318 = vadd.xlane.f32.xlu1 %v1317_v35 }
 0x6ed   : > { %v1831_v52 = vpop.f32.mrf.mxu0 }
 0x6ee   : > { %v5294_v26 = vmul.f32 0.35355338, %v1831_v52 }
 0x6ef   : > { %1579 = vmax.xlane.f32.xlu0 %v1578_v56 }
 0x6f5   : > { %v1571_v46 = vpop.xlane.xlu2 %1570  ;;  %v1833_v56 = vpop.f32.mrf.mxu0 }
 0x6f6   : > { %v1591_v30 = vsub.f32 %v5162_v2, %v1571_v46 }
 0x6f7   : > { %1321 = vadd.xlane.f32.xlu0 %v1320_v1  ;;  %v5300_v1 = vmul.f32 0.35355338, %v1833_v56 }
 0x6f8   : > { %v1600_v8 = vmul.f32 1.442695, %v1591_v30 }
 0x6fa   : > { %4053 = vpow2.f32 %v1600_v8 }
 0x6fd   : > { %v5264_v47 = vpop.xlane.xlu2 %1576 }
 0x6ff   : > { %1585 = vmax.xlane.f32.xlu0 %v1584_v58 }
 0x700   : > { %v5268_v59 = vpop.eup %4053 }
 0x701   : > { %v1617_v2 = vsel %vm1024_vm5, %v5268_v59, 0.0 }
 0x702   : > { %1618 = vadd.xlane.f32.xlu2 %v1617_v2 }
 0x704   : > { %v1301_v31 = vpop.xlane.xlu0 %1300 }
 0x705   : > { %1664 = vrot.lane.b32.xlu1 %v4971_v36, %s4635_s28  ;;  %v5276_v12 = vpop.xlane.xlu2 %1582  ;;  %v5290_v36 = vmul.f32 0.35355338, %v1826_v57  ;;  %v1865_v57 = vsel %vm1024_vm5, %v5300_v1, -inf }
 0x707   : > { %v1856_v13 = vsel %vm1024_vm5, %v5290_v36, -inf }
 0x70a   : > { %1845 = vmax.xlane.f32.xlu2 %v1844_v0 }
 0x70c   : > { %v1304_v21 = vpop.xlane.xlu1 %1303 }
 0x70d   : > { %1660 = vrot.lane.b32.xlu1 %v4967_v25, %s4635_s28  ;;  %v5284_v10 = vpop.xlane.xlu2 %1588  ;;  %4055 = vrcp.f32 %v1304_v21 }
 0x70e   : > { %4057 = vrcp.f32 %v1301_v31  ;;  %v5308_v31 = vmul.f32 0.35355338, %v5243_v20 }
 0x712   : > { %1851 = vmax.xlane.f32.xlu2 %v1850_v11  ;;  %v1847_v11 = vsel %vm1024_vm5, %v5308_v31, -inf }
 0x713   : > { %1662 = vrot.lane.b32.xlu0 %v4963_v63, %s4635_s28  ;;  %v1862_v63 = vsel %vm1024_vm5, %v5294_v26, -inf  ;;  %v4056_v41 = vpop.eup %4055 }
 0x714   : > { %v4058_v30 = vpop.eup %4057  ;;  %v1332_v58 = vmul.f32 %v4056_v41, %v5184_v27  ;;  %v5316_v27 = vmul.f32 0.35355338, %v1828_v48 }
 0x715   : > { %v1943_v14 = vpop.permute.xlu2 %1942  ;;  %v1331_v2 = vmul.f32 %v4058_v30, %v5176_v19 }
 0x716   : > { %1964 = vmatpush.bf16.msrb.mxu1 %v1943_v14  ;;  %v5312_v14 = vmul.f32 0.35355338, %v1823_v55  ;;  %v1859_v52 = vsel %vm1024_vm5, %v5316_v27, -inf }
 0x717   : > { %v1348_v17 = vpop.permute.xlu0 %1347  ;;  %v1339_v0 = vpack.c.bf16 %v1332_v58, %v1331_v2 }
 0x718   : > { %1372 = vmatpush.bf16.msra.mxu2 %v1348_v17  ;;  %v1853_v19 = vsel %vm1024_vm5, %v5312_v14, -inf }
 0x71a   : > { %1857 = vmax.xlane.f32.xlu2 %v1856_v13 }
 0x71d   : > { %v5296_v35 = vpop.permute.xlu2 %1658 }
 0x722   : > { %1863 = vmax.xlane.f32.xlu2 %v1862_v63 }
 0x724   : > { %v1346_v46 = vpop.permute.xlu1 %1345 }
 0x725   : > { %1373 = vmatpush.bf16.msra.mxu2 %v1346_v46  ;;  %v1941_v8 = vpop.permute.xlu2 %1940 }
 0x726   : > { %1965 = vmatpush.bf16.msrb.mxu1 %v1941_v8  ;;  %v1593_v8 = vsub.f32 %v5166_v7, %v5264_v47 }
 0x729   : > { %1374 = vmatpush.bf16.msra.mxu2 %v1344_v39 }
 0x72a   : > { %1866 = vmax.xlane.f32.xlu2 %v1865_v57 }
 0x72c   : > { %3681 = vmatmul.msk.bf16.vlgmr.msra.gmra.mxu2 %vm1024_vm5, %v1339_v0 }
 0x737   : > { %1848 = vmax.xlane.f32.xlu1 %v1847_v11 }
 0x73f   : > { %1854 = vmax.xlane.f32.xlu1 %v1853_v19 }
 0x742   : > { %v1568_v39 = vpop.xlane.xlu0 %1567  ;;  %1938 = vrot.lane.b32.xlu2 %v4967_v25, %s4634_s1 }
 0x743   : > { %v1590_v17 = vsub.f32 %v5213_v51, %v1568_v39 }
 0x745   : > { %v1598_v20 = vmul.f32 1.442695, %v1590_v17 }
 0x747   : > { %4059 = vpow2.f32 %v1598_v20  ;;  %1860 = vmax.xlane.f32.xlu1 %v1859_v52 }
 0x74a   : > { %v1310_v55 = vpop.xlane.xlu0 %1309 }
 0x74b   : > { %4061 = vrcp.f32 %v1310_v55 }
 0x74d   : > { %v5323_v13 = vpop.eup %4059 }
 0x74e   : > { %v1614_v48 = vsel %vm1024_vm5, %v5323_v13, 0.0 }
 0x74f   : > { %v1307_v21 = vpop.xlane.xlu1 %1306  ;;  %1615 = vadd.xlane.f32.xlu0 %v1614_v48 }
 0x750   : > { %4063 = vrcp.f32 %v1307_v21 }
 0x751   : > { %v4062_v51 = vpop.eup %4061 }
 0x752   : > { %v1574_v63 = vpop.xlane.xlu0 %1573  ;;  %v1334_v30 = vmul.f32 %v4062_v51, %v5221_v43 }
 0x753   : > { %v1592_v25 = vsub.f32 %v5229_v6, %v1574_v63  ;;  %v1604_v6 = vmul.f32 1.442695, %v1593_v8 }
 0x755   : > { %v1602_v56 = vmul.f32 1.442695, %v1592_v25 }
 0x756   : > { %v4064_v41 = vpop.eup %4063 }
 0x757   : > { %4065 = vpow2.f32 %v1602_v56  ;;  %v1333_v46 = vmul.f32 %v4064_v41, %v5226_v4  ;;  %v1313_v57 = vpop.xlane.xlu1 %1312 }
 0x759   : > { %v1340_v58 = vpack.c.bf16 %v1334_v30, %v1333_v46 }
 0x75a   : > { %v1316_v2 = vpop.xlane.xlu0 %1315 }
 0x75b   : > { %3682 = vmatmul.msk.bf16.gmra.mxu2 %vm1024_vm5, %v1340_v58  ;;  %4067 = vrcp.f32 %v1316_v2 }
 0x75c   : > { %4069 = vrcp.f32 %v1313_v57 }
 0x75d   : > { %v5333_v0 = vpop.eup %4065  ;;  %4071 = vpow2.f32 %v1604_v6 }
 0x75e   : > { %v1620_v11 = vsel %vm1024_vm5, %v5333_v0, 0.0 }
 0x75f   : > { %1621 = vadd.xlane.f32.xlu0 %v1620_v11  ;;  %v1319_v55 = vpop.xlane.xlu1 %1318 }
 0x761   : > { %v4068_v4 = vpop.eup %4067 }
 0x762   : > { %v1580_v43 = vpop.xlane.xlu0 %1579  ;;  %v4070_v19 = vpop.eup %4069  ;;  %v1336_v7 = vmul.f32 %v4068_v4, %v5238_v62 }
 0x763   : > { %v5338_v47 = vpop.eup %4071  ;;  %v1335_v39 = vmul.f32 %v4070_v19, %v5236_v15  ;;  %v1594_v2 = vsub.f32 %v5250_v29, %v1580_v43 }
 0x764   : > { %v1623_v52 = vsel %vm1024_vm5, %v5338_v47, 0.0 }
 0x765   : > { %v1341_v17 = vpack.c.bf16 %v1336_v7, %v1335_v39  ;;  %v1606_v57 = vmul.f32 1.442695, %v1594_v2 }
 0x76a   : > { %v1322_v20 = vpop.xlane.xlu0 %1321 }
 0x76b   : > { %3683 = vmatmul.msk.bf16.gmra.mxu2 %vm1024_vm5, %v1341_v17  ;;  %1624 = vadd.xlane.f32.xlu2 %v1623_v52  ;;  %4073 = vrcp.f32 %v1322_v20  ;;  %v858_v52 = vld [vmem:[#allocation14 + $0x4] sm:$0xf] }
 0x76c   : > { %4075 = vrcp.f32 %v1319_v55  ;;  %v1414_v55 = vsel %vm1412_vm6, %v858_v52, 0 }
 0x76d   : > { %1423 = vmatpush.bf16.msra.mxu3 %v1414_v55 }
 0x771   : > { %v4074_v48 = vpop.eup %4073 }
 0x772   : > { %v1586_v21 = vpop.xlane.xlu0 %1585  ;;  %v4076_v62 = vpop.eup %4075  ;;  %v1338_v15 = vmul.f32 %v4074_v48, %v5256_v61 }
 0x773   : > { %v1596_v63 = vsub.f32 %v5262_v54, %v1586_v21  ;;  %v1337_v41 = vmul.f32 %v4076_v62, %v5247_v22 }
 0x775   : > { %v1610_v25 = vmul.f32 1.442695, %v1596_v63  ;;  %v5345_v51 = vpop.xlane.xlu2 %1618  ;;  %v1342_v46 = vpack.c.bf16 %v1338_v15, %v1337_v41 }
 0x777   : > { %4077 = vpow2.f32 %v1610_v25  ;;  %v1665_v56 = vpop.permute.xlu1 %1664 }
 0x778   : > { %1686 = vmatpush.bf16.msrb.mxu2 %v1665_v56 }
 0x77b   : > { %3684 = vmatmul.msk.bf16.gmra.mxu2 %vm1024_vm5, %v1342_v46 }
 0x77d   : > { %v5350_v30 = vpop.eup %4077  ;;  %v1846_v8 = vpop.xlane.xlu2 %1845 }
 0x77e   : > { %v1868_v58 = vsub.f32 %v5272_v34, %v1846_v8  ;;  %v1632_v54 = vsel %vm1024_vm5, %v5350_v30, 0.0 }
 0x77f   : > { %1633 = vadd.xlane.f32.xlu2 %v1632_v54  ;;  %v1661_v19 = vpop.permute.xlu1 %1660 }
 0x780   : > { %v1876_v61 = vmul.f32 1.442695, %v1868_v58 }
 0x782   : > { %4079 = vpow2.f32 %v1876_v61 }
 0x783   : > { %4081 = vpow2.f32 %v1606_v57 }
 0x785   : > { %v1663_v6 = vpop.permute.xlu0 %1662  ;;  %v1852_v22 = vpop.xlane.xlu2 %1851 }
 0x786   : > { %1687 = vmatpush.bf16.msrb.mxu2 %v1663_v6  ;;  %v1870_v4 = vsub.f32 %v5280_v5, %v1852_v22 }
 0x788   : > { %v5356_v11 = vpop.eup %4079  ;;  %v1880_v7 = vmul.f32 1.442695, %v1870_v4 }
 0x789   : > { %v1892_v34 = vsel %vm1024_vm5, %v5356_v11, 0.0  ;;  %v5361_v29 = vpop.eup %4081 }
 0x78a   : > { %1688 = vmatpush.bf16.msrb.mxu2 %v1661_v19  ;;  %1893 = vadd.xlane.f32.xlu0 %v1892_v34  ;;  %4083 = vpow2.f32 %v1880_v7  ;;  %v1626_v43 = vsel %vm1024_vm5, %v5361_v29, 0.0 }
 0x78d   : > { %v1858_v39 = vpop.xlane.xlu2 %1857 }
 0x78e   : > { %1689 = vmatpush.bf16.msrb.mxu2 %v5296_v35  ;;  %v1872_v54 = vsub.f32 %v5290_v36, %v1858_v39  ;;  %v1597_v39 = vsub.f32 %v5182_v23, %v5284_v10 }
 0x790   : > { %v5366_v20 = vpop.eup %4083  ;;  %v1884_v22 = vmul.f32 1.442695, %v1872_v54  ;;  %v1595_v54 = vsub.f32 %v5172_v16, %v5276_v12 }
 0x791   : > { %v1898_v21 = vsel %vm1024_vm5, %v5366_v20, 0.0 }
 0x792   : > { %1627 = vadd.xlane.f32.xlu0 %v1626_v43 }
 0x795   : > { %v1864_v17 = vpop.xlane.xlu2 %1863 }
 0x796   : > { %v1874_v5 = vsub.f32 %v5294_v26, %v1864_v17 }
 0x798   : > { %v1888_v48 = vmul.f32 1.442695, %v1874_v5  ;;  %v1612_v5 = vmul.f32 1.442695, %v1597_v39  ;;  %v859_v39 = vld [vmem:[#allocation14 + $0x8] sm:$0xf] }
 0x79a   : > { %4085 = vpow2.f32 %v1888_v48  ;;  %1899 = vadd.xlane.f32.xlu0 %v1898_v21 }
 0x79d   : > { %v1867_v35 = vpop.xlane.xlu2 %1866 }
 0x79e   : > { %v1875_v21 = vsub.f32 %v5300_v1, %v1867_v35 }
 0x7a0   : > { %v5372_v63 = vpop.eup %4085  ;;  %v1890_v10 = vmul.f32 1.442695, %v1875_v21 }
 0x7a1   : > { %v1910_v62 = vsel %vm1024_vm5, %v5372_v63, 0.0 }
 0x7a2   : > { %1911 = vadd.xlane.f32.xlu2 %v1910_v62 }
 0x7a5   : > { %v1939_v25 = vpop.permute.xlu2 %1938 }
 0x7a6   : > { %1966 = vmatpush.bf16.msrb.mxu1 %v1939_v25 }
 0x7aa   : > { %v1849_v26 = vpop.xlane.xlu1 %1848 }
 0x7ab   : > { %v1869_v15 = vsub.f32 %v5308_v31, %v1849_v26 }
 0x7ad   : > { %v1878_v56 = vmul.f32 1.442695, %v1869_v15 }
 0x7af   : > { %4087 = vpow2.f32 %v1878_v56  ;;  %v1376_v41 = vpop.f32.mrf.mxu2 }
 0x7b2   : > { %v1855_v46 = vpop.xlane.xlu1 %1854 }
 0x7b3   : > { %v1871_v8 = vsub.f32 %v5312_v14, %v1855_v46 }
 0x7b5   : > { %v5378_v58 = vpop.eup %4087  ;;  %v1882_v2 = vmul.f32 1.442695, %v1871_v8 }
 0x7b6   : > { %v1895_v61 = vsel %vm1024_vm5, %v5378_v58, 0.0 }
 0x7b7   : > { %4089 = vpow2.f32 %v1882_v2  ;;  %1896 = vadd.xlane.f32.xlu1 %v1895_v61  ;;  %v1378_v57 = vpop.f32.mrf.mxu2  ;;  %v1608_v61 = vmul.f32 1.442695, %v1595_v54 }
 0x7b8   : > { %v1396_v6 = vpack.c.bf16 %v1378_v57, %v1376_v41  ;;  %4091 = vpow2.f32 %v1884_v22 }
 0x7b9   : > { %4093 = vrcp.f32 %v5345_v51 }
 0x7ba   : > { %v1861_v31 = vpop.xlane.xlu1 %1860  ;;  %3685 = vmatmul.msk.bf16.vlgmr.msra.gmra.mxu3 %vm962_vm4, %v1396_v6 }
 0x7bb   : > { %v1873_v14 = vsub.f32 %v5316_v27, %v1861_v31 }
 0x7bd   : > { %v5384_v4 = vpop.eup %4089  ;;  %v1886_v19 = vmul.f32 1.442695, %v1873_v14 }
 0x7be   : > { %v1901_v36 = vsel %vm1024_vm5, %v5384_v4, 0.0  ;;  %v5390_v7 = vpop.eup %4091 }
 0x7bf   : > { %1902 = vadd.xlane.f32.xlu0 %v1901_v36  ;;  %v1904_v43 = vsel %vm1024_vm5, %v5390_v7, 0.0  ;;  %v4094_v17 = vpop.eup %4093 }
 0x7c0   : > { %v1647_v52 = vmul.f32 %v4094_v17, %v5268_v59 }
 0x7c2   : > { %v1616_v34 = vpop.xlane.xlu0 %1615 }
 0x7c3   : > { %4095 = vrcp.f32 %v1616_v34 }
 0x7c4   : > { %4097 = vpow2.f32 %v1886_v19 }
 0x7c5   : > { %4099 = vpow2.f32 %v1612_v5 }
 0x7c6   : > { %4101 = vpow2.f32 %v1890_v10 }
 0x7c7   : > { %1905 = vadd.xlane.f32.xlu0 %v1904_v43  ;;  %v1728_v43 = vsel %vm1412_vm6, %v859_v39, 0 }
 0x7c8   : > { %1737 = vmatpush.bf16.msrb.mxu3 %v1728_v43 }
 0x7c9   : > { %v4096_v27 = vpop.eup %4095 }
 0x7ca   : > { %v1646_v51 = vmul.f32 %v4096_v27, %v5323_v13  ;;  %v5398_v55 = vpop.eup %4097 }
 0x7cb   : > { %v1907_v23 = vsel %vm1024_vm5, %v5398_v55, 0.0  ;;  %v5406_v62 = vpop.eup %4099 }
 0x7cc   : > { %v1654_v48 = vpack.c.bf16 %v1647_v52, %v1646_v51  ;;  %v1635_v59 = vsel %vm1024_vm5, %v5406_v62, 0.0  ;;  %v5410_v25 = vpop.eup %4101 }
 0x7cd   : > { %v1913_v26 = vsel %vm1024_vm5, %v5410_v25, 0.0 }
 0x7ce   : > { %3697 = vmatmul.msk.bf16.vlgmr.msrb.gmra.mxu2 %vm1024_vm5, %v1654_v48 }
 0x7cf   : > { %1908 = vadd.xlane.f32.xlu0 %v1907_v23 }
 0x7d0   : > { %1936 = vrot.lane.b32.xlu1 %v4959_v3, %s4634_s1 }
 0x7d2   : > { %v1622_v13 = vpop.xlane.xlu0 %1621 }
 0x7d3   : > { %4103 = vrcp.f32 %v1622_v13 }
 0x7d7   : > { %1636 = vadd.xlane.f32.xlu0 %v1635_v59 }
 0x7d9   : > { %v4104_v3 = vpop.eup %4103 }
 0x7da   : > { %v1648_v41 = vmul.f32 %v4104_v3, %v5333_v0 }
 0x7de   : > { %v1381_v1 = vpop.f32.mrf.mxu2  ;;  %v1625_v35 = vpop.xlane.xlu2 %1624 }
 0x7df   : > { %4105 = vrcp.f32 %v1625_v35  ;;  %1914 = vadd.xlane.f32.xlu0 %v1913_v26 }
 0x7e0   : > { %4107 = vpow2.f32 %v1608_v61 }
 0x7e5   : > { %v4106_v15 = vpop.eup %4105 }
 0x7e6   : > { %v1383_v56 = vpop.f32.mrf.mxu2  ;;  %v1649_v46 = vmul.f32 %v4106_v15, %v5338_v47  ;;  %v5420_v6 = vpop.eup %4107 }
 0x7e7   : > { %v1397_v8 = vpack.c.bf16 %v1383_v56, %v1381_v1  ;;  %v1629_v0 = vsel %vm1024_vm5, %v5420_v6, 0.0 }
 0x7e8   : > { %v1655_v2 = vpack.c.bf16 %v1649_v46, %v1648_v41 }
 0x7e9   : > { %3686 = vmatmul.msk.bf16.gmra.mxu3 %vm962_vm4, %v1397_v8 }
 0x7ea   : > { %3698 = vmatmul.msk.bf16.gmra.mxu2 %vm1024_vm5, %v1655_v2 }
 0x7ee   : > { %v1386_v57 = vpop.f32.mrf.mxu2 }
 0x7f2   : > { %v1634_v41 = vpop.xlane.xlu2 %1633 }
 0x7f6   : > { %v1388_v22 = vpop.f32.mrf.mxu2 }
 0x7f7   : > { %v1398_v31 = vpack.c.bf16 %v1388_v22, %v1386_v57 }
 0x7f9   : > { %3687 = vmatmul.msk.bf16.gmra.mxu3 %vm962_vm4, %v1398_v31 }
 0x7fa   : > { %1630 = vadd.xlane.f32.xlu1 %v1629_v0 }
 0x7fd   : > { %v1894_v14 = vpop.xlane.xlu0 %1893 }
 0x7fe   : > { %v1391_v47 = vpop.f32.mrf.mxu2 }
 0x805   : > { %v1628_v36 = vpop.xlane.xlu0 %1627 }
 0x806   : > { %v1393_v16 = vpop.f32.mrf.mxu2 }
 0x807   : > { %v1399_v12 = vpack.c.bf16 %v1393_v16, %v1391_v47 }
 0x809   : > { %3688 = vmatmul.msk.bf16.gmra.mxu3 %vm962_vm4, %v1399_v12 }
 0x80d   : > { %v1900_v19 = vpop.xlane.xlu0 %1899 }
 0x82a   : > { %v1897_v34 = vpop.xlane.xlu1 %1896 }
 0x82b   : > { %4109 = vrcp.f32 %v1897_v34 }
 0x82c   : > { %4111 = vrcp.f32 %v1894_v14 }
 0x831   : > { %v4110_v27 = vpop.eup %4109 }
 0x832   : > { %v1903_v17 = vpop.xlane.xlu0 %1902  ;;  %v4112_v5 = vpop.eup %4111  ;;  %v1925_v52 = vmul.f32 %v4110_v27, %v5378_v58 }
 0x833   : > { %v1924_v51 = vmul.f32 %v4112_v5, %v5356_v11  ;;  %4113 = vrcp.f32 %v1903_v17 }
 0x834   : > { %4115 = vrcp.f32 %v1900_v19 }
 0x835   : > { %v1932_v21 = vpack.c.bf16 %v1925_v52, %v1924_v51 }
 0x839   : > { %v4114_v10 = vpop.eup %4113 }
 0x83a   : > { %v1906_v23 = vpop.xlane.xlu0 %1905  ;;  %v4116_v59 = vpop.eup %4115  ;;  %v1927_v1 = vmul.f32 %v4114_v10, %v5384_v4 }
 0x83b   : > { %v1926_v26 = vmul.f32 %v4116_v59, %v5366_v20  ;;  %v1912_v20 = vpop.xlane.xlu2 %1911 }
 0x83d   : > { %v1933_v3 = vpack.c.bf16 %v1927_v1, %v1926_v26 }
 0x842   : > { %v1937_v48 = vpop.permute.xlu1 %1936  ;;  %v1909_v13 = vpop.xlane.xlu0 %1908 }
 0x843   : > { %1967 = vmatpush.bf16.msrb.mxu1 %v1937_v48  ;;  %4117 = vrcp.f32 %v1909_v13 }
 0x844   : > { %4119 = vrcp.f32 %v1906_v23 }
 0x846   : > { %3709 = vmatmul.msk.bf16.vlgmr.msrb.gmra.mxu1 %vm1024_vm5, %v1932_v21 }
 0x849   : > { %v4118_v56 = vpop.eup %4117 }
 0x84a   : > { %v1637_v58 = vpop.xlane.xlu0 %1636  ;;  %v4120_v46 = vpop.eup %4119  ;;  %v1929_v8 = vmul.f32 %v4118_v56, %v5398_v55 }
 0x84b   : > { %v1928_v4 = vmul.f32 %v4120_v46, %v5390_v7 }
 0x84d   : > { %v1934_v2 = vpack.c.bf16 %v1929_v8, %v1928_v4 }
 0x851   : > { %v1691_v35 = vpop.f32.mrf.mxu2 }
 0x852   : > { %v1915_v54 = vpop.xlane.xlu0 %1914 }
 0x853   : > { %4121 = vrcp.f32 %v1915_v54 }
 0x854   : > { %4123 = vrcp.f32 %v1912_v20  ;;  %v3812_v20 = vld [vmem:[#allocation16] sm:$0xff] }
 0x855   : > { %4125 = vrcp.f32 %v1628_v36 }
 0x856   : > { %3710 = vmatmul.msk.bf16.gmra.mxu1 %vm1024_vm5, %v1933_v3 }
 0x859   : > { %v1693_v11 = vpop.f32.mrf.mxu2  ;;  %v4122_v61 = vpop.eup %4121 }
 0x85a   : > { %v1711_v15 = vpack.c.bf16 %v1693_v11, %v1691_v35  ;;  %v4124_v31 = vpop.eup %4123  ;;  %v1931_v0 = vmul.f32 %v4122_v61, %v5410_v25  ;;  %v1425_v35 = vpop.f32.mrf.mxu3 }
 0x85b   : > { %v4126_v47 = vpop.eup %4125  ;;  %v1930_v55 = vmul.f32 %v4124_v31, %v5372_v63  ;;  %v1470_v31 = vadd.f32 %v5174_v18, %v1425_v35 }
 0x85c   : > { %3701 = vmatmul.msk.bf16.vlgmr.msrb.gmra.mxu3 %vm962_vm4, %v1711_v15  ;;  %v1650_v12 = vmul.f32 %v4126_v47, %v5361_v29 }
 0x85d   : > { %v1935_v7 = vpack.c.bf16 %v1931_v0, %v1930_v55 }
 0x862   : > { %v1427_v11 = vpop.f32.mrf.mxu3 }
 0x863   : > { %v1472_v55 = vadd.f32 %v5186_v28, %v1427_v11 }
 0x866   : > { %3711 = vmatmul.msk.bf16.gmra.mxu1 %vm1024_vm5, %v1934_v2  ;;  %v3813_v2 = vld [vmem:[#allocation16 + $0x8] sm:$0xff] }
 0x867   : > { %2098 = vmatpush.bf16.msra.mxu3 %v3813_v2 }
 0x86b   : > { %2099 = vmatpush.bf16.msra.mxu3 %v3812_v20 }
 0x86c   : > { %v1430_v15 = vpop.f32.mrf.mxu3 }
 0x86d   : > { %v1631_v57 = vpop.xlane.xlu1 %1630  ;;  %v1696_v22 = vpop.f32.mrf.mxu2 }
 0x86e   : > { %4127 = vrcp.f32 %v1631_v57 }
 0x86f   : > { %4129 = vrcp.f32 %v1637_v58 }
 0x870   : > { %4131 = vrcp.f32 %v1634_v41 }
 0x874   : > { %v4128_v16 = vpop.eup %4127  ;;  %v1432_v46 = vpop.f32.mrf.mxu3 }
 0x875   : > { %v1651_v14 = vmul.f32 %v4128_v16, %v5420_v6  ;;  %v1698_v19 = vpop.f32.mrf.mxu2  ;;  %v4130_v25 = vpop.eup %4129  ;;  %v860_v6 = vld [vmem:[#allocation14 + $0xc] sm:$0xf] }
 0x876   : > { %v1712_v34 = vpack.c.bf16 %v1698_v19, %v1696_v22  ;;  %3712 = vmatmul.msk.bf16.gmra.mxu1 %vm1024_vm5, %v1935_v7  ;;  %v4132_v39 = vpop.eup %4131  ;;  %v1653_v63 = vmul.f32 %v4130_v25, %v5406_v62  ;;  %v2006_v17 = vsel %vm1412_vm6, %v860_v6, 0  ;;  %v3970_v7 = vld [vmem:[%s6068_s9] ss:$0 sm:$0xff] }
 0x877   : > { %v1656_v36 = vpack.c.bf16 %v1651_v14, %v1650_v12  ;;  %v1652_v43 = vmul.f32 %v4132_v39, %v5350_v30  ;;  %2015 = vmatpush.bf16.msra.mxu2 %v2006_v17  ;;  %v1477_v17 = vadd.f32 %v5196_v38, %v1432_v46 }
 0x878   : > { %3702 = vmatmul.msk.bf16.gmra.mxu3 %vm962_vm4, %v1712_v34 }
 0x879   : > { %3699 = vmatmul.msk.bf16.gmra.mxu2 %vm1024_vm5, %v1656_v36  ;;  %v1657_v29 = vpack.c.bf16 %v1653_v63, %v1652_v43 }
 0x87c   : > { %v1435_v8 = vpop.f32.mrf.mxu3 }
 0x884   : > { %v1437_v4 = vpop.f32.mrf.mxu3 }
 0x885   : > { %v1482_v38 = vadd.f32 %v5206_v42, %v1437_v4 }
 0x889   : > { %3700 = vmatmul.msk.bf16.gmra.mxu2 %vm1024_vm5, %v1657_v29  ;;  %v1475_v29 = vadd.f32 %v5192_v33, %v1430_v15 }
 0x88c   : > { %v1440_v54 = vpop.f32.mrf.mxu3 }
 0x894   : > { %v1442_v61 = vpop.f32.mrf.mxu3 }
 0x895   : > { %v1487_v42 = vadd.f32 %v5218_v60, %v1442_v61 }
 0x8c3   : > { %v1969_v27 = vpop.f32.mrf.mxu1 }
 0x8cb   : > { %v1971_v5 = vpop.f32.mrf.mxu1 }
 0x8cc   : > { %v1989_v52 = vpack.c.bf16 %v1971_v5, %v1969_v27 }
 0x8ce   : > { %3713 = vmatmul.msk.bf16.vlgmr.msra.gmra.mxu2 %vm962_vm4, %v1989_v52 }
 0x8d3   : > { %v1974_v51 = vpop.f32.mrf.mxu1 }
 0x8db   : > { %v1976_v48 = vpop.f32.mrf.mxu1 }
 0x8dc   : > { %v1990_v21 = vpack.c.bf16 %v1976_v48, %v1974_v51 }
 0x8de   : > { %3714 = vmatmul.msk.bf16.gmra.mxu2 %vm962_vm4, %v1990_v21 }
 0x8df   : > { %v1739_v57 = vpop.f32.mrf.mxu3 }
 0x8e0   : > { %v1759_v47 = vadd.f32 %v1739_v57, %v1470_v31 }
 0x8e3   : > { %v1979_v62 = vpop.f32.mrf.mxu1 }
 0x8e7   : > { %v1741_v0 = vpop.f32.mrf.mxu3 }
 0x8e8   : > { %v1760_v12 = vadd.f32 %v1741_v0, %v1472_v55 }
 0x8eb   : > { %v1981_v23 = vpop.f32.mrf.mxu1 }
 0x8ec   : > { %v1991_v30 = vpack.c.bf16 %v1981_v23, %v1979_v62 }
 0x8ee   : > { %3715 = vmatmul.msk.bf16.gmra.mxu2 %vm962_vm4, %v1991_v30  ;;  %v1480_v30 = vadd.f32 %v5202_v32, %v1435_v8 }
 0x8f3   : > { %v1984_v10 = vpop.f32.mrf.mxu1 }
 0x8fb   : > { %v1986_v59 = vpop.f32.mrf.mxu1  ;;  %v1744_v36 = vpop.f32.mrf.mxu3 }
 0x8fc   : > { %v1992_v13 = vpack.c.bf16 %v1986_v59, %v1984_v10  ;;  %v1701_v1 = vpop.f32.mrf.mxu2  ;;  %v1761_v28 = vadd.f32 %v1744_v36, %v1475_v29 }
 0x8fe   : > { %3716 = vmatmul.msk.bf16.gmra.mxu2 %vm962_vm4, %v1992_v13 }
 0x903   : > { %v1746_v6 = vpop.f32.mrf.mxu3 }
 0x904   : > { %v1703_v26 = vpop.f32.mrf.mxu2  ;;  %v1762_v5 = vadd.f32 %v1746_v6, %v1477_v17 }
 0x905   : > { %v1713_v3 = vpack.c.bf16 %v1703_v26, %v1701_v1 }
 0x907   : > { %3703 = vmatmul.msk.bf16.gmra.mxu3 %vm962_vm4, %v1713_v3 }
 0x90c   : > { %v1706_v58 = vpop.f32.mrf.mxu2 }
 0x914   : > { %v1708_v56 = vpop.f32.mrf.mxu2 }
 0x915   : > { %v1714_v41 = vpack.c.bf16 %v1708_v56, %v1706_v58  ;;  %v1485_v56 = vadd.f32 %v5211_v37, %v1440_v54  ;;  %v3815_v37 = vld [vmem:[#allocation13 + $0x18] sm:$0xff]  ;;  %v3814_v54 = vld [vmem:[#allocation13 + $0x10] sm:$0xff] }
 0x916   : > { %2185 = vmatpush.bf16.msra.mxu0 %v3815_v37 }
 0x917   : > { %3704 = vmatmul.msk.bf16.gmra.mxu3 %vm962_vm4, %v1714_v41 }
 0x91a   : > { %2186 = vmatpush.bf16.msra.mxu0 %v3814_v54 }
 0x951   : > { %v2017_v22 = vpop.f32.mrf.mxu2 }
 0x952   : > { %v2037_v16 = vadd.f32 %v2017_v22, %v1759_v47 }
 0x954   : > { %v2048_v19 = vadd.f32 %v3970_v7, %v2037_v16 }
 0x956   : > { %v2056_v39 = vadd.f32 %v2048_v19, %v4925_v24 }
 0x959   : > { %v2019_v14 = vpop.f32.mrf.mxu2 }
 0x95a   : > { %v2038_v34 = vadd.f32 %v2019_v14, %v1760_v12 }
 0x95c   : > { %v2049_v25 = vadd.f32 %v3970_v7, %v2038_v34 }
 0x95e   : > { %v2057_v63 = vadd.f32 %v2049_v25, %v4928_v40 }
 0x960   : > { %v2064_v18 = vpack.c.bf16 %v2057_v63, %v2056_v39 }
 0x961   : > { %v2022_v43 = vpop.f32.mrf.mxu2 }
 0x962   : > { %3725 = vmatmul.msk.bf16.vlgmr.msra.gmra.mxu3 %vm802_vm10, %v2064_v18  ;;  %v2039_v27 = vadd.f32 %v2022_v43, %v1761_v28 }
 0x964   : > { %v2050_v51 = vadd.f32 %v3970_v7, %v2039_v27  ;;  %v3971_v27 = vld [vmem:[%s6066_s7 + $0x1] ss:$0 sm:$0xff] }
 0x966   : > { %v2058_v24 = vadd.f32 %v2050_v51, %v4934_v44 }
 0x969   : > { %v2024_v52 = vpop.f32.mrf.mxu2 }
 0x96a   : > { %v2040_v48 = vadd.f32 %v2024_v52, %v1762_v5 }
 0x96c   : > { %v2051_v21 = vadd.f32 %v3970_v7, %v2040_v48 }
 0x96e   : > { %v2059_v40 = vadd.f32 %v2051_v21, %v4937_v45 }
 0x970   : > { %v2065_v62 = vpack.c.bf16 %v2059_v40, %v2058_v24 }
 0x971   : > { %v2027_v33 = vpop.f32.mrf.mxu2 }
 0x972   : > { %3726 = vmatmul.msk.bf16.gmra.mxu3 %vm802_vm10, %v2065_v62 }
 0x979   : > { %v2029_v59 = vpop.f32.mrf.mxu2 }
 0x981   : > { %v2032_v58 = vpop.f32.mrf.mxu2 }
 0x989   : > { %v2034_v2 = vpop.f32.mrf.mxu2 }
 0x98a   : > { %v1749_v23 = vpop.f32.mrf.mxu3 }
 0x98b   : > { %v1763_v10 = vadd.f32 %v1749_v23, %v1480_v30 }
 0x98d   : > { %v2041_v13 = vadd.f32 %v2027_v33, %v1763_v10 }
 0x98f   : > { %v2052_v26 = vadd.f32 %v3970_v7, %v2041_v13 }
 0x991   : > { %v2060_v44 = vadd.f32 %v2052_v26, %v4942_v49 }
 0x992   : > { %v1751_v1 = vpop.f32.mrf.mxu3 }
 0x993   : > { %v1764_v35 = vadd.f32 %v1751_v1, %v1482_v38 }
 0x995   : > { %v2042_v3 = vadd.f32 %v2029_v59, %v1764_v35 }
 0x997   : > { %v2053_v11 = vadd.f32 %v3970_v7, %v2042_v3 }
 0x999   : > { %v2061_v45 = vadd.f32 %v2053_v11, %v4944_v50 }
 0x99a   : > { %v1754_v15 = vpop.f32.mrf.mxu3 }
 0x99b   : > { %v2066_v41 = vpack.c.bf16 %v2061_v45, %v2060_v44  ;;  %v1765_v32 = vadd.f32 %v1754_v15, %v1485_v56 }
 0x99d   : > { %3727 = vmatmul.msk.bf16.gmra.mxu3 %vm802_vm10, %v2066_v41  ;;  %v2043_v46 = vadd.f32 %v2032_v58, %v1765_v32 }
 0x99f   : > { %v2054_v20 = vadd.f32 %v3970_v7, %v2043_v46 }
 0x9a1   : > { %v2062_v49 = vadd.f32 %v2054_v20, %v4949_v53 }
 0x9a2   : > { %v1756_v8 = vpop.f32.mrf.mxu3 }
 0x9a3   : > { %v1766_v4 = vadd.f32 %v1756_v8, %v1487_v42 }
 0x9a5   : > { %v2044_v57 = vadd.f32 %v2034_v2, %v1766_v4 }
 0x9a7   : > { %v2055_v22 = vadd.f32 %v3970_v7, %v2044_v57 }
 0x9a9   : > { %v2063_v50 = vadd.f32 %v2055_v22, %v4951_v9 }
 0x9ab   : > { %v2067_v31 = vpack.c.bf16 %v2063_v50, %v2062_v49 }
 0x9ad   : > { %3728 = vmatmul.msk.bf16.gmra.mxu3 %vm802_vm10, %v2067_v31 }
 0x9e5   : > { %v2101_v0 = vpop.f32.mrf.mxu3 }
 0x9e6   : > { %v5477_v61 = vadd.f32 %v2101_v0, %v2056_v39 }
 0x9ed   : > { %v2103_v60 = vpop.f32.mrf.mxu3 }
 0x9ee   : > { %v5479_v47 = vadd.f32 %v2103_v60, %v2057_v63 }
 0x9f0   : > { %v2148_v55 = vpack.c.bf16 %v5479_v47, %v5477_v61 }
 0x9f2   : > { %3739 = vmatmul.msk.bf16.vlgmr.msra.gmra.mxu0 %vm802_vm10, %v2148_v55 }
 0x9f5   : > { %v2106_v53 = vpop.f32.mrf.mxu3 }
 0x9f6   : > { %v5484_v16 = vadd.f32 %v2106_v53, %v2058_v24 }
 0x9fd   : > { %v2108_v9 = vpop.f32.mrf.mxu3 }
 0x9fe   : > { %v5486_v7 = vadd.f32 %v2108_v9, %v2059_v40 }
 0xa00   : > { %v2149_v12 = vpack.c.bf16 %v5486_v7, %v5484_v16 }
 0xa02   : > { %3740 = vmatmul.msk.bf16.gmra.mxu0 %vm802_vm10, %v2149_v12 }
 0xa20   : > { %v2111_v14 = vpop.f32.mrf.mxu3 }
 0xa21   : > { %v5491_v34 = vadd.f32 %v2111_v14, %v2060_v44 }
 0xa28   : > { %v2113_v19 = vpop.f32.mrf.mxu3 }
 0xa29   : > { %v5493_v36 = vadd.f32 %v2113_v19, %v2061_v45 }
 0xa2b   : > { %v2150_v25 = vpack.c.bf16 %v5493_v36, %v5491_v34 }
 0xa2d   : > { %3741 = vmatmul.msk.bf16.gmra.mxu0 %vm802_vm10, %v2150_v25 }
 0xa30   : > { %v2116_v39 = vpop.f32.mrf.mxu3 }
 0xa31   : > { %v5498_v18 = vadd.f32 %v2116_v39, %v2062_v49 }
 0xa38   : > { %v2118_v63 = vpop.f32.mrf.mxu3 }
 0xa39   : > { %v5500_v43 = vadd.f32 %v2118_v63, %v2063_v50 }
 0xa3b   : > { %v2151_v29 = vpack.c.bf16 %v5500_v43, %v5498_v18 }
 0xa3d   : > { %3742 = vmatmul.msk.bf16.gmra.mxu0 %vm802_vm10, %v2151_v29 }
 0xa6f   : > { %v2188_v28 = vpop.f32.mrf.mxu0 }
 0xa70   : > { %v2189_v56 = vadd.f32 %v3971_v27, %v2188_v28 }
 0xa72   : > { %v2208_v8 = vpack.c.bf16 %v2189_v56, %v2189_v56 }
 0xa74   : > { %v2224_v2 = vunpack.c.l.b16 %v2208_v8 }
 0xa77   : > { %v2190_v6 = vpop.f32.mrf.mxu0 }
 0xa78   : > { %v2191_v58 = vadd.f32 %v3971_v27, %v2190_v6 }
 0xa7a   : > { %v2209_v42 = vpack.c.bf16 %v2191_v58, %v2191_v58 }
 0xa7c   : > { %v2225_v4 = vunpack.c.l.b16 %v2209_v42 }
 0xa7e   : > { %v5522_v20 = vpack.c.b16 %v2225_v4, %v2224_v2 }
 0xa7f   : > { %v2193_v17 = vpop.f32.mrf.mxu0 }
 0xa80   : > { %v2194_v5 = vadd.f32 %v3971_v27, %v2193_v17 }
 0xa82   : > { %v2210_v51 = vpack.c.bf16 %v2194_v5, %v2194_v5 }
 0xa84   : > { %v2226_v24 = vunpack.c.l.b16 %v2210_v51 }
 0xa87   : > { %v2195_v52 = vpop.f32.mrf.mxu0 }
 0xa88   : > { %v2196_v48 = vadd.f32 %v3971_v27, %v2195_v52 }
 0xa8a   : > { %v2211_v21 = vpack.c.bf16 %v2196_v48, %v2196_v48 }
 0xa8c   : > { %v2227_v40 = vunpack.c.l.b16 %v2211_v21 }
 0xa8e   : > { %v5508_v62 = vpack.c.b16 %v2227_v40, %v2226_v24 }
 0xa90   : > { %2238 = vrot.lane.b32.xlu1 %v5508_v62, %s4625_s6 }
 0xaaa   : > { %v2198_v33 = vpop.f32.mrf.mxu0 }
 0xaab   : > { %v2199_v23 = vadd.f32 %v3971_v27, %v2198_v33 }
 0xaad   : > { %v2212_v10 = vpack.c.bf16 %v2199_v23, %v2199_v23 }
 0xaaf   : > { %v2228_v13 = vunpack.c.l.b16 %v2212_v10 }
 0xab2   : > { %v2200_v30 = vpop.f32.mrf.mxu0 }
 0xab3   : > { %v2201_v59 = vadd.f32 %v3971_v27, %v2200_v30 }
 0xab5   : > { %v2213_v38 = vpack.c.bf16 %v2201_v59, %v2201_v59 }
 0xab7   : > { %v2229_v1 = vunpack.c.l.b16 %v2213_v38 }
 0xab9   : > { %v5512_v35 = vpack.c.b16 %v2229_v1, %v2228_v13 }
 0xaba   : > { %v2203_v26 = vpop.f32.mrf.mxu0 }
 0xabb   : > { %2240 = vrot.lane.b32.xlu0 %v5512_v35, %s4625_s6  ;;  %v2204_v3 = vadd.f32 %v3971_v27, %v2203_v26 }
 0xabd   : > { %v2214_v44 = vpack.c.bf16 %v2204_v3, %v2204_v3 }
 0xabf   : > { %v2230_v41 = vunpack.c.l.b16 %v2214_v44 }
 0xac2   : > { %v2205_v11 = vpop.f32.mrf.mxu0 }
 0xac3   : > { %v2206_v45 = vadd.f32 %v3971_v27, %v2205_v11 }
 0xac5   : > { %v2215_v15 = vpack.c.bf16 %v2206_v45, %v2206_v45 }
 0xac7   : > { %v2231_v32 = vunpack.c.l.b16 %v2215_v15 }
 0xac9   : > { %v5516_v46 = vpack.c.b16 %v2231_v32, %v2230_v41 }
 0xacb   : > { %2403 = vrot.lane.b32.xlu0 %v5516_v46, %s4626_s25  ;;  %2242 = vrot.lane.b32.xlu2 %v5516_v46, %s4625_s6 }
 0xad3   : > { %2236 = vrot.lane.b32.xlu2 %v5522_v20, %s4625_s6 }
 0xb02   : > { %v2239_v31 = vpop.permute.xlu1 %2238 }
 0xb03   : > { %v2260_v37 = vsel %vm962_vm4, %v2239_v31, 0 }
 0xb25   : > { %v2243_v57 = vpop.permute.xlu2 %2242 }
 0xb26   : > { %v2266_v22 = vsel %vm962_vm4, %v2243_v57, 0 }
 0xb27   : > { %2272 = vmatpush.bf16.xpose.msra.mxu1 %v2266_v22 }
 0xb2d   : > { %v2241_v49 = vpop.permute.xlu0 %2240  ;;  %v2237_v54 = vpop.permute.xlu2 %2236 }
 0xb2e   : > { %v2263_v50 = vsel %vm962_vm4, %v2241_v49, 0  ;;  %v2257_v60 = vsel %vm962_vm4, %v2237_v54, 0 }
 0xb2f   : > { %2273 = vmatpush.bf16.xpose.msra.mxu1 %v2263_v50 }
 0xb37   : > { %2274 = vmatpush.bf16.xpose.msra.mxu1 %v2260_v37 }
 0xb3d   : > { %v2404_v0 = vpop.permute.xlu0 %2403 }
 0xb3e   : > { %2425 = vmatpush.bf16.msrb.mxu2 %v2404_v0 }
 0xb3f   : > { %2275 = vmatpush.bf16.xpose.msra.mxu1 %v2257_v60 }
 0xb46   : > { %3743 = vmatmul.msk.bf16.vlgmr.msra.gmra.mxu1 %vm962_vm4, %v5522_v20 }
 0xb56   : > { %3744 = vmatmul.msk.bf16.gmra.mxu1 %vm962_vm4, %v5508_v62 }
 0xb66   : > { %3745 = vmatmul.msk.bf16.gmra.mxu1 %vm962_vm4, %v5512_v35 }
 0xb76   : > { %3746 = vmatmul.msk.bf16.gmra.mxu1 %vm962_vm4, %v5516_v46 }
 0xbc3   : > { %v2277_v55 = vpop.f32.mrf.mxu1 }
 0xbc4   : > { %v2297_v53 = vmul.f32 0.35355338, %v2277_v55 }
 0xbc6   : > { %v2305_v9 = vsel %vm1024_vm5, %v2297_v53, -inf }
 0xbc7   : > { %2306 = vmax.xlane.f32.xlu0 %v2305_v9 }
 0xbcb   : > { %v2279_v12 = vpop.f32.mrf.mxu1 }
 0xbcc   : > { %v2298_v14 = vmul.f32 0.35355338, %v2279_v12 }
 0xbce   : > { %v2308_v19 = vsel %vm1024_vm5, %v2298_v14, -inf }
 0xbcf   : > { %2309 = vmax.xlane.f32.xlu2 %v2308_v19 }
 0xbd3   : > { %v2282_v25 = vpop.f32.mrf.mxu1 }
 0xbd4   : > { %v2299_v39 = vmul.f32 0.35355338, %v2282_v25 }
 0xbd6   : > { %v2311_v63 = vsel %vm1024_vm5, %v2299_v39, -inf }
 0xbd7   : > { %2312 = vmax.xlane.f32.xlu1 %v2311_v63 }
 0xbdb   : > { %v2284_v29 = vpop.f32.mrf.mxu1 }
 0xbdc   : > { %v5541_v28 = vmul.f32 0.35355338, %v2284_v29 }
 0xbde   : > { %v2314_v6 = vsel %vm1024_vm5, %v5541_v28, -inf }
 0xbdf   : > { %2315 = vmax.xlane.f32.xlu0 %v2314_v6 }
 0xbe3   : > { %v2287_v17 = vpop.f32.mrf.mxu1 }
 0xbe4   : > { %v2301_v27 = vmul.f32 0.35355338, %v2287_v17 }
 0xbe6   : > { %v2317_v5 = vsel %vm1024_vm5, %v2301_v27, -inf }
 0xbe7   : > { %2318 = vmax.xlane.f32.xlu2 %v2317_v5 }
 0xbeb   : > { %v2289_v52 = vpop.f32.mrf.mxu1 }
 0xbec   : > { %v2302_v51 = vmul.f32 0.35355338, %v2289_v52 }
 0xbee   : > { %v2320_v48 = vsel %vm1024_vm5, %v2302_v51, -inf }
 0xbef   : > { %2321 = vmax.xlane.f32.xlu0 %v2320_v48 }
 0xbf3   : > { %v2292_v21 = vpop.f32.mrf.mxu1 }
 0xbf4   : > { %v2303_v24 = vmul.f32 0.35355338, %v2292_v21 }
 0xbf6   : > { %v2323_v40 = vsel %vm1024_vm5, %v2303_v24, -inf }
 0xbf7   : > { %2324 = vmax.xlane.f32.xlu1 %v2323_v40 }
 0xbfb   : > { %v2294_v33 = vpop.f32.mrf.mxu1 }
 0xbfc   : > { %v2304_v23 = vmul.f32 0.35355338, %v2294_v33 }
 0xbfe   : > { %v2326_v30 = vsel %vm1024_vm5, %v2304_v23, -inf }
 0xbff   : > { %2327 = vmax.xlane.f32.xlu2 %v2326_v30 }
 0xc03   : > { %2397 = vrot.lane.b32.xlu0 %v5522_v20, %s4626_s25 }
 0xc17   : > { %2399 = vrot.lane.b32.xlu2 %v5508_v62, %s4626_s25 }
 0xc3a   : > { %v2307_v10 = vpop.xlane.xlu0 %2306 }
 0xc3b   : > { %v2329_v59 = vsub.f32 %v2297_v53, %v2307_v10 }
 0xc3d   : > { %v2337_v38 = vmul.f32 1.442695, %v2329_v59 }
 0xc3f   : > { %4133 = vpow2.f32 %v2337_v38 }
 0xc42   : > { %v2310_v13 = vpop.xlane.xlu2 %2309 }
 0xc43   : > { %v2330_v1 = vsub.f32 %v2298_v14, %v2310_v13 }
 0xc45   : > { %v5553_v26 = vpop.eup %4133  ;;  %v2339_v3 = vmul.f32 1.442695, %v2330_v1 }
 0xc46   : > { %v2353_v11 = vsel %vm1024_vm5, %v5553_v26, 0.0 }
 0xc47   : > { %4135 = vpow2.f32 %v2339_v3  ;;  %2354 = vadd.xlane.f32.xlu1 %v2353_v11 }
 0xc4a   : > { %v2313_v44 = vpop.xlane.xlu1 %2312 }
 0xc4b   : > { %v2331_v45 = vsub.f32 %v2299_v39, %v2313_v44 }
 0xc4d   : > { %v5557_v58 = vpop.eup %4135  ;;  %v2341_v15 = vmul.f32 1.442695, %v2331_v45 }
 0xc4e   : > { %v2356_v56 = vsel %vm1024_vm5, %v5557_v58, 0.0 }
 0xc4f   : > { %4137 = vpow2.f32 %v2341_v15  ;;  %2357 = vadd.xlane.f32.xlu2 %v2356_v56  ;;  %v2137_v15 = vld [vmem:[#allocation14 + $0x10] sm:$0xf] }
 0xc50   : > { %v2737_v56 = vsel %vm1412_vm6, %v2137_v15, 0 }
 0xc52   : > { %v2316_v42 = vpop.xlane.xlu0 %2315 }
 0xc53   : > { %v2332_v12 = vsub.f32 %v5541_v28, %v2316_v42 }
 0xc55   : > { %v5561_v41 = vpop.eup %4137  ;;  %v2343_v14 = vmul.f32 1.442695, %v2332_v12 }
 0xc56   : > { %v2359_v32 = vsel %vm1024_vm5, %v5561_v41, 0.0 }
 0xc57   : > { %2360 = vadd.xlane.f32.xlu0 %v2359_v32 }
 0xc5a   : > { %v2319_v8 = vpop.xlane.xlu2 %2318 }
 0xc5b   : > { %v2333_v4 = vsub.f32 %v2301_v27, %v2319_v8 }
 0xc5d   : > { %v2345_v2 = vmul.f32 1.442695, %v2333_v4 }
 0xc5f   : > { %4139 = vpow2.f32 %v2345_v2 }
 0xc60   : > { %2401 = vrot.lane.b32.xlu1 %v5512_v35, %s4626_s25 }
 0xc62   : > { %v2322_v57 = vpop.xlane.xlu0 %2321 }
 0xc63   : > { %v2334_v22 = vsub.f32 %v2302_v51, %v2322_v57 }
 0xc65   : > { %v5567_v49 = vpop.eup %4139  ;;  %v2347_v50 = vmul.f32 1.442695, %v2334_v22 }
 0xc66   : > { %v2365_v31 = vsel %vm1024_vm5, %v5567_v49, 0.0 }
 0xc67   : > { %4141 = vpow2.f32 %v2347_v50  ;;  %2366 = vadd.xlane.f32.xlu2 %v2365_v31 }
 0xc6a   : > { %v2325_v37 = vpop.xlane.xlu1 %2324 }
 0xc6b   : > { %v2335_v54 = vsub.f32 %v2303_v24, %v2325_v37 }
 0xc6d   : > { %v5571_v0 = vpop.eup %4141  ;;  %v2349_v60 = vmul.f32 1.442695, %v2335_v54 }
 0xc6e   : > { %v2368_v55 = vsel %vm1024_vm5, %v5571_v0, 0.0 }
 0xc6f   : > { %4143 = vpow2.f32 %v2349_v60  ;;  %2369 = vadd.xlane.f32.xlu0 %v2368_v55 }
 0xc70   : > { %4145 = vpow2.f32 %v2343_v14 }
 0xc72   : > { %v2328_v19 = vpop.xlane.xlu2 %2327 }
 0xc73   : > { %v2336_v25 = vsub.f32 %v2304_v23, %v2328_v19 }
 0xc75   : > { %v5575_v53 = vpop.eup %4143  ;;  %v2351_v39 = vmul.f32 1.442695, %v2336_v25  ;;  %v2398_v24 = vpop.permute.xlu0 %2397 }
 0xc76   : > { %v2371_v9 = vsel %vm1024_vm5, %v5575_v53, 0.0  ;;  %v4146_v63 = vpop.eup %4145 }
 0xc77   : > { %2372 = vadd.xlane.f32.xlu0 %v2371_v9  ;;  %4147 = vpow2.f32 %v2351_v39  ;;  %v2362_v29 = vsel %vm1024_vm5, %v4146_v63, 0.0 }
 0xc7a   : > { %v2400_v17 = vpop.permute.xlu2 %2399 }
 0xc7d   : > { %v5587_v28 = vpop.eup %4147 }
 0xc7e   : > { %v2374_v6 = vsel %vm1024_vm5, %v5587_v28, 0.0 }
 0xc7f   : > { %2468 = vrot.lane.b32.xlu2 %v5516_v46, %s4627_s12 }
 0xc87   : > { %2462 = vrot.lane.b32.xlu2 %v5522_v20, %s4627_s12 }
 0xc8a   : > { %2363 = vadd.xlane.f32.xlu1 %v2362_v29 }
 0xc8b   : > { %2466 = vrot.lane.b32.xlu0 %v5512_v35, %s4627_s12 }
 0xc8f   : > { %2456 = vrot.lane.b32.xlu2 %v5508_v62, %s4628_s26 }
 0xc92   : > { %2375 = vadd.xlane.f32.xlu1 %v2374_v6 }
 0xc93   : > { %2454 = vrot.lane.b32.xlu0 %v5522_v20, %s4628_s26 }
 0xc97   : > { %2782 = vrot.lane.b32.xlu2 %v5516_v46, %s4631_s5 }
 0xc9b   : > { %2458 = vrot.lane.b32.xlu0 %v5512_v35, %s4628_s26 }
 0xc9f   : > { %3056 = vrot.lane.b32.xlu2 %v5508_v62, %s4629_s29 }
 0xca3   : > { %2780 = vrot.lane.b32.xlu0 %v5512_v35, %s4631_s5 }
 0xca7   : > { %3054 = vrot.lane.b32.xlu2 %v5522_v20, %s4629_s29 }
 0xcab   : > { %2778 = vrot.lane.b32.xlu0 %v5508_v62, %s4631_s5  ;;  %2464 = vrot.lane.b32.xlu1 %v5508_v62, %s4627_s12  ;;  %s3632_s12 = sshll.u32 %s4836_s23, 5 }
 0xcaf   : > { %2768 = vrot.lane.b32.xlu2 %v5522_v20, %s4630_s21 }
 0xcb3   : > { %3046 = vrot.lane.b32.xlu0 %v5522_v20, %s4632_s30  ;;  %3060 = vrot.lane.b32.xlu1 %v5516_v46, %s4629_s29 }
 0xcb7   : > { %3050 = vrot.lane.b32.xlu2 %v5512_v35, %s4632_s30 }
 0xcba   : > { %v2355_v27 = vpop.xlane.xlu1 %2354 }
 0xcbb   : > { %2770 = vrot.lane.b32.xlu0 %v5508_v62, %s4630_s21  ;;  %3058 = vrot.lane.b32.xlu1 %v5512_v35, %s4629_s29  ;;  %s3818_s29 = sshll.u32 %s4722_s24, 5 }
 0xcbf   : > { %2774 = vrot.lane.b32.xlu2 %v5516_v46, %s4630_s21 }
 0xcc2   : > { %v2358_v5 = vpop.xlane.xlu2 %2357 }
 0xcc3   : > { %3052 = vrot.lane.b32.xlu0 %v5516_v46, %s4632_s30  ;;  %2460 = vrot.lane.b32.xlu1 %v5516_v46, %s4628_s26  ;;  %4149 = vrcp.f32 %v2358_v5  ;;  %s527_s26 = scalar_lea.vmem [#allocation17], %s3632_s12 }
 0xcc4   : > { %4151 = vrcp.f32 %v2355_v27 }
 0xcc9   : > { %v4150_v51 = vpop.eup %4149 }
 0xcca   : > { %v4152_v48 = vpop.eup %4151  ;;  %v2386_v21 = vmul.f32 %v4150_v51, %v5557_v58  ;;  %v2361_v10 = vpop.xlane.xlu0 %2360 }
 0xccb   : > { %2776 = vrot.lane.b32.xlu1 %v5522_v20, %s4631_s5  ;;  %v2385_v40 = vmul.f32 %v4152_v48, %v5553_v26  ;;  %4153 = vrcp.f32 %v2361_v10 }
 0xccd   : > { %v2393_v23 = vpack.c.bf16 %v2386_v21, %v2385_v40 }
 0xcd1   : > { %v4154_v11 = vpop.eup %4153 }
 0xcd2   : > { %v2402_v52 = vpop.permute.xlu1 %2401  ;;  %v2387_v45 = vmul.f32 %v4154_v11, %v5561_v41 }
 0xcd3   : > { %2426 = vmatpush.bf16.msrb.mxu2 %v2402_v52  ;;  %3048 = vrot.lane.b32.xlu1 %v5508_v62, %s4632_s30  ;;  %s3456_s30 = scalar_lea.hbm %s6070_s11, %s3818_s29 }
 0xcd7   : > { %2427 = vmatpush.bf16.msrb.mxu2 %v2400_v17 }
 0xcda   : > { %v2367_v33 = vpop.xlane.xlu2 %2366 }
 0xcdb   : > { %2772 = vrot.lane.b32.xlu1 %v5512_v35, %s4630_s21  ;;  %2428 = vmatpush.bf16.msrb.mxu2 %v2398_v24 }
 0xcde   : > { %3747 = vmatmul.msk.bf16.vlgmr.msrb.gmra.mxu2 %vm1024_vm5, %v2393_v23 }
 0xcdf   : > { %2746 = vmatpush.bf16.msra.mxu2 %v2737_v56 }
 0xce2   : > { %v2469_v30 = vpop.permute.xlu2 %2468  ;;  %v2370_v38 = vpop.xlane.xlu0 %2369 }
 0xce3   : > { %v2492_v59 = vsel %vm962_vm4, %v2469_v30, 0 }
 0xce4   : > { %2498 = vmatpush.bf16.xpose.msrb.mxu3 %v2492_v59 }
 0xcea   : > { %v2373_v13 = vpop.xlane.xlu0 %2372  ;;  %v2463_v8 = vpop.permute.xlu2 %2462 }
 0xceb   : > { %v2483_v19 = vsel %vm962_vm4, %v2463_v8, 0 }
 0xcf2   : > { %v2457_v31 = vpop.permute.xlu2 %2456 }
 0xcfd   : > { %v2467_v1 = vpop.permute.xlu0 %2466  ;;  %v2364_v3 = vpop.xlane.xlu1 %2363 }
 0xcfe   : > { %v2489_v26 = vsel %vm962_vm4, %v2467_v1, 0  ;;  %4155 = vrcp.f32 %v2364_v3 }
 0xcff   : > { %2499 = vmatpush.bf16.xpose.msrb.mxu3 %v2489_v26  ;;  %4157 = vrcp.f32 %v2370_v38 }
 0xd00   : > { %4159 = vrcp.f32 %v2367_v33 }
 0xd04   : > { %v4156_v44 = vpop.eup %4155 }
 0xd05   : > { %v2388_v58 = vmul.f32 %v4156_v44, %v4146_v63  ;;  %v4158_v42 = vpop.eup %4157  ;;  %v2376_v22 = vpop.xlane.xlu1 %2375 }
 0xd06   : > { %v4160_v4 = vpop.eup %4159  ;;  %v2390_v2 = vmul.f32 %v4158_v42, %v5571_v0  ;;  %v2455_v50 = vpop.permute.xlu0 %2454  ;;  %4161 = vrcp.f32 %v2376_v22 }
 0xd07   : > { %v2394_v32 = vpack.c.bf16 %v2388_v58, %v2387_v45  ;;  %v2389_v57 = vmul.f32 %v4160_v4, %v5567_v49  ;;  %4163 = vrcp.f32 %v2373_v13  ;;  %v2783_v0 = vpop.permute.xlu2 %2782 }
 0xd08   : > { %v2806_v39 = vsel %vm962_vm4, %v2783_v0, 0 }
 0xd09   : > { %3748 = vmatmul.msk.bf16.gmra.mxu2 %vm1024_vm5, %v2394_v32  ;;  %v2395_v41 = vpack.c.bf16 %v2390_v2, %v2389_v57 }
 0xd0c   : > { %v4162_v60 = vpop.eup %4161 }
 0xd0d   : > { %v4164_v9 = vpop.eup %4163  ;;  %v2392_v12 = vmul.f32 %v4162_v60, %v5587_v28 }
 0xd0e   : > { %v2459_v55 = vpop.permute.xlu0 %2458  ;;  %v2391_v49 = vmul.f32 %v4164_v9, %v5575_v53 }
 0xd0f   : > { %v3057_v17 = vpop.permute.xlu2 %3056 }
 0xd10   : > { %v2396_v63 = vpack.c.bf16 %v2392_v12, %v2391_v49  ;;  %v3078_v52 = vsel %vm962_vm4, %v3057_v17, 0 }
 0xd16   : > { %v2781_v29 = vpop.permute.xlu0 %2780 }
 0xd17   : > { %v2803_v53 = vsel %vm962_vm4, %v2781_v29, 0  ;;  %v3055_v48 = vpop.permute.xlu2 %3054 }
 0xd18   : > { %v3075_v24 = vsel %vm962_vm4, %v3055_v48, 0 }
 0xd19   : > { %3749 = vmatmul.msk.bf16.gmra.mxu2 %vm1024_vm5, %v2395_v41 }
 0xd1d   : > { %v2465_v37 = vpop.permute.xlu1 %2464 }
 0xd1e   : > { %v2486_v54 = vsel %vm962_vm4, %v2465_v37, 0  ;;  %v2779_v27 = vpop.permute.xlu0 %2778 }
 0xd1f   : > { %2500 = vmatpush.bf16.xpose.msrb.mxu3 %v2486_v54  ;;  %v2800_v51 = vsel %vm962_vm4, %v2779_v27, 0  ;;  %v2769_v10 = vpop.permute.xlu2 %2768 }
 0xd25   : > { %v3061_v14 = vpop.permute.xlu1 %3060 }
 0xd26   : > { %v3084_v25 = vsel %vm962_vm4, %v3061_v14, 0  ;;  %v3047_v59 = vpop.permute.xlu0 %3046 }
 0xd27   : > { %2501 = vmatpush.bf16.xpose.msrb.mxu3 %v2483_v19  ;;  %3090 = vmatpush.bf16.xpose.msrb.mxu2 %v3084_v25  ;;  %v3051_v26 = vpop.permute.xlu2 %3050 }
 0xd29   : > { %3750 = vmatmul.msk.bf16.gmra.mxu2 %vm1024_vm5, %v2396_v63 }
 0xd2d   : > { %v3059_v6 = vpop.permute.xlu1 %3058 }
 0xd2e   : > { %v3081_v28 = vsel %vm962_vm4, %v3059_v6, 0  ;;  %3751 = vmatmul.msk.bf16.vlgmr.msrb.gmra.mxu3 %vm962_vm4, %v2455_v50  ;;  %v2771_v38 = vpop.permute.xlu0 %2770 }
 0xd2f   : > { %2812 = vmatpush.bf16.xpose.msra.mxu3 %v2806_v39  ;;  %3091 = vmatpush.bf16.xpose.msrb.mxu2 %v3081_v28  ;;  %v2775_v58 = vpop.permute.xlu2 %2774 }
 0xd35   : > { %v2461_v5 = vpop.permute.xlu1 %2460 }
 0xd36   : > { %v3053_v17 = vpop.permute.xlu0 %3052 }
 0xd37   : > { %2813 = vmatpush.bf16.xpose.msra.mxu3 %v2803_v53  ;;  %3092 = vmatpush.bf16.xpose.msrb.mxu2 %v3078_v52 }
 0xd3d   : > { %v2777_v21 = vpop.permute.xlu1 %2776 }
 0xd3e   : > { %v2797_v40 = vsel %vm962_vm4, %v2777_v21, 0  ;;  %3752 = vmatmul.msk.bf16.gmra.mxu3 %vm962_vm4, %v2457_v31 }
 0xd3f   : > { %2814 = vmatpush.bf16.xpose.msra.mxu3 %v2800_v51  ;;  %3093 = vmatpush.bf16.xpose.msrb.mxu2 %v3075_v24 }
 0xd45   : > { %v3049_v13 = vpop.permute.xlu1 %3048 }
 0xd47   : > { %2815 = vmatpush.bf16.xpose.msra.mxu3 %v2797_v40 }
 0xd4d   : > { %v2773_v3 = vpop.permute.xlu1 %2772 }
 0xd4e   : > { %3753 = vmatmul.msk.bf16.gmra.mxu3 %vm962_vm4, %v2459_v55 }
 0xd5e   : > { %3754 = vmatmul.msk.bf16.gmra.mxu3 %vm962_vm4, %v2461_v5 }
 0xd61   : > { %v2430_v33 = vpop.f32.mrf.mxu2 }
 0xd69   : > { %v2432_v23 = vpop.f32.mrf.mxu2 }
 0xd6a   : > { %v2450_v30 = vpack.c.bf16 %v2432_v23, %v2430_v33 }
 0xd6c   : > { %3763 = vmatmul.msk.bf16.vlgmr.msra.gmra.mxu2 %vm962_vm4, %v2450_v30 }
 0xd6e   : > { %3767 = vmatmul.msk.bf16.vlgmr.msra.gmra.mxu3 %vm962_vm4, %v2769_v10 }
 0xd7e   : > { %3768 = vmatmul.msk.bf16.gmra.mxu3 %vm962_vm4, %v2771_v38 }
 0xd8c   : > { %v2435_v1 = vpop.f32.mrf.mxu2 }
 0xd8e   : > { %3769 = vmatmul.msk.bf16.gmra.mxu3 %vm962_vm4, %v2773_v3 }
 0xd94   : > { %v2437_v11 = vpop.f32.mrf.mxu2 }
 0xd95   : > { %v2451_v44 = vpack.c.bf16 %v2437_v11, %v2435_v1 }
 0xd97   : > { %3764 = vmatmul.msk.bf16.gmra.mxu2 %vm962_vm4, %v2451_v44 }
 0xd9c   : > { %v2440_v45 = vpop.f32.mrf.mxu2 }
 0xd9e   : > { %3770 = vmatmul.msk.bf16.gmra.mxu3 %vm962_vm4, %v2775_v58 }
 0xda4   : > { %v2442_v15 = vpop.f32.mrf.mxu2 }
 0xda5   : > { %v2452_v56 = vpack.c.bf16 %v2442_v15, %v2440_v45 }
 0xda7   : > { %3765 = vmatmul.msk.bf16.gmra.mxu2 %vm962_vm4, %v2452_v56 }
 0xdac   : > { %v2445_v32 = vpop.f32.mrf.mxu2 }
 0xdb1   : > { %v2503_v42 = vpop.f32.mrf.mxu3 }
 0xdb2   : > { %v2523_v8 = vmul.f32 0.35355338, %v2503_v42 }
 0xdb4   : > { %v2447_v4 = vpop.f32.mrf.mxu2  ;;  %v2531_v2 = vsel %vm1024_vm5, %v2523_v8, -inf }
 0xdb5   : > { %v2453_v57 = vpack.c.bf16 %v2447_v4, %v2445_v32  ;;  %2532 = vmax.xlane.f32.xlu1 %v2531_v2 }
 0xdb7   : > { %3766 = vmatmul.msk.bf16.gmra.mxu2 %vm962_vm4, %v2453_v57 }
 0xdb9   : > { %v2505_v22 = vpop.f32.mrf.mxu3 }
 0xdba   : > { %v2524_v50 = vmul.f32 0.35355338, %v2505_v22 }
 0xdbc   : > { %v2534_v41 = vsel %vm1024_vm5, %v2524_v50, -inf }
 0xdbd   : > { %2535 = vmax.xlane.f32.xlu0 %v2534_v41 }
 0xdc1   : > { %v2508_v31 = vpop.f32.mrf.mxu3 }
 0xdc2   : > { %v2525_v37 = vmul.f32 0.35355338, %v2508_v31 }
 0xdc4   : > { %v2537_v54 = vsel %vm1024_vm5, %v2525_v37, -inf }
 0xdc5   : > { %2538 = vmax.xlane.f32.xlu2 %v2537_v54 }
 0xdc7   : > { %3779 = vmatmul.msk.bf16.vlgmr.msrb.gmra.mxu2 %vm962_vm4, %v3047_v59 }
 0xdc9   : > { %v2510_v60 = vpop.f32.mrf.mxu3 }
 0xdca   : > { %v5673_v55 = vmul.f32 0.35355338, %v2510_v60 }
 0xdcc   : > { %v2540_v9 = vsel %vm1024_vm5, %v5673_v55, -inf }
 0xdcd   : > { %2541 = vmax.xlane.f32.xlu1 %v2540_v9 }
 0xdd1   : > { %v2513_v12 = vpop.f32.mrf.mxu3 }
 0xdd2   : > { %v5677_v0 = vmul.f32 0.35355338, %v2513_v12 }
 0xdd4   : > { %v2543_v49 = vsel %vm1024_vm5, %v5677_v0, -inf }
 0xdd5   : > { %2544 = vmax.xlane.f32.xlu0 %v2543_v49 }
 0xdd7   : > { %3780 = vmatmul.msk.bf16.gmra.mxu2 %vm962_vm4, %v3049_v13 }
 0xdd9   : > { %v2515_v14 = vpop.f32.mrf.mxu3 }
 0xdda   : > { %v5682_v19 = vmul.f32 0.35355338, %v2515_v14 }
 0xddc   : > { %v2546_v25 = vsel %vm1024_vm5, %v5682_v19, -inf }
 0xddd   : > { %2547 = vmax.xlane.f32.xlu2 %v2546_v25 }
 0xde1   : > { %v2518_v39 = vpop.f32.mrf.mxu3 }
 0xde2   : > { %v5686_v63 = vmul.f32 0.35355338, %v2518_v39 }
 0xde4   : > { %v2549_v29 = vsel %vm1024_vm5, %v5686_v63, -inf }
 0xde5   : > { %2550 = vmax.xlane.f32.xlu1 %v2549_v29 }
 0xde7   : > { %3781 = vmatmul.msk.bf16.gmra.mxu2 %vm962_vm4, %v3051_v26 }
 0xde9   : > { %v2520_v6 = vpop.f32.mrf.mxu3 }
 0xdea   : > { %v5691_v28 = vmul.f32 0.35355338, %v2520_v6 }
 0xdec   : > { %v2552_v53 = vsel %vm1024_vm5, %v5691_v28, -inf }
 0xded   : > { %2553 = vmax.xlane.f32.xlu0 %v2552_v53 }
 0xdef   : > { %v5712_v26 = vpop.f32.mrf.mxu2 }
 0xdf1   : > { %v5698_v27 = vpop.f32.mrf.mxu3 }
 0xdf5   : > { %2629 = vrot.lane.b32.xlu2 %v5516_v46, %s4633_s14 }
 0xdf7   : > { %3782 = vmatmul.msk.bf16.gmra.mxu2 %vm962_vm4, %v3053_v17  ;;  %v5722_v56 = vpop.f32.mrf.mxu2 }
 0xdf9   : > { %v2819_v5 = vpop.f32.mrf.mxu3 }
 0xdfa   : > { %v5700_v52 = vmul.f32 0.35355338, %v2819_v5 }
 0xdfc   : > { %v2848_v51 = vsel %vm1024_vm5, %v5700_v52, -inf }
 0xe01   : > { %v5704_v40 = vpop.f32.mrf.mxu3 }
 0xe09   : > { %v2824_v38 = vpop.f32.mrf.mxu3 }
 0xe0a   : > { %v5724_v32 = vmul.f32 0.35355338, %v2824_v38 }
 0xe11   : > { %v5716_v45 = vpop.f32.mrf.mxu3 }
 0xe19   : > { %v2829_v42 = vpop.f32.mrf.mxu3 }
 0xe1a   : > { %v5728_v4 = vpop.f32.mrf.mxu2  ;;  %v5732_v2 = vmul.f32 0.35355338, %v2829_v42 }
 0xe1c   : > { %v2860_v22 = vsel %vm1024_vm5, %v5732_v2, -inf }
 0xe1e   : > { %2849 = vmax.xlane.f32.xlu2 %v2848_v51  ;;  %v5762_v51 = vmul.f32 0.35355338, %v5698_v27  ;;  %v5774_v27 = vmul.f32 0.35355338, %v5704_v40 }
 0xe22   : > { %v5740_v41 = vpop.f32.mrf.mxu2 }
 0xe28   : > { %v2533_v48 = vpop.xlane.xlu1 %2532 }
 0xe29   : > { %v2555_v21 = vsub.f32 %v2523_v8, %v2533_v48  ;;  %v2854_v8 = vsel %vm1024_vm5, %v5724_v32, -inf }
 0xe2a   : > { %v5746_v60 = vpop.f32.mrf.mxu2 }
 0xe2b   : > { %v2563_v24 = vmul.f32 1.442695, %v2555_v21 }
 0xe2d   : > { %4165 = vpow2.f32 %v2563_v24 }
 0xe30   : > { %v2536_v33 = vpop.xlane.xlu0 %2535 }
 0xe31   : > { %v2556_v23 = vsub.f32 %v2524_v50, %v2536_v33  ;;  %v2832_v50 = vpop.f32.mrf.mxu3  ;;  %v2845_v33 = vsel %vm1024_vm5, %v5762_v51, -inf }
 0xe32   : > { %v5742_v31 = vmul.f32 0.35355338, %v2832_v50  ;;  %v5749_v49 = vpop.f32.mrf.mxu2 }
 0xe33   : > { %v5706_v30 = vpop.eup %4165  ;;  %v2565_v10 = vmul.f32 1.442695, %v2556_v23 }
 0xe34   : > { %v2579_v59 = vsel %vm1024_vm5, %v5706_v30, 0.0  ;;  %v2863_v54 = vsel %vm1024_vm5, %v5742_v31, -inf }
 0xe35   : > { %4167 = vpow2.f32 %v2565_v10  ;;  %2580 = vadd.xlane.f32.xlu1 %v2579_v59 }
 0xe38   : > { %v2539_v13 = vpop.xlane.xlu2 %2538 }
 0xe39   : > { %v2557_v1 = vsub.f32 %v2525_v37, %v2539_v13  ;;  %v2834_v13 = vpop.f32.mrf.mxu3 }
 0xe3a   : > { %v5752_v29 = vpop.f32.mrf.mxu2 }
 0xe3b   : > { %v5710_v3 = vpop.eup %4167  ;;  %v2567_v11 = vmul.f32 1.442695, %v2557_v1 }
 0xe3c   : > { %v2582_v44 = vsel %vm1024_vm5, %v5710_v3, 0.0 }
 0xe3d   : > { %4169 = vpow2.f32 %v2567_v11  ;;  %2583 = vadd.xlane.f32.xlu0 %v2582_v44  ;;  %v5784_v11 = vmul.f32 0.35355338, %v2834_v13 }
 0xe3f   : > { %v2866_v44 = vsel %vm1024_vm5, %v5784_v11, -inf }
 0xe40   : > { %v2542_v9 = vpop.xlane.xlu1 %2541 }
 0xe41   : > { %v2558_v12 = vsub.f32 %v5673_v55, %v2542_v9 }
 0xe42   : > { %v5767_v24 = vpop.f32.mrf.mxu2 }
 0xe43   : > { %v5718_v58 = vpop.eup %4169  ;;  %v2569_v14 = vmul.f32 1.442695, %v2558_v12 }
 0xe44   : > { %v2585_v15 = vsel %vm1024_vm5, %v5718_v58, 0.0 }
 0xe45   : > { %2586 = vadd.xlane.f32.xlu2 %v2585_v15  ;;  %4171 = vpow2.f32 %v2569_v14  ;;  %v5791_v15 = vmul.f32 0.35355338, %v5716_v45 }
 0xe48   : > { %v2545_v25 = vpop.xlane.xlu0 %2544 }
 0xe49   : > { %v2559_v39 = vsub.f32 %v5677_v0, %v2545_v25 }
 0xe4a   : > { %v3095_v59 = vpop.f32.mrf.mxu2 }
 0xe4b   : > { %v2571_v6 = vmul.f32 1.442695, %v2559_v39  ;;  %v5756_v17 = vpop.eup %4171 }
 0xe4c   : > { %v2588_v55 = vsel %vm1024_vm5, %v5756_v17, 0.0 }
 0xe4d   : > { %2855 = vmax.xlane.f32.xlu2 %v2854_v8  ;;  %4173 = vpow2.f32 %v2571_v6 }
 0xe4e   : > { %2627 = vrot.lane.b32.xlu1 %v5512_v35, %s4633_s14 }
 0xe50   : > { %v2548_v57 = vpop.xlane.xlu2 %2547 }
 0xe51   : > { %2625 = vrot.lane.b32.xlu0 %v5508_v62, %s4633_s14  ;;  %v2560_v48 = vsub.f32 %v5682_v19, %v2548_v57  ;;  %v2851_v19 = vsel %vm1024_vm5, %v5774_v27, -inf  ;;  %v2857_v57 = vsel %vm1024_vm5, %v5791_v15, -inf }
 0xe52   : > { %v3097_v42 = vpop.f32.mrf.mxu2 }
 0xe53   : > { %v5765_v21 = vpop.eup %4173  ;;  %v5793_v8 = vmul.f32 0.35355338, %v3097_v42 }
 0xe54   : > { %v2591_v23 = vsel %vm1024_vm5, %v5765_v21, 0.0 }
 0xe55   : > { %2861 = vmax.xlane.f32.xlu2 %v2860_v22  ;;  %v5797_v22 = vmul.f32 0.35355338, %v3095_v59  ;;  %v3126_v50 = vsel %vm1024_vm5, %v5793_v8, -inf }
 0xe56   : > { %2623 = vrot.lane.b32.xlu1 %v5522_v20, %s4633_s14  ;;  %s3457_s14 = sshll.u32 %s527_s26, 4  ;;  %s3458_s14 = int_to_ptr.vmem [resolvable:$true] %s3457_s14 }
 0xe58   : > { %v2630_v37 = vpop.permute.xlu2 %2629  ;;  %v2551_v53 = vpop.xlane.xlu1 %2550 }
 0xe59   : > { %2651 = vmatpush.bf16.msrb.mxu0 %v2630_v37  ;;  %v2561_v5 = vsub.f32 %v5686_v63, %v2551_v53  ;;  %v2573_v63 = vmul.f32 1.442695, %v2560_v48  ;;  %v3123_v37 = vsel %vm1024_vm5, %v5797_v22, -inf }
 0xe5b   : > { %v2575_v0 = vmul.f32 1.442695, %v2561_v5 }
 0xe5d   : > { %2864 = vmax.xlane.f32.xlu2 %v2863_v54  ;;  %4175 = vpow2.f32 %v2575_v0  ;;  %v3100_v54 = vpop.f32.mrf.mxu2 }
 0xe5e   : > { %4177 = vpow2.f32 %v2573_v63  ;;  %v5803_v45 = vmul.f32 0.35355338, %v3100_v54 }
 0xe60   : > { %v3129_v9 = vsel %vm1024_vm5, %v5803_v45, -inf  ;;  %v2554_v14 = vpop.xlane.xlu0 %2553 }
 0xe63   : > { %v5776_v10 = vpop.eup %4175 }
 0xe64   : > { %v2597_v38 = vsel %vm1024_vm5, %v5776_v10, 0.0  ;;  %v5782_v1 = vpop.eup %4177 }
 0xe65   : > { %v2594_v40 = vsel %vm1024_vm5, %v5782_v1, 0.0 }
 0xe75   : > { %2943 = vrot.lane.b32.xlu2 %v5516_v46, %s4635_s28 }
 0xe7b   : > { %2589 = vadd.xlane.f32.xlu0 %v2588_v55  ;;  %v3102_v55 = vpop.f32.mrf.mxu2 }
 0xe80   : > { %2846 = vmax.xlane.f32.xlu1 %v2845_v33 }
 0xe83   : > { %2592 = vadd.xlane.f32.xlu0 %v2591_v23 }
 0xe88   : > { %2852 = vmax.xlane.f32.xlu1 %v2851_v19 }
 0xe8b   : > { %2598 = vadd.xlane.f32.xlu0 %v2597_v38  ;;  %v3105_v38 = vpop.f32.mrf.mxu2 }
 0xe90   : > { %2595 = vadd.xlane.f32.xlu1 %v2594_v40 }
 0xe91   : > { %v2850_v12 = vpop.xlane.xlu2 %2849 }
 0xe93   : > { %2867 = vmax.xlane.f32.xlu0 %v2866_v44  ;;  %v5828_v44 = vmul.f32 0.35355338, %v3102_v55  ;;  %v3107_v42 = vpop.f32.mrf.mxu2  ;;  %v5848_v55 = vmul.f32 0.35355338, %v3105_v38 }
 0xe98   : > { %2858 = vmax.xlane.f32.xlu1 %v2857_v57 }
 0xe9b   : > { %3127 = vmax.xlane.f32.xlu0 %v3126_v50  ;;  %v3132_v50 = vsel %vm1024_vm5, %v5828_v44, -inf }
 0xe9e   : > { %3124 = vmax.xlane.f32.xlu2 %v3123_v37  ;;  %v3110_v37 = vpop.f32.mrf.mxu2 }
 0xea6   : > { %3130 = vmax.xlane.f32.xlu2 %v3129_v9  ;;  %v5840_v9 = vmul.f32 0.35355338, %v3107_v42 }
 0xea8   : > { %v2581_v25 = vpop.xlane.xlu1 %2580 }
 0xeaf   : > { %3219 = vrot.lane.b32.xlu0 %v5512_v35, %s4634_s1 }
 0xeb0   : > { %v2584_v6 = vpop.xlane.xlu0 %2583 }
 0xeb1   : > { %3221 = vrot.lane.b32.xlu1 %v5516_v46, %s4634_s1  ;;  %4179 = vrcp.f32 %v2584_v6 }
 0xeb2   : > { %4181 = vrcp.f32 %v2581_v25 }
 0xeb7   : > { %v4180_v0 = vpop.eup %4179 }
 0xeb8   : > { %v2587_v39 = vpop.xlane.xlu2 %2586  ;;  %v4182_v33 = vpop.eup %4181  ;;  %v2612_v46 = vmul.f32 %v4180_v0, %v5710_v3  ;;  %v2870_v3 = vsub.f32 %v5700_v52, %v2850_v12  ;;  %v3138_v12 = vsel %vm1024_vm5, %v5840_v9, -inf }
 0xeb9   : > { %v2611_v63 = vmul.f32 %v4182_v33, %v5706_v30 }
 0xeba   : > { %v2879_v30 = vmul.f32 1.442695, %v2870_v3  ;;  %v5855_v3 = vmul.f32 0.35355338, %v3110_v37 }
 0xebb   : > { %v2619_v59 = vpack.c.bf16 %v2612_v46, %v2611_v63 }
 0xebe   : > { %2941 = vrot.lane.b32.xlu2 %v5512_v35, %s4635_s28  ;;  %v2562_v35 = vsub.f32 %v5691_v28, %v2554_v14  ;;  %v3112_v14 = vpop.f32.mrf.mxu2 }
 0xebf   : > { %v5844_v25 = vmul.f32 0.35355338, %v3112_v14 }
 0xec0   : > { %v2628_v53 = vpop.permute.xlu1 %2627  ;;  %v5813_v5 = vpop.xlane.xlu2 %2855  ;;  %v2577_v13 = vmul.f32 1.442695, %v2562_v35 }
 0xec1   : > { %2652 = vmatpush.bf16.msrb.mxu0 %v2628_v53  ;;  %v3144_v53 = vsel %vm1024_vm5, %v5844_v25, -inf }
 0xec2   : > { %4183 = vpow2.f32 %v2577_v13 }
 0xec3   : > { %v2626_v48 = vpop.permute.xlu0 %2625  ;;  %4185 = vpow2.f32 %v2879_v30 }
 0xec4   : > { %4187 = vrcp.f32 %v2587_v39  ;;  %v3135_v39 = vsel %vm1024_vm5, %v5848_v55, -inf }
 0xec5   : > { %2653 = vmatpush.bf16.msrb.mxu0 %v2626_v48 }
 0xec6   : > { %3217 = vrot.lane.b32.xlu2 %v5508_v62, %s4634_s1 }
 0xec8   : > { %v2624_v23 = vpop.permute.xlu1 %2623  ;;  %v5819_v19 = vpop.xlane.xlu2 %2861 }
 0xec9   : > { %2654 = vmatpush.bf16.msrb.mxu0 %v2624_v23  ;;  %v5830_v57 = vpop.eup %4183 }
 0xeca   : > { %v5836_v52 = vpop.eup %4185 }
 0xecb   : > { %v2896_v54 = vsel %vm1024_vm5, %v5836_v52, 0.0  ;;  %v4188_v0 = vpop.eup %4187 }
 0xecc   : > { %3755 = vmatmul.msk.bf16.vlgmr.msrb.gmra.mxu0 %vm1024_vm5, %v2619_v59  ;;  %v2613_v63 = vmul.f32 %v4188_v0, %v5718_v58  ;;  %v3141_v58 = vsel %vm1024_vm5, %v5855_v3, -inf }
 0xece   : > { %2939 = vrot.lane.b32.xlu2 %v5508_v62, %s4635_s28  ;;  %v2600_v62 = vsel %vm1024_vm5, %v5830_v57, 0.0 }
 0xed0   : > { %v5826_v40 = vpop.xlane.xlu2 %2864 }
 0xed8   : > { %v2944_v28 = vpop.permute.xlu2 %2943 }
 0xed9   : > { %3133 = vmax.xlane.f32.xlu0 %v3132_v50  ;;  %2965 = vmatpush.bf16.msra.mxu0 %v2944_v28 }
 0xedb   : > { %2601 = vadd.xlane.f32.xlu1 %v2600_v62 }
 0xee1   : > { %2897 = vadd.xlane.f32.xlu0 %v2896_v54 }
 0xee9   : > { %3139 = vmax.xlane.f32.xlu0 %v3138_v12 }
 0xeee   : > { %v2590_v6 = vpop.xlane.xlu0 %2589 }
 0xeef   : > { %4189 = vrcp.f32 %v2590_v6 }
 0xef1   : > { %3145 = vmax.xlane.f32.xlu0 %v3144_v53 }
 0xef3   : > { %v2847_v48 = vpop.xlane.xlu1 %2846 }
 0xef4   : > { %v2869_v33 = vsub.f32 %v5762_v51, %v2847_v48 }
 0xef5   : > { %v4190_v46 = vpop.eup %4189 }
 0xef6   : > { %v2614_v23 = vmul.f32 %v4190_v46, %v5756_v17  ;;  %v2877_v35 = vmul.f32 1.442695, %v2869_v33  ;;  %v2593_v59 = vpop.xlane.xlu0 %2592 }
 0xef7   : > { %3136 = vmax.xlane.f32.xlu2 %v3135_v39 }
 0xef8   : > { %4191 = vpow2.f32 %v2877_v35  ;;  %v2620_v13 = vpack.c.bf16 %v2614_v23, %v2613_v63 }
 0xef9   : > { %4193 = vrcp.f32 %v2593_v59 }
 0xefa   : > { %3756 = vmatmul.msk.bf16.gmra.mxu0 %vm1024_vm5, %v2620_v13 }
 0xefb   : > { %v2853_v38 = vpop.xlane.xlu1 %2852 }
 0xefc   : > { %v2871_v53 = vsub.f32 %v5774_v27, %v2853_v38 }
 0xefe   : > { %v5858_v30 = vpop.eup %4191  ;;  %v2599_v51 = vpop.xlane.xlu0 %2598  ;;  %v2881_v63 = vmul.f32 1.442695, %v2871_v53 }
 0xeff   : > { %3142 = vmax.xlane.f32.xlu2 %v3141_v58  ;;  %v2893_v17 = vsel %vm1024_vm5, %v5858_v30, 0.0  ;;  %v4194_v50 = vpop.eup %4193 }
 0xf00   : > { %2894 = vadd.xlane.f32.xlu1 %v2893_v17  ;;  %v2615_v37 = vmul.f32 %v4194_v50, %v5765_v21  ;;  %v2138_v17 = vld [vmem:[#allocation14 + $0x14] sm:$0xf] }
 0xf03   : > { %v2596_v42 = vpop.xlane.xlu1 %2595 }
 0xf04   : > { %4195 = vrcp.f32 %v2596_v42  ;;  %v2872_v42 = vsub.f32 %v5724_v32, %v5813_v5 }
 0xf06   : > { %v5864_v28 = vpop.xlane.xlu0 %2867 }
 0xf0a   : > { %v4196_v62 = vpop.eup %4195 }
 0xf0b   : > { %v2616_v54 = vmul.f32 %v4196_v62, %v5782_v1  ;;  %v2693_v62 = vsel %vm1412_vm6, %v2138_v17, 0 }
 0xf0c   : > { %2702 = vmatpush.bf16.msrb.mxu1 %v2693_v62 }
 0xf0d   : > { %v2621_v12 = vpack.c.bf16 %v2616_v54, %v2615_v37  ;;  %v2883_v37 = vmul.f32 1.442695, %v2872_v42 }
 0xf0e   : > { %v3128_v14 = vpop.xlane.xlu0 %3127 }
 0xf0f   : > { %v3148_v6 = vsub.f32 %v5793_v8, %v3128_v14  ;;  %3757 = vmatmul.msk.bf16.gmra.mxu0 %vm1024_vm5, %v2621_v12  ;;  %v5878_v8 = vpop.xlane.xlu1 %2858 }
 0xf11   : > { %v3157_v0 = vmul.f32 1.442695, %v3148_v6  ;;  %v3125_v48 = vpop.xlane.xlu2 %3124 }
 0xf12   : > { %v3147_v33 = vsub.f32 %v5797_v22, %v3125_v48 }
 0xf13   : > { %4197 = vpow2.f32 %v3157_v0 }
 0xf14   : > { %v3155_v46 = vmul.f32 1.442695, %v3147_v33 }
 0xf16   : > { %4199 = vpow2.f32 %v3155_v46 }
 0xf17   : > { %4201 = vpow2.f32 %v2881_v63 }
 0xf18   : > { %4203 = vpow2.f32 %v2883_v37 }
 0xf19   : > { %v5872_v23 = vpop.eup %4197  ;;  %3215 = vrot.lane.b32.xlu1 %v5522_v20, %s4634_s1  ;;  %v3131_v21 = vpop.xlane.xlu2 %3130  ;;  %4205 = vrcp.f32 %v2599_v51  ;;  %v2874_v51 = vsub.f32 %v5732_v2, %v5819_v19  ;;  %s3459_s1 = sshll.u32 %s3456_s30, 4  ;;  %s3460_s1 = int_to_ptr.hbm [resolvable:$true] %s3459_s1 }
 0xf1a   : > { %v3174_v1 = vsel %vm1024_vm5, %v5872_v23, 0.0  ;;  %v3149_v32 = vsub.f32 %v5803_v45, %v3131_v21  ;;  %s4545_s22 = sshra.s32 %s3460_s1, 4  ;;  %s4546_s22 = int_to_ptr.hbm [resolvable:$true] %s4545_s22 }
 0xf1b   : > { %3175 = vadd.xlane.f32.xlu0 %v3174_v1  ;;  %s4547_s16 = scalar_lea.hbm %s4546_s22, 32  ;;  %p4552_p12 = scmp.lt.s32.totalorder %s4546_s22, %s6070_s11 }
 0xf1c   : > { %v5880_v27 = vpop.eup %4199  ;;  %v3159_v48 = vmul.f32 1.442695, %v3149_v32  ;;  %p4548_p1 = scmp.ne.s32.totalorder %s4546_s22, %s4547_s16  ;;  %p4553_p7 = scmp.lt.s32.totalorder %s4551_s4, %s4547_s16 }
 0xf1d   : > { %v3171_v22 = vsel %vm1024_vm5, %v5880_v27, 0.0  ;;  %v5884_v35 = vpop.eup %4201 }
 0xf1e   : > { %3172 = vadd.xlane.f32.xlu2 %v3171_v22  ;;  %v2899_v39 = vsel %vm1024_vm5, %v5884_v35, 0.0  ;;  %v5893_v54 = vpop.eup %4203  ;;  %p4549_p3 = pnand %p4548_p1, %p4805_p5  ;;  %p4554_p8 = por %p4553_p7, %p4552_p12 }
 0xf1f   : > { %v2902_v12 = vsel %vm1024_vm5, %v5893_v54, 0.0  ;;  %v4206_v46 = vpop.eup %4205 }
 0xf20   : > { %v2617_v45 = vmul.f32 %v4206_v46, %v5776_v10  ;;  %p4550_p4 = pneg %p4549_p3 }
 0xf21   : > { %v2942_v59 = vpop.permute.xlu2 %2941  ;;  %v3220_v38 = vpop.permute.xlu0 %3219 }
 0xf22   : > { %2966 = vmatpush.bf16.msra.mxu0 %v2942_v59  ;;  %p4555_p9 = pnand %p4554_p8, %p4550_p4 }
 0xf23   : > { %v3222_v13 = vpop.permute.xlu1 %3221  ;;  %2900 = vadd.xlane.f32.xlu0 %v2899_v39  ;;  %v2887_v39 = vmul.f32 1.442695, %v2874_v51 }
 0xf24   : > { %3243 = vmatpush.bf16.msrb.mxu3 %v3222_v13 }
 0xf28   : > { %3244 = vmatpush.bf16.msrb.mxu3 %v3220_v38 }
 0xf29   : > { %v3218_v58 = vpop.permute.xlu2 %3217 }
 0xf2c   : > { %3245 = vmatpush.bf16.msrb.mxu3 %v3218_v58  ;;  %v2876_v58 = vsub.f32 %v5784_v11, %v5864_v28 }
 0xf31   : > { %v2940_v50 = vpop.permute.xlu2 %2939 }
 0xf32   : > { %2967 = vmatpush.bf16.msra.mxu0 %v2940_v50  ;;  %v2891_v50 = vmul.f32 1.442695, %v2876_v58 }
 0xf36   : > { %2937 = vrot.lane.b32.xlu2 %v5522_v20, %s4635_s28  ;;  %s3445_s28 = scalar_lea.sflag [#allocation4], %s4836_s23 }
 0xf43   : > { %2903 = vadd.xlane.f32.xlu1 %v2902_v12 }
 0xf49   : > { %v2656_v14 = vpop.f32.mrf.mxu0 }
 0xf4c   : > { %v3134_v6 = vpop.xlane.xlu0 %3133 }
 0xf4d   : > { %v3150_v5 = vsub.f32 %v5828_v44, %v3134_v6 }
 0xf4e   : > { %v2602_v53 = vpop.xlane.xlu1 %2601 }
 0xf4f   : > { %v3161_v0 = vmul.f32 1.442695, %v3150_v5  ;;  %4207 = vrcp.f32 %v2602_v53  ;;  %v2873_v5 = vsub.f32 %v5791_v15, %v5878_v8 }
 0xf51   : > { %4209 = vpow2.f32 %v3161_v0  ;;  %v2658_v20 = vpop.f32.mrf.mxu0  ;;  %v2885_v0 = vmul.f32 1.442695, %v2873_v5 }
 0xf52   : > { %v2676_v33 = vpack.c.bf16 %v2658_v20, %v2656_v14  ;;  %4211 = vpow2.f32 %v3159_v48 }
 0xf53   : > { %4213 = vpow2.f32 %v2887_v39 }
 0xf54   : > { %3759 = vmatmul.msk.bf16.vlgmr.msrb.gmra.mxu1 %vm962_vm4, %v2676_v33  ;;  %v5900_v63 = vpop.xlane.xlu0 %2897 }
 0xf55   : > { %v4208_v1 = vpop.eup %4207 }
 0xf56   : > { %v2618_v44 = vmul.f32 %v4208_v1, %v5830_v57 }
 0xf57   : > { %v5906_v21 = vpop.eup %4209 }
 0xf58   : > { %v3180_v22 = vsel %vm1024_vm5, %v5906_v21, 0.0  ;;  %v2622_v59 = vpack.c.bf16 %v2618_v44, %v2617_v45  ;;  %v5911_v13 = vpop.eup %4211  ;;  %v2875_v44 = vsub.f32 %v5742_v31, %v5826_v40 }
 0xf59   : > { %3181 = vadd.xlane.f32.xlu0 %v3180_v22  ;;  %v3177_v2 = vsel %vm1024_vm5, %v5911_v13, 0.0  ;;  %v5915_v10 = vpop.eup %4213 }
 0xf5a   : > { %3758 = vmatmul.msk.bf16.gmra.mxu0 %vm1024_vm5, %v2622_v59  ;;  %v2908_v17 = vsel %vm1024_vm5, %v5915_v10, 0.0 }
 0xf5c   : > { %v3140_v38 = vpop.xlane.xlu0 %3139 }
 0xf5d   : > { %v3152_v12 = vsub.f32 %v5840_v9, %v3140_v38 }
 0xf5f   : > { %3178 = vadd.xlane.f32.xlu2 %v3177_v2 }
 0xf64   : > { %v3146_v19 = vpop.xlane.xlu0 %3145 }
 0xf65   : > { %v3154_v57 = vsub.f32 %v5844_v25, %v3146_v19  ;;  %v3165_v25 = vmul.f32 1.442695, %v3152_v12 }
 0xf67   : > { %v3169_v42 = vmul.f32 1.442695, %v3154_v57  ;;  %2909 = vadd.xlane.f32.xlu2 %v2908_v17 }
 0xf69   : > { %4215 = vpow2.f32 %v3169_v42 }
 0xf6a   : > { %v3137_v62 = vpop.xlane.xlu2 %3136  ;;  %4217 = vpow2.f32 %v2891_v50 }
 0xf6b   : > { %v3151_v37 = vsub.f32 %v5848_v55, %v3137_v62 }
 0xf6d   : > { %v3163_v14 = vmul.f32 1.442695, %v3151_v37 }
 0xf6f   : > { %v5924_v6 = vpop.eup %4215  ;;  %4219 = vpow2.f32 %v3163_v14 }
 0xf70   : > { %v3192_v11 = vsel %vm1024_vm5, %v5924_v6, 0.0  ;;  %v5928_v28 = vpop.eup %4217  ;;  %4221 = vpow2.f32 %v3165_v25 }
 0xf71   : > { %3193 = vadd.xlane.f32.xlu2 %v3192_v11  ;;  %v2914_v53 = vsel %vm1024_vm5, %v5928_v28, 0.0  ;;  %4223 = vpow2.f32 %v2885_v0 }
 0xf72   : > { %v3143_v48 = vpop.xlane.xlu2 %3142 }
 0xf73   : > { %v3153_v33 = vsub.f32 %v5855_v3, %v3143_v48  ;;  %v2895_v45 = vpop.xlane.xlu1 %2894  ;;  %v2889_v3 = vmul.f32 1.442695, %v2875_v44 }
 0xf75   : > { %v5930_v32 = vpop.eup %4219  ;;  %v3167_v1 = vmul.f32 1.442695, %v3153_v33 }
 0xf76   : > { %v3183_v9 = vsel %vm1024_vm5, %v5930_v32, 0.0  ;;  %v5938_v20 = vpop.eup %4221 }
 0xf77   : > { %v2661_v55 = vpop.f32.mrf.mxu0  ;;  %3184 = vadd.xlane.f32.xlu0 %v3183_v9  ;;  %v3186_v15 = vsel %vm1024_vm5, %v5938_v20, 0.0  ;;  %v5944_v51 = vpop.eup %4223  ;;  %4225 = vpow2.f32 %v3167_v1 }
 0xf78   : > { %v2905_v22 = vsel %vm1024_vm5, %v5944_v51, 0.0  ;;  %4227 = vpow2.f32 %v2889_v3 }
 0xf79   : > { %2915 = vadd.xlane.f32.xlu2 %v2914_v53  ;;  %4229 = vrcp.f32 %v2895_v45 }
 0xf7a   : > { %4231 = vrcp.f32 %v5900_v63 }
 0xf7d   : > { %v5950_v59 = vpop.eup %4225 }
 0xf7e   : > { %v3189_v19 = vsel %vm1024_vm5, %v5950_v59, 0.0  ;;  %v5955_v40 = vpop.eup %4227 }
 0xf7f   : > { %v2663_v8 = vpop.f32.mrf.mxu0  ;;  %3187 = vadd.xlane.f32.xlu0 %v3186_v15  ;;  %v4230_v57 = vpop.eup %4229  ;;  %v2911_v62 = vsel %vm1024_vm5, %v5955_v40, 0.0 }
 0xf80   : > { %v2677_v46 = vpack.c.bf16 %v2663_v8, %v2661_v55  ;;  %v4232_v17 = vpop.eup %4231  ;;  %v2925_v37 = vmul.f32 %v4230_v57, %v5858_v30 }
 0xf81   : > { %v2926_v12 = vmul.f32 %v4232_v17, %v5836_v52 }
 0xf82   : > { %3760 = vmatmul.msk.bf16.gmra.mxu1 %vm962_vm4, %v2677_v46 }
 0xf83   : > { %v2933_v5 = vpack.c.bf16 %v2926_v12, %v2925_v37 }
 0xf87   : > { %2906 = vadd.xlane.f32.xlu0 %v2905_v22 }
 0xf8b   : > { %v3216_v39 = vpop.permute.xlu1 %3215 }
 0xf8c   : > { %v2666_v38 = vpop.f32.mrf.mxu0  ;;  %3246 = vmatpush.bf16.msrb.mxu3 %v3216_v39 }
 0xf8e   : > { %v3176_v2 = vpop.xlane.xlu0 %3175 }
 0xf8f   : > { %3190 = vadd.xlane.f32.xlu0 %v3189_v19  ;;  %4233 = vrcp.f32 %v3176_v2 }
 0xf91   : > { %v3173_v31 = vpop.xlane.xlu2 %3172 }
 0xf92   : > { %4235 = vrcp.f32 %v3173_v31 }
 0xf94   : > { %v2668_v58 = vpop.f32.mrf.mxu0 }
 0xf95   : > { %v2678_v42 = vpack.c.bf16 %v2668_v58, %v2666_v38  ;;  %v4234_v50 = vpop.eup %4233 }
 0xf96   : > { %v3204_v14 = vmul.f32 %v4234_v50, %v5872_v23  ;;  %v2901_v55 = vpop.xlane.xlu0 %2900 }
 0xf97   : > { %3761 = vmatmul.msk.bf16.gmra.mxu1 %vm962_vm4, %v2678_v42  ;;  %2912 = vadd.xlane.f32.xlu0 %v2911_v62  ;;  %4237 = vrcp.f32 %v2901_v55  ;;  %v2139_v42 = vld [vmem:[#allocation14 + $0x18] sm:$0xf] }
 0xf98   : > { %v4236_v63 = vpop.eup %4235 }
 0xf99   : > { %v3203_v11 = vmul.f32 %v4236_v63, %v5880_v27  ;;  %v2938_v25 = vpop.permute.xlu2 %2937  ;;  %v3007_v63 = vsel %vm1412_vm6, %v2139_v42, 0  ;;  %v3816_v42 = vld [vmem:[#allocation16 + $0x10] sm:$0xff] }
 0xf9a   : > { %2968 = vmatpush.bf16.msra.mxu0 %v2938_v25  ;;  %3016 = vmatpush.bf16.msra.mxu1 %v3007_v63 }
 0xf9b   : > { %v3211_v9 = vpack.c.bf16 %v3204_v14, %v3203_v11  ;;  %v2140_v14 = vld [vmem:[#allocation14 + $0x1c] sm:$0xf] }
 0xf9c   : > { %v3285_v11 = vsel %vm1412_vm6, %v2140_v14, 0 }
 0xf9d   : > { %3771 = vmatmul.msk.bf16.vlgmr.msra.gmra.mxu0 %vm1024_vm5, %v2933_v5  ;;  %3783 = vmatmul.msk.bf16.vlgmr.msrb.gmra.mxu3 %vm1024_vm5, %v3211_v9  ;;  %v4238_v53 = vpop.eup %4237 }
 0xf9e   : > { %v2927_v52 = vmul.f32 %v4238_v53, %v5884_v35  ;;  %3294 = vmatpush.bf16.msrb.mxu0 %v3285_v11 }
 0xfb6   : > { %v2904_v30 = vpop.xlane.xlu1 %2903 }
 0xfb7   : > { %4239 = vrcp.f32 %v2904_v30 }
 0xfbd   : > { %v4240_v0 = vpop.eup %4239 }
 0xfbe   : > { %v2928_v23 = vmul.f32 %v4240_v0, %v5893_v54 }
 0xfc0   : > { %v2934_v48 = vpack.c.bf16 %v2928_v23, %v2927_v52 }
 0xfc2   : > { %3772 = vmatmul.msk.bf16.gmra.mxu0 %vm1024_vm5, %v2934_v48 }
 0xfcc   : > { %v3182_v27 = vpop.xlane.xlu0 %3181 }
 0xfcd   : > { %4241 = vrcp.f32 %v3182_v27 }
 0xfd2   : > { %v3179_v33 = vpop.xlane.xlu2 %3178 }
 0xfd3   : > { %4243 = vrcp.f32 %v3179_v33  ;;  %v4242_v15 = vpop.eup %4241 }
 0xfd4   : > { %v3206_v1 = vmul.f32 %v4242_v15, %v5906_v21 }
 0xfd7   : > { %v2671_v8 = vpop.f32.mrf.mxu0 }
 0xfd9   : > { %v4244_v46 = vpop.eup %4243 }
 0xfda   : > { %v3205_v45 = vmul.f32 %v4244_v46, %v5911_v13  ;;  %v2910_v39 = vpop.xlane.xlu2 %2909 }
 0xfdc   : > { %v3212_v44 = vpack.c.bf16 %v3206_v1, %v3205_v45 }
 0xfde   : > { %3784 = vmatmul.msk.bf16.gmra.mxu3 %vm1024_vm5, %v3212_v44 }
 0xfdf   : > { %v2673_v35 = vpop.f32.mrf.mxu0 }
 0xfe0   : > { %v2679_v22 = vpack.c.bf16 %v2673_v35, %v2671_v8 }
 0xfe2   : > { %3762 = vmatmul.msk.bf16.gmra.mxu1 %vm962_vm4, %v2679_v22 }
 0xfe4   : > { %v3194_v31 = vpop.xlane.xlu2 %3193 }
 0xfea   : > { %v3185_v54 = vpop.xlane.xlu0 %3184 }
 0xfeb   : > { %4245 = vrcp.f32 %v3185_v54 }
 0xff1   : > { %v4246_v38 = vpop.eup %4245 }
 0xff2   : > { %v3188_v3 = vpop.xlane.xlu0 %3187  ;;  %v3207_v19 = vmul.f32 %v4246_v38, %v5930_v32 }
 0xff3   : > { %4247 = vrcp.f32 %v3188_v3 }
 0xff4   : > { %4249 = vrcp.f32 %v2910_v39 }
 0xff9   : > { %v4248_v2 = vpop.eup %4247 }
 0xffa   : > { %v3208_v21 = vmul.f32 %v4248_v2, %v5938_v20  ;;  %v2907_v13 = vpop.xlane.xlu0 %2906  ;;  %v4250_v58 = vpop.eup %4249 }
 0xffb   : > { %4251 = vrcp.f32 %v2907_v13  ;;  %v2930_v50 = vmul.f32 %v4250_v58, %v5915_v10  ;;  %v2916_v20 = vpop.xlane.xlu2 %2915  ;;  %v3817_v58 = vld [vmem:[#allocation16 + $0x18] sm:$0xff] }
 0xffc   : > { %v3213_v57 = vpack.c.bf16 %v3208_v21, %v3207_v19  ;;  %4253 = vrcp.f32 %v3194_v31  ;;  %3377 = vmatpush.bf16.msrb.mxu1 %v3817_v58 }
 0xffe   : > { %3785 = vmatmul.msk.bf16.gmra.mxu3 %vm1024_vm5, %v3213_v57 }
0x1000   : > { %3378 = vmatpush.bf16.msrb.mxu1 %v3816_v42 }
0x1001   : > { %v4252_v17 = vpop.eup %4251 }
0x1002   : > { %v2929_v62 = vmul.f32 %v4252_v17, %v5944_v51  ;;  %v3191_v37 = vpop.xlane.xlu0 %3190  ;;  %v4254_v12 = vpop.eup %4253 }
0x1003   : > { %4255 = vrcp.f32 %v3191_v37  ;;  %v3210_v10 = vmul.f32 %v4254_v12, %v5924_v6 }
0x1004   : > { %v2935_v32 = vpack.c.bf16 %v2930_v50, %v2929_v62  ;;  %4257 = vrcp.f32 %v2916_v20 }
0x1006   : > { %3773 = vmatmul.msk.bf16.gmra.mxu0 %vm1024_vm5, %v2935_v32 }
0x1009   : > { %v4256_v25 = vpop.eup %4255 }
0x100a   : > { %v3209_v51 = vmul.f32 %v4256_v25, %v5950_v59  ;;  %v2913_v5 = vpop.xlane.xlu0 %2912  ;;  %v4258_v55 = vpop.eup %4257 }
0x100b   : > { %4259 = vrcp.f32 %v2913_v5  ;;  %v2932_v53 = vmul.f32 %v4258_v55, %v5928_v28  ;;  %v2704_v28 = vpop.f32.mrf.mxu1  ;;  %v3972_v5 = vld [vmem:[%s6068_s9 + $0x1] ss:$0 sm:$0xff] }
0x100c   : > { %v3214_v9 = vpack.c.bf16 %v3210_v10, %v3209_v51  ;;  %v2749_v14 = vadd.f32 %v5712_v26, %v2704_v28 }
0x100e   : > { %3786 = vmatmul.msk.bf16.gmra.mxu3 %vm1024_vm5, %v3214_v9 }
0x1011   : > { %v4260_v30 = vpop.eup %4259 }
0x1012   : > { %v2931_v0 = vmul.f32 %v4260_v30, %v5955_v40 }
0x1013   : > { %v2706_v1 = vpop.f32.mrf.mxu1 }
0x1014   : > { %v2936_v52 = vpack.c.bf16 %v2932_v53, %v2931_v0  ;;  %v2751_v10 = vadd.f32 %v5722_v56, %v2706_v1 }
0x1016   : > { %3774 = vmatmul.msk.bf16.gmra.mxu0 %vm1024_vm5, %v2936_v52 }
0x101a   : > { %v2970_v23 = vpop.f32.mrf.mxu0 }
0x101b   : > { %v2709_v35 = vpop.f32.mrf.mxu1 }
0x101c   : > { %v2754_v56 = vadd.f32 %v5728_v4, %v2709_v35 }
0x1020   : > { %v3248_v48 = vpop.f32.mrf.mxu3 }
0x1022   : > { %v2972_v27 = vpop.f32.mrf.mxu0 }
0x1023   : > { %v2990_v6 = vpack.c.bf16 %v2972_v27, %v2970_v23  ;;  %v2711_v22 = vpop.f32.mrf.mxu1 }
0x1025   : > { %3775 = vmatmul.msk.bf16.vlgmr.msra.gmra.mxu1 %vm962_vm4, %v2990_v6 }
0x1028   : > { %v3250_v59 = vpop.f32.mrf.mxu3 }
0x1029   : > { %v3268_v33 = vpack.c.bf16 %v3250_v59, %v3248_v48 }
0x102b   : > { %3787 = vmatmul.msk.bf16.vlgmr.msrb.gmra.mxu0 %vm962_vm4, %v3268_v33  ;;  %v2714_v54 = vpop.f32.mrf.mxu1  ;;  %v2756_v33 = vadd.f32 %v5740_v41, %v2711_v22 }
0x102c   : > { %v2759_v4 = vadd.f32 %v5746_v60, %v2714_v54 }
0x1033   : > { %v2716_v38 = vpop.f32.mrf.mxu1 }
0x1034   : > { %v2761_v41 = vadd.f32 %v5749_v49, %v2716_v38 }
0x103f   : > { %v2975_v15 = vpop.f32.mrf.mxu0 }
0x1047   : > { %v2977_v8 = vpop.f32.mrf.mxu0 }
0x1048   : > { %v2991_v46 = vpack.c.bf16 %v2977_v8, %v2975_v15 }
0x104a   : > { %3776 = vmatmul.msk.bf16.gmra.mxu1 %vm962_vm4, %v2991_v46 }
0x105f   : > { %v5993_v31 = vpop.f32.mrf.mxu1 }
0x1060   : > { %v2764_v42 = vadd.f32 %v5752_v29, %v5993_v31 }
0x1061   : > { %v3253_v40 = vpop.f32.mrf.mxu3 }
0x1067   : > { %v2721_v62 = vpop.f32.mrf.mxu1 }
0x1068   : > { %v2766_v49 = vadd.f32 %v5767_v24, %v2721_v62 }
0x1069   : > { %v3255_v45 = vpop.f32.mrf.mxu3 }
0x106a   : > { %v3269_v44 = vpack.c.bf16 %v3255_v45, %v3253_v40 }
0x106c   : > { %3788 = vmatmul.msk.bf16.gmra.mxu0 %vm962_vm4, %v3269_v44 }
0x1081   : > { %v3258_v3 = vpop.f32.mrf.mxu3 }
0x1083   : > { %v2980_v39 = vpop.f32.mrf.mxu0 }
0x1089   : > { %v3260_v2 = vpop.f32.mrf.mxu3 }
0x108a   : > { %v3270_v19 = vpack.c.bf16 %v3260_v2, %v3258_v3 }
0x108b   : > { %v2982_v21 = vpop.f32.mrf.mxu0 }
0x108c   : > { %v2992_v13 = vpack.c.bf16 %v2982_v21, %v2980_v39  ;;  %3789 = vmatmul.msk.bf16.gmra.mxu0 %vm962_vm4, %v3270_v19 }
0x108e   : > { %3777 = vmatmul.msk.bf16.gmra.mxu1 %vm962_vm4, %v2992_v13 }
0x1091   : > { %v3263_v57 = vpop.f32.mrf.mxu3 }
0x1093   : > { %v2985_v17 = vpop.f32.mrf.mxu0 }
0x1099   : > { %v3265_v50 = vpop.f32.mrf.mxu3 }
0x109a   : > { %v3271_v37 = vpack.c.bf16 %v3265_v50, %v3263_v57 }
0x109b   : > { %v2987_v63 = vpop.f32.mrf.mxu0 }
0x109c   : > { %v2993_v32 = vpack.c.bf16 %v2987_v63, %v2985_v17  ;;  %3790 = vmatmul.msk.bf16.gmra.mxu0 %vm962_vm4, %v3271_v37 }
0x109e   : > { %3778 = vmatmul.msk.bf16.gmra.mxu1 %vm962_vm4, %v2993_v32 }
0x10a2   : > { %v3018_v20 = vpop.f32.mrf.mxu1 }
0x10a3   : > { %v3038_v11 = vadd.f32 %v3018_v20, %v2749_v14 }
0x10a8   : > { %v3296_v12 = vpop.f32.mrf.mxu0 }
0x10a9   : > { %v3316_v51 = vadd.f32 %v3296_v12, %v3038_v11 }
0x10aa   : > { %v3020_v25 = vpop.f32.mrf.mxu1 }
0x10ab   : > { %v3039_v9 = vadd.f32 %v3020_v25, %v2751_v10  ;;  %v3327_v30 = vadd.f32 %v3972_v5, %v3316_v51 }
0x10ad   : > { %v3335_v52 = vadd.f32 %v3327_v30, %v5477_v61 }
0x10b0   : > { %v3298_v55 = vpop.f32.mrf.mxu0 }
0x10b1   : > { %v3317_v53 = vadd.f32 %v3298_v55, %v3039_v9 }
0x10b3   : > { %v3328_v0 = vadd.f32 %v3972_v5, %v3317_v53 }
0x10b5   : > { %v3336_v23 = vadd.f32 %v3328_v0, %v5479_v47 }
0x10b7   : > { %v3343_v48 = vpack.c.bf16 %v3336_v23, %v3335_v52 }
0x10b9   : > { %3799 = vmatmul.msk.bf16.vlgmr.msrb.gmra.mxu1 %vm802_vm10, %v3343_v48 }
0x10c7   : > { %v3023_v26 = vpop.f32.mrf.mxu1 }
0x10c8   : > { %v3040_v6 = vadd.f32 %v3023_v26, %v2754_v56 }
0x10cf   : > { %v3025_v59 = vpop.f32.mrf.mxu1 }
0x10d0   : > { %v3041_v8 = vadd.f32 %v3025_v59, %v2756_v33 }
0x10e9   : > { %v3301_v27 = vpop.f32.mrf.mxu0 }
0x10ea   : > { %v3318_v15 = vadd.f32 %v3301_v27, %v3040_v6 }
0x10ec   : > { %v3329_v28 = vadd.f32 %v3972_v5, %v3318_v15 }
0x10ee   : > { %v3337_v61 = vadd.f32 %v3329_v28, %v5484_v16 }
0x10f1   : > { %v3303_v46 = vpop.f32.mrf.mxu0 }
0x10f2   : > { %v3319_v40 = vadd.f32 %v3303_v46, %v3041_v8 }
0x10f4   : > { %v3330_v1 = vadd.f32 %v3972_v5, %v3319_v40 }
0x10f6   : > { %v3338_v47 = vadd.f32 %v3330_v1, %v5486_v7 }
0x10f8   : > { %v3344_v45 = vpack.c.bf16 %v3338_v47, %v3337_v61 }
0x10fa   : > { %3800 = vmatmul.msk.bf16.gmra.mxu1 %vm802_vm10, %v3344_v45 }
0x1109   : > { %v3306_v44 = vpop.f32.mrf.mxu0 }
0x110b   : > { %v3028_v3 = vpop.f32.mrf.mxu1 }
0x110c   : > { %v3042_v35 = vadd.f32 %v3028_v3, %v2759_v4 }
0x110e   : > { %v3320_v22 = vadd.f32 %v3306_v44, %v3042_v35 }
0x1110   : > { %v3331_v21 = vadd.f32 %v3972_v5, %v3320_v22 }
0x1111   : > { %v3308_v39 = vpop.f32.mrf.mxu0 }
0x1112   : > { %v3339_v16 = vadd.f32 %v3331_v21, %v5491_v34 }
0x1113   : > { %v3030_v2 = vpop.f32.mrf.mxu1 }
0x1114   : > { %v3043_v19 = vadd.f32 %v3030_v2, %v2761_v41 }
0x1116   : > { %v3321_v13 = vadd.f32 %v3308_v39, %v3043_v19 }
0x1118   : > { %v3332_v57 = vadd.f32 %v3972_v5, %v3321_v13 }
0x1119   : > { %v3311_v58 = vpop.f32.mrf.mxu0 }
0x111a   : > { %v3340_v7 = vadd.f32 %v3332_v57, %v5493_v36 }
0x111b   : > { %v3033_v17 = vpop.f32.mrf.mxu1 }
0x111c   : > { %v3345_v60 = vpack.c.bf16 %v3340_v7, %v3339_v16  ;;  %v3044_v54 = vadd.f32 %v3033_v17, %v2764_v42 }
0x111e   : > { %3801 = vmatmul.msk.bf16.gmra.mxu1 %vm802_vm10, %v3345_v60  ;;  %v3322_v38 = vadd.f32 %v3311_v58, %v3044_v54 }
0x1120   : > { %v3333_v32 = vadd.f32 %v3972_v5, %v3322_v38 }
0x1121   : > { %v3313_v63 = vpop.f32.mrf.mxu0 }
0x1122   : > { %v3341_v36 = vadd.f32 %v3333_v32, %v5498_v18 }
0x1123   : > { %v3035_v50 = vpop.f32.mrf.mxu1 }
0x1124   : > { %v3045_v37 = vadd.f32 %v3035_v50, %v2766_v49 }
0x1126   : > { %v3323_v20 = vadd.f32 %v3313_v63, %v3045_v37 }
0x1128   : > { %v3334_v34 = vadd.f32 %v3972_v5, %v3323_v20 }
0x112a   : > { %v3342_v12 = vadd.f32 %v3334_v34, %v5500_v43 }
0x112c   : > { %v3346_v14 = vpack.c.bf16 %v3342_v12, %v3341_v36 }
0x112e   : > { %3802 = vmatmul.msk.bf16.gmra.mxu1 %vm802_vm10, %v3346_v14 }
0x1136   : > { %v3380_v29 = vpop.f32.mrf.mxu1 }
0x1137   : > { %v3400_v31 = vadd.f32 %v3380_v29, %v3335_v52 }
0x1139   : > { %3408 = vxpose.xlu1.b32.start [1/8] (short) (narrow) %v3400_v31, 32 }
0x113e   : > { %v3382_v11 = vpop.f32.mrf.mxu1 }
0x113f   : > { %v3401_v25 = vadd.f32 %v3382_v11, %v3336_v23 }
0x1141   : > { %3409 = vxpose.xlu1.b32.cont [2/8] (short) (narrow) %v3401_v25, 32 }
0x1177   : > { %v3385_v24 = vpop.f32.mrf.mxu1 }
0x1178   : > { %v3402_v62 = vadd.f32 %v3385_v24, %v3337_v61 }
0x117a   : > { %3410 = vxpose.xlu1.b32.cont [3/8] (short) (narrow) %v3402_v62, 32 }
0x117f   : > { %v3387_v10 = vpop.f32.mrf.mxu1 }
0x1180   : > { %v3403_v51 = vadd.f32 %v3387_v10, %v3338_v47 }
0x1182   : > { %3411 = vxpose.xlu1.b32.cont [4/8] (short) (narrow) %v3403_v51, 32 }
0x119b   : > { %v3390_v5 = vpop.f32.mrf.mxu1 }
0x119c   : > { %v3404_v18 = vadd.f32 %v3390_v5, %v3339_v16 }
0x119e   : > { %3412 = vxpose.xlu1.b32.cont [5/8] (short) (narrow) %v3404_v18, 32 }
0x11a3   : > { %v3392_v43 = vpop.f32.mrf.mxu1 }
0x11a4   : > { %v3405_v9 = vadd.f32 %v3392_v43, %v3340_v7 }
0x11a6   : > { %3413 = vxpose.xlu1.b32.cont [6/8] (short) (narrow) %v3405_v9, 32 }
0x11ab   : > { %v3395_v55 = vpop.f32.mrf.mxu1 }
0x11ac   : > { %v3406_v30 = vadd.f32 %v3395_v55, %v3341_v36 }
0x11ae   : > { %3414 = vxpose.xlu1.b32.cont [7/8] (short) (narrow) %v3406_v30, 32 }
0x11b3   : > { %v3397_v53 = vpop.f32.mrf.mxu1 }
0x11b4   : > { %v3407_v0 = vadd.f32 %v3397_v53, %v3342_v12 }
0x11b6   : > { %3415 = vxpose.xlu1.b32.end [8/8] (short) (narrow) %v3407_v0, 32 }
0x1222   : > { %v3424_v52 = vpop.trf.xlu1 }
0x1223   : > { %3440 = vst.msk [vmem:[%s527_s26] sm:$0xff] %vm1024_vm5, %v3424_v52 }
0x122a   : > { %v3425_v23 = vpop.trf.xlu1 }
0x122b   : > { %3441 = vst.msk [vmem:[%s527_s26 + $0x8] sm:$0xff] %vm1024_vm5, %v3425_v23 }
0x1232   : > { %v3426_v48 = vpop.trf.xlu1 }
0x1233   : > { %3442 = vst.msk [vmem:[%s527_s26 + $0x10] sm:$0xff] %vm1024_vm5, %v3426_v48 }
0x123a   : > { %v3427_v26 = vpop.trf.xlu1 }
0x123b   : > { %3443 = vst.msk [vmem:[%s527_s26 + $0x18] sm:$0xff] %vm1024_vm5, %v3427_v26 }
0x123c   : > { %4558 = shalt.err (!%p4555_p9)
}
0x123d   : > { %s4636_s23 = smov 128   ;;  %s4637_s12 = smov 8  }
0x123e   : > { %3856 = dma.vmem_to_hbm [thread:$0]  (%p4805_p5), %s3458_s14, 512, %s3460_s1, %s3445_s28, %s4636_s23, %s4636_s23, %s4637_s12  }
0x123f PF: > { %s3474_s26 = sand.u32 1, %s4601_s17   ;;  %p6090_p10 = scmp.ge.s32.totalorder %s4613_s20, 2 }
0x1240   : > { %s3475_s29 = scalar_lea.sflag [#allocation4], %s3474_s26 }
0x1241   : > { %p3888_p13 = pnand %p6090_p10, %p4809_p6 }
0x1243   : > { %p3889_p11 = pneg %p3888_p13 }
0x1245   : > { %4596 = dma.done.wait (%p3889_p11), %s3475_s29, 512  }
0x1246   : > { %4598 = vsyncadd (%p3889_p11), %s3475_s29, 4294966784  ;;  %p28_p0 = scmp.ge.s32.totalorder %s4779_s3, 4   ;;  %s6091_s17 = smov %s4605_s18 }
0x1247   : > { %s6092_s18 = smov %s4609_s19  ;;  %s6093_s19 = smov %s4790_s13 }
0x1248   : > { %s6094_s20 = smov %s4779_s3  ;;  %30 = sbr.rel (!%p28_p0) target bundleno = 16 (0x10), region = 146 }
0x124d   :  { %3481 = vsyncpa [#allocation3], 1 }
0x124e   :  { %3483 = vsyncpa [#allocation3 + $0x1], 1 }
0x124f   :  { %3484 = vsyncpa [#allocation6], 1 }
0x1250   :  { %3485 = vsyncpa [#allocation9], 1 }
0x1251   :  { %3486 = vsyncpa [#allocation12], 1 }
0x1252   :  { %3487 = vsyncpa [#allocation15], 1 }
0x1253   :  { %3488 = vsyncpa [#allocation4], 1 }
0x1254   :  { %3490 = vsyncpa [#allocation4 + $0x1], 1 }

// kernel: tpu_custom_call.1
= control target key start
LH: loop header
LB: loop body
LE: loop exit
PB: predicated region body
PF: predicated region fallthrough
CT: control target
= control target key end

     0   :  { %s6059_s0 = inlined_call_operand.hbm [shape: f32[2,4,64], index: 0, kind: input, shape index: {}]   ;;  %s6060_s1 = inlined_call_operand.hbm [shape: bf16[4,32], index: 1, kind: input, shape index: {}]   ;;  %s6061_s2 = inlined_call_operand.hbm [shape: f32[1,32], index: 2, kind: input, shape index: {}]   ;;  %s6062_s3 = inlined_call_operand.hbm [shape: f32[1,32], index: 3, kind: input, shape index: {}]   ;;  %s6063_s4 = inlined_call_operand.hbm [shape: bf16[32,32], index: 4, kind: input, shape index: {}]   ;;  %s6064_s5 = inlined_call_operand.hbm [shape: f32[1,32], index: 5, kind: input, shape index: {}]   ;;  %s6065_s6 = inlined_call_operand.hbm [shape: bf16[2,32,96], index: 6, kind: input, shape index: {}]   ;;  %s6066_s7 = inlined_call_operand.vmem [shape: f32[2,1,96], index: 7, kind: input, shape index: {}]   ;;  %s6067_s8 = inlined_call_operand.hbm [shape: bf16[2,32,32], index: 8, kind: input, shape index: {}]   ;;  %s6068_s9 = inlined_call_operand.vmem [shape: f32[2,1,32], index: 9, kind: input, shape index: {}]   ;;  %s6069_s10 = inlined_call_operand.hbm [shape: bf16[2,32,32], index: 10, kind: input, shape index: {}]   ;;  %s6070_s11 = inlined_call_operand.hbm [shape: f32[2,32,64], index: 11, kind: output, shape index: {}]  }
   0x1   :  { %6071 = sst [smem:[#allocation24_spill]] %s6060_s1 }
   0x2   :  { %6072 = sst [smem:[#allocation25_spill]] %s6061_s2 }
   0x3   :  { %6073 = sst [smem:[#allocation26_spill]] %s6062_s3 }
   0x4   :  { %6074 = sst [smem:[#allocation27_spill]] %s6063_s4 }
   0x5   :  { %6075 = sst [smem:[#allocation28_spill]] %s6064_s5 }
   0x6   :  { %6076 = sst [smem:[#allocation29_spill]] %s6065_s6 }
   0x7   :  { %16 = vsyncpa [#allocation3], 0 }
   0x8   :  { %18 = vsyncpa [#allocation3 + $0x1], 0 }
   0x9   :  { %19 = vsyncpa [#allocation6], 0 }
   0xa   :  { %20 = vsyncpa [#allocation9], 0 }
   0xb   :  { %21 = vsyncpa [#allocation12], 0 }
   0xc   :  { %22 = vsyncpa [#allocation15], 0 }
   0xd   :  { %23 = vsyncpa [#allocation4], 0 }
   0xe   :  { %25 = vsyncpa [#allocation4 + $0x1], 0  ;;  %s4698_s17 = smov 0   ;;  %s4700_s18 = smov 0  }
   0xf   :  { %s4702_s19 = smov 0   ;;  %s4704_s20 = smov 0  }
  0x10 LB: > { %s6077_s1 = sld [smem:[#allocation24_spill]]  ;;  %s4722_s24 = sadd.s32 4294967295, %s4613_s20   ;;  %s4613_s20 = sphi %s4704_s20, %s6094_s20   ;;  %s4609_s19 = sphi %s4702_s19, %s6093_s19   ;;  %s4605_s18 = sphi %s4700_s18, %s6092_s18   ;;  %s4601_s17 = sphi %s4698_s17, %s6091_s17  }
  0x11   : > { %p3610_p0 = scmp.ge.s32.totalorder %s4613_s20, 1  ;;  %p52_p1 = scmp.eq.s32.totalorder %s4722_s24, 0 }
  0x12   : > { %p298_p2 = scmp.lt.s32.totalorder %s4613_s20, 3  ;;  %s4615_s26 = smov [#allocation5]  }
  0x13   : > { %s312_s27 = sshll.u32 %s4615_s26, 4  ;;  %s6079_s3 = sld [smem:[#allocation26_spill]]  ;;  %s313_s27 = int_to_ptr.vmem [resolvable:$true] %s312_s27 }
  0x14   : > { %p4727_p3 = pnand %p3610_p0, %p298_p2  ;;  %s4616_s13 = smov [#allocation8]  }
  0x15   : > { %s336_s14 = sshll.u32 %s4616_s13, 4  ;;  %s6081_s5 = sld [smem:[#allocation28_spill]]  ;;  %s337_s14 = int_to_ptr.vmem [resolvable:$true] %s336_s14 }
  0x16   : > { %s310_s23 = sshll.u32 %s6077_s1, 4  ;;  %p3858_p5 = pneg %p4727_p3  ;;  %s311_s23 = int_to_ptr.hbm [resolvable:$true] %s310_s23 }
  0x17   : > { %s4617_s22 = smov [#allocation11]   ;;  %s388_s1 = sshll.u32 %s6067_s8, 4  ;;  %s389_s1 = int_to_ptr.hbm [resolvable:$true] %s388_s1 }
  0x18   : > { %p4739_p6 = pnand %p3858_p5, %p52_p1  ;;  %s362_s26 = sshll.u32 %s4617_s22, 4  ;;  %s363_s26 = int_to_ptr.vmem [resolvable:$true] %s362_s26 }
  0x19   : > { %s334_s30 = sshll.u32 %s6079_s3, 4  ;;  %s4618_s13 = smov [#allocation14]   ;;  %s335_s30 = int_to_ptr.hbm [resolvable:$true] %s334_s30 }
  0x1a   : > { %3861 = dma.hbm_to_vmem [thread:$0]  (!%p4739_p6), %s311_s23, 32, %s313_s27, [#allocation6]  }
  0x1b   : > { %s360_s21 = sshll.u32 %s6081_s5, 4  ;;  %s390_s15 = sshll.u32 %s4618_s13, 4  ;;  %s361_s21 = int_to_ptr.hbm [resolvable:$true] %s360_s21  ;;  %s391_s15 = int_to_ptr.vmem [resolvable:$true] %s390_s15 }
  0x1c   : > { %3867 = dma.hbm_to_vmem [thread:$0]  (!%p4739_p6), %s335_s30, 16, %s337_s14, [#allocation9]  }
  0x1d   : > { %3873 = dma.hbm_to_vmem [thread:$0]  (!%p4739_p6), %s361_s21, 16, %s363_s26, [#allocation12]  }
  0x1e   : > { %s6082_s2 = sld [smem:[#allocation25_spill]]  ;;  %s4619_s23 = smov 64  }
  0x1f   : > { %s4620_s27 = smov 4   ;;  %s6083_s4 = sld [smem:[#allocation27_spill]] }
  0x20   : > { %3879 = dma.hbm_to_vmem [thread:$0]  (!%p4739_p6), %s389_s1, 512, %s391_s15, [#allocation15], %s4619_s23, %s4619_s23, %s4620_s27  }
  0x21   : > { %s4621_s28 = smov [#allocation7]   ;;  %s4622_s3 = smov [#allocation10]  }
  0x22   : > { %s324_s21 = sshll.u32 %s4621_s28, 4  ;;  %s347_s26 = sshll.u32 %s4622_s3, 4  ;;  %s325_s21 = int_to_ptr.vmem [resolvable:$true] %s324_s21  ;;  %s348_s26 = int_to_ptr.vmem [resolvable:$true] %s347_s26 }
  0x23   : > { %s6084_s6 = sld [smem:[#allocation29_spill]]  ;;  %s4623_s30 = smov [#allocation13]  }
  0x24   : > { %s322_s5 = sshll.u32 %s6082_s2, 4  ;;  %s373_s14 = sshll.u32 %s4623_s30, 4  ;;  %s323_s5 = int_to_ptr.hbm [resolvable:$true] %s322_s5  ;;  %s374_s14 = int_to_ptr.vmem [resolvable:$true] %s373_s14 }
  0x25   : > { %s345_s22 = sshll.u32 %s6083_s4, 4  ;;  %s4624_s28 = smov [#allocation16]   ;;  %s346_s22 = int_to_ptr.hbm [resolvable:$true] %s345_s22 }
  0x26   : > { %3864 = dma.hbm_to_vmem [thread:$0]  (!%p4739_p6), %s323_s5, 16, %s325_s21, [#allocation6]  }
  0x27   : > { %3870 = dma.hbm_to_vmem [thread:$0]  (!%p4739_p6), %s346_s22, 256, %s348_s26, [#allocation9], %s4619_s23, %s4619_s23, %s4620_s27  }
  0x28   : > { %s405_s5 = sshll.u32 %s6069_s10, 4  ;;  %s407_s22 = sshll.u32 %s4624_s28, 4  ;;  %s406_s5 = int_to_ptr.hbm [resolvable:$true] %s405_s5  ;;  %s408_s22 = int_to_ptr.vmem [resolvable:$true] %s407_s22 }
  0x29   : > { %s371_s1 = sshll.u32 %s6084_s6, 4  ;;  %s3609_s21 = sadd.s32 4294967294, %s4613_s20   ;;  %s372_s1 = int_to_ptr.hbm [resolvable:$true] %s371_s1 }
  0x2a   : > { %3876 = dma.hbm_to_vmem [thread:$0]  (!%p4739_p6), %s372_s1, 512, %s374_s14, [#allocation12], %s4619_s23, %s4619_s23, %s4620_s27  }
  0x2b   : > { %3882 = dma.hbm_to_vmem [thread:$0]  (!%p4739_p6), %s406_s5, 512, %s408_s22, [#allocation15], %s4619_s23, %s4619_s23, %s4620_s27  }
  0x2c   : > { %s4779_s3 = sadd.s32 1, %s4613_s20   ;;  %s38_s29 = sadd.s32 1, %s4609_s19 }
  0x2d   : > { %s35_s26 = ssub.s32 %s4613_s20, %s4779_s3  ;;  %p45_p8 = scmp.ne.s32.totalorder %s4609_s19, %s4605_s18 }
  0x2e   : > { %p36_p7 = scmp.eq.s32.totalorder %s35_s26, 0  ;;  %p46_p9 = scmp.eq.s32.totalorder %s4613_s20, 0 }
  0x2f   : > { %p51_p10 = scmp.ne.s32.totalorder %s4605_s18, %s4601_s17  ;;  %p285_p13 = scmp.eq.s32.totalorder %s4722_s24, 1 }
  0x30   : > { %s4790_s13 = scalar_select %p36_p7, %s4609_s19, %s38_s29  }
  0x31   : > { %p4792_p11 = por %p46_p9, %p45_p8  ;;  %p4798_p12 = por %p52_p1, %p51_p10 }
  0x32   : > { %p291_p0 = scmp.eq.s32.totalorder %s3609_s21, 1  ;;  %p3899_p2 = scmp.lt.s32.totalorder %s4613_s20, 2 }
  0x33   : > { %s421_s23 = sand.u32 1, %s4609_s19   ;;  %p4805_p5 = por %p285_p13, %p45_p8 }
  0x34   : > { %p4809_p6 = por %p291_p0, %p51_p10  ;;  %s3620_s16 = sshll.u32 %s421_s23, 2 }
  0x35   : > { %s3621_s5 = sshll.u32 %s4613_s20, 2  ;;  %s425_s22 = scalar_lea.vmem [#allocation2], %s3620_s16 }
  0x36   : > { %s429_s28 = scalar_lea.hbm %s6059_s0, %s3621_s5  ;;  %s433_s26 = sshll.u32 %s425_s22, 4  ;;  %s434_s26 = int_to_ptr.vmem [resolvable:$true] %s433_s26 }
  0x37   : > { %s431_s29 = sshll.u32 %s429_s28, 4  ;;  %p4819_p7 = pnand %p3899_p2, %p4792_p11  ;;  %s432_s29 = int_to_ptr.hbm [resolvable:$true] %s431_s29 }
  0x38   : > { %s422_s2 = scalar_lea.sflag [#allocation3], %s421_s23  ;;  %s4501_s4 = sshra.s32 %s432_s29, 4  ;;  %s4502_s4 = int_to_ptr.hbm [resolvable:$true] %s4501_s4 }
  0x39   : > { %s4503_s6 = scalar_lea.hbm %s4502_s4, 4  ;;  %p4505_p9 = pneg %p4819_p7 }
  0x3a   : > { %p4504_p8 = scmp.ne.s32.totalorder %s4502_s4, %s4503_s6  ;;  %s4508_s30 = scalar_lea.hbm %s6059_s0, 8 }
  0x3b   : > { %p4509_p11 = scmp.lt.s32.totalorder %s4502_s4, %s6059_s0  ;;  %p4510_p0 = scmp.lt.s32.totalorder %s4508_s30, %s4503_s6 }
  0x3c   : > { %p4506_p10 = pnand %p4505_p9, %p4504_p8 }
  0x3d   : > { %p4511_p2 = por %p4510_p0, %p4509_p11 }
  0x3e   : > { %p4507_p13 = pneg %p4506_p10 }
  0x40   : > { %p4512_p4 = pnand %p4511_p2, %p4507_p13 }
  0x42   : > { %4515 = shalt.err (!%p4512_p4)
}
  0x43   : > { %3886 = dma.hbm_to_vmem [thread:$0]  (!%p4819_p7), %s432_s29, 64, %s434_s26, %s422_s2  }
  0x44   : > { %442 = sbr.rel (%p4727_p3) target bundleno = 4671 (0x123f), region = 64  ;;  %s4836_s23 = sand.u32 (!%p4727_p3), 1, %s4605_s18  }
  0x45   : > { %s3623_s28 = sshll.u32 (!%p4727_p3), %s4836_s23, 2  ;;  %s445_s22 = scalar_lea.sflag (!%p4727_p3), [#allocation3], %s4836_s23 }
  0x46   : > { %s448_s16 = scalar_lea.vmem (!%p4727_p3), [#allocation2], %s3623_s28 }
  0x49   : > { %4576 = dma.done.wait (%p4798_p12), %s445_s22, 64  }
  0x4a   : > { %4578 = vsyncadd (%p4798_p12), %s445_s22, 4294967232 }
  0x4b   : > { %4580 = dma.done.wait (%p52_p1), [#allocation6], 48  }
  0x4c   : > { %4582 = vsyncadd (%p52_p1), [#allocation6], 4294967248 }
  0x4d   : > { %4584 = dma.done.wait (%p52_p1), [#allocation9], 272  }
  0x4e   : > { %4586 = vsyncadd (%p52_p1), [#allocation9], 4294967024 }
  0x4f   : > { %4588 = dma.done.wait (%p52_p1), [#allocation12], 528  }
  0x50   : > { %4590 = vsyncadd (%p52_p1), [#allocation12], 4294966768 }
  0x51   : > { %4592 = dma.done.wait (%p52_p1), [#allocation15], 1024  }
  0x52   : > { %4594 = vsyncadd (%p52_p1), [#allocation15], 4294966272  ;;  %vm561_vm0 = vcmask 1041408   ;;  %v529_v0 = vld [vmem:[%s448_s16] sm:$0xf]  ;;  %vm548_vm1 = vcmask 31744  }
  0x53   : > { %v531_v1 = vld [vmem:[#allocation5] sm:$0x3]  ;;  %v530_v2 = vpack.c.bf16 %v529_v0, %v529_v0  ;;  %v4860_v8 = vld [vmem:[#allocation7] ss:$0 sm:$0xff]  ;;  %v4862_v9 = vld [vmem:[#allocation8] ss:$0 sm:$0xff] }
  0x54   : > { %v563_v3 = vsel %vm561_vm0, %v531_v1, 0  ;;  %v3809_v14 = vld [vmem:[#allocation10 + $0x8] sm:$0xff]  ;;  %v3808_v17 = vld [vmem:[#allocation10] sm:$0xff]  ;;  %vm802_vm10 = vcmask 261120   ;;  %s4625_s6 = smov 96   ;;  %s4626_s25 = smov 64  }
  0x55   : > { %572 = vmatpush.bf16.msra.mxu0 %v563_v3  ;;  %3819 = vmatpush.bf16.msra.mxu3 %v563_v3  ;;  %s4627_s12 = smov 88   ;;  %s4628_s26 = smov 120  }
  0x56   : > { %532 = vxpose.xlu0.c.b16.start.end [1/1] (short) (narrow) %v530_v2, 64  ;;  %821 = vmatpush.bf16.msra.mxu1 %v3809_v14  ;;  %s4629_s29 = smov 72   ;;  %s4630_s21 = smov 112  }
  0x57   : > { %3820 = vmatpush.bf16.msra.mxu2 %v3809_v14  ;;  %s4631_s5 = smov 80   ;;  %s4632_s30 = smov 104  }
  0x58   : > { %s4633_s14 = smov 56   ;;  %s4634_s1 = smov 40  }
  0x59   : > { %s4635_s28 = smov 48   ;;  %s4551_s4 = scalar_lea.hbm %s6070_s11, 64 }
  0x5a   : > { %822 = vmatpush.bf16.msra.mxu1 %v3808_v17 }
  0x5b   : > { %3821 = vmatpush.bf16.msra.mxu2 %v3808_v17 }
 0x102   : > { %v540_v4 = vpop.trf.xlu0 }
 0x103   : > { %3633 = vmatmul.msk.bf16.vlgmr.msra.gmra.mxu0 %vm548_vm1, %v540_v4 }
 0x112   : > { %v541_v5 = vpop.trf.xlu0 }
 0x113   : > { %3634 = vmatmul.msk.bf16.gmra.mxu0 %vm548_vm1, %v541_v5 }
 0x122   : > { %v542_v6 = vpop.trf.xlu0 }
 0x123   : > { %3635 = vmatmul.msk.bf16.vlgmr.msra.gmra.mxu3 %vm548_vm1, %v542_v6 }
 0x132   : > { %v543_v7 = vpop.trf.xlu0 }
 0x133   : > { %3636 = vmatmul.msk.bf16.gmra.mxu3 %vm548_vm1, %v543_v7 }
 0x180   : > { %v574_v10 = vpop.f32.mrf.mxu0 }
 0x181   : > { %v598_v11 = vmul.f32 %v4860_v8, %v574_v10 }
 0x183   : > { %v4866_v12 = vadd.f32 %v4862_v9, %v598_v11 }
 0x185   : > { %v3637_v13 = vmul.f32 -1.442695, %v4866_v12 }
 0x187   : > { %3973 = vpow2.f32 %v3637_v13 }
 0x188   : > { %v576_v15 = vpop.f32.mrf.mxu0 }
 0x189   : > { %v599_v16 = vmul.f32 %v4860_v8, %v576_v15 }
 0x18b   : > { %v611_v18 = vadd.f32 %v4862_v9, %v599_v16 }
 0x18d   : > { %v3974_v19 = vpop.eup %3973  ;;  %v3638_v20 = vmul.f32 -1.442695, %v611_v18 }
 0x18e   : > { %v642_v21 = vadd.f32 1.0, %v3974_v19 }
 0x18f   : > { %3975 = vpow2.f32 %v3638_v20 }
 0x190   : > { %3977 = vrcp.f32 %v642_v21  ;;  %v579_v22 = vpop.f32.mrf.mxu0  ;;  %vm655_vm2 = vweird.f32 %v642_v21  ;;  %v659_v38 = vand.u32 2147483647, %v642_v21  ;;  %v661_v39 = vand.u32 2147483648, %v642_v21 }
 0x191   : > { %v600_v23 = vmul.f32 %v4860_v8, %v579_v22 }
 0x192   : > { %vm660_vm5 = vcmp.eq.f32.partialorder %v659_v38, 8.507059e+37  ;;  %v662_v44 = vor.u32 1.1754944e-38, %v661_v39 }
 0x193   : > { %v4873_v24 = vadd.f32 %v4862_v9, %v600_v23 }
 0x195   : > { %v3976_v25 = vpop.eup %3975  ;;  %v3639_v26 = vmul.f32 -1.442695, %v4873_v24 }
 0x196   : > { %v3978_v27 = vpop.eup %3977  ;;  %v643_v28 = vadd.f32 1.0, %v3976_v25 }
 0x197   : > { %v651_v29 = vmul.f32 %v3978_v27, %v642_v21  ;;  %3979 = vpow2.f32 %v3639_v26  ;;  %vm656_vm3 = vweird.f32 %v3978_v27 }
 0x198   : > { %3981 = vrcp.f32 %v643_v28  ;;  %v581_v30 = vpop.f32.mrf.mxu0  ;;  %vm657_vm4 = vmor %vm655_vm2, %vm656_vm3  ;;  %v676_v45 = vand.u32 2147483648, %v643_v28  ;;  %v674_v48 = vand.u32 2147483647, %v643_v28  ;;  %vm670_vm7 = vweird.f32 %v643_v28 }
 0x199   : > { %v652_v31 = vsub.f32 1.0, %v651_v29  ;;  %v601_v32 = vmul.f32 %v4860_v8, %v581_v30 }
 0x19a   : > { %v677_v53 = vor.u32 1.1754944e-38, %v676_v45  ;;  %vm675_vm9 = vcmp.eq.f32.partialorder %v674_v48, 8.507059e+37 }
 0x19b   : > { %v653_v33 = vmul.f32 %v3978_v27, %v652_v31  ;;  %v4878_v34 = vadd.f32 %v4862_v9, %v601_v32 }
 0x19d   : > { %v3980_v35 = vpop.eup %3979  ;;  %v3640_v36 = vmul.f32 -1.442695, %v4878_v34  ;;  %v654_v41 = vadd.f32 %v3978_v27, %v653_v33 }
 0x19e   : > { %v3982_v37 = vpop.eup %3981  ;;  %v644_v40 = vadd.f32 1.0, %v3980_v35 }
 0x19f   : > { %v666_v42 = vmul.f32 %v3982_v37, %v643_v28  ;;  %3983 = vpow2.f32 %v3640_v36  ;;  %v658_v46 = vsel %vm657_vm4, %v3978_v27, %v654_v41  ;;  %vm671_vm6 = vweird.f32 %v3982_v37 }
 0x1a0   : > { %3985 = vrcp.f32 %v644_v40  ;;  %v663_v52 = vsel %vm660_vm5, %v662_v44, %v658_v46  ;;  %vm672_vm8 = vmor %vm670_vm7, %vm671_vm6  ;;  %vm685_vm11 = vweird.f32 %v644_v40  ;;  %v691_v10 = vand.u32 2147483648, %v644_v40 }
 0x1a1   : > { %v667_v43 = vsub.f32 1.0, %v666_v42  ;;  %v4883_v60 = vmul.f32 %v663_v52, %v4866_v12  ;;  %v689_v11 = vand.u32 2147483647, %v644_v40 }
 0x1a2   : > { %v692_v20 = vor.u32 1.1754944e-38, %v691_v10 }
 0x1a3   : > { %v668_v47 = vmul.f32 %v3982_v37, %v667_v43  ;;  %vm690_vm15 = vcmp.eq.f32.partialorder %v689_v11, 8.507059e+37 }
 0x1a5   : > { %v3984_v49 = vpop.eup %3983  ;;  %v669_v50 = vadd.f32 %v3982_v37, %v668_v47 }
 0x1a6   : > { %v3986_v51 = vpop.eup %3985  ;;  %v645_v54 = vadd.f32 1.0, %v3984_v49  ;;  %v584_v55 = vpop.f32.mrf.mxu3 }
 0x1a7   : > { %v673_v56 = vsel %vm672_vm8, %v3982_v37, %v669_v50  ;;  %v681_v57 = vmul.f32 %v3986_v51, %v644_v40  ;;  %v602_v58 = vmul.f32 %v4860_v8, %v584_v55  ;;  %vm686_vm12 = vweird.f32 %v3986_v51 }
 0x1a8   : > { %v678_v59 = vsel %vm675_vm9, %v677_v53, %v673_v56  ;;  %3987 = vrcp.f32 %v645_v54  ;;  %vm687_vm13 = vmor %vm685_vm11, %vm686_vm12  ;;  %v704_v14 = vand.u32 2147483647, %v645_v54  ;;  %v706_v15 = vand.u32 2147483648, %v645_v54 }
 0x1a9   : > { %v4885_v61 = vmul.f32 %v678_v59, %v611_v18  ;;  %v682_v62 = vsub.f32 1.0, %v681_v57  ;;  %v4888_v63 = vadd.f32 %v4862_v9, %v602_v58  ;;  %vm700_vm0 = vweird.f32 %v645_v54 }
 0x1aa   : > { %v707_v25 = vor.u32 1.1754944e-38, %v706_v15  ;;  %vm705_vm2 = vcmp.eq.f32.partialorder %v704_v14, 8.507059e+37 }
 0x1ab   : > { %v683_v0 = vmul.f32 %v3986_v51, %v682_v62  ;;  %v3641_v1 = vmul.f32 -1.442695, %v4888_v63  ;;  %v778_v2 = vpack.c.bf16 %v4885_v61, %v4883_v60 }
 0x1ad   : > { %3989 = vpow2.f32 %v3641_v1  ;;  %3653 = vmatmul.msk.bf16.vlgmr.msra.gmra.mxu1 %vm802_vm10, %v778_v2  ;;  %v684_v5 = vadd.f32 %v3986_v51, %v683_v0 }
 0x1ae   : > { %v3988_v3 = vpop.eup %3987  ;;  %v586_v4 = vpop.f32.mrf.mxu3 }
 0x1af   : > { %v696_v6 = vmul.f32 %v3988_v3, %v645_v54  ;;  %v603_v7 = vmul.f32 %v4860_v8, %v586_v4  ;;  %v688_v17 = vsel %vm687_vm13, %v3986_v51, %v684_v5  ;;  %vm701_vm14 = vweird.f32 %v3988_v3 }
 0x1b0   : > { %v693_v23 = vsel %vm690_vm15, %v692_v20, %v688_v17  ;;  %vm702_vm1 = vmor %vm700_vm0, %vm701_vm14 }
 0x1b1   : > { %v697_v12 = vsub.f32 1.0, %v696_v6  ;;  %v4896_v13 = vadd.f32 %v4862_v9, %v603_v7  ;;  %v4901_v30 = vmul.f32 %v693_v23, %v4873_v24 }
 0x1b3   : > { %v3990_v16 = vpop.eup %3989  ;;  %v698_v18 = vmul.f32 %v3988_v3, %v697_v12  ;;  %v3642_v19 = vmul.f32 -1.442695, %v4896_v13 }
 0x1b4   : > { %v646_v21 = vadd.f32 1.0, %v3990_v16 }
 0x1b5   : > { %v699_v22 = vadd.f32 %v3988_v3, %v698_v18  ;;  %3991 = vpow2.f32 %v3642_v19 }
 0x1b6   : > { %3993 = vrcp.f32 %v646_v21  ;;  %v589_v26 = vpop.f32.mrf.mxu3  ;;  %v721_v49 = vand.u32 2147483648, %v646_v21  ;;  %vm715_vm4 = vweird.f32 %v646_v21  ;;  %v719_v50 = vand.u32 2147483647, %v646_v21 }
 0x1b7   : > { %v703_v27 = vsel %vm702_vm1, %v3988_v3, %v699_v22  ;;  %v604_v28 = vmul.f32 %v4860_v8, %v589_v26 }
 0x1b8   : > { %v708_v29 = vsel %vm705_vm2, %v707_v25, %v703_v27  ;;  %v722_v54 = vor.u32 1.1754944e-38, %v721_v49  ;;  %vm720_vm7 = vcmp.eq.f32.partialorder %v719_v50, 8.507059e+37 }
 0x1b9   : > { %v4904_v31 = vmul.f32 %v708_v29, %v4878_v34  ;;  %v4907_v32 = vadd.f32 %v4862_v9, %v604_v28  ;;  %v3811_v29 = vld [vmem:[#allocation13 + $0x8] sm:$0xff] }
 0x1ba   : > { %903 = vmatpush.bf16.msrb.mxu2 %v3811_v29 }
 0x1bb   : > { %v3992_v33 = vpop.eup %3991  ;;  %v3643_v35 = vmul.f32 -1.442695, %v4907_v32  ;;  %v779_v36 = vpack.c.bf16 %v4904_v31, %v4901_v30 }
 0x1bc   : > { %v3994_v37 = vpop.eup %3993  ;;  %v647_v38 = vadd.f32 1.0, %v3992_v33  ;;  %v3810_v33 = vld [vmem:[#allocation13] sm:$0xff] }
 0x1bd   : > { %v711_v39 = vmul.f32 %v3994_v37, %v646_v21  ;;  %3995 = vpow2.f32 %v3643_v35  ;;  %3654 = vmatmul.msk.bf16.gmra.mxu1 %vm802_vm10, %v779_v36  ;;  %vm716_vm3 = vweird.f32 %v3994_v37  ;;  %v3968_v36 = vld [vmem:[#allocation11] ss:$0 sm:$0xff] }
 0x1be   : > { %3997 = vrcp.f32 %v647_v38  ;;  %v591_v24 = vpop.f32.mrf.mxu3  ;;  %vm717_vm5 = vmor %vm715_vm4, %vm716_vm3  ;;  %vm730_vm8 = vweird.f32 %v647_v38  ;;  %904 = vmatpush.bf16.msrb.mxu2 %v3810_v33  ;;  %vm962_vm4 = vcmask 64512  }
 0x1bf   : > { %v712_v40 = vsub.f32 1.0, %v711_v39  ;;  %v605_v34 = vmul.f32 %v4860_v8, %v591_v24  ;;  %v736_v8 = vand.u32 2147483648, %v647_v38 }
 0x1c1   : > { %v713_v41 = vmul.f32 %v3994_v37, %v712_v40  ;;  %v4915_v42 = vadd.f32 %v4862_v9, %v605_v34  ;;  %v734_v9 = vand.u32 2147483647, %v647_v38  ;;  %v737_v59 = vor.u32 1.1754944e-38, %v736_v8 }
 0x1c3   : > { %v3996_v43 = vpop.eup %3995  ;;  %v3644_v44 = vmul.f32 -1.442695, %v4915_v42  ;;  %v714_v47 = vadd.f32 %v3994_v37, %v713_v41  ;;  %vm735_vm11 = vcmp.eq.f32.partialorder %v734_v9, 8.507059e+37 }
 0x1c4   : > { %v3998_v45 = vpop.eup %3997  ;;  %v648_v46 = vadd.f32 1.0, %v3996_v43 }
 0x1c5   : > { %v726_v48 = vmul.f32 %v3998_v45, %v647_v38  ;;  %3999 = vpow2.f32 %v3644_v44  ;;  %v718_v52 = vsel %vm717_vm5, %v3994_v37, %v714_v47  ;;  %vm731_vm6 = vweird.f32 %v3998_v45 }
 0x1c6   : > { %4001 = vrcp.f32 %v648_v46  ;;  %v723_v58 = vsel %vm720_vm7, %v722_v54, %v718_v52  ;;  %vm732_vm9 = vmor %vm730_vm8, %vm731_vm6  ;;  %v751_v14 = vand.u32 2147483648, %v648_v46  ;;  %vm745_vm13 = vweird.f32 %v648_v46 }
 0x1c7   : > { %v727_v51 = vsub.f32 1.0, %v726_v48  ;;  %v774_v3 = vmul.f32 %v723_v58, %v4888_v63  ;;  %v749_v15 = vand.u32 2147483647, %v648_v46  ;;  %vm1024_vm5 = vcmask 523264  }
 0x1c8   : > { %vm1412_vm6 = vcmask 1043456  }
 0x1c9   : > { %v728_v53 = vmul.f32 %v3998_v45, %v727_v51  ;;  %vm750_vm0 = vcmp.eq.f32.partialorder %v749_v15, 8.507059e+37 }
 0x1cb   : > { %v4000_v55 = vpop.eup %3999  ;;  %v729_v56 = vadd.f32 %v3998_v45, %v728_v53 }
 0x1cc   : > { %v4002_v57 = vpop.eup %4001  ;;  %v649_v62 = vadd.f32 1.0, %v4000_v55 }
 0x1cd   : > { %v733_v0 = vsel %vm732_vm9, %v3998_v45, %v729_v56  ;;  %v741_v1 = vmul.f32 %v4002_v57, %v648_v46  ;;  %vm746_vm12 = vweird.f32 %v4002_v57  ;;  %v3969_v56 = vld [vmem:[%s6066_s7] ss:$0 sm:$0xff] }
 0x1ce   : > { %v738_v2 = vsel %vm735_vm11, %v737_v59, %v733_v0  ;;  %4003 = vrcp.f32 %v649_v62  ;;  %vm747_vm14 = vmor %vm745_vm13, %vm746_vm12  ;;  %v766_v17 = vand.u32 2147483648, %v649_v62  ;;  %v764_v63 = vand.u32 2147483647, %v649_v62 }
 0x1cf   : > { %v775_v4 = vmul.f32 %v738_v2, %v4896_v13  ;;  %v742_v5 = vsub.f32 1.0, %v741_v1  ;;  %v752_v13 = vor.u32 1.1754944e-38, %v751_v14  ;;  %vm760_vm1 = vweird.f32 %v649_v62 }
 0x1d0   : > { %v767_v22 = vor.u32 1.1754944e-38, %v766_v17  ;;  %vm765_vm3 = vcmp.eq.f32.partialorder %v764_v63, 8.507059e+37 }
 0x1d1   : > { %v743_v6 = vmul.f32 %v4002_v57, %v742_v5  ;;  %v780_v7 = vpack.c.bf16 %v775_v4, %v774_v3 }
 0x1d3   : > { %3655 = vmatmul.msk.bf16.vlgmr.msra.gmra.mxu2 %vm802_vm10, %v780_v7  ;;  %v744_v11 = vadd.f32 %v4002_v57, %v743_v6 }
 0x1d4   : > { %v4004_v10 = vpop.eup %4003 }
 0x1d5   : > { %v756_v12 = vmul.f32 %v4004_v10, %v649_v62  ;;  %v748_v18 = vsel %vm747_vm14, %v4002_v57, %v744_v11  ;;  %vm761_vm15 = vweird.f32 %v4004_v10 }
 0x1d6   : > { %v753_v21 = vsel %vm750_vm0, %v752_v13, %v748_v18  ;;  %vm762_vm2 = vmor %vm760_vm1, %vm761_vm15 }
 0x1d7   : > { %v757_v16 = vsub.f32 1.0, %v756_v12  ;;  %v776_v26 = vmul.f32 %v753_v21, %v4907_v32 }
 0x1d9   : > { %v758_v19 = vmul.f32 %v4004_v10, %v757_v16 }
 0x1db   : > { %v759_v20 = vadd.f32 %v4004_v10, %v758_v19 }
 0x1dd   : > { %v763_v23 = vsel %vm762_vm2, %v4004_v10, %v759_v20 }
 0x1de   : > { %v768_v25 = vsel %vm765_vm3, %v767_v22, %v763_v23 }
 0x1df   : > { %v777_v27 = vmul.f32 %v768_v25, %v4915_v42 }
 0x1e1   : > { %v781_v28 = vpack.c.bf16 %v777_v27, %v776_v26 }
 0x1e3   : > { %3656 = vmatmul.msk.bf16.gmra.mxu2 %vm802_vm10, %v781_v28 }
 0x22a   : > { %v824_v35 = vpop.f32.mrf.mxu1 }
 0x22b   : > { %v825_v37 = vadd.f32 %v3968_v36, %v824_v35 }
 0x22d   : > { %v4925_v24 = vadd.f32 %v825_v37, %v4883_v60 }
 0x232   : > { %v826_v38 = vpop.f32.mrf.mxu1 }
 0x233   : > { %v827_v39 = vadd.f32 %v3968_v36, %v826_v38 }
 0x235   : > { %v4928_v40 = vadd.f32 %v827_v39, %v4885_v61 }
 0x237   : > { %v866_v32 = vpack.c.bf16 %v4928_v40, %v4925_v24 }
 0x239   : > { %3665 = vmatmul.msk.bf16.vlgmr.msrb.gmra.mxu2 %vm802_vm10, %v866_v32 }
 0x23a   : > { %v829_v34 = vpop.f32.mrf.mxu1 }
 0x23b   : > { %v830_v41 = vadd.f32 %v3968_v36, %v829_v34 }
 0x23d   : > { %v4934_v44 = vadd.f32 %v830_v41, %v4901_v30 }
 0x242   : > { %v831_v42 = vpop.f32.mrf.mxu1 }
 0x243   : > { %v832_v43 = vadd.f32 %v3968_v36, %v831_v42 }
 0x245   : > { %v4937_v45 = vadd.f32 %v832_v43, %v4904_v31 }
 0x247   : > { %v867_v60 = vpack.c.bf16 %v4937_v45, %v4934_v44 }
 0x249   : > { %3666 = vmatmul.msk.bf16.gmra.mxu2 %vm802_vm10, %v867_v60 }
 0x256   : > { %v834_v61 = vpop.f32.mrf.mxu2 }
 0x257   : > { %v835_v46 = vadd.f32 %v3968_v36, %v834_v61 }
 0x259   : > { %v4942_v49 = vadd.f32 %v835_v46, %v774_v3 }
 0x25e   : > { %v836_v47 = vpop.f32.mrf.mxu2 }
 0x25f   : > { %v837_v48 = vadd.f32 %v3968_v36, %v836_v47 }
 0x261   : > { %v4944_v50 = vadd.f32 %v837_v48, %v775_v4 }
 0x263   : > { %v868_v30 = vpack.c.bf16 %v4944_v50, %v4942_v49 }
 0x265   : > { %3667 = vmatmul.msk.bf16.gmra.mxu2 %vm802_vm10, %v868_v30 }
 0x266   : > { %v839_v31 = vpop.f32.mrf.mxu2 }
 0x267   : > { %v840_v51 = vadd.f32 %v3968_v36, %v839_v31 }
 0x269   : > { %v4949_v53 = vadd.f32 %v840_v51, %v776_v26 }
 0x26e   : > { %v841_v8 = vpop.f32.mrf.mxu2 }
 0x26f   : > { %v842_v52 = vadd.f32 %v3968_v36, %v841_v8 }
 0x271   : > { %v4951_v9 = vadd.f32 %v842_v52, %v777_v27 }
 0x273   : > { %v869_v54 = vpack.c.bf16 %v4951_v9, %v4949_v53 }
 0x275   : > { %3668 = vmatmul.msk.bf16.gmra.mxu2 %vm802_vm10, %v869_v54 }
 0x2bc   : > { %v906_v55 = vpop.f32.mrf.mxu2 }
 0x2bd   : > { %v907_v57 = vadd.f32 %v3969_v56, %v906_v55 }
 0x2bf   : > { %v926_v59 = vpack.c.bf16 %v907_v57, %v907_v57 }
 0x2c1   : > { %v942_v1 = vunpack.c.l.b16 %v926_v59 }
 0x2c4   : > { %v908_v58 = vpop.f32.mrf.mxu2 }
 0x2c5   : > { %v909_v62 = vadd.f32 %v3969_v56, %v908_v58 }
 0x2c7   : > { %v927_v0 = vpack.c.bf16 %v909_v62, %v909_v62 }
 0x2c9   : > { %v943_v2 = vunpack.c.l.b16 %v927_v0 }
 0x2cb   : > { %v4959_v3 = vpack.c.b16 %v943_v2, %v942_v1 }
 0x2cc   : > { %v911_v4 = vpop.f32.mrf.mxu2 }
 0x2cd   : > { %954 = vrot.lane.b32.xlu2 %v4959_v3, %s4625_s6  ;;  %v912_v16 = vadd.f32 %v3969_v56, %v911_v4 }
 0x2cf   : > { %v928_v20 = vpack.c.bf16 %v912_v16, %v912_v16 }
 0x2d1   : > { %v944_v22 = vunpack.c.l.b16 %v928_v20 }
 0x2d4   : > { %v913_v5 = vpop.f32.mrf.mxu2 }
 0x2d5   : > { %v914_v14 = vadd.f32 %v3969_v56, %v913_v5 }
 0x2d7   : > { %v929_v19 = vpack.c.bf16 %v914_v14, %v914_v14 }
 0x2d9   : > { %v945_v21 = vunpack.c.l.b16 %v929_v19 }
 0x2db   : > { %v4967_v25 = vpack.c.b16 %v945_v21, %v944_v22 }
 0x2e8   : > { %v916_v6 = vpop.f32.mrf.mxu2 }
 0x2e9   : > { %v917_v7 = vadd.f32 %v3969_v56, %v916_v6 }
 0x2eb   : > { %v930_v11 = vpack.c.bf16 %v917_v7, %v917_v7 }
 0x2ed   : > { %v946_v17 = vunpack.c.l.b16 %v930_v11 }
 0x2f0   : > { %v918_v10 = vpop.f32.mrf.mxu2 }
 0x2f1   : > { %v919_v12 = vadd.f32 %v3969_v56, %v918_v10 }
 0x2f3   : > { %v931_v15 = vpack.c.bf16 %v919_v12, %v919_v12 }
 0x2f5   : > { %v947_v18 = vunpack.c.l.b16 %v931_v15 }
 0x2f7   : > { %v4963_v63 = vpack.c.b16 %v947_v18, %v946_v17 }
 0x2f8   : > { %v921_v13 = vpop.f32.mrf.mxu2 }
 0x2f9   : > { %958 = vrot.lane.b32.xlu1 %v4963_v63, %s4625_s6  ;;  %v922_v23 = vadd.f32 %v3969_v56, %v921_v13 }
 0x2fb   : > { %v932_v27 = vpack.c.bf16 %v922_v23, %v922_v23 }
 0x2fd   : > { %v948_v33 = vunpack.c.l.b16 %v932_v27 }
 0x300   : > { %v923_v26 = vpop.f32.mrf.mxu2 }
 0x301   : > { %v924_v28 = vadd.f32 %v3969_v56, %v923_v26  ;;  %956 = vrot.lane.b32.xlu1 %v4967_v25, %s4625_s6 }
 0x303   : > { %v933_v29 = vpack.c.bf16 %v924_v28, %v924_v28 }
 0x305   : > { %v949_v35 = vunpack.c.l.b16 %v933_v29 }
 0x307   : > { %v4971_v36 = vpack.c.b16 %v949_v35, %v948_v33 }
 0x309   : > { %1123 = vrot.lane.b32.xlu1 %v4971_v36, %s4626_s25  ;;  %960 = vrot.lane.b32.xlu0 %v4971_v36, %s4625_s6 }
 0x327   : > { %v955_v43 = vpop.permute.xlu2 %954 }
 0x328   : > { %v976_v60 = vsel %vm962_vm4, %v955_v43, 0 }
 0x36b   : > { %v959_v37 = vpop.permute.xlu1 %958 }
 0x36c   : > { %v982_v41 = vsel %vm962_vm4, %v959_v37, 0 }
 0x373   : > { %v957_v38 = vpop.permute.xlu1 %956 }
 0x374   : > { %v979_v42 = vsel %vm962_vm4, %v957_v38, 0 }
 0x37b   : > { %v1124_v39 = vpop.permute.xlu1 %1123  ;;  %v961_v32 = vpop.permute.xlu0 %960 }
 0x37c   : > { %1145 = vmatpush.bf16.msrb.mxu0 %v1124_v39  ;;  %v985_v34 = vsel %vm962_vm4, %v961_v32, 0 }
 0x37d   : > { %991 = vmatpush.bf16.xpose.msrb.mxu3 %v985_v34 }
 0x385   : > { %992 = vmatpush.bf16.xpose.msrb.mxu3 %v982_v41 }
 0x38d   : > { %993 = vmatpush.bf16.xpose.msrb.mxu3 %v979_v42 }
 0x395   : > { %994 = vmatpush.bf16.xpose.msrb.mxu3 %v976_v60 }
 0x39c   : > { %3669 = vmatmul.msk.bf16.vlgmr.msrb.gmra.mxu3 %vm962_vm4, %v4959_v3 }
 0x3ac   : > { %3670 = vmatmul.msk.bf16.gmra.mxu3 %vm962_vm4, %v4967_v25 }
 0x3bc   : > { %3671 = vmatmul.msk.bf16.gmra.mxu3 %vm962_vm4, %v4963_v63 }
 0x3cc   : > { %3672 = vmatmul.msk.bf16.gmra.mxu3 %vm962_vm4, %v4971_v36 }
 0x41f   : > { %v996_v61 = vpop.f32.mrf.mxu3 }
 0x420   : > { %v1016_v46 = vmul.f32 0.35355338, %v996_v61 }
 0x422   : > { %v1025_v47 = vsel %vm1024_vm5, %v1016_v46, -inf }
 0x423   : > { %1026 = vmax.xlane.f32.xlu2 %v1025_v47 }
 0x427   : > { %v998_v48 = vpop.f32.mrf.mxu3 }
 0x428   : > { %v1017_v30 = vmul.f32 0.35355338, %v998_v48 }
 0x42a   : > { %v1028_v31 = vsel %vm1024_vm5, %v1017_v30, -inf }
 0x42b   : > { %1029 = vmax.xlane.f32.xlu1 %v1028_v31 }
 0x42f   : > { %v1001_v51 = vpop.f32.mrf.mxu3 }
 0x430   : > { %v1018_v8 = vmul.f32 0.35355338, %v1001_v51 }
 0x432   : > { %v1031_v52 = vsel %vm1024_vm5, %v1018_v8, -inf }
 0x433   : > { %1032 = vmax.xlane.f32.xlu2 %v1031_v52 }
 0x437   : > { %v1003_v54 = vpop.f32.mrf.mxu3 }
 0x438   : > { %v4992_v55 = vmul.f32 0.35355338, %v1003_v54 }
 0x43a   : > { %v1034_v56 = vsel %vm1024_vm5, %v4992_v55, -inf }
 0x43b   : > { %1035 = vmax.xlane.f32.xlu2 %v1034_v56 }
 0x43f   : > { %v1006_v57 = vpop.f32.mrf.mxu3 }
 0x440   : > { %v1020_v58 = vmul.f32 0.35355338, %v1006_v57 }
 0x442   : > { %v1037_v59 = vsel %vm1024_vm5, %v1020_v58, -inf }
 0x443   : > { %1038 = vmax.xlane.f32.xlu1 %v1037_v59 }
 0x447   : > { %v1008_v62 = vpop.f32.mrf.mxu3 }
 0x448   : > { %v1021_v0 = vmul.f32 0.35355338, %v1008_v62 }
 0x44a   : > { %v1040_v1 = vsel %vm1024_vm5, %v1021_v0, -inf }
 0x44b   : > { %1041 = vmax.xlane.f32.xlu2 %v1040_v1 }
 0x44f   : > { %v1011_v2 = vpop.f32.mrf.mxu3 }
 0x450   : > { %v1022_v4 = vmul.f32 0.35355338, %v1011_v2 }
 0x452   : > { %v1043_v5 = vsel %vm1024_vm5, %v1022_v4, -inf }
 0x453   : > { %1044 = vmax.xlane.f32.xlu1 %v1043_v5 }
 0x457   : > { %v1013_v6 = vpop.f32.mrf.mxu3 }
 0x458   : > { %v1023_v7 = vmul.f32 0.35355338, %v1013_v6 }
 0x45a   : > { %v1046_v10 = vsel %vm1024_vm5, %v1023_v7, -inf }
 0x45b   : > { %1047 = vmax.xlane.f32.xlu2 %v1046_v10 }
 0x46c   : > { %1119 = vrot.lane.b32.xlu1 %v4967_v25, %s4626_s25 }
 0x474   : > { %1117 = vrot.lane.b32.xlu1 %v4959_v3, %s4626_s25 }
 0x496   : > { %v1027_v11 = vpop.xlane.xlu2 %1026 }
 0x497   : > { %v1049_v12 = vsub.f32 %v1016_v46, %v1027_v11 }
 0x499   : > { %v1057_v14 = vmul.f32 1.442695, %v1049_v12 }
 0x49b   : > { %4005 = vpow2.f32 %v1057_v14 }
 0x49e   : > { %v1030_v15 = vpop.xlane.xlu1 %1029 }
 0x49f   : > { %v1050_v16 = vsub.f32 %v1017_v30, %v1030_v15 }
 0x4a1   : > { %v5004_v17 = vpop.eup %4005  ;;  %v1059_v18 = vmul.f32 1.442695, %v1050_v16 }
 0x4a2   : > { %v1073_v19 = vsel %vm1024_vm5, %v5004_v17, 0.0 }
 0x4a3   : > { %4007 = vpow2.f32 %v1059_v18  ;;  %1074 = vadd.xlane.f32.xlu2 %v1073_v19 }
 0x4a6   : > { %v1033_v13 = vpop.xlane.xlu2 %1032 }
 0x4a7   : > { %v1051_v20 = vsub.f32 %v1018_v8, %v1033_v13 }
 0x4a9   : > { %v5008_v21 = vpop.eup %4007  ;;  %v1061_v22 = vmul.f32 1.442695, %v1051_v20 }
 0x4aa   : > { %v1076_v23 = vsel %vm1024_vm5, %v5008_v21, 0.0 }
 0x4ab   : > { %4009 = vpow2.f32 %v1061_v22  ;;  %1077 = vadd.xlane.f32.xlu2 %v1076_v23 }
 0x4ae   : > { %v1036_v35 = vpop.xlane.xlu2 %1035 }
 0x4af   : > { %v1052_v48 = vsub.f32 %v4992_v55, %v1036_v35 }
 0x4b1   : > { %v5012_v26 = vpop.eup %4009  ;;  %v1063_v31 = vmul.f32 1.442695, %v1052_v48 }
 0x4b2   : > { %v1079_v27 = vsel %vm1024_vm5, %v5012_v26, 0.0 }
 0x4b3   : > { %1080 = vadd.xlane.f32.xlu1 %v1079_v27 }
 0x4b6   : > { %v1039_v28 = vpop.xlane.xlu1 %1038 }
 0x4b7   : > { %v1053_v29 = vsub.f32 %v1020_v58, %v1039_v28 }
 0x4b9   : > { %v1065_v33 = vmul.f32 1.442695, %v1053_v29 }
 0x4bb   : > { %4011 = vpow2.f32 %v1065_v33 }
 0x4be   : > { %v1042_v39 = vpop.xlane.xlu2 %1041 }
 0x4bf   : > { %v1054_v51 = vsub.f32 %v1021_v0, %v1042_v39 }
 0x4c1   : > { %v5016_v37 = vpop.eup %4011  ;;  %v1067_v8 = vmul.f32 1.442695, %v1054_v51 }
 0x4c2   : > { %v1085_v38 = vsel %vm1024_vm5, %v5016_v37, 0.0 }
 0x4c3   : > { %1086 = vadd.xlane.f32.xlu1 %v1085_v38  ;;  %1121 = vrot.lane.b32.xlu2 %v4963_v63, %s4626_s25 }
 0x4c6   : > { %v1045_v32 = vpop.xlane.xlu1 %1044 }
 0x4c7   : > { %v1055_v34 = vsub.f32 %v1022_v4, %v1045_v32 }
 0x4c9   : > { %v1069_v41 = vmul.f32 1.442695, %v1055_v34 }
 0x4cb   : > { %4013 = vpow2.f32 %v1069_v41 }
 0x4ce   : > { %v1048_v42 = vpop.xlane.xlu2 %1047 }
 0x4cf   : > { %v1056_v43 = vsub.f32 %v1023_v7, %v1048_v42 }
 0x4d1   : > { %v5022_v60 = vpop.eup %4013  ;;  %v1071_v61 = vmul.f32 1.442695, %v1056_v43 }
 0x4d2   : > { %v1091_v46 = vsel %vm1024_vm5, %v5022_v60, 0.0 }
 0x4d3   : > { %4015 = vpow2.f32 %v1071_v61  ;;  %1092 = vadd.xlane.f32.xlu1 %v1091_v46 }
 0x4d4   : > { %4017 = vpow2.f32 %v1063_v31 }
 0x4d5   : > { %4019 = vpow2.f32 %v1067_v8 }
 0x4d9   : > { %v5026_v47 = vpop.eup %4015 }
 0x4da   : > { %v1094_v30 = vsel %vm1024_vm5, %v5026_v47, 0.0  ;;  %v5031_v52 = vpop.eup %4017 }
 0x4db   : > { %1095 = vadd.xlane.f32.xlu0 %v1094_v30  ;;  %v1082_v54 = vsel %vm1024_vm5, %v5031_v52, 0.0  ;;  %v5039_v55 = vpop.eup %4019 }
 0x4dc   : > { %v1088_v56 = vsel %vm1024_vm5, %v5039_v55, 0.0 }
 0x4de   : > { %v1120_v59 = vpop.permute.xlu1 %1119 }
 0x4e6   : > { %v1118_v4 = vpop.permute.xlu1 %1117 }
 0x4ec   : > { %1186 = vrot.lane.b32.xlu1 %v4963_v63, %s4627_s12  ;;  %1083 = vadd.xlane.f32.xlu2 %v1082_v54 }
 0x4ef   : > { %1178 = vrot.lane.b32.xlu0 %v4963_v63, %s4628_s26 }
 0x4f4   : > { %1182 = vrot.lane.b32.xlu1 %v4959_v3, %s4627_s12  ;;  %1089 = vadd.xlane.f32.xlu2 %v1088_v56 }
 0x4f7   : > { %1779 = vrot.lane.b32.xlu0 %v4963_v63, %s4629_s29 }
 0x4fc   : > { %1176 = vrot.lane.b32.xlu1 %v4967_v25, %s4628_s26 }
 0x4ff   : > { %1489 = vrot.lane.b32.xlu0 %v4959_v3, %s4630_s21 }
 0x504   : > { %1501 = vrot.lane.b32.xlu1 %v4963_v63, %s4631_s5 }
 0x507   : > { %1491 = vrot.lane.b32.xlu0 %v4967_v25, %s4630_s21 }
 0x50c   : > { %1180 = vrot.lane.b32.xlu1 %v4971_v36, %s4628_s26  ;;  %1188 = vrot.lane.b32.xlu2 %v4971_v36, %s4627_s12 }
 0x50f   : > { %1771 = vrot.lane.b32.xlu0 %v4963_v63, %s4632_s30 }
 0x514   : > { %1497 = vrot.lane.b32.xlu1 %v4959_v3, %s4631_s5  ;;  %1184 = vrot.lane.b32.xlu2 %v4967_v25, %s4627_s12 }
 0x516   : > { %v1075_v57 = vpop.xlane.xlu2 %1074 }
 0x51c   : > { %1775 = vrot.lane.b32.xlu1 %v4959_v3, %s4629_s29  ;;  %1174 = vrot.lane.b32.xlu2 %v4959_v3, %s4628_s26 }
 0x51e   : > { %v1078_v58 = vpop.xlane.xlu2 %1077 }
 0x51f   : > { %4021 = vrcp.f32 %v1078_v58 }
 0x520   : > { %4023 = vrcp.f32 %v1075_v57 }
 0x524   : > { %1769 = vrot.lane.b32.xlu1 %v4967_v25, %s4632_s30  ;;  %1503 = vrot.lane.b32.xlu2 %v4971_v36, %s4631_s5 }
 0x525   : > { %v4022_v0 = vpop.eup %4021 }
 0x526   : > { %v1122_v62 = vpop.permute.xlu2 %1121  ;;  %v4024_v1 = vpop.eup %4023  ;;  %v1106_v2 = vmul.f32 %v4022_v0, %v5008_v21  ;;  %v857_v21 = vld [vmem:[#allocation14] sm:$0xf] }
 0x527   : > { %1146 = vmatpush.bf16.msrb.mxu0 %v1122_v62  ;;  %v1105_v5 = vmul.f32 %v4024_v1, %v5004_v17  ;;  %v1081_v7 = vpop.xlane.xlu1 %1080  ;;  %v1458_v23 = vsel %vm1412_vm6, %v857_v21, 0 }
 0x528   : > { %4025 = vrcp.f32 %v1081_v7 }
 0x529   : > { %v1113_v6 = vpack.c.bf16 %v1106_v2, %v1105_v5 }
 0x52b   : > { %1147 = vmatpush.bf16.msrb.mxu0 %v1120_v59 }
 0x52c   : > { %1495 = vrot.lane.b32.xlu1 %v4971_v36, %s4630_s21  ;;  %1781 = vrot.lane.b32.xlu2 %v4971_v36, %s4629_s29 }
 0x52e   : > { %v4026_v14 = vpop.eup %4025 }
 0x52f   : > { %1148 = vmatpush.bf16.msrb.mxu0 %v1118_v4  ;;  %v1107_v17 = vmul.f32 %v4026_v14, %v5012_v26 }
 0x532   : > { %3673 = vmatmul.msk.bf16.vlgmr.msrb.gmra.mxu0 %vm1024_vm5, %v1113_v6 }
 0x533   : > { %1467 = vmatpush.bf16.msra.mxu0 %v1458_v23 }
 0x534   : > { %1499 = vrot.lane.b32.xlu2 %v4967_v25, %s4631_s5 }
 0x536   : > { %v1087_v10 = vpop.xlane.xlu1 %1086 }
 0x53c   : > { %1777 = vrot.lane.b32.xlu2 %v4967_v25, %s4629_s29 }
 0x544   : > { %1767 = vrot.lane.b32.xlu2 %v4959_v3, %s4632_s30 }
 0x546   : > { %v1093_v12 = vpop.xlane.xlu1 %1092 }
 0x54c   : > { %1493 = vrot.lane.b32.xlu2 %v4963_v63, %s4630_s21 }
 0x54e   : > { %v1096_v39 = vpop.xlane.xlu0 %1095 }
 0x554   : > { %1773 = vrot.lane.b32.xlu2 %v4971_v36, %s4632_s30 }
 0x55e   : > { %v1187_v19 = vpop.permute.xlu1 %1186 }
 0x55f   : > { %v1084_v11 = vpop.xlane.xlu2 %1083  ;;  %v1209_v38 = vsel %vm962_vm4, %v1187_v19, 0 }
 0x560   : > { %4027 = vrcp.f32 %v1084_v11 }
 0x566   : > { %v4028_v15 = vpop.eup %4027  ;;  %v1183_v28 = vpop.permute.xlu1 %1182 }
 0x567   : > { %v1090_v16 = vpop.xlane.xlu2 %1089  ;;  %v1108_v18 = vmul.f32 %v4028_v15, %v5031_v52  ;;  %v1203_v51 = vsel %vm962_vm4, %v1183_v28, 0  ;;  %v1179_v52 = vpop.permute.xlu0 %1178 }
 0x568   : > { %4029 = vrcp.f32 %v1090_v16 }
 0x569   : > { %v1114_v13 = vpack.c.bf16 %v1108_v18, %v1107_v17  ;;  %4031 = vrcp.f32 %v1087_v10 }
 0x56a   : > { %4033 = vrcp.f32 %v1096_v39 }
 0x56b   : > { %3674 = vmatmul.msk.bf16.gmra.mxu0 %vm1024_vm5, %v1114_v13  ;;  %4035 = vrcp.f32 %v1093_v12 }
 0x56e   : > { %v4030_v27 = vpop.eup %4029  ;;  %v1177_v34 = vpop.permute.xlu1 %1176 }
 0x56f   : > { %v1189_v20 = vpop.permute.xlu2 %1188  ;;  %v4032_v26 = vpop.eup %4031  ;;  %v1110_v29 = vmul.f32 %v4030_v27, %v5039_v55 }
 0x570   : > { %v1212_v22 = vsel %vm962_vm4, %v1189_v20, 0  ;;  %v1109_v35 = vmul.f32 %v4032_v26, %v5016_v37  ;;  %v4034_v43 = vpop.eup %4033 }
 0x571   : > { %1218 = vmatpush.bf16.xpose.msrb.mxu1 %v1212_v22  ;;  %v4036_v61 = vpop.eup %4035  ;;  %v1112_v46 = vmul.f32 %v4034_v43, %v5026_v47 }
 0x572   : > { %v1115_v32 = vpack.c.bf16 %v1110_v29, %v1109_v35  ;;  %v1111_v30 = vmul.f32 %v4036_v61, %v5022_v60  ;;  %v1780_v60 = vpop.permute.xlu0 %1779 }
 0x573   : > { %v1802_v58 = vsel %vm962_vm4, %v1780_v60, 0 }
 0x574   : > { %v1116_v8 = vpack.c.bf16 %v1112_v46, %v1111_v30 }
 0x576   : > { %v1502_v48 = vpop.permute.xlu1 %1501 }
 0x577   : > { %v1185_v33 = vpop.permute.xlu2 %1184  ;;  %v1524_v56 = vsel %vm962_vm4, %v1502_v48, 0 }
 0x578   : > { %v1206_v42 = vsel %vm962_vm4, %v1185_v33, 0 }
 0x579   : > { %1219 = vmatpush.bf16.xpose.msrb.mxu1 %v1209_v38 }
 0x57a   : > { %v1490_v11 = vpop.permute.xlu0 %1489 }
 0x57b   : > { %3675 = vmatmul.msk.bf16.gmra.mxu0 %vm1024_vm5, %v1115_v32 }
 0x57e   : > { %v1181_v47 = vpop.permute.xlu1 %1180 }
 0x57f   : > { %v1175_v41 = vpop.permute.xlu2 %1174 }
 0x581   : > { %1220 = vmatpush.bf16.xpose.msrb.mxu1 %v1206_v42 }
 0x582   : > { %v1492_v12 = vpop.permute.xlu0 %1491 }
 0x586   : > { %v1498_v62 = vpop.permute.xlu1 %1497 }
 0x587   : > { %v1504_v37 = vpop.permute.xlu2 %1503  ;;  %v1518_v2 = vsel %vm962_vm4, %v1498_v62, 0 }
 0x588   : > { %v1527_v31 = vsel %vm962_vm4, %v1504_v37, 0 }
 0x589   : > { %1221 = vmatpush.bf16.xpose.msrb.mxu1 %v1203_v51 }
 0x58b   : > { %3676 = vmatmul.msk.bf16.gmra.mxu0 %vm1024_vm5, %v1116_v8 }
 0x58e   : > { %v1776_v4 = vpop.permute.xlu1 %1775 }
 0x58f   : > { %v1782_v54 = vpop.permute.xlu2 %1781  ;;  %v1796_v5 = vsel %vm962_vm4, %v1776_v4, 0 }
 0x590   : > { %v1805_v55 = vsel %vm962_vm4, %v1782_v54, 0  ;;  %3677 = vmatmul.msk.bf16.vlgmr.msrb.gmra.mxu1 %vm962_vm4, %v1175_v41 }
 0x591   : > { %1533 = vmatpush.bf16.xpose.msra.mxu1 %v1527_v31  ;;  %1811 = vmatpush.bf16.xpose.msrb.mxu0 %v1805_v55  ;;  %v1772_v55 = vpop.permute.xlu0 %1771 }
 0x596   : > { %v1770_v19 = vpop.permute.xlu1 %1769 }
 0x597   : > { %v1500_v57 = vpop.permute.xlu2 %1499 }
 0x598   : > { %v1521_v59 = vsel %vm962_vm4, %v1500_v57, 0 }
 0x599   : > { %1534 = vmatpush.bf16.xpose.msra.mxu1 %v1524_v56  ;;  %1812 = vmatpush.bf16.xpose.msrb.mxu0 %v1802_v58 }
 0x59e   : > { %v1496_v20 = vpop.permute.xlu1 %1495 }
 0x59f   : > { %v1778_v0 = vpop.permute.xlu2 %1777 }
 0x5a0   : > { %3678 = vmatmul.msk.bf16.gmra.mxu1 %vm962_vm4, %v1177_v34  ;;  %v1799_v1 = vsel %vm962_vm4, %v1778_v0, 0 }
 0x5a1   : > { %1535 = vmatpush.bf16.xpose.msra.mxu1 %v1521_v59  ;;  %1813 = vmatpush.bf16.xpose.msrb.mxu0 %v1799_v1 }
 0x5a7   : > { %v1768_v14 = vpop.permute.xlu2 %1767 }
 0x5a9   : > { %1536 = vmatpush.bf16.xpose.msra.mxu1 %v1518_v2  ;;  %1814 = vmatpush.bf16.xpose.msrb.mxu0 %v1796_v5 }
 0x5af   : > { %v1150_v6 = vpop.f32.mrf.mxu0  ;;  %v1494_v16 = vpop.permute.xlu2 %1493 }
 0x5b0   : > { %3679 = vmatmul.msk.bf16.gmra.mxu1 %vm962_vm4, %v1179_v52 }
 0x5b7   : > { %v1152_v7 = vpop.f32.mrf.mxu0  ;;  %v1774_v58 = vpop.permute.xlu2 %1773 }
 0x5b8   : > { %v1170_v10 = vpack.c.bf16 %v1152_v7, %v1150_v6 }
 0x5ba   : > { %3689 = vmatmul.msk.bf16.vlgmr.msra.gmra.mxu0 %vm962_vm4, %v1170_v10 }
 0x5c0   : > { %3680 = vmatmul.msk.bf16.gmra.mxu1 %vm962_vm4, %v1181_v47 }
 0x5d0   : > { %3693 = vmatmul.msk.bf16.vlgmr.msra.gmra.mxu1 %vm962_vm4, %v1490_v11 }
 0x5e0   : > { %3694 = vmatmul.msk.bf16.gmra.mxu1 %vm962_vm4, %v1492_v12 }
 0x5e8   : > { %v1155_v15 = vpop.f32.mrf.mxu0 }
 0x5f0   : > { %v1157_v17 = vpop.f32.mrf.mxu0  ;;  %3695 = vmatmul.msk.bf16.gmra.mxu1 %vm962_vm4, %v1494_v16 }
 0x5f1   : > { %v1171_v18 = vpack.c.bf16 %v1157_v17, %v1155_v15 }
 0x5f3   : > { %3690 = vmatmul.msk.bf16.gmra.mxu0 %vm962_vm4, %v1171_v18 }
 0x5f8   : > { %v1160_v13 = vpop.f32.mrf.mxu0 }
 0x600   : > { %v1162_v21 = vpop.f32.mrf.mxu0  ;;  %3696 = vmatmul.msk.bf16.gmra.mxu1 %vm962_vm4, %v1496_v20 }
 0x601   : > { %v1172_v22 = vpack.c.bf16 %v1162_v21, %v1160_v13 }
 0x603   : > { %3691 = vmatmul.msk.bf16.gmra.mxu0 %vm962_vm4, %v1172_v22 }
 0x608   : > { %v1165_v23 = vpop.f32.mrf.mxu0 }
 0x60d   : > { %v1223_v27 = vpop.f32.mrf.mxu1 }
 0x60e   : > { %v1243_v28 = vmul.f32 0.35355338, %v1223_v27 }
 0x610   : > { %v1167_v26 = vpop.f32.mrf.mxu0  ;;  %v1251_v29 = vsel %vm1024_vm5, %v1243_v28, -inf }
 0x611   : > { %v1173_v33 = vpack.c.bf16 %v1167_v26, %v1165_v23  ;;  %1252 = vmax.xlane.f32.xlu0 %v1251_v29 }
 0x613   : > { %3692 = vmatmul.msk.bf16.gmra.mxu0 %vm962_vm4, %v1173_v33 }
 0x615   : > { %v1225_v35 = vpop.f32.mrf.mxu1 }
 0x616   : > { %v1244_v38 = vmul.f32 0.35355338, %v1225_v35 }
 0x618   : > { %v1254_v39 = vsel %vm1024_vm5, %v1244_v38, -inf }
 0x619   : > { %1255 = vmax.xlane.f32.xlu1 %v1254_v39 }
 0x61d   : > { %v1228_v32 = vpop.f32.mrf.mxu1 }
 0x61e   : > { %v5126_v34 = vmul.f32 0.35355338, %v1228_v32 }
 0x620   : > { %v1257_v41 = vsel %vm1024_vm5, %v5126_v34, -inf }
 0x621   : > { %1258 = vmax.xlane.f32.xlu2 %v1257_v41 }
 0x623   : > { %3705 = vmatmul.msk.bf16.vlgmr.msrb.gmra.mxu0 %vm962_vm4, %v1768_v14 }
 0x625   : > { %v1230_v42 = vpop.f32.mrf.mxu1 }
 0x626   : > { %v5131_v43 = vmul.f32 0.35355338, %v1230_v42 }
 0x628   : > { %v1260_v61 = vsel %vm1024_vm5, %v5131_v43, -inf }
 0x629   : > { %1261 = vmax.xlane.f32.xlu0 %v1260_v61 }
 0x62d   : > { %v1233_v46 = vpop.f32.mrf.mxu1 }
 0x62e   : > { %v5135_v48 = vmul.f32 0.35355338, %v1233_v46 }
 0x630   : > { %v1263_v37 = vsel %vm1024_vm5, %v5135_v48, -inf }
 0x631   : > { %1264 = vmax.xlane.f32.xlu1 %v1263_v37 }
 0x633   : > { %3706 = vmatmul.msk.bf16.gmra.mxu0 %vm962_vm4, %v1770_v19 }
 0x635   : > { %v1235_v30 = vpop.f32.mrf.mxu1 }
 0x636   : > { %v5140_v31 = vmul.f32 0.35355338, %v1235_v30 }
 0x637   : > { %v5174_v18 = vpop.f32.mrf.mxu0 }
 0x638   : > { %v1266_v51 = vsel %vm1024_vm5, %v5140_v31, -inf }
 0x639   : > { %1267 = vmax.xlane.f32.xlu2 %v1266_v51 }
 0x63d   : > { %v1238_v8 = vpop.f32.mrf.mxu1 }
 0x63e   : > { %v5144_v52 = vmul.f32 0.35355338, %v1238_v8 }
 0x640   : > { %v1269_v54 = vsel %vm1024_vm5, %v5144_v52, -inf }
 0x641   : > { %1270 = vmax.xlane.f32.xlu0 %v1269_v54 }
 0x643   : > { %3707 = vmatmul.msk.bf16.gmra.mxu0 %vm962_vm4, %v1772_v55 }
 0x645   : > { %v1240_v47 = vpop.f32.mrf.mxu1 }
 0x646   : > { %v5149_v56 = vmul.f32 0.35355338, %v1240_v47 }
 0x648   : > { %v1272_v60 = vsel %vm1024_vm5, %v5149_v56, -inf }
 0x649   : > { %1273 = vmax.xlane.f32.xlu1 %v1272_v60 }
 0x64d   : > { %v1538_v57 = vpop.f32.mrf.mxu1 }
 0x64e   : > { %v5213_v51 = vmul.f32 0.35355338, %v1538_v57 }
 0x650   : > { %v1566_v55 = vsel %vm1024_vm5, %v5213_v51, -inf }
 0x651   : > { %1349 = vrot.lane.b32.xlu2 %v4971_v36, %s4633_s14 }
 0x653   : > { %3708 = vmatmul.msk.bf16.gmra.mxu0 %vm962_vm4, %v1774_v58 }
 0x655   : > { %v1540_v59 = vpop.f32.mrf.mxu1 }
 0x656   : > { %v5162_v2 = vmul.f32 0.35355338, %v1540_v59 }
 0x658   : > { %v1569_v5 = vsel %vm1024_vm5, %v5162_v2, -inf }
 0x659   : > { %1343 = vrot.lane.b32.xlu2 %v4959_v3, %s4633_s14 }
 0x65d   : > { %v5158_v62 = vpop.f32.mrf.mxu1 }
 0x665   : > { %v1545_v0 = vpop.f32.mrf.mxu1 }
 0x666   : > { %v5166_v7 = vmul.f32 0.35355338, %v1545_v0 }
 0x668   : > { %v1575_v14 = vsel %vm1024_vm5, %v5166_v7, -inf }
 0x66d   : > { %v5160_v1 = vpop.f32.mrf.mxu1 }
 0x675   : > { %v1550_v4 = vpop.f32.mrf.mxu1 }
 0x676   : > { %v5172_v16 = vmul.f32 0.35355338, %v1550_v4 }
 0x678   : > { %v1581_v21 = vsel %vm1024_vm5, %v5172_v16, -inf }
 0x67d   : > { %v5168_v12 = vpop.f32.mrf.mxu1 }
 0x682   : > { %1570 = vmax.xlane.f32.xlu2 %v1569_v5 }
 0x684   : > { %v1253_v6 = vpop.xlane.xlu0 %1252 }
 0x685   : > { %v1275_v10 = vsub.f32 %v1243_v28, %v1253_v6  ;;  %v1555_v22 = vpop.f32.mrf.mxu1  ;;  %v5186_v28 = vpop.f32.mrf.mxu0  ;;  %v5229_v6 = vmul.f32 0.35355338, %v5158_v62 }
 0x686   : > { %v5182_v23 = vmul.f32 0.35355338, %v1555_v22 }
 0x687   : > { %v1283_v11 = vmul.f32 1.442695, %v1275_v10 }
 0x688   : > { %v1587_v29 = vsel %vm1024_vm5, %v5182_v23, -inf }
 0x689   : > { %4037 = vpow2.f32 %v1283_v11 }
 0x68a   : > { %1576 = vmax.xlane.f32.xlu2 %v1575_v14  ;;  %v1572_v14 = vsel %vm1024_vm5, %v5229_v6, -inf }
 0x68c   : > { %v1256_v15 = vpop.xlane.xlu1 %1255 }
 0x68d   : > { %v1276_v17 = vsub.f32 %v1244_v38, %v1256_v15  ;;  %v5192_v33 = vpop.f32.mrf.mxu0 }
 0x68f   : > { %v5176_v19 = vpop.eup %4037  ;;  %v1285_v13 = vmul.f32 1.442695, %v1276_v17 }
 0x690   : > { %v1299_v20 = vsel %vm1024_vm5, %v5176_v19, 0.0 }
 0x691   : > { %4039 = vpow2.f32 %v1285_v13  ;;  %1300 = vadd.xlane.f32.xlu0 %v1299_v20 }
 0x692   : > { %1582 = vmax.xlane.f32.xlu2 %v1581_v21 }
 0x694   : > { %v1259_v35 = vpop.xlane.xlu2 %1258 }
 0x695   : > { %v5196_v38 = vpop.f32.mrf.mxu0  ;;  %v1277_v8 = vsub.f32 %v5126_v34, %v1259_v35 }
 0x697   : > { %v5184_v27 = vpop.eup %4039  ;;  %v1287_v54 = vmul.f32 1.442695, %v1277_v8 }
 0x698   : > { %v1302_v26 = vsel %vm1024_vm5, %v5184_v27, 0.0 }
 0x699   : > { %1303 = vadd.xlane.f32.xlu1 %v1302_v26 }
 0x69a   : > { %1588 = vmax.xlane.f32.xlu2 %v1587_v29  ;;  %v5250_v29 = vmul.f32 0.35355338, %v5160_v1 }
 0x69c   : > { %v1262_v61 = vpop.xlane.xlu0 %1261 }
 0x69d   : > { %v5202_v32 = vpop.f32.mrf.mxu0  ;;  %v1278_v46 = vsub.f32 %v5131_v43, %v1262_v61 }
 0x69f   : > { %v1289_v30 = vmul.f32 1.442695, %v1278_v46 }
 0x6a1   : > { %4041 = vpow2.f32 %v1289_v30 }
 0x6a2   : > { %4043 = vpow2.f32 %v1287_v54  ;;  %v5262_v54 = vmul.f32 0.35355338, %v5168_v12 }
 0x6a4   : > { %v1265_v47 = vpop.xlane.xlu1 %1264 }
 0x6a5   : > { %1347 = vrot.lane.b32.xlu0 %v4963_v63, %s4633_s14  ;;  %v5206_v42 = vpop.f32.mrf.mxu0  ;;  %v1279_v58 = vsub.f32 %v5135_v48, %v1265_v47 }
 0x6a7   : > { %v5221_v43 = vpop.eup %4041  ;;  %v1291_v57 = vmul.f32 1.442695, %v1279_v58  ;;  %v1584_v58 = vsel %vm1024_vm5, %v5262_v54, -inf }
 0x6a8   : > { %v1308_v34 = vsel %vm1024_vm5, %v5221_v43, 0.0  ;;  %v5226_v4 = vpop.eup %4043 }
 0x6a9   : > { %4045 = vpow2.f32 %v1291_v57  ;;  %v1305_v48 = vsel %vm1024_vm5, %v5226_v4, 0.0 }
 0x6ac   : > { %v1268_v39 = vpop.xlane.xlu2 %1267 }
 0x6ad   : > { %v5211_v37 = vpop.f32.mrf.mxu0  ;;  %v1280_v59 = vsub.f32 %v5140_v31, %v1268_v39 }
 0x6af   : > { %v1293_v5 = vmul.f32 1.442695, %v1280_v59  ;;  %v5236_v15 = vpop.eup %4045 }
 0x6b1   : > { %4047 = vpow2.f32 %v1293_v5 }
 0x6b2   : > { %1345 = vrot.lane.b32.xlu1 %v4967_v25, %s4633_s14  ;;  %1942 = vrot.lane.b32.xlu2 %v4971_v36, %s4634_s1 }
 0x6b4   : > { %v1350_v41 = vpop.permute.xlu2 %1349  ;;  %v1271_v0 = vpop.xlane.xlu0 %1270 }
 0x6b5   : > { %1371 = vmatpush.bf16.msra.mxu2 %v1350_v41  ;;  %v5218_v60 = vpop.f32.mrf.mxu0  ;;  %v1281_v10 = vsub.f32 %v5144_v52, %v1271_v0  ;;  %v1311_v52 = vsel %vm1024_vm5, %v5236_v15, 0.0 }
 0x6b7   : > { %v1295_v31 = vmul.f32 1.442695, %v1281_v10  ;;  %v5238_v62 = vpop.eup %4047 }
 0x6b8   : > { %v1314_v21 = vsel %vm1024_vm5, %v5238_v62, 0.0 }
 0x6b9   : > { %4049 = vpow2.f32 %v1295_v31 }
 0x6ba   : > { %1658 = vrot.lane.b32.xlu2 %v4959_v3, %s4635_s28 }
 0x6bc   : > { %v1274_v17 = vpop.xlane.xlu1 %1273  ;;  %v1344_v39 = vpop.permute.xlu2 %1343 }
 0x6bd   : > { %v1816_v11 = vpop.f32.mrf.mxu0  ;;  %v1282_v13 = vsub.f32 %v5149_v56, %v1274_v17  ;;  %v1578_v56 = vsel %vm1024_vm5, %v5250_v29, -inf }
 0x6bf   : > { %v5247_v22 = vpop.eup %4049  ;;  %v1297_v26 = vmul.f32 1.442695, %v1282_v13 }
 0x6c0   : > { %v1317_v35 = vsel %vm1024_vm5, %v5247_v22, 0.0 }
 0x6c1   : > { %4051 = vpow2.f32 %v1297_v26 }
 0x6c2   : > { %1940 = vrot.lane.b32.xlu2 %v4963_v63, %s4634_s1 }
 0x6c5   : > { %v5243_v20 = vpop.f32.mrf.mxu0 }
 0x6c7   : > { %v5256_v61 = vpop.eup %4051 }
 0x6c8   : > { %v1320_v1 = vsel %vm1024_vm5, %v5256_v61, 0.0 }
 0x6cd   : > { %v1821_v41 = vpop.f32.mrf.mxu0 }
 0x6ce   : > { %v5280_v5 = vmul.f32 0.35355338, %v1821_v41 }
 0x6cf   : > { %1567 = vmax.xlane.f32.xlu0 %v1566_v55 }
 0x6d5   : > { %v1823_v55 = vpop.f32.mrf.mxu0 }
 0x6d7   : > { %1309 = vadd.xlane.f32.xlu0 %v1308_v34  ;;  %v5272_v34 = vmul.f32 0.35355338, %v1816_v11  ;;  %v1850_v11 = vsel %vm1024_vm5, %v5280_v5, -inf }
 0x6d9   : > { %v1844_v0 = vsel %vm1024_vm5, %v5272_v34, -inf }
 0x6dc   : > { %1306 = vadd.xlane.f32.xlu1 %v1305_v48 }
 0x6dd   : > { %v1826_v57 = vpop.f32.mrf.mxu0 }
 0x6df   : > { %1573 = vmax.xlane.f32.xlu0 %v1572_v14 }
 0x6e4   : > { %1312 = vadd.xlane.f32.xlu1 %v1311_v52 }
 0x6e5   : > { %v1828_v48 = vpop.f32.mrf.mxu0 }
 0x6e7   : > { %1315 = vadd.xlane.f32.xlu0 %v1314_v21 }
 0x6ec   : > { %1318 = vadd.xlane.f32.xlu1 %v1317_v35 }
 0x6ed   : > { %v1831_v52 = vpop.f32.mrf.mxu0 }
 0x6ee   : > { %v5294_v26 = vmul.f32 0.35355338, %v1831_v52 }
 0x6ef   : > { %1579 = vmax.xlane.f32.xlu0 %v1578_v56 }
 0x6f5   : > { %v1571_v46 = vpop.xlane.xlu2 %1570  ;;  %v1833_v56 = vpop.f32.mrf.mxu0 }
 0x6f6   : > { %v1591_v30 = vsub.f32 %v5162_v2, %v1571_v46 }
 0x6f7   : > { %1321 = vadd.xlane.f32.xlu0 %v1320_v1  ;;  %v5300_v1 = vmul.f32 0.35355338, %v1833_v56 }
 0x6f8   : > { %v1600_v8 = vmul.f32 1.442695, %v1591_v30 }
 0x6fa   : > { %4053 = vpow2.f32 %v1600_v8 }
 0x6fd   : > { %v5264_v47 = vpop.xlane.xlu2 %1576 }
 0x6ff   : > { %1585 = vmax.xlane.f32.xlu0 %v1584_v58 }
 0x700   : > { %v5268_v59 = vpop.eup %4053 }
 0x701   : > { %v1617_v2 = vsel %vm1024_vm5, %v5268_v59, 0.0 }
 0x702   : > { %1618 = vadd.xlane.f32.xlu2 %v1617_v2 }
 0x704   : > { %v1301_v31 = vpop.xlane.xlu0 %1300 }
 0x705   : > { %1664 = vrot.lane.b32.xlu1 %v4971_v36, %s4635_s28  ;;  %v5276_v12 = vpop.xlane.xlu2 %1582  ;;  %v5290_v36 = vmul.f32 0.35355338, %v1826_v57  ;;  %v1865_v57 = vsel %vm1024_vm5, %v5300_v1, -inf }
 0x707   : > { %v1856_v13 = vsel %vm1024_vm5, %v5290_v36, -inf }
 0x70a   : > { %1845 = vmax.xlane.f32.xlu2 %v1844_v0 }
 0x70c   : > { %v1304_v21 = vpop.xlane.xlu1 %1303 }
 0x70d   : > { %1660 = vrot.lane.b32.xlu1 %v4967_v25, %s4635_s28  ;;  %v5284_v10 = vpop.xlane.xlu2 %1588  ;;  %4055 = vrcp.f32 %v1304_v21 }
 0x70e   : > { %4057 = vrcp.f32 %v1301_v31  ;;  %v5308_v31 = vmul.f32 0.35355338, %v5243_v20 }
 0x712   : > { %1851 = vmax.xlane.f32.xlu2 %v1850_v11  ;;  %v1847_v11 = vsel %vm1024_vm5, %v5308_v31, -inf }
 0x713   : > { %1662 = vrot.lane.b32.xlu0 %v4963_v63, %s4635_s28  ;;  %v1862_v63 = vsel %vm1024_vm5, %v5294_v26, -inf  ;;  %v4056_v41 = vpop.eup %4055 }
 0x714   : > { %v4058_v30 = vpop.eup %4057  ;;  %v1332_v58 = vmul.f32 %v4056_v41, %v5184_v27  ;;  %v5316_v27 = vmul.f32 0.35355338, %v1828_v48 }
 0x715   : > { %v1943_v14 = vpop.permute.xlu2 %1942  ;;  %v1331_v2 = vmul.f32 %v4058_v30, %v5176_v19 }
 0x716   : > { %1964 = vmatpush.bf16.msrb.mxu1 %v1943_v14  ;;  %v5312_v14 = vmul.f32 0.35355338, %v1823_v55  ;;  %v1859_v52 = vsel %vm1024_vm5, %v5316_v27, -inf }
 0x717   : > { %v1348_v17 = vpop.permute.xlu0 %1347  ;;  %v1339_v0 = vpack.c.bf16 %v1332_v58, %v1331_v2 }
 0x718   : > { %1372 = vmatpush.bf16.msra.mxu2 %v1348_v17  ;;  %v1853_v19 = vsel %vm1024_vm5, %v5312_v14, -inf }
 0x71a   : > { %1857 = vmax.xlane.f32.xlu2 %v1856_v13 }
 0x71d   : > { %v5296_v35 = vpop.permute.xlu2 %1658 }
 0x722   : > { %1863 = vmax.xlane.f32.xlu2 %v1862_v63 }
 0x724   : > { %v1346_v46 = vpop.permute.xlu1 %1345 }
 0x725   : > { %1373 = vmatpush.bf16.msra.mxu2 %v1346_v46  ;;  %v1941_v8 = vpop.permute.xlu2 %1940 }
 0x726   : > { %1965 = vmatpush.bf16.msrb.mxu1 %v1941_v8  ;;  %v1593_v8 = vsub.f32 %v5166_v7, %v5264_v47 }
 0x729   : > { %1374 = vmatpush.bf16.msra.mxu2 %v1344_v39 }
 0x72a   : > { %1866 = vmax.xlane.f32.xlu2 %v1865_v57 }
 0x72c   : > { %3681 = vmatmul.msk.bf16.vlgmr.msra.gmra.mxu2 %vm1024_vm5, %v1339_v0 }
 0x737   : > { %1848 = vmax.xlane.f32.xlu1 %v1847_v11 }
 0x73f   : > { %1854 = vmax.xlane.f32.xlu1 %v1853_v19 }
 0x742   : > { %v1568_v39 = vpop.xlane.xlu0 %1567  ;;  %1938 = vrot.lane.b32.xlu2 %v4967_v25, %s4634_s1 }
 0x743   : > { %v1590_v17 = vsub.f32 %v5213_v51, %v1568_v39 }
 0x745   : > { %v1598_v20 = vmul.f32 1.442695, %v1590_v17 }
 0x747   : > { %4059 = vpow2.f32 %v1598_v20  ;;  %1860 = vmax.xlane.f32.xlu1 %v1859_v52 }
 0x74a   : > { %v1310_v55 = vpop.xlane.xlu0 %1309 }
 0x74b   : > { %4061 = vrcp.f32 %v1310_v55 }
 0x74d   : > { %v5323_v13 = vpop.eup %4059 }
 0x74e   : > { %v1614_v48 = vsel %vm1024_vm5, %v5323_v13, 0.0 }
 0x74f   : > { %v1307_v21 = vpop.xlane.xlu1 %1306  ;;  %1615 = vadd.xlane.f32.xlu0 %v1614_v48 }
 0x750   : > { %4063 = vrcp.f32 %v1307_v21 }
 0x751   : > { %v4062_v51 = vpop.eup %4061 }
 0x752   : > { %v1574_v63 = vpop.xlane.xlu0 %1573  ;;  %v1334_v30 = vmul.f32 %v4062_v51, %v5221_v43 }
 0x753   : > { %v1592_v25 = vsub.f32 %v5229_v6, %v1574_v63  ;;  %v1604_v6 = vmul.f32 1.442695, %v1593_v8 }
 0x755   : > { %v1602_v56 = vmul.f32 1.442695, %v1592_v25 }
 0x756   : > { %v4064_v41 = vpop.eup %4063 }
 0x757   : > { %4065 = vpow2.f32 %v1602_v56  ;;  %v1333_v46 = vmul.f32 %v4064_v41, %v5226_v4  ;;  %v1313_v57 = vpop.xlane.xlu1 %1312 }
 0x759   : > { %v1340_v58 = vpack.c.bf16 %v1334_v30, %v1333_v46 }
 0x75a   : > { %v1316_v2 = vpop.xlane.xlu0 %1315 }
 0x75b   : > { %3682 = vmatmul.msk.bf16.gmra.mxu2 %vm1024_vm5, %v1340_v58  ;;  %4067 = vrcp.f32 %v1316_v2 }
 0x75c   : > { %4069 = vrcp.f32 %v1313_v57 }
 0x75d   : > { %v5333_v0 = vpop.eup %4065  ;;  %4071 = vpow2.f32 %v1604_v6 }
 0x75e   : > { %v1620_v11 = vsel %vm1024_vm5, %v5333_v0, 0.0 }
 0x75f   : > { %1621 = vadd.xlane.f32.xlu0 %v1620_v11  ;;  %v1319_v55 = vpop.xlane.xlu1 %1318 }
 0x761   : > { %v4068_v4 = vpop.eup %4067 }
 0x762   : > { %v1580_v43 = vpop.xlane.xlu0 %1579  ;;  %v4070_v19 = vpop.eup %4069  ;;  %v1336_v7 = vmul.f32 %v4068_v4, %v5238_v62 }
 0x763   : > { %v5338_v47 = vpop.eup %4071  ;;  %v1335_v39 = vmul.f32 %v4070_v19, %v5236_v15  ;;  %v1594_v2 = vsub.f32 %v5250_v29, %v1580_v43 }
 0x764   : > { %v1623_v52 = vsel %vm1024_vm5, %v5338_v47, 0.0 }
 0x765   : > { %v1341_v17 = vpack.c.bf16 %v1336_v7, %v1335_v39  ;;  %v1606_v57 = vmul.f32 1.442695, %v1594_v2 }
 0x76a   : > { %v1322_v20 = vpop.xlane.xlu0 %1321 }
 0x76b   : > { %3683 = vmatmul.msk.bf16.gmra.mxu2 %vm1024_vm5, %v1341_v17  ;;  %1624 = vadd.xlane.f32.xlu2 %v1623_v52  ;;  %4073 = vrcp.f32 %v1322_v20  ;;  %v858_v52 = vld [vmem:[#allocation14 + $0x4] sm:$0xf] }
 0x76c   : > { %4075 = vrcp.f32 %v1319_v55  ;;  %v1414_v55 = vsel %vm1412_vm6, %v858_v52, 0 }
 0x76d   : > { %1423 = vmatpush.bf16.msra.mxu3 %v1414_v55 }
 0x771   : > { %v4074_v48 = vpop.eup %4073 }
 0x772   : > { %v1586_v21 = vpop.xlane.xlu0 %1585  ;;  %v4076_v62 = vpop.eup %4075  ;;  %v1338_v15 = vmul.f32 %v4074_v48, %v5256_v61 }
 0x773   : > { %v1596_v63 = vsub.f32 %v5262_v54, %v1586_v21  ;;  %v1337_v41 = vmul.f32 %v4076_v62, %v5247_v22 }
 0x775   : > { %v1610_v25 = vmul.f32 1.442695, %v1596_v63  ;;  %v5345_v51 = vpop.xlane.xlu2 %1618  ;;  %v1342_v46 = vpack.c.bf16 %v1338_v15, %v1337_v41 }
 0x777   : > { %4077 = vpow2.f32 %v1610_v25  ;;  %v1665_v56 = vpop.permute.xlu1 %1664 }
 0x778   : > { %1686 = vmatpush.bf16.msrb.mxu2 %v1665_v56 }
 0x77b   : > { %3684 = vmatmul.msk.bf16.gmra.mxu2 %vm1024_vm5, %v1342_v46 }
 0x77d   : > { %v5350_v30 = vpop.eup %4077  ;;  %v1846_v8 = vpop.xlane.xlu2 %1845 }
 0x77e   : > { %v1868_v58 = vsub.f32 %v5272_v34, %v1846_v8  ;;  %v1632_v54 = vsel %vm1024_vm5, %v5350_v30, 0.0 }
 0x77f   : > { %1633 = vadd.xlane.f32.xlu2 %v1632_v54  ;;  %v1661_v19 = vpop.permute.xlu1 %1660 }
 0x780   : > { %v1876_v61 = vmul.f32 1.442695, %v1868_v58 }
 0x782   : > { %4079 = vpow2.f32 %v1876_v61 }
 0x783   : > { %4081 = vpow2.f32 %v1606_v57 }
 0x785   : > { %v1663_v6 = vpop.permute.xlu0 %1662  ;;  %v1852_v22 = vpop.xlane.xlu2 %1851 }
 0x786   : > { %1687 = vmatpush.bf16.msrb.mxu2 %v1663_v6  ;;  %v1870_v4 = vsub.f32 %v5280_v5, %v1852_v22 }
 0x788   : > { %v5356_v11 = vpop.eup %4079  ;;  %v1880_v7 = vmul.f32 1.442695, %v1870_v4 }
 0x789   : > { %v1892_v34 = vsel %vm1024_vm5, %v5356_v11, 0.0  ;;  %v5361_v29 = vpop.eup %4081 }
 0x78a   : > { %1688 = vmatpush.bf16.msrb.mxu2 %v1661_v19  ;;  %1893 = vadd.xlane.f32.xlu0 %v1892_v34  ;;  %4083 = vpow2.f32 %v1880_v7  ;;  %v1626_v43 = vsel %vm1024_vm5, %v5361_v29, 0.0 }
 0x78d   : > { %v1858_v39 = vpop.xlane.xlu2 %1857 }
 0x78e   : > { %1689 = vmatpush.bf16.msrb.mxu2 %v5296_v35  ;;  %v1872_v54 = vsub.f32 %v5290_v36, %v1858_v39  ;;  %v1597_v39 = vsub.f32 %v5182_v23, %v5284_v10 }
 0x790   : > { %v5366_v20 = vpop.eup %4083  ;;  %v1884_v22 = vmul.f32 1.442695, %v1872_v54  ;;  %v1595_v54 = vsub.f32 %v5172_v16, %v5276_v12 }
 0x791   : > { %v1898_v21 = vsel %vm1024_vm5, %v5366_v20, 0.0 }
 0x792   : > { %1627 = vadd.xlane.f32.xlu0 %v1626_v43 }
 0x795   : > { %v1864_v17 = vpop.xlane.xlu2 %1863 }
 0x796   : > { %v1874_v5 = vsub.f32 %v5294_v26, %v1864_v17 }
 0x798   : > { %v1888_v48 = vmul.f32 1.442695, %v1874_v5  ;;  %v1612_v5 = vmul.f32 1.442695, %v1597_v39  ;;  %v859_v39 = vld [vmem:[#allocation14 + $0x8] sm:$0xf] }
 0x79a   : > { %4085 = vpow2.f32 %v1888_v48  ;;  %1899 = vadd.xlane.f32.xlu0 %v1898_v21 }
 0x79d   : > { %v1867_v35 = vpop.xlane.xlu2 %1866 }
 0x79e   : > { %v1875_v21 = vsub.f32 %v5300_v1, %v1867_v35 }
 0x7a0   : > { %v5372_v63 = vpop.eup %4085  ;;  %v1890_v10 = vmul.f32 1.442695, %v1875_v21 }
 0x7a1   : > { %v1910_v62 = vsel %vm1024_vm5, %v5372_v63, 0.0 }
 0x7a2   : > { %1911 = vadd.xlane.f32.xlu2 %v1910_v62 }
 0x7a5   : > { %v1939_v25 = vpop.permute.xlu2 %1938 }
 0x7a6   : > { %1966 = vmatpush.bf16.msrb.mxu1 %v1939_v25 }
 0x7aa   : > { %v1849_v26 = vpop.xlane.xlu1 %1848 }
 0x7ab   : > { %v1869_v15 = vsub.f32 %v5308_v31, %v1849_v26 }
 0x7ad   : > { %v1878_v56 = vmul.f32 1.442695, %v1869_v15 }
 0x7af   : > { %4087 = vpow2.f32 %v1878_v56  ;;  %v1376_v41 = vpop.f32.mrf.mxu2 }
 0x7b2   : > { %v1855_v46 = vpop.xlane.xlu1 %1854 }
 0x7b3   : > { %v1871_v8 = vsub.f32 %v5312_v14, %v1855_v46 }
 0x7b5   : > { %v5378_v58 = vpop.eup %4087  ;;  %v1882_v2 = vmul.f32 1.442695, %v1871_v8 }
 0x7b6   : > { %v1895_v61 = vsel %vm1024_vm5, %v5378_v58, 0.0 }
 0x7b7   : > { %4089 = vpow2.f32 %v1882_v2  ;;  %1896 = vadd.xlane.f32.xlu1 %v1895_v61  ;;  %v1378_v57 = vpop.f32.mrf.mxu2  ;;  %v1608_v61 = vmul.f32 1.442695, %v1595_v54 }
 0x7b8   : > { %v1396_v6 = vpack.c.bf16 %v1378_v57, %v1376_v41  ;;  %4091 = vpow2.f32 %v1884_v22 }
 0x7b9   : > { %4093 = vrcp.f32 %v5345_v51 }
 0x7ba   : > { %v1861_v31 = vpop.xlane.xlu1 %1860  ;;  %3685 = vmatmul.msk.bf16.vlgmr.msra.gmra.mxu3 %vm962_vm4, %v1396_v6 }
 0x7bb   : > { %v1873_v14 = vsub.f32 %v5316_v27, %v1861_v31 }
 0x7bd   : > { %v5384_v4 = vpop.eup %4089  ;;  %v1886_v19 = vmul.f32 1.442695, %v1873_v14 }
 0x7be   : > { %v1901_v36 = vsel %vm1024_vm5, %v5384_v4, 0.0  ;;  %v5390_v7 = vpop.eup %4091 }
 0x7bf   : > { %1902 = vadd.xlane.f32.xlu0 %v1901_v36  ;;  %v1904_v43 = vsel %vm1024_vm5, %v5390_v7, 0.0  ;;  %v4094_v17 = vpop.eup %4093 }
 0x7c0   : > { %v1647_v52 = vmul.f32 %v4094_v17, %v5268_v59 }
 0x7c2   : > { %v1616_v34 = vpop.xlane.xlu0 %1615 }
 0x7c3   : > { %4095 = vrcp.f32 %v1616_v34 }
 0x7c4   : > { %4097 = vpow2.f32 %v1886_v19 }
 0x7c5   : > { %4099 = vpow2.f32 %v1612_v5 }
 0x7c6   : > { %4101 = vpow2.f32 %v1890_v10 }
 0x7c7   : > { %1905 = vadd.xlane.f32.xlu0 %v1904_v43  ;;  %v1728_v43 = vsel %vm1412_vm6, %v859_v39, 0 }
 0x7c8   : > { %1737 = vmatpush.bf16.msrb.mxu3 %v1728_v43 }
 0x7c9   : > { %v4096_v27 = vpop.eup %4095 }
 0x7ca   : > { %v1646_v51 = vmul.f32 %v4096_v27, %v5323_v13  ;;  %v5398_v55 = vpop.eup %4097 }
 0x7cb   : > { %v1907_v23 = vsel %vm1024_vm5, %v5398_v55, 0.0  ;;  %v5406_v62 = vpop.eup %4099 }
 0x7cc   : > { %v1654_v48 = vpack.c.bf16 %v1647_v52, %v1646_v51  ;;  %v1635_v59 = vsel %vm1024_vm5, %v5406_v62, 0.0  ;;  %v5410_v25 = vpop.eup %4101 }
 0x7cd   : > { %v1913_v26 = vsel %vm1024_vm5, %v5410_v25, 0.0 }
 0x7ce   : > { %3697 = vmatmul.msk.bf16.vlgmr.msrb.gmra.mxu2 %vm1024_vm5, %v1654_v48 }
 0x7cf   : > { %1908 = vadd.xlane.f32.xlu0 %v1907_v23 }
 0x7d0   : > { %1936 = vrot.lane.b32.xlu1 %v4959_v3, %s4634_s1 }
 0x7d2   : > { %v1622_v13 = vpop.xlane.xlu0 %1621 }
 0x7d3   : > { %4103 = vrcp.f32 %v1622_v13 }
 0x7d7   : > { %1636 = vadd.xlane.f32.xlu0 %v1635_v59 }
 0x7d9   : > { %v4104_v3 = vpop.eup %4103 }
 0x7da   : > { %v1648_v41 = vmul.f32 %v4104_v3, %v5333_v0 }
 0x7de   : > { %v1381_v1 = vpop.f32.mrf.mxu2  ;;  %v1625_v35 = vpop.xlane.xlu2 %1624 }
 0x7df   : > { %4105 = vrcp.f32 %v1625_v35  ;;  %1914 = vadd.xlane.f32.xlu0 %v1913_v26 }
 0x7e0   : > { %4107 = vpow2.f32 %v1608_v61 }
 0x7e5   : > { %v4106_v15 = vpop.eup %4105 }
 0x7e6   : > { %v1383_v56 = vpop.f32.mrf.mxu2  ;;  %v1649_v46 = vmul.f32 %v4106_v15, %v5338_v47  ;;  %v5420_v6 = vpop.eup %4107 }
 0x7e7   : > { %v1397_v8 = vpack.c.bf16 %v1383_v56, %v1381_v1  ;;  %v1629_v0 = vsel %vm1024_vm5, %v5420_v6, 0.0 }
 0x7e8   : > { %v1655_v2 = vpack.c.bf16 %v1649_v46, %v1648_v41 }
 0x7e9   : > { %3686 = vmatmul.msk.bf16.gmra.mxu3 %vm962_vm4, %v1397_v8 }
 0x7ea   : > { %3698 = vmatmul.msk.bf16.gmra.mxu2 %vm1024_vm5, %v1655_v2 }
 0x7ee   : > { %v1386_v57 = vpop.f32.mrf.mxu2 }
 0x7f2   : > { %v1634_v41 = vpop.xlane.xlu2 %1633 }
 0x7f6   : > { %v1388_v22 = vpop.f32.mrf.mxu2 }
 0x7f7   : > { %v1398_v31 = vpack.c.bf16 %v1388_v22, %v1386_v57 }
 0x7f9   : > { %3687 = vmatmul.msk.bf16.gmra.mxu3 %vm962_vm4, %v1398_v31 }
 0x7fa   : > { %1630 = vadd.xlane.f32.xlu1 %v1629_v0 }
 0x7fd   : > { %v1894_v14 = vpop.xlane.xlu0 %1893 }
 0x7fe   : > { %v1391_v47 = vpop.f32.mrf.mxu2 }
 0x805   : > { %v1628_v36 = vpop.xlane.xlu0 %1627 }
 0x806   : > { %v1393_v16 = vpop.f32.mrf.mxu2 }
 0x807   : > { %v1399_v12 = vpack.c.bf16 %v1393_v16, %v1391_v47 }
 0x809   : > { %3688 = vmatmul.msk.bf16.gmra.mxu3 %vm962_vm4, %v1399_v12 }
 0x80d   : > { %v1900_v19 = vpop.xlane.xlu0 %1899 }
 0x82a   : > { %v1897_v34 = vpop.xlane.xlu1 %1896 }
 0x82b   : > { %4109 = vrcp.f32 %v1897_v34 }
 0x82c   : > { %4111 = vrcp.f32 %v1894_v14 }
 0x831   : > { %v4110_v27 = vpop.eup %4109 }
 0x832   : > { %v1903_v17 = vpop.xlane.xlu0 %1902  ;;  %v4112_v5 = vpop.eup %4111  ;;  %v1925_v52 = vmul.f32 %v4110_v27, %v5378_v58 }
 0x833   : > { %v1924_v51 = vmul.f32 %v4112_v5, %v5356_v11  ;;  %4113 = vrcp.f32 %v1903_v17 }
 0x834   : > { %4115 = vrcp.f32 %v1900_v19 }
 0x835   : > { %v1932_v21 = vpack.c.bf16 %v1925_v52, %v1924_v51 }
 0x839   : > { %v4114_v10 = vpop.eup %4113 }
 0x83a   : > { %v1906_v23 = vpop.xlane.xlu0 %1905  ;;  %v4116_v59 = vpop.eup %4115  ;;  %v1927_v1 = vmul.f32 %v4114_v10, %v5384_v4 }
 0x83b   : > { %v1926_v26 = vmul.f32 %v4116_v59, %v5366_v20  ;;  %v1912_v20 = vpop.xlane.xlu2 %1911 }
 0x83d   : > { %v1933_v3 = vpack.c.bf16 %v1927_v1, %v1926_v26 }
 0x842   : > { %v1937_v48 = vpop.permute.xlu1 %1936  ;;  %v1909_v13 = vpop.xlane.xlu0 %1908 }
 0x843   : > { %1967 = vmatpush.bf16.msrb.mxu1 %v1937_v48  ;;  %4117 = vrcp.f32 %v1909_v13 }
 0x844   : > { %4119 = vrcp.f32 %v1906_v23 }
 0x846   : > { %3709 = vmatmul.msk.bf16.vlgmr.msrb.gmra.mxu1 %vm1024_vm5, %v1932_v21 }
 0x849   : > { %v4118_v56 = vpop.eup %4117 }
 0x84a   : > { %v1637_v58 = vpop.xlane.xlu0 %1636  ;;  %v4120_v46 = vpop.eup %4119  ;;  %v1929_v8 = vmul.f32 %v4118_v56, %v5398_v55 }
 0x84b   : > { %v1928_v4 = vmul.f32 %v4120_v46, %v5390_v7 }
 0x84d   : > { %v1934_v2 = vpack.c.bf16 %v1929_v8, %v1928_v4 }
 0x851   : > { %v1691_v35 = vpop.f32.mrf.mxu2 }
 0x852   : > { %v1915_v54 = vpop.xlane.xlu0 %1914 }
 0x853   : > { %4121 = vrcp.f32 %v1915_v54 }
 0x854   : > { %4123 = vrcp.f32 %v1912_v20  ;;  %v3812_v20 = vld [vmem:[#allocation16] sm:$0xff] }
 0x855   : > { %4125 = vrcp.f32 %v1628_v36 }
 0x856   : > { %3710 = vmatmul.msk.bf16.gmra.mxu1 %vm1024_vm5, %v1933_v3 }
 0x859   : > { %v1693_v11 = vpop.f32.mrf.mxu2  ;;  %v4122_v61 = vpop.eup %4121 }
 0x85a   : > { %v1711_v15 = vpack.c.bf16 %v1693_v11, %v1691_v35  ;;  %v4124_v31 = vpop.eup %4123  ;;  %v1931_v0 = vmul.f32 %v4122_v61, %v5410_v25  ;;  %v1425_v35 = vpop.f32.mrf.mxu3 }
 0x85b   : > { %v4126_v47 = vpop.eup %4125  ;;  %v1930_v55 = vmul.f32 %v4124_v31, %v5372_v63  ;;  %v1470_v31 = vadd.f32 %v5174_v18, %v1425_v35 }
 0x85c   : > { %3701 = vmatmul.msk.bf16.vlgmr.msrb.gmra.mxu3 %vm962_vm4, %v1711_v15  ;;  %v1650_v12 = vmul.f32 %v4126_v47, %v5361_v29 }
 0x85d   : > { %v1935_v7 = vpack.c.bf16 %v1931_v0, %v1930_v55 }
 0x862   : > { %v1427_v11 = vpop.f32.mrf.mxu3 }
 0x863   : > { %v1472_v55 = vadd.f32 %v5186_v28, %v1427_v11 }
 0x866   : > { %3711 = vmatmul.msk.bf16.gmra.mxu1 %vm1024_vm5, %v1934_v2  ;;  %v3813_v2 = vld [vmem:[#allocation16 + $0x8] sm:$0xff] }
 0x867   : > { %2098 = vmatpush.bf16.msra.mxu3 %v3813_v2 }
 0x86b   : > { %2099 = vmatpush.bf16.msra.mxu3 %v3812_v20 }
 0x86c   : > { %v1430_v15 = vpop.f32.mrf.mxu3 }
 0x86d   : > { %v1631_v57 = vpop.xlane.xlu1 %1630  ;;  %v1696_v22 = vpop.f32.mrf.mxu2 }
 0x86e   : > { %4127 = vrcp.f32 %v1631_v57 }
 0x86f   : > { %4129 = vrcp.f32 %v1637_v58 }
 0x870   : > { %4131 = vrcp.f32 %v1634_v41 }
 0x874   : > { %v4128_v16 = vpop.eup %4127  ;;  %v1432_v46 = vpop.f32.mrf.mxu3 }
 0x875   : > { %v1651_v14 = vmul.f32 %v4128_v16, %v5420_v6  ;;  %v1698_v19 = vpop.f32.mrf.mxu2  ;;  %v4130_v25 = vpop.eup %4129  ;;  %v860_v6 = vld [vmem:[#allocation14 + $0xc] sm:$0xf] }
 0x876   : > { %v1712_v34 = vpack.c.bf16 %v1698_v19, %v1696_v22  ;;  %3712 = vmatmul.msk.bf16.gmra.mxu1 %vm1024_vm5, %v1935_v7  ;;  %v4132_v39 = vpop.eup %4131  ;;  %v1653_v63 = vmul.f32 %v4130_v25, %v5406_v62  ;;  %v2006_v17 = vsel %vm1412_vm6, %v860_v6, 0  ;;  %v3970_v7 = vld [vmem:[%s6068_s9] ss:$0 sm:$0xff] }
 0x877   : > { %v1656_v36 = vpack.c.bf16 %v1651_v14, %v1650_v12  ;;  %v1652_v43 = vmul.f32 %v4132_v39, %v5350_v30  ;;  %2015 = vmatpush.bf16.msra.mxu2 %v2006_v17  ;;  %v1477_v17 = vadd.f32 %v5196_v38, %v1432_v46 }
 0x878   : > { %3702 = vmatmul.msk.bf16.gmra.mxu3 %vm962_vm4, %v1712_v34 }
 0x879   : > { %3699 = vmatmul.msk.bf16.gmra.mxu2 %vm1024_vm5, %v1656_v36  ;;  %v1657_v29 = vpack.c.bf16 %v1653_v63, %v1652_v43 }
 0x87c   : > { %v1435_v8 = vpop.f32.mrf.mxu3 }
 0x884   : > { %v1437_v4 = vpop.f32.mrf.mxu3 }
 0x885   : > { %v1482_v38 = vadd.f32 %v5206_v42, %v1437_v4 }
 0x889   : > { %3700 = vmatmul.msk.bf16.gmra.mxu2 %vm1024_vm5, %v1657_v29  ;;  %v1475_v29 = vadd.f32 %v5192_v33, %v1430_v15 }
 0x88c   : > { %v1440_v54 = vpop.f32.mrf.mxu3 }
 0x894   : > { %v1442_v61 = vpop.f32.mrf.mxu3 }
 0x895   : > { %v1487_v42 = vadd.f32 %v5218_v60, %v1442_v61 }
 0x8c3   : > { %v1969_v27 = vpop.f32.mrf.mxu1 }
 0x8cb   : > { %v1971_v5 = vpop.f32.mrf.mxu1 }
 0x8cc   : > { %v1989_v52 = vpack.c.bf16 %v1971_v5, %v1969_v27 }
 0x8ce   : > { %3713 = vmatmul.msk.bf16.vlgmr.msra.gmra.mxu2 %vm962_vm4, %v1989_v52 }
 0x8d3   : > { %v1974_v51 = vpop.f32.mrf.mxu1 }
 0x8db   : > { %v1976_v48 = vpop.f32.mrf.mxu1 }
 0x8dc   : > { %v1990_v21 = vpack.c.bf16 %v1976_v48, %v1974_v51 }
 0x8de   : > { %3714 = vmatmul.msk.bf16.gmra.mxu2 %vm962_vm4, %v1990_v21 }
 0x8df   : > { %v1739_v57 = vpop.f32.mrf.mxu3 }
 0x8e0   : > { %v1759_v47 = vadd.f32 %v1739_v57, %v1470_v31 }
 0x8e3   : > { %v1979_v62 = vpop.f32.mrf.mxu1 }
 0x8e7   : > { %v1741_v0 = vpop.f32.mrf.mxu3 }
 0x8e8   : > { %v1760_v12 = vadd.f32 %v1741_v0, %v1472_v55 }
 0x8eb   : > { %v1981_v23 = vpop.f32.mrf.mxu1 }
 0x8ec   : > { %v1991_v30 = vpack.c.bf16 %v1981_v23, %v1979_v62 }
 0x8ee   : > { %3715 = vmatmul.msk.bf16.gmra.mxu2 %vm962_vm4, %v1991_v30  ;;  %v1480_v30 = vadd.f32 %v5202_v32, %v1435_v8 }
 0x8f3   : > { %v1984_v10 = vpop.f32.mrf.mxu1 }
 0x8fb   : > { %v1986_v59 = vpop.f32.mrf.mxu1  ;;  %v1744_v36 = vpop.f32.mrf.mxu3 }
 0x8fc   : > { %v1992_v13 = vpack.c.bf16 %v1986_v59, %v1984_v10  ;;  %v1701_v1 = vpop.f32.mrf.mxu2  ;;  %v1761_v28 = vadd.f32 %v1744_v36, %v1475_v29 }
 0x8fe   : > { %3716 = vmatmul.msk.bf16.gmra.mxu2 %vm962_vm4, %v1992_v13 }
 0x903   : > { %v1746_v6 = vpop.f32.mrf.mxu3 }
 0x904   : > { %v1703_v26 = vpop.f32.mrf.mxu2  ;;  %v1762_v5 = vadd.f32 %v1746_v6, %v1477_v17 }
 0x905   : > { %v1713_v3 = vpack.c.bf16 %v1703_v26, %v1701_v1 }
 0x907   : > { %3703 = vmatmul.msk.bf16.gmra.mxu3 %vm962_vm4, %v1713_v3 }
 0x90c   : > { %v1706_v58 = vpop.f32.mrf.mxu2 }
 0x914   : > { %v1708_v56 = vpop.f32.mrf.mxu2 }
 0x915   : > { %v1714_v41 = vpack.c.bf16 %v1708_v56, %v1706_v58  ;;  %v1485_v56 = vadd.f32 %v5211_v37, %v1440_v54  ;;  %v3815_v37 = vld [vmem:[#allocation13 + $0x18] sm:$0xff]  ;;  %v3814_v54 = vld [vmem:[#allocation13 + $0x10] sm:$0xff] }
 0x916   : > { %2185 = vmatpush.bf16.msra.mxu0 %v3815_v37 }
 0x917   : > { %3704 = vmatmul.msk.bf16.gmra.mxu3 %vm962_vm4, %v1714_v41 }
 0x91a   : > { %2186 = vmatpush.bf16.msra.mxu0 %v3814_v54 }
 0x951   : > { %v2017_v22 = vpop.f32.mrf.mxu2 }
 0x952   : > { %v2037_v16 = vadd.f32 %v2017_v22, %v1759_v47 }
 0x954   : > { %v2048_v19 = vadd.f32 %v3970_v7, %v2037_v16 }
 0x956   : > { %v2056_v39 = vadd.f32 %v2048_v19, %v4925_v24 }
 0x959   : > { %v2019_v14 = vpop.f32.mrf.mxu2 }
 0x95a   : > { %v2038_v34 = vadd.f32 %v2019_v14, %v1760_v12 }
 0x95c   : > { %v2049_v25 = vadd.f32 %v3970_v7, %v2038_v34 }
 0x95e   : > { %v2057_v63 = vadd.f32 %v2049_v25, %v4928_v40 }
 0x960   : > { %v2064_v18 = vpack.c.bf16 %v2057_v63, %v2056_v39 }
 0x961   : > { %v2022_v43 = vpop.f32.mrf.mxu2 }
 0x962   : > { %3725 = vmatmul.msk.bf16.vlgmr.msra.gmra.mxu3 %vm802_vm10, %v2064_v18  ;;  %v2039_v27 = vadd.f32 %v2022_v43, %v1761_v28 }
 0x964   : > { %v2050_v51 = vadd.f32 %v3970_v7, %v2039_v27  ;;  %v3971_v27 = vld [vmem:[%s6066_s7 + $0x1] ss:$0 sm:$0xff] }
 0x966   : > { %v2058_v24 = vadd.f32 %v2050_v51, %v4934_v44 }
 0x969   : > { %v2024_v52 = vpop.f32.mrf.mxu2 }
 0x96a   : > { %v2040_v48 = vadd.f32 %v2024_v52, %v1762_v5 }
 0x96c   : > { %v2051_v21 = vadd.f32 %v3970_v7, %v2040_v48 }
 0x96e   : > { %v2059_v40 = vadd.f32 %v2051_v21, %v4937_v45 }
 0x970   : > { %v2065_v62 = vpack.c.bf16 %v2059_v40, %v2058_v24 }
 0x971   : > { %v2027_v33 = vpop.f32.mrf.mxu2 }
 0x972   : > { %3726 = vmatmul.msk.bf16.gmra.mxu3 %vm802_vm10, %v2065_v62 }
 0x979   : > { %v2029_v59 = vpop.f32.mrf.mxu2 }
 0x981   : > { %v2032_v58 = vpop.f32.mrf.mxu2 }
 0x989   : > { %v2034_v2 = vpop.f32.mrf.mxu2 }
 0x98a   : > { %v1749_v23 = vpop.f32.mrf.mxu3 }
 0x98b   : > { %v1763_v10 = vadd.f32 %v1749_v23, %v1480_v30 }
 0x98d   : > { %v2041_v13 = vadd.f32 %v2027_v33, %v1763_v10 }
 0x98f   : > { %v2052_v26 = vadd.f32 %v3970_v7, %v2041_v13 }
 0x991   : > { %v2060_v44 = vadd.f32 %v2052_v26, %v4942_v49 }
 0x992   : > { %v1751_v1 = vpop.f32.mrf.mxu3 }
 0x993   : > { %v1764_v35 = vadd.f32 %v1751_v1, %v1482_v38 }
 0x995   : > { %v2042_v3 = vadd.f32 %v2029_v59, %v1764_v35 }
 0x997   : > { %v2053_v11 = vadd.f32 %v3970_v7, %v2042_v3 }
 0x999   : > { %v2061_v45 = vadd.f32 %v2053_v11, %v4944_v50 }
 0x99a   : > { %v1754_v15 = vpop.f32.mrf.mxu3 }
 0x99b   : > { %v2066_v41 = vpack.c.bf16 %v2061_v45, %v2060_v44  ;;  %v1765_v32 = vadd.f32 %v1754_v15, %v1485_v56 }
 0x99d   : > { %3727 = vmatmul.msk.bf16.gmra.mxu3 %vm802_vm10, %v2066_v41  ;;  %v2043_v46 = vadd.f32 %v2032_v58, %v1765_v32 }
 0x99f   : > { %v2054_v20 = vadd.f32 %v3970_v7, %v2043_v46 }
 0x9a1   : > { %v2062_v49 = vadd.f32 %v2054_v20, %v4949_v53 }
 0x9a2   : > { %v1756_v8 = vpop.f32.mrf.mxu3 }
 0x9a3   : > { %v1766_v4 = vadd.f32 %v1756_v8, %v1487_v42 }
 0x9a5   : > { %v2044_v57 = vadd.f32 %v2034_v2, %v1766_v4 }
 0x9a7   : > { %v2055_v22 = vadd.f32 %v3970_v7, %v2044_v57 }
 0x9a9   : > { %v2063_v50 = vadd.f32 %v2055_v22, %v4951_v9 }
 0x9ab   : > { %v2067_v31 = vpack.c.bf16 %v2063_v50, %v2062_v49 }
 0x9ad   : > { %3728 = vmatmul.msk.bf16.gmra.mxu3 %vm802_vm10, %v2067_v31 }
 0x9e5   : > { %v2101_v0 = vpop.f32.mrf.mxu3 }
 0x9e6   : > { %v5477_v61 = vadd.f32 %v2101_v0, %v2056_v39 }
 0x9ed   : > { %v2103_v60 = vpop.f32.mrf.mxu3 }
 0x9ee   : > { %v5479_v47 = vadd.f32 %v2103_v60, %v2057_v63 }
 0x9f0   : > { %v2148_v55 = vpack.c.bf16 %v5479_v47, %v5477_v61 }
 0x9f2   : > { %3739 = vmatmul.msk.bf16.vlgmr.msra.gmra.mxu0 %vm802_vm10, %v2148_v55 }
 0x9f5   : > { %v2106_v53 = vpop.f32.mrf.mxu3 }
 0x9f6   : > { %v5484_v16 = vadd.f32 %v2106_v53, %v2058_v24 }
 0x9fd   : > { %v2108_v9 = vpop.f32.mrf.mxu3 }
 0x9fe   : > { %v5486_v7 = vadd.f32 %v2108_v9, %v2059_v40 }
 0xa00   : > { %v2149_v12 = vpack.c.bf16 %v5486_v7, %v5484_v16 }
 0xa02   : > { %3740 = vmatmul.msk.bf16.gmra.mxu0 %vm802_vm10, %v2149_v12 }
 0xa20   : > { %v2111_v14 = vpop.f32.mrf.mxu3 }
 0xa21   : > { %v5491_v34 = vadd.f32 %v2111_v14, %v2060_v44 }
 0xa28   : > { %v2113_v19 = vpop.f32.mrf.mxu3 }
 0xa29   : > { %v5493_v36 = vadd.f32 %v2113_v19, %v2061_v45 }
 0xa2b   : > { %v2150_v25 = vpack.c.bf16 %v5493_v36, %v5491_v34 }
 0xa2d   : > { %3741 = vmatmul.msk.bf16.gmra.mxu0 %vm802_vm10, %v2150_v25 }
 0xa30   : > { %v2116_v39 = vpop.f32.mrf.mxu3 }
 0xa31   : > { %v5498_v18 = vadd.f32 %v2116_v39, %v2062_v49 }
 0xa38   : > { %v2118_v63 = vpop.f32.mrf.mxu3 }
 0xa39   : > { %v5500_v43 = vadd.f32 %v2118_v63, %v2063_v50 }
 0xa3b   : > { %v2151_v29 = vpack.c.bf16 %v5500_v43, %v5498_v18 }
 0xa3d   : > { %3742 = vmatmul.msk.bf16.gmra.mxu0 %vm802_vm10, %v2151_v29 }
 0xa6f   : > { %v2188_v28 = vpop.f32.mrf.mxu0 }
 0xa70   : > { %v2189_v56 = vadd.f32 %v3971_v27, %v2188_v28 }
 0xa72   : > { %v2208_v8 = vpack.c.bf16 %v2189_v56, %v2189_v56 }
 0xa74   : > { %v2224_v2 = vunpack.c.l.b16 %v2208_v8 }
 0xa77   : > { %v2190_v6 = vpop.f32.mrf.mxu0 }
 0xa78   : > { %v2191_v58 = vadd.f32 %v3971_v27, %v2190_v6 }
 0xa7a   : > { %v2209_v42 = vpack.c.bf16 %v2191_v58, %v2191_v58 }
 0xa7c   : > { %v2225_v4 = vunpack.c.l.b16 %v2209_v42 }
 0xa7e   : > { %v5522_v20 = vpack.c.b16 %v2225_v4, %v2224_v2 }
 0xa7f   : > { %v2193_v17 = vpop.f32.mrf.mxu0 }
 0xa80   : > { %v2194_v5 = vadd.f32 %v3971_v27, %v2193_v17 }
 0xa82   : > { %v2210_v51 = vpack.c.bf16 %v2194_v5, %v2194_v5 }
 0xa84   : > { %v2226_v24 = vunpack.c.l.b16 %v2210_v51 }
 0xa87   : > { %v2195_v52 = vpop.f32.mrf.mxu0 }
 0xa88   : > { %v2196_v48 = vadd.f32 %v3971_v27, %v2195_v52 }
 0xa8a   : > { %v2211_v21 = vpack.c.bf16 %v2196_v48, %v2196_v48 }
 0xa8c   : > { %v2227_v40 = vunpack.c.l.b16 %v2211_v21 }
 0xa8e   : > { %v5508_v62 = vpack.c.b16 %v2227_v40, %v2226_v24 }
 0xa90   : > { %2238 = vrot.lane.b32.xlu1 %v5508_v62, %s4625_s6 }
 0xaaa   : > { %v2198_v33 = vpop.f32.mrf.mxu0 }
 0xaab   : > { %v2199_v23 = vadd.f32 %v3971_v27, %v2198_v33 }
 0xaad   : > { %v2212_v10 = vpack.c.bf16 %v2199_v23, %v2199_v23 }
 0xaaf   : > { %v2228_v13 = vunpack.c.l.b16 %v2212_v10 }
 0xab2   : > { %v2200_v30 = vpop.f32.mrf.mxu0 }
 0xab3   : > { %v2201_v59 = vadd.f32 %v3971_v27, %v2200_v30 }
 0xab5   : > { %v2213_v38 = vpack.c.bf16 %v2201_v59, %v2201_v59 }
 0xab7   : > { %v2229_v1 = vunpack.c.l.b16 %v2213_v38 }
 0xab9   : > { %v5512_v35 = vpack.c.b16 %v2229_v1, %v2228_v13 }
 0xaba   : > { %v2203_v26 = vpop.f32.mrf.mxu0 }
 0xabb   : > { %2240 = vrot.lane.b32.xlu0 %v5512_v35, %s4625_s6  ;;  %v2204_v3 = vadd.f32 %v3971_v27, %v2203_v26 }
 0xabd   : > { %v2214_v44 = vpack.c.bf16 %v2204_v3, %v2204_v3 }
 0xabf   : > { %v2230_v41 = vunpack.c.l.b16 %v2214_v44 }
 0xac2   : > { %v2205_v11 = vpop.f32.mrf.mxu0 }
 0xac3   : > { %v2206_v45 = vadd.f32 %v3971_v27, %v2205_v11 }
 0xac5   : > { %v2215_v15 = vpack.c.bf16 %v2206_v45, %v2206_v45 }
 0xac7   : > { %v2231_v32 = vunpack.c.l.b16 %v2215_v15 }
 0xac9   : > { %v5516_v46 = vpack.c.b16 %v2231_v32, %v2230_v41 }
 0xacb   : > { %2403 = vrot.lane.b32.xlu0 %v5516_v46, %s4626_s25  ;;  %2242 = vrot.lane.b32.xlu2 %v5516_v46, %s4625_s6 }
 0xad3   : > { %2236 = vrot.lane.b32.xlu2 %v5522_v20, %s4625_s6 }
 0xb02   : > { %v2239_v31 = vpop.permute.xlu1 %2238 }
 0xb03   : > { %v2260_v37 = vsel %vm962_vm4, %v2239_v31, 0 }
 0xb25   : > { %v2243_v57 = vpop.permute.xlu2 %2242 }
 0xb26   : > { %v2266_v22 = vsel %vm962_vm4, %v2243_v57, 0 }
 0xb27   : > { %2272 = vmatpush.bf16.xpose.msra.mxu1 %v2266_v22 }
 0xb2d   : > { %v2241_v49 = vpop.permute.xlu0 %2240  ;;  %v2237_v54 = vpop.permute.xlu2 %2236 }
 0xb2e   : > { %v2263_v50 = vsel %vm962_vm4, %v2241_v49, 0  ;;  %v2257_v60 = vsel %vm962_vm4, %v2237_v54, 0 }
 0xb2f   : > { %2273 = vmatpush.bf16.xpose.msra.mxu1 %v2263_v50 }
 0xb37   : > { %2274 = vmatpush.bf16.xpose.msra.mxu1 %v2260_v37 }
 0xb3d   : > { %v2404_v0 = vpop.permute.xlu0 %2403 }
 0xb3e   : > { %2425 = vmatpush.bf16.msrb.mxu2 %v2404_v0 }
 0xb3f   : > { %2275 = vmatpush.bf16.xpose.msra.mxu1 %v2257_v60 }
 0xb46   : > { %3743 = vmatmul.msk.bf16.vlgmr.msra.gmra.mxu1 %vm962_vm4, %v5522_v20 }
 0xb56   : > { %3744 = vmatmul.msk.bf16.gmra.mxu1 %vm962_vm4, %v5508_v62 }
 0xb66   : > { %3745 = vmatmul.msk.bf16.gmra.mxu1 %vm962_vm4, %v5512_v35 }
 0xb76   : > { %3746 = vmatmul.msk.bf16.gmra.mxu1 %vm962_vm4, %v5516_v46 }
 0xbc3   : > { %v2277_v55 = vpop.f32.mrf.mxu1 }
 0xbc4   : > { %v2297_v53 = vmul.f32 0.35355338, %v2277_v55 }
 0xbc6   : > { %v2305_v9 = vsel %vm1024_vm5, %v2297_v53, -inf }
 0xbc7   : > { %2306 = vmax.xlane.f32.xlu0 %v2305_v9 }
 0xbcb   : > { %v2279_v12 = vpop.f32.mrf.mxu1 }
 0xbcc   : > { %v2298_v14 = vmul.f32 0.35355338, %v2279_v12 }
 0xbce   : > { %v2308_v19 = vsel %vm1024_vm5, %v2298_v14, -inf }
 0xbcf   : > { %2309 = vmax.xlane.f32.xlu2 %v2308_v19 }
 0xbd3   : > { %v2282_v25 = vpop.f32.mrf.mxu1 }
 0xbd4   : > { %v2299_v39 = vmul.f32 0.35355338, %v2282_v25 }
 0xbd6   : > { %v2311_v63 = vsel %vm1024_vm5, %v2299_v39, -inf }
 0xbd7   : > { %2312 = vmax.xlane.f32.xlu1 %v2311_v63 }
 0xbdb   : > { %v2284_v29 = vpop.f32.mrf.mxu1 }
 0xbdc   : > { %v5541_v28 = vmul.f32 0.35355338, %v2284_v29 }
 0xbde   : > { %v2314_v6 = vsel %vm1024_vm5, %v5541_v28, -inf }
 0xbdf   : > { %2315 = vmax.xlane.f32.xlu0 %v2314_v6 }
 0xbe3   : > { %v2287_v17 = vpop.f32.mrf.mxu1 }
 0xbe4   : > { %v2301_v27 = vmul.f32 0.35355338, %v2287_v17 }
 0xbe6   : > { %v2317_v5 = vsel %vm1024_vm5, %v2301_v27, -inf }
 0xbe7   : > { %2318 = vmax.xlane.f32.xlu2 %v2317_v5 }
 0xbeb   : > { %v2289_v52 = vpop.f32.mrf.mxu1 }
 0xbec   : > { %v2302_v51 = vmul.f32 0.35355338, %v2289_v52 }
 0xbee   : > { %v2320_v48 = vsel %vm1024_vm5, %v2302_v51, -inf }
 0xbef   : > { %2321 = vmax.xlane.f32.xlu0 %v2320_v48 }
 0xbf3   : > { %v2292_v21 = vpop.f32.mrf.mxu1 }
 0xbf4   : > { %v2303_v24 = vmul.f32 0.35355338, %v2292_v21 }
 0xbf6   : > { %v2323_v40 = vsel %vm1024_vm5, %v2303_v24, -inf }
 0xbf7   : > { %2324 = vmax.xlane.f32.xlu1 %v2323_v40 }
 0xbfb   : > { %v2294_v33 = vpop.f32.mrf.mxu1 }
 0xbfc   : > { %v2304_v23 = vmul.f32 0.35355338, %v2294_v33 }
 0xbfe   : > { %v2326_v30 = vsel %vm1024_vm5, %v2304_v23, -inf }
 0xbff   : > { %2327 = vmax.xlane.f32.xlu2 %v2326_v30 }
 0xc03   : > { %2397 = vrot.lane.b32.xlu0 %v5522_v20, %s4626_s25 }
 0xc17   : > { %2399 = vrot.lane.b32.xlu2 %v5508_v62, %s4626_s25 }
 0xc3a   : > { %v2307_v10 = vpop.xlane.xlu0 %2306 }
 0xc3b   : > { %v2329_v59 = vsub.f32 %v2297_v53, %v2307_v10 }
 0xc3d   : > { %v2337_v38 = vmul.f32 1.442695, %v2329_v59 }
 0xc3f   : > { %4133 = vpow2.f32 %v2337_v38 }
 0xc42   : > { %v2310_v13 = vpop.xlane.xlu2 %2309 }
 0xc43   : > { %v2330_v1 = vsub.f32 %v2298_v14, %v2310_v13 }
 0xc45   : > { %v5553_v26 = vpop.eup %4133  ;;  %v2339_v3 = vmul.f32 1.442695, %v2330_v1 }
 0xc46   : > { %v2353_v11 = vsel %vm1024_vm5, %v5553_v26, 0.0 }
 0xc47   : > { %4135 = vpow2.f32 %v2339_v3  ;;  %2354 = vadd.xlane.f32.xlu1 %v2353_v11 }
 0xc4a   : > { %v2313_v44 = vpop.xlane.xlu1 %2312 }
 0xc4b   : > { %v2331_v45 = vsub.f32 %v2299_v39, %v2313_v44 }
 0xc4d   : > { %v5557_v58 = vpop.eup %4135  ;;  %v2341_v15 = vmul.f32 1.442695, %v2331_v45 }
 0xc4e   : > { %v2356_v56 = vsel %vm1024_vm5, %v5557_v58, 0.0 }
 0xc4f   : > { %4137 = vpow2.f32 %v2341_v15  ;;  %2357 = vadd.xlane.f32.xlu2 %v2356_v56  ;;  %v2137_v15 = vld [vmem:[#allocation14 + $0x10] sm:$0xf] }
 0xc50   : > { %v2737_v56 = vsel %vm1412_vm6, %v2137_v15, 0 }
 0xc52   : > { %v2316_v42 = vpop.xlane.xlu0 %2315 }
 0xc53   : > { %v2332_v12 = vsub.f32 %v5541_v28, %v2316_v42 }
 0xc55   : > { %v5561_v41 = vpop.eup %4137  ;;  %v2343_v14 = vmul.f32 1.442695, %v2332_v12 }
 0xc56   : > { %v2359_v32 = vsel %vm1024_vm5, %v5561_v41, 0.0 }
 0xc57   : > { %2360 = vadd.xlane.f32.xlu0 %v2359_v32 }
 0xc5a   : > { %v2319_v8 = vpop.xlane.xlu2 %2318 }
 0xc5b   : > { %v2333_v4 = vsub.f32 %v2301_v27, %v2319_v8 }
 0xc5d   : > { %v2345_v2 = vmul.f32 1.442695, %v2333_v4 }
 0xc5f   : > { %4139 = vpow2.f32 %v2345_v2 }
 0xc60   : > { %2401 = vrot.lane.b32.xlu1 %v5512_v35, %s4626_s25 }
 0xc62   : > { %v2322_v57 = vpop.xlane.xlu0 %2321 }
 0xc63   : > { %v2334_v22 = vsub.f32 %v2302_v51, %v2322_v57 }
 0xc65   : > { %v5567_v49 = vpop.eup %4139  ;;  %v2347_v50 = vmul.f32 1.442695, %v2334_v22 }
 0xc66   : > { %v2365_v31 = vsel %vm1024_vm5, %v5567_v49, 0.0 }
 0xc67   : > { %4141 = vpow2.f32 %v2347_v50  ;;  %2366 = vadd.xlane.f32.xlu2 %v2365_v31 }
 0xc6a   : > { %v2325_v37 = vpop.xlane.xlu1 %2324 }
 0xc6b   : > { %v2335_v54 = vsub.f32 %v2303_v24, %v2325_v37 }
 0xc6d   : > { %v5571_v0 = vpop.eup %4141  ;;  %v2349_v60 = vmul.f32 1.442695, %v2335_v54 }
 0xc6e   : > { %v2368_v55 = vsel %vm1024_vm5, %v5571_v0, 0.0 }
 0xc6f   : > { %4143 = vpow2.f32 %v2349_v60  ;;  %2369 = vadd.xlane.f32.xlu0 %v2368_v55 }
 0xc70   : > { %4145 = vpow2.f32 %v2343_v14 }
 0xc72   : > { %v2328_v19 = vpop.xlane.xlu2 %2327 }
 0xc73   : > { %v2336_v25 = vsub.f32 %v2304_v23, %v2328_v19 }
 0xc75   : > { %v5575_v53 = vpop.eup %4143  ;;  %v2351_v39 = vmul.f32 1.442695, %v2336_v25  ;;  %v2398_v24 = vpop.permute.xlu0 %2397 }
 0xc76   : > { %v2371_v9 = vsel %vm1024_vm5, %v5575_v53, 0.0  ;;  %v4146_v63 = vpop.eup %4145 }
 0xc77   : > { %2372 = vadd.xlane.f32.xlu0 %v2371_v9  ;;  %4147 = vpow2.f32 %v2351_v39  ;;  %v2362_v29 = vsel %vm1024_vm5, %v4146_v63, 0.0 }
 0xc7a   : > { %v2400_v17 = vpop.permute.xlu2 %2399 }
 0xc7d   : > { %v5587_v28 = vpop.eup %4147 }
 0xc7e   : > { %v2374_v6 = vsel %vm1024_vm5, %v5587_v28, 0.0 }
 0xc7f   : > { %2468 = vrot.lane.b32.xlu2 %v5516_v46, %s4627_s12 }
 0xc87   : > { %2462 = vrot.lane.b32.xlu2 %v5522_v20, %s4627_s12 }
 0xc8a   : > { %2363 = vadd.xlane.f32.xlu1 %v2362_v29 }
 0xc8b   : > { %2466 = vrot.lane.b32.xlu0 %v5512_v35, %s4627_s12 }
 0xc8f   : > { %2456 = vrot.lane.b32.xlu2 %v5508_v62, %s4628_s26 }
 0xc92   : > { %2375 = vadd.xlane.f32.xlu1 %v2374_v6 }
 0xc93   : > { %2454 = vrot.lane.b32.xlu0 %v5522_v20, %s4628_s26 }
 0xc97   : > { %2782 = vrot.lane.b32.xlu2 %v5516_v46, %s4631_s5 }
 0xc9b   : > { %2458 = vrot.lane.b32.xlu0 %v5512_v35, %s4628_s26 }
 0xc9f   : > { %3056 = vrot.lane.b32.xlu2 %v5508_v62, %s4629_s29 }
 0xca3   : > { %2780 = vrot.lane.b32.xlu0 %v5512_v35, %s4631_s5 }
 0xca7   : > { %3054 = vrot.lane.b32.xlu2 %v5522_v20, %s4629_s29 }
 0xcab   : > { %2778 = vrot.lane.b32.xlu0 %v5508_v62, %s4631_s5  ;;  %2464 = vrot.lane.b32.xlu1 %v5508_v62, %s4627_s12  ;;  %s3632_s12 = sshll.u32 %s4836_s23, 5 }
 0xcaf   : > { %2768 = vrot.lane.b32.xlu2 %v5522_v20, %s4630_s21 }
 0xcb3   : > { %3046 = vrot.lane.b32.xlu0 %v5522_v20, %s4632_s30  ;;  %3060 = vrot.lane.b32.xlu1 %v5516_v46, %s4629_s29 }
 0xcb7   : > { %3050 = vrot.lane.b32.xlu2 %v5512_v35, %s4632_s30 }
 0xcba   : > { %v2355_v27 = vpop.xlane.xlu1 %2354 }
 0xcbb   : > { %2770 = vrot.lane.b32.xlu0 %v5508_v62, %s4630_s21  ;;  %3058 = vrot.lane.b32.xlu1 %v5512_v35, %s4629_s29  ;;  %s3818_s29 = sshll.u32 %s4722_s24, 5 }
 0xcbf   : > { %2774 = vrot.lane.b32.xlu2 %v5516_v46, %s4630_s21 }
 0xcc2   : > { %v2358_v5 = vpop.xlane.xlu2 %2357 }
 0xcc3   : > { %3052 = vrot.lane.b32.xlu0 %v5516_v46, %s4632_s30  ;;  %2460 = vrot.lane.b32.xlu1 %v5516_v46, %s4628_s26  ;;  %4149 = vrcp.f32 %v2358_v5  ;;  %s527_s26 = scalar_lea.vmem [#allocation17], %s3632_s12 }
 0xcc4   : > { %4151 = vrcp.f32 %v2355_v27 }
 0xcc9   : > { %v4150_v51 = vpop.eup %4149 }
 0xcca   : > { %v4152_v48 = vpop.eup %4151  ;;  %v2386_v21 = vmul.f32 %v4150_v51, %v5557_v58  ;;  %v2361_v10 = vpop.xlane.xlu0 %2360 }
 0xccb   : > { %2776 = vrot.lane.b32.xlu1 %v5522_v20, %s4631_s5  ;;  %v2385_v40 = vmul.f32 %v4152_v48, %v5553_v26  ;;  %4153 = vrcp.f32 %v2361_v10 }
 0xccd   : > { %v2393_v23 = vpack.c.bf16 %v2386_v21, %v2385_v40 }
 0xcd1   : > { %v4154_v11 = vpop.eup %4153 }
 0xcd2   : > { %v2402_v52 = vpop.permute.xlu1 %2401  ;;  %v2387_v45 = vmul.f32 %v4154_v11, %v5561_v41 }
 0xcd3   : > { %2426 = vmatpush.bf16.msrb.mxu2 %v2402_v52  ;;  %3048 = vrot.lane.b32.xlu1 %v5508_v62, %s4632_s30  ;;  %s3456_s30 = scalar_lea.hbm %s6070_s11, %s3818_s29 }
 0xcd7   : > { %2427 = vmatpush.bf16.msrb.mxu2 %v2400_v17 }
 0xcda   : > { %v2367_v33 = vpop.xlane.xlu2 %2366 }
 0xcdb   : > { %2772 = vrot.lane.b32.xlu1 %v5512_v35, %s4630_s21  ;;  %2428 = vmatpush.bf16.msrb.mxu2 %v2398_v24 }
 0xcde   : > { %3747 = vmatmul.msk.bf16.vlgmr.msrb.gmra.mxu2 %vm1024_vm5, %v2393_v23 }
 0xcdf   : > { %2746 = vmatpush.bf16.msra.mxu2 %v2737_v56 }
 0xce2   : > { %v2469_v30 = vpop.permute.xlu2 %2468  ;;  %v2370_v38 = vpop.xlane.xlu0 %2369 }
 0xce3   : > { %v2492_v59 = vsel %vm962_vm4, %v2469_v30, 0 }
 0xce4   : > { %2498 = vmatpush.bf16.xpose.msrb.mxu3 %v2492_v59 }
 0xcea   : > { %v2373_v13 = vpop.xlane.xlu0 %2372  ;;  %v2463_v8 = vpop.permute.xlu2 %2462 }
 0xceb   : > { %v2483_v19 = vsel %vm962_vm4, %v2463_v8, 0 }
 0xcf2   : > { %v2457_v31 = vpop.permute.xlu2 %2456 }
 0xcfd   : > { %v2467_v1 = vpop.permute.xlu0 %2466  ;;  %v2364_v3 = vpop.xlane.xlu1 %2363 }
 0xcfe   : > { %v2489_v26 = vsel %vm962_vm4, %v2467_v1, 0  ;;  %4155 = vrcp.f32 %v2364_v3 }
 0xcff   : > { %2499 = vmatpush.bf16.xpose.msrb.mxu3 %v2489_v26  ;;  %4157 = vrcp.f32 %v2370_v38 }
 0xd00   : > { %4159 = vrcp.f32 %v2367_v33 }
 0xd04   : > { %v4156_v44 = vpop.eup %4155 }
 0xd05   : > { %v2388_v58 = vmul.f32 %v4156_v44, %v4146_v63  ;;  %v4158_v42 = vpop.eup %4157  ;;  %v2376_v22 = vpop.xlane.xlu1 %2375 }
 0xd06   : > { %v4160_v4 = vpop.eup %4159  ;;  %v2390_v2 = vmul.f32 %v4158_v42, %v5571_v0  ;;  %v2455_v50 = vpop.permute.xlu0 %2454  ;;  %4161 = vrcp.f32 %v2376_v22 }
 0xd07   : > { %v2394_v32 = vpack.c.bf16 %v2388_v58, %v2387_v45  ;;  %v2389_v57 = vmul.f32 %v4160_v4, %v5567_v49  ;;  %4163 = vrcp.f32 %v2373_v13  ;;  %v2783_v0 = vpop.permute.xlu2 %2782 }
 0xd08   : > { %v2806_v39 = vsel %vm962_vm4, %v2783_v0, 0 }
 0xd09   : > { %3748 = vmatmul.msk.bf16.gmra.mxu2 %vm1024_vm5, %v2394_v32  ;;  %v2395_v41 = vpack.c.bf16 %v2390_v2, %v2389_v57 }
 0xd0c   : > { %v4162_v60 = vpop.eup %4161 }
 0xd0d   : > { %v4164_v9 = vpop.eup %4163  ;;  %v2392_v12 = vmul.f32 %v4162_v60, %v5587_v28 }
 0xd0e   : > { %v2459_v55 = vpop.permute.xlu0 %2458  ;;  %v2391_v49 = vmul.f32 %v4164_v9, %v5575_v53 }
 0xd0f   : > { %v3057_v17 = vpop.permute.xlu2 %3056 }
 0xd10   : > { %v2396_v63 = vpack.c.bf16 %v2392_v12, %v2391_v49  ;;  %v3078_v52 = vsel %vm962_vm4, %v3057_v17, 0 }
 0xd16   : > { %v2781_v29 = vpop.permute.xlu0 %2780 }
 0xd17   : > { %v2803_v53 = vsel %vm962_vm4, %v2781_v29, 0  ;;  %v3055_v48 = vpop.permute.xlu2 %3054 }
 0xd18   : > { %v3075_v24 = vsel %vm962_vm4, %v3055_v48, 0 }
 0xd19   : > { %3749 = vmatmul.msk.bf16.gmra.mxu2 %vm1024_vm5, %v2395_v41 }
 0xd1d   : > { %v2465_v37 = vpop.permute.xlu1 %2464 }
 0xd1e   : > { %v2486_v54 = vsel %vm962_vm4, %v2465_v37, 0  ;;  %v2779_v27 = vpop.permute.xlu0 %2778 }
 0xd1f   : > { %2500 = vmatpush.bf16.xpose.msrb.mxu3 %v2486_v54  ;;  %v2800_v51 = vsel %vm962_vm4, %v2779_v27, 0  ;;  %v2769_v10 = vpop.permute.xlu2 %2768 }
 0xd25   : > { %v3061_v14 = vpop.permute.xlu1 %3060 }
 0xd26   : > { %v3084_v25 = vsel %vm962_vm4, %v3061_v14, 0  ;;  %v3047_v59 = vpop.permute.xlu0 %3046 }
 0xd27   : > { %2501 = vmatpush.bf16.xpose.msrb.mxu3 %v2483_v19  ;;  %3090 = vmatpush.bf16.xpose.msrb.mxu2 %v3084_v25  ;;  %v3051_v26 = vpop.permute.xlu2 %3050 }
 0xd29   : > { %3750 = vmatmul.msk.bf16.gmra.mxu2 %vm1024_vm5, %v2396_v63 }
 0xd2d   : > { %v3059_v6 = vpop.permute.xlu1 %3058 }
 0xd2e   : > { %v3081_v28 = vsel %vm962_vm4, %v3059_v6, 0  ;;  %3751 = vmatmul.msk.bf16.vlgmr.msrb.gmra.mxu3 %vm962_vm4, %v2455_v50  ;;  %v2771_v38 = vpop.permute.xlu0 %2770 }
 0xd2f   : > { %2812 = vmatpush.bf16.xpose.msra.mxu3 %v2806_v39  ;;  %3091 = vmatpush.bf16.xpose.msrb.mxu2 %v3081_v28  ;;  %v2775_v58 = vpop.permute.xlu2 %2774 }
 0xd35   : > { %v2461_v5 = vpop.permute.xlu1 %2460 }
 0xd36   : > { %v3053_v17 = vpop.permute.xlu0 %3052 }
 0xd37   : > { %2813 = vmatpush.bf16.xpose.msra.mxu3 %v2803_v53  ;;  %3092 = vmatpush.bf16.xpose.msrb.mxu2 %v3078_v52 }
 0xd3d   : > { %v2777_v21 = vpop.permute.xlu1 %2776 }
 0xd3e   : > { %v2797_v40 = vsel %vm962_vm4, %v2777_v21, 0  ;;  %3752 = vmatmul.msk.bf16.gmra.mxu3 %vm962_vm4, %v2457_v31 }
 0xd3f   : > { %2814 = vmatpush.bf16.xpose.msra.mxu3 %v2800_v51  ;;  %3093 = vmatpush.bf16.xpose.msrb.mxu2 %v3075_v24 }
 0xd45   : > { %v3049_v13 = vpop.permute.xlu1 %3048 }
 0xd47   : > { %2815 = vmatpush.bf16.xpose.msra.mxu3 %v2797_v40 }
 0xd4d   : > { %v2773_v3 = vpop.permute.xlu1 %2772 }
 0xd4e   : > { %3753 = vmatmul.msk.bf16.gmra.mxu3 %vm962_vm4, %v2459_v55 }
 0xd5e   : > { %3754 = vmatmul.msk.bf16.gmra.mxu3 %vm962_vm4, %v2461_v5 }
 0xd61   : > { %v2430_v33 = vpop.f32.mrf.mxu2 }
 0xd69   : > { %v2432_v23 = vpop.f32.mrf.mxu2 }
 0xd6a   : > { %v2450_v30 = vpack.c.bf16 %v2432_v23, %v2430_v33 }
 0xd6c   : > { %3763 = vmatmul.msk.bf16.vlgmr.msra.gmra.mxu2 %vm962_vm4, %v2450_v30 }
 0xd6e   : > { %3767 = vmatmul.msk.bf16.vlgmr.msra.gmra.mxu3 %vm962_vm4, %v2769_v10 }
 0xd7e   : > { %3768 = vmatmul.msk.bf16.gmra.mxu3 %vm962_vm4, %v2771_v38 }
 0xd8c   : > { %v2435_v1 = vpop.f32.mrf.mxu2 }
 0xd8e   : > { %3769 = vmatmul.msk.bf16.gmra.mxu3 %vm962_vm4, %v2773_v3 }
 0xd94   : > { %v2437_v11 = vpop.f32.mrf.mxu2 }
 0xd95   : > { %v2451_v44 = vpack.c.bf16 %v2437_v11, %v2435_v1 }
 0xd97   : > { %3764 = vmatmul.msk.bf16.gmra.mxu2 %vm962_vm4, %v2451_v44 }
 0xd9c   : > { %v2440_v45 = vpop.f32.mrf.mxu2 }
 0xd9e   : > { %3770 = vmatmul.msk.bf16.gmra.mxu3 %vm962_vm4, %v2775_v58 }
 0xda4   : > { %v2442_v15 = vpop.f32.mrf.mxu2 }
 0xda5   : > { %v2452_v56 = vpack.c.bf16 %v2442_v15, %v2440_v45 }
 0xda7   : > { %3765 = vmatmul.msk.bf16.gmra.mxu2 %vm962_vm4, %v2452_v56 }
 0xdac   : > { %v2445_v32 = vpop.f32.mrf.mxu2 }
 0xdb1   : > { %v2503_v42 = vpop.f32.mrf.mxu3 }
 0xdb2   : > { %v2523_v8 = vmul.f32 0.35355338, %v2503_v42 }
 0xdb4   : > { %v2447_v4 = vpop.f32.mrf.mxu2  ;;  %v2531_v2 = vsel %vm1024_vm5, %v2523_v8, -inf }
 0xdb5   : > { %v2453_v57 = vpack.c.bf16 %v2447_v4, %v2445_v32  ;;  %2532 = vmax.xlane.f32.xlu1 %v2531_v2 }
 0xdb7   : > { %3766 = vmatmul.msk.bf16.gmra.mxu2 %vm962_vm4, %v2453_v57 }
 0xdb9   : > { %v2505_v22 = vpop.f32.mrf.mxu3 }
 0xdba   : > { %v2524_v50 = vmul.f32 0.35355338, %v2505_v22 }
 0xdbc   : > { %v2534_v41 = vsel %vm1024_vm5, %v2524_v50, -inf }
 0xdbd   : > { %2535 = vmax.xlane.f32.xlu0 %v2534_v41 }
 0xdc1   : > { %v2508_v31 = vpop.f32.mrf.mxu3 }
 0xdc2   : > { %v2525_v37 = vmul.f32 0.35355338, %v2508_v31 }
 0xdc4   : > { %v2537_v54 = vsel %vm1024_vm5, %v2525_v37, -inf }
 0xdc5   : > { %2538 = vmax.xlane.f32.xlu2 %v2537_v54 }
 0xdc7   : > { %3779 = vmatmul.msk.bf16.vlgmr.msrb.gmra.mxu2 %vm962_vm4, %v3047_v59 }
 0xdc9   : > { %v2510_v60 = vpop.f32.mrf.mxu3 }
 0xdca   : > { %v5673_v55 = vmul.f32 0.35355338, %v2510_v60 }
 0xdcc   : > { %v2540_v9 = vsel %vm1024_vm5, %v5673_v55, -inf }
 0xdcd   : > { %2541 = vmax.xlane.f32.xlu1 %v2540_v9 }
 0xdd1   : > { %v2513_v12 = vpop.f32.mrf.mxu3 }
 0xdd2   : > { %v5677_v0 = vmul.f32 0.35355338, %v2513_v12 }
 0xdd4   : > { %v2543_v49 = vsel %vm1024_vm5, %v5677_v0, -inf }
 0xdd5   : > { %2544 = vmax.xlane.f32.xlu0 %v2543_v49 }
 0xdd7   : > { %3780 = vmatmul.msk.bf16.gmra.mxu2 %vm962_vm4, %v3049_v13 }
 0xdd9   : > { %v2515_v14 = vpop.f32.mrf.mxu3 }
 0xdda   : > { %v5682_v19 = vmul.f32 0.35355338, %v2515_v14 }
 0xddc   : > { %v2546_v25 = vsel %vm1024_vm5, %v5682_v19, -inf }
 0xddd   : > { %2547 = vmax.xlane.f32.xlu2 %v2546_v25 }
 0xde1   : > { %v2518_v39 = vpop.f32.mrf.mxu3 }
 0xde2   : > { %v5686_v63 = vmul.f32 0.35355338, %v2518_v39 }
 0xde4   : > { %v2549_v29 = vsel %vm1024_vm5, %v5686_v63, -inf }
 0xde5   : > { %2550 = vmax.xlane.f32.xlu1 %v2549_v29 }
 0xde7   : > { %3781 = vmatmul.msk.bf16.gmra.mxu2 %vm962_vm4, %v3051_v26 }
 0xde9   : > { %v2520_v6 = vpop.f32.mrf.mxu3 }
 0xdea   : > { %v5691_v28 = vmul.f32 0.35355338, %v2520_v6 }
 0xdec   : > { %v2552_v53 = vsel %vm1024_vm5, %v5691_v28, -inf }
 0xded   : > { %2553 = vmax.xlane.f32.xlu0 %v2552_v53 }
 0xdef   : > { %v5712_v26 = vpop.f32.mrf.mxu2 }
 0xdf1   : > { %v5698_v27 = vpop.f32.mrf.mxu3 }
 0xdf5   : > { %2629 = vrot.lane.b32.xlu2 %v5516_v46, %s4633_s14 }
 0xdf7   : > { %3782 = vmatmul.msk.bf16.gmra.mxu2 %vm962_vm4, %v3053_v17  ;;  %v5722_v56 = vpop.f32.mrf.mxu2 }
 0xdf9   : > { %v2819_v5 = vpop.f32.mrf.mxu3 }
 0xdfa   : > { %v5700_v52 = vmul.f32 0.35355338, %v2819_v5 }
 0xdfc   : > { %v2848_v51 = vsel %vm1024_vm5, %v5700_v52, -inf }
 0xe01   : > { %v5704_v40 = vpop.f32.mrf.mxu3 }
 0xe09   : > { %v2824_v38 = vpop.f32.mrf.mxu3 }
 0xe0a   : > { %v5724_v32 = vmul.f32 0.35355338, %v2824_v38 }
 0xe11   : > { %v5716_v45 = vpop.f32.mrf.mxu3 }
 0xe19   : > { %v2829_v42 = vpop.f32.mrf.mxu3 }
 0xe1a   : > { %v5728_v4 = vpop.f32.mrf.mxu2  ;;  %v5732_v2 = vmul.f32 0.35355338, %v2829_v42 }
 0xe1c   : > { %v2860_v22 = vsel %vm1024_vm5, %v5732_v2, -inf }
 0xe1e   : > { %2849 = vmax.xlane.f32.xlu2 %v2848_v51  ;;  %v5762_v51 = vmul.f32 0.35355338, %v5698_v27  ;;  %v5774_v27 = vmul.f32 0.35355338, %v5704_v40 }
 0xe22   : > { %v5740_v41 = vpop.f32.mrf.mxu2 }
 0xe28   : > { %v2533_v48 = vpop.xlane.xlu1 %2532 }
 0xe29   : > { %v2555_v21 = vsub.f32 %v2523_v8, %v2533_v48  ;;  %v2854_v8 = vsel %vm1024_vm5, %v5724_v32, -inf }
 0xe2a   : > { %v5746_v60 = vpop.f32.mrf.mxu2 }
 0xe2b   : > { %v2563_v24 = vmul.f32 1.442695, %v2555_v21 }
 0xe2d   : > { %4165 = vpow2.f32 %v2563_v24 }
 0xe30   : > { %v2536_v33 = vpop.xlane.xlu0 %2535 }
 0xe31   : > { %v2556_v23 = vsub.f32 %v2524_v50, %v2536_v33  ;;  %v2832_v50 = vpop.f32.mrf.mxu3  ;;  %v2845_v33 = vsel %vm1024_vm5, %v5762_v51, -inf }
 0xe32   : > { %v5742_v31 = vmul.f32 0.35355338, %v2832_v50  ;;  %v5749_v49 = vpop.f32.mrf.mxu2 }
 0xe33   : > { %v5706_v30 = vpop.eup %4165  ;;  %v2565_v10 = vmul.f32 1.442695, %v2556_v23 }
 0xe34   : > { %v2579_v59 = vsel %vm1024_vm5, %v5706_v30, 0.0  ;;  %v2863_v54 = vsel %vm1024_vm5, %v5742_v31, -inf }
 0xe35   : > { %4167 = vpow2.f32 %v2565_v10  ;;  %2580 = vadd.xlane.f32.xlu1 %v2579_v59 }
 0xe38   : > { %v2539_v13 = vpop.xlane.xlu2 %2538 }
 0xe39   : > { %v2557_v1 = vsub.f32 %v2525_v37, %v2539_v13  ;;  %v2834_v13 = vpop.f32.mrf.mxu3 }
 0xe3a   : > { %v5752_v29 = vpop.f32.mrf.mxu2 }
 0xe3b   : > { %v5710_v3 = vpop.eup %4167  ;;  %v2567_v11 = vmul.f32 1.442695, %v2557_v1 }
 0xe3c   : > { %v2582_v44 = vsel %vm1024_vm5, %v5710_v3, 0.0 }
 0xe3d   : > { %4169 = vpow2.f32 %v2567_v11  ;;  %2583 = vadd.xlane.f32.xlu0 %v2582_v44  ;;  %v5784_v11 = vmul.f32 0.35355338, %v2834_v13 }
 0xe3f   : > { %v2866_v44 = vsel %vm1024_vm5, %v5784_v11, -inf }
 0xe40   : > { %v2542_v9 = vpop.xlane.xlu1 %2541 }
 0xe41   : > { %v2558_v12 = vsub.f32 %v5673_v55, %v2542_v9 }
 0xe42   : > { %v5767_v24 = vpop.f32.mrf.mxu2 }
 0xe43   : > { %v5718_v58 = vpop.eup %4169  ;;  %v2569_v14 = vmul.f32 1.442695, %v2558_v12 }
 0xe44   : > { %v2585_v15 = vsel %vm1024_vm5, %v5718_v58, 0.0 }
 0xe45   : > { %2586 = vadd.xlane.f32.xlu2 %v2585_v15  ;;  %4171 = vpow2.f32 %v2569_v14  ;;  %v5791_v15 = vmul.f32 0.35355338, %v5716_v45 }
 0xe48   : > { %v2545_v25 = vpop.xlane.xlu0 %2544 }
 0xe49   : > { %v2559_v39 = vsub.f32 %v5677_v0, %v2545_v25 }
 0xe4a   : > { %v3095_v59 = vpop.f32.mrf.mxu2 }
 0xe4b   : > { %v2571_v6 = vmul.f32 1.442695, %v2559_v39  ;;  %v5756_v17 = vpop.eup %4171 }
 0xe4c   : > { %v2588_v55 = vsel %vm1024_vm5, %v5756_v17, 0.0 }
 0xe4d   : > { %2855 = vmax.xlane.f32.xlu2 %v2854_v8  ;;  %4173 = vpow2.f32 %v2571_v6 }
 0xe4e   : > { %2627 = vrot.lane.b32.xlu1 %v5512_v35, %s4633_s14 }
 0xe50   : > { %v2548_v57 = vpop.xlane.xlu2 %2547 }
 0xe51   : > { %2625 = vrot.lane.b32.xlu0 %v5508_v62, %s4633_s14  ;;  %v2560_v48 = vsub.f32 %v5682_v19, %v2548_v57  ;;  %v2851_v19 = vsel %vm1024_vm5, %v5774_v27, -inf  ;;  %v2857_v57 = vsel %vm1024_vm5, %v5791_v15, -inf }
 0xe52   : > { %v3097_v42 = vpop.f32.mrf.mxu2 }
 0xe53   : > { %v5765_v21 = vpop.eup %4173  ;;  %v5793_v8 = vmul.f32 0.35355338, %v3097_v42 }
 0xe54   : > { %v2591_v23 = vsel %vm1024_vm5, %v5765_v21, 0.0 }
 0xe55   : > { %2861 = vmax.xlane.f32.xlu2 %v2860_v22  ;;  %v5797_v22 = vmul.f32 0.35355338, %v3095_v59  ;;  %v3126_v50 = vsel %vm1024_vm5, %v5793_v8, -inf }
 0xe56   : > { %2623 = vrot.lane.b32.xlu1 %v5522_v20, %s4633_s14  ;;  %s3457_s14 = sshll.u32 %s527_s26, 4  ;;  %s3458_s14 = int_to_ptr.vmem [resolvable:$true] %s3457_s14 }
 0xe58   : > { %v2630_v37 = vpop.permute.xlu2 %2629  ;;  %v2551_v53 = vpop.xlane.xlu1 %2550 }
 0xe59   : > { %2651 = vmatpush.bf16.msrb.mxu0 %v2630_v37  ;;  %v2561_v5 = vsub.f32 %v5686_v63, %v2551_v53  ;;  %v2573_v63 = vmul.f32 1.442695, %v2560_v48  ;;  %v3123_v37 = vsel %vm1024_vm5, %v5797_v22, -inf }
 0xe5b   : > { %v2575_v0 = vmul.f32 1.442695, %v2561_v5 }
 0xe5d   : > { %2864 = vmax.xlane.f32.xlu2 %v2863_v54  ;;  %4175 = vpow2.f32 %v2575_v0  ;;  %v3100_v54 = vpop.f32.mrf.mxu2 }
 0xe5e   : > { %4177 = vpow2.f32 %v2573_v63  ;;  %v5803_v45 = vmul.f32 0.35355338, %v3100_v54 }
 0xe60   : > { %v3129_v9 = vsel %vm1024_vm5, %v5803_v45, -inf  ;;  %v2554_v14 = vpop.xlane.xlu0 %2553 }
 0xe63   : > { %v5776_v10 = vpop.eup %4175 }
 0xe64   : > { %v2597_v38 = vsel %vm1024_vm5, %v5776_v10, 0.0  ;;  %v5782_v1 = vpop.eup %4177 }
 0xe65   : > { %v2594_v40 = vsel %vm1024_vm5, %v5782_v1, 0.0 }
 0xe75   : > { %2943 = vrot.lane.b32.xlu2 %v5516_v46, %s4635_s28 }
 0xe7b   : > { %2589 = vadd.xlane.f32.xlu0 %v2588_v55  ;;  %v3102_v55 = vpop.f32.mrf.mxu2 }
 0xe80   : > { %2846 = vmax.xlane.f32.xlu1 %v2845_v33 }
 0xe83   : > { %2592 = vadd.xlane.f32.xlu0 %v2591_v23 }
 0xe88   : > { %2852 = vmax.xlane.f32.xlu1 %v2851_v19 }
 0xe8b   : > { %2598 = vadd.xlane.f32.xlu0 %v2597_v38  ;;  %v3105_v38 = vpop.f32.mrf.mxu2 }
 0xe90   : > { %2595 = vadd.xlane.f32.xlu1 %v2594_v40 }
 0xe91   : > { %v2850_v12 = vpop.xlane.xlu2 %2849 }
 0xe93   : > { %2867 = vmax.xlane.f32.xlu0 %v2866_v44  ;;  %v5828_v44 = vmul.f32 0.35355338, %v3102_v55  ;;  %v3107_v42 = vpop.f32.mrf.mxu2  ;;  %v5848_v55 = vmul.f32 0.35355338, %v3105_v38 }
 0xe98   : > { %2858 = vmax.xlane.f32.xlu1 %v2857_v57 }
 0xe9b   : > { %3127 = vmax.xlane.f32.xlu0 %v3126_v50  ;;  %v3132_v50 = vsel %vm1024_vm5, %v5828_v44, -inf }
 0xe9e   : > { %3124 = vmax.xlane.f32.xlu2 %v3123_v37  ;;  %v3110_v37 = vpop.f32.mrf.mxu2 }
 0xea6   : > { %3130 = vmax.xlane.f32.xlu2 %v3129_v9  ;;  %v5840_v9 = vmul.f32 0.35355338, %v3107_v42 }
 0xea8   : > { %v2581_v25 = vpop.xlane.xlu1 %2580 }
 0xeaf   : > { %3219 = vrot.lane.b32.xlu0 %v5512_v35, %s4634_s1 }
 0xeb0   : > { %v2584_v6 = vpop.xlane.xlu0 %2583 }
 0xeb1   : > { %3221 = vrot.lane.b32.xlu1 %v5516_v46, %s4634_s1  ;;  %4179 = vrcp.f32 %v2584_v6 }
 0xeb2   : > { %4181 = vrcp.f32 %v2581_v25 }
 0xeb7   : > { %v4180_v0 = vpop.eup %4179 }
 0xeb8   : > { %v2587_v39 = vpop.xlane.xlu2 %2586  ;;  %v4182_v33 = vpop.eup %4181  ;;  %v2612_v46 = vmul.f32 %v4180_v0, %v5710_v3  ;;  %v2870_v3 = vsub.f32 %v5700_v52, %v2850_v12  ;;  %v3138_v12 = vsel %vm1024_vm5, %v5840_v9, -inf }
 0xeb9   : > { %v2611_v63 = vmul.f32 %v4182_v33, %v5706_v30 }
 0xeba   : > { %v2879_v30 = vmul.f32 1.442695, %v2870_v3  ;;  %v5855_v3 = vmul.f32 0.35355338, %v3110_v37 }
 0xebb   : > { %v2619_v59 = vpack.c.bf16 %v2612_v46, %v2611_v63 }
 0xebe   : > { %2941 = vrot.lane.b32.xlu2 %v5512_v35, %s4635_s28  ;;  %v2562_v35 = vsub.f32 %v5691_v28, %v2554_v14  ;;  %v3112_v14 = vpop.f32.mrf.mxu2 }
 0xebf   : > { %v5844_v25 = vmul.f32 0.35355338, %v3112_v14 }
 0xec0   : > { %v2628_v53 = vpop.permute.xlu1 %2627  ;;  %v5813_v5 = vpop.xlane.xlu2 %2855  ;;  %v2577_v13 = vmul.f32 1.442695, %v2562_v35 }
 0xec1   : > { %2652 = vmatpush.bf16.msrb.mxu0 %v2628_v53  ;;  %v3144_v53 = vsel %vm1024_vm5, %v5844_v25, -inf }
 0xec2   : > { %4183 = vpow2.f32 %v2577_v13 }
 0xec3   : > { %v2626_v48 = vpop.permute.xlu0 %2625  ;;  %4185 = vpow2.f32 %v2879_v30 }
 0xec4   : > { %4187 = vrcp.f32 %v2587_v39  ;;  %v3135_v39 = vsel %vm1024_vm5, %v5848_v55, -inf }
 0xec5   : > { %2653 = vmatpush.bf16.msrb.mxu0 %v2626_v48 }
 0xec6   : > { %3217 = vrot.lane.b32.xlu2 %v5508_v62, %s4634_s1 }
 0xec8   : > { %v2624_v23 = vpop.permute.xlu1 %2623  ;;  %v5819_v19 = vpop.xlane.xlu2 %2861 }
 0xec9   : > { %2654 = vmatpush.bf16.msrb.mxu0 %v2624_v23  ;;  %v5830_v57 = vpop.eup %4183 }
 0xeca   : > { %v5836_v52 = vpop.eup %4185 }
 0xecb   : > { %v2896_v54 = vsel %vm1024_vm5, %v5836_v52, 0.0  ;;  %v4188_v0 = vpop.eup %4187 }
 0xecc   : > { %3755 = vmatmul.msk.bf16.vlgmr.msrb.gmra.mxu0 %vm1024_vm5, %v2619_v59  ;;  %v2613_v63 = vmul.f32 %v4188_v0, %v5718_v58  ;;  %v3141_v58 = vsel %vm1024_vm5, %v5855_v3, -inf }
 0xece   : > { %2939 = vrot.lane.b32.xlu2 %v5508_v62, %s4635_s28  ;;  %v2600_v62 = vsel %vm1024_vm5, %v5830_v57, 0.0 }
 0xed0   : > { %v5826_v40 = vpop.xlane.xlu2 %2864 }
 0xed8   : > { %v2944_v28 = vpop.permute.xlu2 %2943 }
 0xed9   : > { %3133 = vmax.xlane.f32.xlu0 %v3132_v50  ;;  %2965 = vmatpush.bf16.msra.mxu0 %v2944_v28 }
 0xedb   : > { %2601 = vadd.xlane.f32.xlu1 %v2600_v62 }
 0xee1   : > { %2897 = vadd.xlane.f32.xlu0 %v2896_v54 }
 0xee9   : > { %3139 = vmax.xlane.f32.xlu0 %v3138_v12 }
 0xeee   : > { %v2590_v6 = vpop.xlane.xlu0 %2589 }
 0xeef   : > { %4189 = vrcp.f32 %v2590_v6 }
 0xef1   : > { %3145 = vmax.xlane.f32.xlu0 %v3144_v53 }
 0xef3   : > { %v2847_v48 = vpop.xlane.xlu1 %2846 }
 0xef4   : > { %v2869_v33 = vsub.f32 %v5762_v51, %v2847_v48 }
 0xef5   : > { %v4190_v46 = vpop.eup %4189 }
 0xef6   : > { %v2614_v23 = vmul.f32 %v4190_v46, %v5756_v17  ;;  %v2877_v35 = vmul.f32 1.442695, %v2869_v33  ;;  %v2593_v59 = vpop.xlane.xlu0 %2592 }
 0xef7   : > { %3136 = vmax.xlane.f32.xlu2 %v3135_v39 }
 0xef8   : > { %4191 = vpow2.f32 %v2877_v35  ;;  %v2620_v13 = vpack.c.bf16 %v2614_v23, %v2613_v63 }
 0xef9   : > { %4193 = vrcp.f32 %v2593_v59 }
 0xefa   : > { %3756 = vmatmul.msk.bf16.gmra.mxu0 %vm1024_vm5, %v2620_v13 }
 0xefb   : > { %v2853_v38 = vpop.xlane.xlu1 %2852 }
 0xefc   : > { %v2871_v53 = vsub.f32 %v5774_v27, %v2853_v38 }
 0xefe   : > { %v5858_v30 = vpop.eup %4191  ;;  %v2599_v51 = vpop.xlane.xlu0 %2598  ;;  %v2881_v63 = vmul.f32 1.442695, %v2871_v53 }
 0xeff   : > { %3142 = vmax.xlane.f32.xlu2 %v3141_v58  ;;  %v2893_v17 = vsel %vm1024_vm5, %v5858_v30, 0.0  ;;  %v4194_v50 = vpop.eup %4193 }
 0xf00   : > { %2894 = vadd.xlane.f32.xlu1 %v2893_v17  ;;  %v2615_v37 = vmul.f32 %v4194_v50, %v5765_v21  ;;  %v2138_v17 = vld [vmem:[#allocation14 + $0x14] sm:$0xf] }
 0xf03   : > { %v2596_v42 = vpop.xlane.xlu1 %2595 }
 0xf04   : > { %4195 = vrcp.f32 %v2596_v42  ;;  %v2872_v42 = vsub.f32 %v5724_v32, %v5813_v5 }
 0xf06   : > { %v5864_v28 = vpop.xlane.xlu0 %2867 }
 0xf0a   : > { %v4196_v62 = vpop.eup %4195 }
 0xf0b   : > { %v2616_v54 = vmul.f32 %v4196_v62, %v5782_v1  ;;  %v2693_v62 = vsel %vm1412_vm6, %v2138_v17, 0 }
 0xf0c   : > { %2702 = vmatpush.bf16.msrb.mxu1 %v2693_v62 }
 0xf0d   : > { %v2621_v12 = vpack.c.bf16 %v2616_v54, %v2615_v37  ;;  %v2883_v37 = vmul.f32 1.442695, %v2872_v42 }
 0xf0e   : > { %v3128_v14 = vpop.xlane.xlu0 %3127 }
 0xf0f   : > { %v3148_v6 = vsub.f32 %v5793_v8, %v3128_v14  ;;  %3757 = vmatmul.msk.bf16.gmra.mxu0 %vm1024_vm5, %v2621_v12  ;;  %v5878_v8 = vpop.xlane.xlu1 %2858 }
 0xf11   : > { %v3157_v0 = vmul.f32 1.442695, %v3148_v6  ;;  %v3125_v48 = vpop.xlane.xlu2 %3124 }
 0xf12   : > { %v3147_v33 = vsub.f32 %v5797_v22, %v3125_v48 }
 0xf13   : > { %4197 = vpow2.f32 %v3157_v0 }
 0xf14   : > { %v3155_v46 = vmul.f32 1.442695, %v3147_v33 }
 0xf16   : > { %4199 = vpow2.f32 %v3155_v46 }
 0xf17   : > { %4201 = vpow2.f32 %v2881_v63 }
 0xf18   : > { %4203 = vpow2.f32 %v2883_v37 }
 0xf19   : > { %v5872_v23 = vpop.eup %4197  ;;  %3215 = vrot.lane.b32.xlu1 %v5522_v20, %s4634_s1  ;;  %v3131_v21 = vpop.xlane.xlu2 %3130  ;;  %4205 = vrcp.f32 %v2599_v51  ;;  %v2874_v51 = vsub.f32 %v5732_v2, %v5819_v19  ;;  %s3459_s1 = sshll.u32 %s3456_s30, 4  ;;  %s3460_s1 = int_to_ptr.hbm [resolvable:$true] %s3459_s1 }
 0xf1a   : > { %v3174_v1 = vsel %vm1024_vm5, %v5872_v23, 0.0  ;;  %v3149_v32 = vsub.f32 %v5803_v45, %v3131_v21  ;;  %s4545_s22 = sshra.s32 %s3460_s1, 4  ;;  %s4546_s22 = int_to_ptr.hbm [resolvable:$true] %s4545_s22 }
 0xf1b   : > { %3175 = vadd.xlane.f32.xlu0 %v3174_v1  ;;  %s4547_s16 = scalar_lea.hbm %s4546_s22, 32  ;;  %p4552_p12 = scmp.lt.s32.totalorder %s4546_s22, %s6070_s11 }
 0xf1c   : > { %v5880_v27 = vpop.eup %4199  ;;  %v3159_v48 = vmul.f32 1.442695, %v3149_v32  ;;  %p4548_p1 = scmp.ne.s32.totalorder %s4546_s22, %s4547_s16  ;;  %p4553_p7 = scmp.lt.s32.totalorder %s4551_s4, %s4547_s16 }
 0xf1d   : > { %v3171_v22 = vsel %vm1024_vm5, %v5880_v27, 0.0  ;;  %v5884_v35 = vpop.eup %4201 }
 0xf1e   : > { %3172 = vadd.xlane.f32.xlu2 %v3171_v22  ;;  %v2899_v39 = vsel %vm1024_vm5, %v5884_v35, 0.0  ;;  %v5893_v54 = vpop.eup %4203  ;;  %p4549_p3 = pnand %p4548_p1, %p4805_p5  ;;  %p4554_p8 = por %p4553_p7, %p4552_p12 }
 0xf1f   : > { %v2902_v12 = vsel %vm1024_vm5, %v5893_v54, 0.0  ;;  %v4206_v46 = vpop.eup %4205 }
 0xf20   : > { %v2617_v45 = vmul.f32 %v4206_v46, %v5776_v10  ;;  %p4550_p4 = pneg %p4549_p3 }
 0xf21   : > { %v2942_v59 = vpop.permute.xlu2 %2941  ;;  %v3220_v38 = vpop.permute.xlu0 %3219 }
 0xf22   : > { %2966 = vmatpush.bf16.msra.mxu0 %v2942_v59  ;;  %p4555_p9 = pnand %p4554_p8, %p4550_p4 }
 0xf23   : > { %v3222_v13 = vpop.permute.xlu1 %3221  ;;  %2900 = vadd.xlane.f32.xlu0 %v2899_v39  ;;  %v2887_v39 = vmul.f32 1.442695, %v2874_v51 }
 0xf24   : > { %3243 = vmatpush.bf16.msrb.mxu3 %v3222_v13 }
 0xf28   : > { %3244 = vmatpush.bf16.msrb.mxu3 %v3220_v38 }
 0xf29   : > { %v3218_v58 = vpop.permute.xlu2 %3217 }
 0xf2c   : > { %3245 = vmatpush.bf16.msrb.mxu3 %v3218_v58  ;;  %v2876_v58 = vsub.f32 %v5784_v11, %v5864_v28 }
 0xf31   : > { %v2940_v50 = vpop.permute.xlu2 %2939 }
 0xf32   : > { %2967 = vmatpush.bf16.msra.mxu0 %v2940_v50  ;;  %v2891_v50 = vmul.f32 1.442695, %v2876_v58 }
 0xf36   : > { %2937 = vrot.lane.b32.xlu2 %v5522_v20, %s4635_s28  ;;  %s3445_s28 = scalar_lea.sflag [#allocation4], %s4836_s23 }
 0xf43   : > { %2903 = vadd.xlane.f32.xlu1 %v2902_v12 }
 0xf49   : > { %v2656_v14 = vpop.f32.mrf.mxu0 }
 0xf4c   : > { %v3134_v6 = vpop.xlane.xlu0 %3133 }
 0xf4d   : > { %v3150_v5 = vsub.f32 %v5828_v44, %v3134_v6 }
 0xf4e   : > { %v2602_v53 = vpop.xlane.xlu1 %2601 }
 0xf4f   : > { %v3161_v0 = vmul.f32 1.442695, %v3150_v5  ;;  %4207 = vrcp.f32 %v2602_v53  ;;  %v2873_v5 = vsub.f32 %v5791_v15, %v5878_v8 }
 0xf51   : > { %4209 = vpow2.f32 %v3161_v0  ;;  %v2658_v20 = vpop.f32.mrf.mxu0  ;;  %v2885_v0 = vmul.f32 1.442695, %v2873_v5 }
 0xf52   : > { %v2676_v33 = vpack.c.bf16 %v2658_v20, %v2656_v14  ;;  %4211 = vpow2.f32 %v3159_v48 }
 0xf53   : > { %4213 = vpow2.f32 %v2887_v39 }
 0xf54   : > { %3759 = vmatmul.msk.bf16.vlgmr.msrb.gmra.mxu1 %vm962_vm4, %v2676_v33  ;;  %v5900_v63 = vpop.xlane.xlu0 %2897 }
 0xf55   : > { %v4208_v1 = vpop.eup %4207 }
 0xf56   : > { %v2618_v44 = vmul.f32 %v4208_v1, %v5830_v57 }
 0xf57   : > { %v5906_v21 = vpop.eup %4209 }
 0xf58   : > { %v3180_v22 = vsel %vm1024_vm5, %v5906_v21, 0.0  ;;  %v2622_v59 = vpack.c.bf16 %v2618_v44, %v2617_v45  ;;  %v5911_v13 = vpop.eup %4211  ;;  %v2875_v44 = vsub.f32 %v5742_v31, %v5826_v40 }
 0xf59   : > { %3181 = vadd.xlane.f32.xlu0 %v3180_v22  ;;  %v3177_v2 = vsel %vm1024_vm5, %v5911_v13, 0.0  ;;  %v5915_v10 = vpop.eup %4213 }
 0xf5a   : > { %3758 = vmatmul.msk.bf16.gmra.mxu0 %vm1024_vm5, %v2622_v59  ;;  %v2908_v17 = vsel %vm1024_vm5, %v5915_v10, 0.0 }
 0xf5c   : > { %v3140_v38 = vpop.xlane.xlu0 %3139 }
 0xf5d   : > { %v3152_v12 = vsub.f32 %v5840_v9, %v3140_v38 }
 0xf5f   : > { %3178 = vadd.xlane.f32.xlu2 %v3177_v2 }
 0xf64   : > { %v3146_v19 = vpop.xlane.xlu0 %3145 }
 0xf65   : > { %v3154_v57 = vsub.f32 %v5844_v25, %v3146_v19  ;;  %v3165_v25 = vmul.f32 1.442695, %v3152_v12 }
 0xf67   : > { %v3169_v42 = vmul.f32 1.442695, %v3154_v57  ;;  %2909 = vadd.xlane.f32.xlu2 %v2908_v17 }
 0xf69   : > { %4215 = vpow2.f32 %v3169_v42 }
 0xf6a   : > { %v3137_v62 = vpop.xlane.xlu2 %3136  ;;  %4217 = vpow2.f32 %v2891_v50 }
 0xf6b   : > { %v3151_v37 = vsub.f32 %v5848_v55, %v3137_v62 }
 0xf6d   : > { %v3163_v14 = vmul.f32 1.442695, %v3151_v37 }
 0xf6f   : > { %v5924_v6 = vpop.eup %4215  ;;  %4219 = vpow2.f32 %v3163_v14 }
 0xf70   : > { %v3192_v11 = vsel %vm1024_vm5, %v5924_v6, 0.0  ;;  %v5928_v28 = vpop.eup %4217  ;;  %4221 = vpow2.f32 %v3165_v25 }
 0xf71   : > { %3193 = vadd.xlane.f32.xlu2 %v3192_v11  ;;  %v2914_v53 = vsel %vm1024_vm5, %v5928_v28, 0.0  ;;  %4223 = vpow2.f32 %v2885_v0 }
 0xf72   : > { %v3143_v48 = vpop.xlane.xlu2 %3142 }
 0xf73   : > { %v3153_v33 = vsub.f32 %v5855_v3, %v3143_v48  ;;  %v2895_v45 = vpop.xlane.xlu1 %2894  ;;  %v2889_v3 = vmul.f32 1.442695, %v2875_v44 }
 0xf75   : > { %v5930_v32 = vpop.eup %4219  ;;  %v3167_v1 = vmul.f32 1.442695, %v3153_v33 }
 0xf76   : > { %v3183_v9 = vsel %vm1024_vm5, %v5930_v32, 0.0  ;;  %v5938_v20 = vpop.eup %4221 }
 0xf77   : > { %v2661_v55 = vpop.f32.mrf.mxu0  ;;  %3184 = vadd.xlane.f32.xlu0 %v3183_v9  ;;  %v3186_v15 = vsel %vm1024_vm5, %v5938_v20, 0.0  ;;  %v5944_v51 = vpop.eup %4223  ;;  %4225 = vpow2.f32 %v3167_v1 }
 0xf78   : > { %v2905_v22 = vsel %vm1024_vm5, %v5944_v51, 0.0  ;;  %4227 = vpow2.f32 %v2889_v3 }
 0xf79   : > { %2915 = vadd.xlane.f32.xlu2 %v2914_v53  ;;  %4229 = vrcp.f32 %v2895_v45 }
 0xf7a   : > { %4231 = vrcp.f32 %v5900_v63 }
 0xf7d   : > { %v5950_v59 = vpop.eup %4225 }
 0xf7e   : > { %v3189_v19 = vsel %vm1024_vm5, %v5950_v59, 0.0  ;;  %v5955_v40 = vpop.eup %4227 }
 0xf7f   : > { %v2663_v8 = vpop.f32.mrf.mxu0  ;;  %3187 = vadd.xlane.f32.xlu0 %v3186_v15  ;;  %v4230_v57 = vpop.eup %4229  ;;  %v2911_v62 = vsel %vm1024_vm5, %v5955_v40, 0.0 }
 0xf80   : > { %v2677_v46 = vpack.c.bf16 %v2663_v8, %v2661_v55  ;;  %v4232_v17 = vpop.eup %4231  ;;  %v2925_v37 = vmul.f32 %v4230_v57, %v5858_v30 }
 0xf81   : > { %v2926_v12 = vmul.f32 %v4232_v17, %v5836_v52 }
 0xf82   : > { %3760 = vmatmul.msk.bf16.gmra.mxu1 %vm962_vm4, %v2677_v46 }
 0xf83   : > { %v2933_v5 = vpack.c.bf16 %v2926_v12, %v2925_v37 }
 0xf87   : > { %2906 = vadd.xlane.f32.xlu0 %v2905_v22 }
 0xf8b   : > { %v3216_v39 = vpop.permute.xlu1 %3215 }
 0xf8c   : > { %v2666_v38 = vpop.f32.mrf.mxu0  ;;  %3246 = vmatpush.bf16.msrb.mxu3 %v3216_v39 }
 0xf8e   : > { %v3176_v2 = vpop.xlane.xlu0 %3175 }
 0xf8f   : > { %3190 = vadd.xlane.f32.xlu0 %v3189_v19  ;;  %4233 = vrcp.f32 %v3176_v2 }
 0xf91   : > { %v3173_v31 = vpop.xlane.xlu2 %3172 }
 0xf92   : > { %4235 = vrcp.f32 %v3173_v31 }
 0xf94   : > { %v2668_v58 = vpop.f32.mrf.mxu0 }
 0xf95   : > { %v2678_v42 = vpack.c.bf16 %v2668_v58, %v2666_v38  ;;  %v4234_v50 = vpop.eup %4233 }
 0xf96   : > { %v3204_v14 = vmul.f32 %v4234_v50, %v5872_v23  ;;  %v2901_v55 = vpop.xlane.xlu0 %2900 }
 0xf97   : > { %3761 = vmatmul.msk.bf16.gmra.mxu1 %vm962_vm4, %v2678_v42  ;;  %2912 = vadd.xlane.f32.xlu0 %v2911_v62  ;;  %4237 = vrcp.f32 %v2901_v55  ;;  %v2139_v42 = vld [vmem:[#allocation14 + $0x18] sm:$0xf] }
 0xf98   : > { %v4236_v63 = vpop.eup %4235 }
 0xf99   : > { %v3203_v11 = vmul.f32 %v4236_v63, %v5880_v27  ;;  %v2938_v25 = vpop.permute.xlu2 %2937  ;;  %v3007_v63 = vsel %vm1412_vm6, %v2139_v42, 0  ;;  %v3816_v42 = vld [vmem:[#allocation16 + $0x10] sm:$0xff] }
 0xf9a   : > { %2968 = vmatpush.bf16.msra.mxu0 %v2938_v25  ;;  %3016 = vmatpush.bf16.msra.mxu1 %v3007_v63 }
 0xf9b   : > { %v3211_v9 = vpack.c.bf16 %v3204_v14, %v3203_v11  ;;  %v2140_v14 = vld [vmem:[#allocation14 + $0x1c] sm:$0xf] }
 0xf9c   : > { %v3285_v11 = vsel %vm1412_vm6, %v2140_v14, 0 }
 0xf9d   : > { %3771 = vmatmul.msk.bf16.vlgmr.msra.gmra.mxu0 %vm1024_vm5, %v2933_v5  ;;  %3783 = vmatmul.msk.bf16.vlgmr.msrb.gmra.mxu3 %vm1024_vm5, %v3211_v9  ;;  %v4238_v53 = vpop.eup %4237 }
 0xf9e   : > { %v2927_v52 = vmul.f32 %v4238_v53, %v5884_v35  ;;  %3294 = vmatpush.bf16.msrb.mxu0 %v3285_v11 }
 0xfb6   : > { %v2904_v30 = vpop.xlane.xlu1 %2903 }
 0xfb7   : > { %4239 = vrcp.f32 %v2904_v30 }
 0xfbd   : > { %v4240_v0 = vpop.eup %4239 }
 0xfbe   : > { %v2928_v23 = vmul.f32 %v4240_v0, %v5893_v54 }
 0xfc0   : > { %v2934_v48 = vpack.c.bf16 %v2928_v23, %v2927_v52 }
 0xfc2   : > { %3772 = vmatmul.msk.bf16.gmra.mxu0 %vm1024_vm5, %v2934_v48 }
 0xfcc   : > { %v3182_v27 = vpop.xlane.xlu0 %3181 }
 0xfcd   : > { %4241 = vrcp.f32 %v3182_v27 }
 0xfd2   : > { %v3179_v33 = vpop.xlane.xlu2 %3178 }
 0xfd3   : > { %4243 = vrcp.f32 %v3179_v33  ;;  %v4242_v15 = vpop.eup %4241 }
 0xfd4   : > { %v3206_v1 = vmul.f32 %v4242_v15, %v5906_v21 }
 0xfd7   : > { %v2671_v8 = vpop.f32.mrf.mxu0 }
 0xfd9   : > { %v4244_v46 = vpop.eup %4243 }
 0xfda   : > { %v3205_v45 = vmul.f32 %v4244_v46, %v5911_v13  ;;  %v2910_v39 = vpop.xlane.xlu2 %2909 }
 0xfdc   : > { %v3212_v44 = vpack.c.bf16 %v3206_v1, %v3205_v45 }
 0xfde   : > { %3784 = vmatmul.msk.bf16.gmra.mxu3 %vm1024_vm5, %v3212_v44 }
 0xfdf   : > { %v2673_v35 = vpop.f32.mrf.mxu0 }
 0xfe0   : > { %v2679_v22 = vpack.c.bf16 %v2673_v35, %v2671_v8 }
 0xfe2   : > { %3762 = vmatmul.msk.bf16.gmra.mxu1 %vm962_vm4, %v2679_v22 }
 0xfe4   : > { %v3194_v31 = vpop.xlane.xlu2 %3193 }
 0xfea   : > { %v3185_v54 = vpop.xlane.xlu0 %3184 }
 0xfeb   : > { %4245 = vrcp.f32 %v3185_v54 }
 0xff1   : > { %v4246_v38 = vpop.eup %4245 }
 0xff2   : > { %v3188_v3 = vpop.xlane.xlu0 %3187  ;;  %v3207_v19 = vmul.f32 %v4246_v38, %v5930_v32 }
 0xff3   : > { %4247 = vrcp.f32 %v3188_v3 }
 0xff4   : > { %4249 = vrcp.f32 %v2910_v39 }
 0xff9   : > { %v4248_v2 = vpop.eup %4247 }
 0xffa   : > { %v3208_v21 = vmul.f32 %v4248_v2, %v5938_v20  ;;  %v2907_v13 = vpop.xlane.xlu0 %2906  ;;  %v4250_v58 = vpop.eup %4249 }
 0xffb   : > { %4251 = vrcp.f32 %v2907_v13  ;;  %v2930_v50 = vmul.f32 %v4250_v58, %v5915_v10  ;;  %v2916_v20 = vpop.xlane.xlu2 %2915  ;;  %v3817_v58 = vld [vmem:[#allocation16 + $0x18] sm:$0xff] }
 0xffc   : > { %v3213_v57 = vpack.c.bf16 %v3208_v21, %v3207_v19  ;;  %4253 = vrcp.f32 %v3194_v31  ;;  %3377 = vmatpush.bf16.msrb.mxu1 %v3817_v58 }
 0xffe   : > { %3785 = vmatmul.msk.bf16.gmra.mxu3 %vm1024_vm5, %v3213_v57 }
0x1000   : > { %3378 = vmatpush.bf16.msrb.mxu1 %v3816_v42 }
0x1001   : > { %v4252_v17 = vpop.eup %4251 }
0x1002   : > { %v2929_v62 = vmul.f32 %v4252_v17, %v5944_v51  ;;  %v3191_v37 = vpop.xlane.xlu0 %3190  ;;  %v4254_v12 = vpop.eup %4253 }
0x1003   : > { %4255 = vrcp.f32 %v3191_v37  ;;  %v3210_v10 = vmul.f32 %v4254_v12, %v5924_v6 }
0x1004   : > { %v2935_v32 = vpack.c.bf16 %v2930_v50, %v2929_v62  ;;  %4257 = vrcp.f32 %v2916_v20 }
0x1006   : > { %3773 = vmatmul.msk.bf16.gmra.mxu0 %vm1024_vm5, %v2935_v32 }
0x1009   : > { %v4256_v25 = vpop.eup %4255 }
0x100a   : > { %v3209_v51 = vmul.f32 %v4256_v25, %v5950_v59  ;;  %v2913_v5 = vpop.xlane.xlu0 %2912  ;;  %v4258_v55 = vpop.eup %4257 }
0x100b   : > { %4259 = vrcp.f32 %v2913_v5  ;;  %v2932_v53 = vmul.f32 %v4258_v55, %v5928_v28  ;;  %v2704_v28 = vpop.f32.mrf.mxu1  ;;  %v3972_v5 = vld [vmem:[%s6068_s9 + $0x1] ss:$0 sm:$0xff] }
0x100c   : > { %v3214_v9 = vpack.c.bf16 %v3210_v10, %v3209_v51  ;;  %v2749_v14 = vadd.f32 %v5712_v26, %v2704_v28 }
0x100e   : > { %3786 = vmatmul.msk.bf16.gmra.mxu3 %vm1024_vm5, %v3214_v9 }
0x1011   : > { %v4260_v30 = vpop.eup %4259 }
0x1012   : > { %v2931_v0 = vmul.f32 %v4260_v30, %v5955_v40 }
0x1013   : > { %v2706_v1 = vpop.f32.mrf.mxu1 }
0x1014   : > { %v2936_v52 = vpack.c.bf16 %v2932_v53, %v2931_v0  ;;  %v2751_v10 = vadd.f32 %v5722_v56, %v2706_v1 }
0x1016   : > { %3774 = vmatmul.msk.bf16.gmra.mxu0 %vm1024_vm5, %v2936_v52 }
0x101a   : > { %v2970_v23 = vpop.f32.mrf.mxu0 }
0x101b   : > { %v2709_v35 = vpop.f32.mrf.mxu1 }
0x101c   : > { %v2754_v56 = vadd.f32 %v5728_v4, %v2709_v35 }
0x1020   : > { %v3248_v48 = vpop.f32.mrf.mxu3 }
0x1022   : > { %v2972_v27 = vpop.f32.mrf.mxu0 }
0x1023   : > { %v2990_v6 = vpack.c.bf16 %v2972_v27, %v2970_v23  ;;  %v2711_v22 = vpop.f32.mrf.mxu1 }
0x1025   : > { %3775 = vmatmul.msk.bf16.vlgmr.msra.gmra.mxu1 %vm962_vm4, %v2990_v6 }
0x1028   : > { %v3250_v59 = vpop.f32.mrf.mxu3 }
0x1029   : > { %v3268_v33 = vpack.c.bf16 %v3250_v59, %v3248_v48 }
0x102b   : > { %3787 = vmatmul.msk.bf16.vlgmr.msrb.gmra.mxu0 %vm962_vm4, %v3268_v33  ;;  %v2714_v54 = vpop.f32.mrf.mxu1  ;;  %v2756_v33 = vadd.f32 %v5740_v41, %v2711_v22 }
0x102c   : > { %v2759_v4 = vadd.f32 %v5746_v60, %v2714_v54 }
0x1033   : > { %v2716_v38 = vpop.f32.mrf.mxu1 }
0x1034   : > { %v2761_v41 = vadd.f32 %v5749_v49, %v2716_v38 }
0x103f   : > { %v2975_v15 = vpop.f32.mrf.mxu0 }
0x1047   : > { %v2977_v8 = vpop.f32.mrf.mxu0 }
0x1048   : > { %v2991_v46 = vpack.c.bf16 %v2977_v8, %v2975_v15 }
0x104a   : > { %3776 = vmatmul.msk.bf16.gmra.mxu1 %vm962_vm4, %v2991_v46 }
0x105f   : > { %v5993_v31 = vpop.f32.mrf.mxu1 }
0x1060   : > { %v2764_v42 = vadd.f32 %v5752_v29, %v5993_v31 }
0x1061   : > { %v3253_v40 = vpop.f32.mrf.mxu3 }
0x1067   : > { %v2721_v62 = vpop.f32.mrf.mxu1 }
0x1068   : > { %v2766_v49 = vadd.f32 %v5767_v24, %v2721_v62 }
0x1069   : > { %v3255_v45 = vpop.f32.mrf.mxu3 }
0x106a   : > { %v3269_v44 = vpack.c.bf16 %v3255_v45, %v3253_v40 }
0x106c   : > { %3788 = vmatmul.msk.bf16.gmra.mxu0 %vm962_vm4, %v3269_v44 }
0x1081   : > { %v3258_v3 = vpop.f32.mrf.mxu3 }
0x1083   : > { %v2980_v39 = vpop.f32.mrf.mxu0 }
0x1089   : > { %v3260_v2 = vpop.f32.mrf.mxu3 }
0x108a   : > { %v3270_v19 = vpack.c.bf16 %v3260_v2, %v3258_v3 }
0x108b   : > { %v2982_v21 = vpop.f32.mrf.mxu0 }
0x108c   : > { %v2992_v13 = vpack.c.bf16 %v2982_v21, %v2980_v39  ;;  %3789 = vmatmul.msk.bf16.gmra.mxu0 %vm962_vm4, %v3270_v19 }
0x108e   : > { %3777 = vmatmul.msk.bf16.gmra.mxu1 %vm962_vm4, %v2992_v13 }
0x1091   : > { %v3263_v57 = vpop.f32.mrf.mxu3 }
0x1093   : > { %v2985_v17 = vpop.f32.mrf.mxu0 }
0x1099   : > { %v3265_v50 = vpop.f32.mrf.mxu3 }
0x109a   : > { %v3271_v37 = vpack.c.bf16 %v3265_v50, %v3263_v57 }
0x109b   : > { %v2987_v63 = vpop.f32.mrf.mxu0 }
0x109c   : > { %v2993_v32 = vpack.c.bf16 %v2987_v63, %v2985_v17  ;;  %3790 = vmatmul.msk.bf16.gmra.mxu0 %vm962_vm4, %v3271_v37 }
0x109e   : > { %3778 = vmatmul.msk.bf16.gmra.mxu1 %vm962_vm4, %v2993_v32 }
0x10a2   : > { %v3018_v20 = vpop.f32.mrf.mxu1 }
0x10a3   : > { %v3038_v11 = vadd.f32 %v3018_v20, %v2749_v14 }
0x10a8   : > { %v3296_v12 = vpop.f32.mrf.mxu0 }
0x10a9   : > { %v3316_v51 = vadd.f32 %v3296_v12, %v3038_v11 }
0x10aa   : > { %v3020_v25 = vpop.f32.mrf.mxu1 }
0x10ab   : > { %v3039_v9 = vadd.f32 %v3020_v25, %v2751_v10  ;;  %v3327_v30 = vadd.f32 %v3972_v5, %v3316_v51 }
0x10ad   : > { %v3335_v52 = vadd.f32 %v3327_v30, %v5477_v61 }
0x10b0   : > { %v3298_v55 = vpop.f32.mrf.mxu0 }
0x10b1   : > { %v3317_v53 = vadd.f32 %v3298_v55, %v3039_v9 }
0x10b3   : > { %v3328_v0 = vadd.f32 %v3972_v5, %v3317_v53 }
0x10b5   : > { %v3336_v23 = vadd.f32 %v3328_v0, %v5479_v47 }
0x10b7   : > { %v3343_v48 = vpack.c.bf16 %v3336_v23, %v3335_v52 }
0x10b9   : > { %3799 = vmatmul.msk.bf16.vlgmr.msrb.gmra.mxu1 %vm802_vm10, %v3343_v48 }
0x10c7   : > { %v3023_v26 = vpop.f32.mrf.mxu1 }
0x10c8   : > { %v3040_v6 = vadd.f32 %v3023_v26, %v2754_v56 }
0x10cf   : > { %v3025_v59 = vpop.f32.mrf.mxu1 }
0x10d0   : > { %v3041_v8 = vadd.f32 %v3025_v59, %v2756_v33 }
0x10e9   : > { %v3301_v27 = vpop.f32.mrf.mxu0 }
0x10ea   : > { %v3318_v15 = vadd.f32 %v3301_v27, %v3040_v6 }
0x10ec   : > { %v3329_v28 = vadd.f32 %v3972_v5, %v3318_v15 }
0x10ee   : > { %v3337_v61 = vadd.f32 %v3329_v28, %v5484_v16 }
0x10f1   : > { %v3303_v46 = vpop.f32.mrf.mxu0 }
0x10f2   : > { %v3319_v40 = vadd.f32 %v3303_v46, %v3041_v8 }
0x10f4   : > { %v3330_v1 = vadd.f32 %v3972_v5, %v3319_v40 }
0x10f6   : > { %v3338_v47 = vadd.f32 %v3330_v1, %v5486_v7 }
0x10f8   : > { %v3344_v45 = vpack.c.bf16 %v3338_v47, %v3337_v61 }
0x10fa   : > { %3800 = vmatmul.msk.bf16.gmra.mxu1 %vm802_vm10, %v3344_v45 }
0x1109   : > { %v3306_v44 = vpop.f32.mrf.mxu0 }
0x110b   : > { %v3028_v3 = vpop.f32.mrf.mxu1 }
0x110c   : > { %v3042_v35 = vadd.f32 %v3028_v3, %v2759_v4 }
0x110e   : > { %v3320_v22 = vadd.f32 %v3306_v44, %v3042_v35 }
0x1110   : > { %v3331_v21 = vadd.f32 %v3972_v5, %v3320_v22 }
0x1111   : > { %v3308_v39 = vpop.f32.mrf.mxu0 }
0x1112   : > { %v3339_v16 = vadd.f32 %v3331_v21, %v5491_v34 }
0x1113   : > { %v3030_v2 = vpop.f32.mrf.mxu1 }
0x1114   : > { %v3043_v19 = vadd.f32 %v3030_v2, %v2761_v41 }
0x1116   : > { %v3321_v13 = vadd.f32 %v3308_v39, %v3043_v19 }
0x1118   : > { %v3332_v57 = vadd.f32 %v3972_v5, %v3321_v13 }
0x1119   : > { %v3311_v58 = vpop.f32.mrf.mxu0 }
0x111a   : > { %v3340_v7 = vadd.f32 %v3332_v57, %v5493_v36 }
0x111b   : > { %v3033_v17 = vpop.f32.mrf.mxu1 }
0x111c   : > { %v3345_v60 = vpack.c.bf16 %v3340_v7, %v3339_v16  ;;  %v3044_v54 = vadd.f32 %v3033_v17, %v2764_v42 }
0x111e   : > { %3801 = vmatmul.msk.bf16.gmra.mxu1 %vm802_vm10, %v3345_v60  ;;  %v3322_v38 = vadd.f32 %v3311_v58, %v3044_v54 }
0x1120   : > { %v3333_v32 = vadd.f32 %v3972_v5, %v3322_v38 }
0x1121   : > { %v3313_v63 = vpop.f32.mrf.mxu0 }
0x1122   : > { %v3341_v36 = vadd.f32 %v3333_v32, %v5498_v18 }
0x1123   : > { %v3035_v50 = vpop.f32.mrf.mxu1 }
0x1124   : > { %v3045_v37 = vadd.f32 %v3035_v50, %v2766_v49 }
0x1126   : > { %v3323_v20 = vadd.f32 %v3313_v63, %v3045_v37 }
0x1128   : > { %v3334_v34 = vadd.f32 %v3972_v5, %v3323_v20 }
0x112a   : > { %v3342_v12 = vadd.f32 %v3334_v34, %v5500_v43 }
0x112c   : > { %v3346_v14 = vpack.c.bf16 %v3342_v12, %v3341_v36 }
0x112e   : > { %3802 = vmatmul.msk.bf16.gmra.mxu1 %vm802_vm10, %v3346_v14 }
0x1136   : > { %v3380_v29 = vpop.f32.mrf.mxu1 }
0x1137   : > { %v3400_v31 = vadd.f32 %v3380_v29, %v3335_v52 }
0x1139   : > { %3408 = vxpose.xlu1.b32.start [1/8] (short) (narrow) %v3400_v31, 32 }
0x113e   : > { %v3382_v11 = vpop.f32.mrf.mxu1 }
0x113f   : > { %v3401_v25 = vadd.f32 %v3382_v11, %v3336_v23 }
0x1141   : > { %3409 = vxpose.xlu1.b32.cont [2/8] (short) (narrow) %v3401_v25, 32 }
0x1177   : > { %v3385_v24 = vpop.f32.mrf.mxu1 }
0x1178   : > { %v3402_v62 = vadd.f32 %v3385_v24, %v3337_v61 }
0x117a   : > { %3410 = vxpose.xlu1.b32.cont [3/8] (short) (narrow) %v3402_v62, 32 }
0x117f   : > { %v3387_v10 = vpop.f32.mrf.mxu1 }
0x1180   : > { %v3403_v51 = vadd.f32 %v3387_v10, %v3338_v47 }
0x1182   : > { %3411 = vxpose.xlu1.b32.cont [4/8] (short) (narrow) %v3403_v51, 32 }
0x119b   : > { %v3390_v5 = vpop.f32.mrf.mxu1 }
0x119c   : > { %v3404_v18 = vadd.f32 %v3390_v5, %v3339_v16 }
0x119e   : > { %3412 = vxpose.xlu1.b32.cont [5/8] (short) (narrow) %v3404_v18, 32 }
0x11a3   : > { %v3392_v43 = vpop.f32.mrf.mxu1 }
0x11a4   : > { %v3405_v9 = vadd.f32 %v3392_v43, %v3340_v7 }
0x11a6   : > { %3413 = vxpose.xlu1.b32.cont [6/8] (short) (narrow) %v3405_v9, 32 }
0x11ab   : > { %v3395_v55 = vpop.f32.mrf.mxu1 }
0x11ac   : > { %v3406_v30 = vadd.f32 %v3395_v55, %v3341_v36 }
0x11ae   : > { %3414 = vxpose.xlu1.b32.cont [7/8] (short) (narrow) %v3406_v30, 32 }
0x11b3   : > { %v3397_v53 = vpop.f32.mrf.mxu1 }
0x11b4   : > { %v3407_v0 = vadd.f32 %v3397_v53, %v3342_v12 }
0x11b6   : > { %3415 = vxpose.xlu1.b32.end [8/8] (short) (narrow) %v3407_v0, 32 }
0x1222   : > { %v3424_v52 = vpop.trf.xlu1 }
0x1223   : > { %3440 = vst.msk [vmem:[%s527_s26] sm:$0xff] %vm1024_vm5, %v3424_v52 }
0x122a   : > { %v3425_v23 = vpop.trf.xlu1 }
0x122b   : > { %3441 = vst.msk [vmem:[%s527_s26 + $0x8] sm:$0xff] %vm1024_vm5, %v3425_v23 }
0x1232   : > { %v3426_v48 = vpop.trf.xlu1 }
0x1233   : > { %3442 = vst.msk [vmem:[%s527_s26 + $0x10] sm:$0xff] %vm1024_vm5, %v3426_v48 }
0x123a   : > { %v3427_v26 = vpop.trf.xlu1 }
0x123b   : > { %3443 = vst.msk [vmem:[%s527_s26 + $0x18] sm:$0xff] %vm1024_vm5, %v3427_v26 }
0x123c   : > { %4558 = shalt.err (!%p4555_p9)
}
0x123d   : > { %s4636_s23 = smov 128   ;;  %s4637_s12 = smov 8  }
0x123e   : > { %3856 = dma.vmem_to_hbm [thread:$0]  (%p4805_p5), %s3458_s14, 512, %s3460_s1, %s3445_s28, %s4636_s23, %s4636_s23, %s4637_s12  }
0x123f PF: > { %s3474_s26 = sand.u32 1, %s4601_s17   ;;  %p6090_p10 = scmp.ge.s32.totalorder %s4613_s20, 2 }
0x1240   : > { %s3475_s29 = scalar_lea.sflag [#allocation4], %s3474_s26 }
0x1241   : > { %p3888_p13 = pnand %p6090_p10, %p4809_p6 }
0x1243   : > { %p3889_p11 = pneg %p3888_p13 }
0x1245   : > { %4596 = dma.done.wait (%p3889_p11), %s3475_s29, 512  }
0x1246   : > { %4598 = vsyncadd (%p3889_p11), %s3475_s29, 4294966784  ;;  %p28_p0 = scmp.ge.s32.totalorder %s4779_s3, 4   ;;  %s6091_s17 = smov %s4605_s18 }
0x1247   : > { %s6092_s18 = smov %s4609_s19  ;;  %s6093_s19 = smov %s4790_s13 }
0x1248   : > { %s6094_s20 = smov %s4779_s3  ;;  %30 = sbr.rel (!%p28_p0) target bundleno = 16 (0x10), region = 146 }
0x124d   :  { %3481 = vsyncpa [#allocation3], 1 }
0x124e   :  { %3483 = vsyncpa [#allocation3 + $0x1], 1 }
0x124f   :  { %3484 = vsyncpa [#allocation6], 1 }
0x1250   :  { %3485 = vsyncpa [#allocation9], 1 }
0x1251   :  { %3486 = vsyncpa [#allocation12], 1 }
0x1252   :  { %3487 = vsyncpa [#allocation15], 1 }
0x1253   :  { %3488 = vsyncpa [#allocation4], 1 }
0x1254   :  { %3490 = vsyncpa [#allocation4 + $0x1], 1 }

</bundles_post_ra>
